<compile_context>
chip_gen: v7x
topology: tpu7x:2x2x1
jax: 0.10.0
libtpu: 0.0.40
codegen_flags: <defaults>
</compile_context>

<pallas_src>
import functools

import jax
import jax.numpy as jnp
from jax import lax
from jax.experimental import pallas as pl
from jax.experimental.pallas import tpu as pltpu

LRELU_SLOPE = 0.2
IN_EPS = 1e-5
KH = KW = 4
STRIDE = 2
PAD = 1
LANE = 128


def _round_up(x, m):
    return (x + m - 1) // m * m


# ---------------------------------------------------------------------------
# Pallas kernel: one fused conv block (per batch element)
# ---------------------------------------------------------------------------
def _conv_block_kernel(x_ref, w_ref, b_ref, out_ref, acc_ref, *,
                       oh, ow, use_instance_norm, fuse_pool):
    """stride-2 4x4 conv -> [InstanceNorm] -> LeakyReLU [-> global avg pool].

    x_ref:   (1, rows_in, C4)  bf16  flattened space-to-depth padded activation
    w_ref:   (4, C4, N)        bf16  per-tap matmul weights (resident across grid)
    b_ref:   (1, N)            f32   conv bias
    out_ref: (1, rows_acc, N)  bf16  activation rows (1 junk slot per output row)
             or (1, 1, N)      f32   pooled features when fuse_pool
    acc_ref: (rows_acc, N)     f32   VMEM accumulator scratch
    """
    wp1 = ow + 1                      # S2D row pitch (junk slot lives at column `ow`)
    rows_acc = oh * wp1

    # 4 tap matmuls; each tap is one contiguous slice of the flattened S2D input.
    for t, (di, dj) in enumerate(((0, 0), (0, 1), (1, 0), (1, 1))):
        off = di * wp1 + dj
        tap = x_ref[0, off:off + rows_acc, :]                       # (rows_acc, C4) bf16
        contrib = jnp.dot(tap, w_ref[t], preferred_element_type=jnp.float32)
        if t == 0:
            acc_ref[...] = contrib
        else:
            acc_ref[...] += contrib

    x = acc_ref[...] + b_ref[...]                                   # (rows_acc, N) f32

    if use_instance_norm or fuse_pool:
        ridx = lax.broadcasted_iota(jnp.int32, (rows_acc, 1), 0)
        maskf = ((ridx % wp1) != ow).astype(jnp.float32)            # 0.0 on junk rows
        inv_cnt = 1.0 / float(oh * ow)

    if use_instance_norm:
        # InstanceNorm2d(affine=False): biased variance in one pass, eps inside rsqrt.
        xm = x * maskf
        mean = jnp.sum(xm, axis=0, keepdims=True) * inv_cnt
        ex2 = jnp.sum(xm * x, axis=0, keepdims=True) * inv_cnt
        var = ex2 - mean * mean
        x = (x - mean) * lax.rsqrt(var + IN_EPS)

    y = jnp.where(x >= 0.0, x, LRELU_SLOPE * x)                     # LeakyReLU(0.2)

    if fuse_pool:
        out_ref[0] = (jnp.sum(y * maskf, axis=0, keepdims=True) * inv_cnt
                      ).astype(out_ref.dtype)
    else:
        out_ref[0] = y.astype(out_ref.dtype)


# ---------------------------------------------------------------------------
# Wrapper: pad + space-to-depth + pallas_call
# ---------------------------------------------------------------------------
def conv_block(x_nhwc, w_s2d, bias, *, use_instance_norm, fuse_pool=False):
    B, H, W, C = x_nhwc.shape
    OH, OW = H // STRIDE, W // STRIDE
    C4 = 4 * C
    ntaps, k, N = w_s2d.shape
    assert (ntaps, k) == (4, C4)

    # pad=1 then space-to-depth(2): stride-2 4x4 conv == stride-1 2x2 conv on this view.
    Hp, Wp = H + 2 * PAD, W + 2 * PAD
    xp = jnp.pad(x_nhwc, ((0, 0), (PAD, PAD), (PAD, PAD), (0, 0)))
    x2 = (xp.reshape(B, Hp // 2, 2, Wp // 2, 2, C)
            .transpose(0, 1, 3, 2, 4, 5)
            .reshape(B, (Hp // 2) * (Wp // 2), C4))
    rows_acc = OH * (OW + 1)
    rows_in = _round_up(rows_acc + OW + 2, 8)        # room for the (1,1)-tap slice
    x2 = jnp.pad(x2, ((0, 0), (0, rows_in - x2.shape[1]), (0, 0))).astype(jnp.bfloat16)

    if fuse_pool:
        out_shape = jax.ShapeDtypeStruct((B, 1, N), jnp.float32)
        out_spec = pl.BlockSpec((1, 1, N), lambda b: (b, 0, 0))
    else:
        out_shape = jax.ShapeDtypeStruct((B, rows_acc, N), jnp.bfloat16)
        out_spec = pl.BlockSpec((1, rows_acc, N), lambda b: (b, 0, 0))

    kern = functools.partial(_conv_block_kernel, oh=OH, ow=OW,
                             use_instance_norm=use_instance_norm, fuse_pool=fuse_pool)
    # TODO(synk): for large resolutions, tile the spatial axis (two-pass InstanceNorm
    # with per-channel sum/sumsq accumulators) instead of one full-image block.
    return pl.pallas_call(
        kern,
        out_shape=out_shape,
        grid=(B,),
        in_specs=[
            pl.BlockSpec((1, rows_in, C4), lambda b: (b, 0, 0)),
            pl.BlockSpec((4, C4, N), lambda b: (0, 0, 0)),   # weights stay resident
            pl.BlockSpec((1, N), lambda b: (0, 0)),
        ],
        out_specs=out_spec,
        scratch_shapes=[pltpu.VMEM((rows_acc, N), jnp.float32)],
        compiler_params=pltpu.CompilerParams(
            dimension_semantics=("parallel",),       # 2x on v7x (2 TCs); free elsewhere
            vmem_limit_bytes=32 * 1024 * 1024,
        ),
    )(x2, w_s2d, bias)


# ---------------------------------------------------------------------------
# Parameters
# ---------------------------------------------------------------------------
def _to_s2d_weight(w, b):
    """(Cout, Cin, 4, 4) PyTorch conv weight -> (4, 4*Cin, Cout) per-tap matmul form."""
    cout, cin = w.shape[0], w.shape[1]
    w_hw = jnp.transpose(w, (2, 3, 1, 0))            # (KH, KW, Cin, Cout)
    w_t = w_hw.reshape(2, 2, 2, 2, cin, cout)        # (di, a, dj, b, Cin, Cout)
    w_t = jnp.transpose(w_t, (0, 2, 1, 3, 4, 5))     # (di, dj, a, b, Cin, Cout)
    w_t = w_t.reshape(4, 4 * cin, cout)
    return w_t.astype(jnp.bfloat16), b.reshape(1, cout).astype(jnp.float32)


def init_params(key):
    """Deterministic synthetic params matching nn.Conv2d shapes, prepped for the kernel."""
    specs = [(3, 64), (64, 128), (128, 256), (256, 512)]
    raw = []
    for idx, (cin, cout) in enumerate(specs):
        kw_key, kb_key = jax.random.split(jax.random.fold_in(key, idx))
        fan_in = cin * KH * KW
        bound = 1.0 / float(fan_in) ** 0.5
        w = jax.random.uniform(kw_key, (cout, cin, KH, KW), jnp.float32, -bound, bound)
        b = jax.random.uniform(kb_key, (cout,), jnp.float32, -bound, bound)
        raw.append([w, b])
    # Lane-dense layer 1: pad Cout 64 -> 128 with zero filters/bias; the dead channels
    # become zero-weight inputs of layer 2, so the math is unchanged.
    pad = LANE - raw[0][0].shape[0]
    if pad > 0:
        raw[0][0] = jnp.pad(raw[0][0], ((0, pad), (0, 0), (0, 0), (0, 0)))
        raw[0][1] = jnp.pad(raw[0][1], ((0, pad),))
        raw[1][0] = jnp.pad(raw[1][0], ((0, 0), (0, pad), (0, 0), (0, 0)))
    return [_to_s2d_weight(w, b) for w, b in raw]


# ---------------------------------------------------------------------------
# Full forward pass
# ---------------------------------------------------------------------------
def discriminator_forward(x_nchw, params):
    """4x (Conv4x4/s2 -> [InstanceNorm] -> LeakyReLU(0.2)) -> global avg pool -> (B, 512)."""
    # TODO(synk): the reference __init__ never assigns `self.model` and duplicates the
    # layer list; we implement the clearly intended 4-block stack that forward() expresses.
    x = jnp.transpose(x_nchw, (0, 2, 3, 1)).astype(jnp.bfloat16)    # NCHW -> NHWC
    layer_cfg = [(False, False), (True, False), (True, False), (True, True)]
    for (w_s2d, bias), (use_in, fuse) in zip(params, layer_cfg):
        B, H, W, _ = x.shape
        OH, OW = H // STRIDE, W // STRIDE
        N = w_s2d.shape[-1]
        y = conv_block(x, w_s2d, bias, use_instance_norm=use_in, fuse_pool=fuse)
        if fuse:
            return y.reshape(B, N)                                  # (B, 512), f32
        # drop the per-row junk slot and restore NHWC for the next layer
        x = y.reshape(B, OH, OW + 1, N)[:, :, :OW, :]
    raise AssertionError("last layer must fuse the pool")


if __name__ == "__main__":
    key = jax.random.PRNGKey(0)
    params = init_params(jax.random.fold_in(key, 1))
    x = jax.random.normal(jax.random.fold_in(key, 2), (2, 3, 32, 32), jnp.float32)
    fwd = jax.jit(discriminator_forward)
    out = fwd(x, params)
    jax.block_until_ready(out)
    assert out.shape == (2, 512), out.shape
    assert bool(jnp.all(jnp.isfinite(out))), "non-finite output"
    print("KERNEL_OK")
</pallas_src>

<mosaic_0001>
module attributes {stable_mosaic.version = 11 : i64} {
  func.func @_conv_block_kernel(%arg0: i32, %arg1: memref<1x296x12xbf16, #tpu.memory_space<vmem>>, %arg2: memref<4x12x128xbf16, #tpu.memory_space<vmem>>, %arg3: memref<1x128xf32, #tpu.memory_space<vmem>>, %arg4: memref<1x272x128xbf16, #tpu.memory_space<vmem>>, %arg5: memref<272x128xf32, #tpu.memory_space<vmem>>) attributes {dimension_semantics = [#tpu.dimension_semantics<parallel>], iteration_bounds = array<i64: 2>, scalar_prefetch = 0 : i64, scratch_operands = 1 : i64, tpu.core_type = #tpu.core_type<tc>, window_params = [{transform_indices = @transform_0, window_bounds = array<i64: 1, 296, 12>}, {pipeline_mode = #tpu.pipeline_mode<synchronous>, transform_indices = @transform_1, window_bounds = array<i64: 4, 12, 128>}, {pipeline_mode = #tpu.pipeline_mode<synchronous>, transform_indices = @transform_2, window_bounds = array<i64: 1, 128>}, {transform_indices = @transform_3, window_bounds = array<i64: 1, 272, 128>}]} {
    %c0 = arith.constant 0 : index
    %c0_0 = arith.constant 0 : index
    %c0_1 = arith.constant 0 : index
    %0 = vector.load %arg1[%c0, %c0_0, %c0_1] : memref<1x296x12xbf16, #tpu.memory_space<vmem>>, vector<1x272x12xbf16>
    %1 = vector.shape_cast %0 : vector<1x272x12xbf16> to vector<272x12xbf16>
    %c0_2 = arith.constant 0 : index
    %c0_3 = arith.constant 0 : index
    %c0_4 = arith.constant 0 : index
    %2 = vector.load %arg2[%c0_2, %c0_3, %c0_4] : memref<4x12x128xbf16, #tpu.memory_space<vmem>>, vector<1x12x128xbf16>
    %3 = vector.shape_cast %2 : vector<1x12x128xbf16> to vector<12x128xbf16>
    %cst = arith.constant dense<0.000000e+00> : vector<272x128xf32>
    %4 = tpu.matmul %1, %3, %cst {dimension_numbers = #tpu.dot_dimension_numbers<[1], [0], [0], [1], [0, 0, 1, 1], [], []>} : vector<272x12xbf16>, vector<12x128xbf16>, vector<272x128xf32> -> vector<272x128xf32>
    %c0_5 = arith.constant 0 : index
    %c0_6 = arith.constant 0 : index
    %5 = vector.load %arg5[%c0_5, %c0_6] : memref<272x128xf32, #tpu.memory_space<vmem>>, vector<272x128xf32>
    tpu.vector_store %arg5[%c0_5, %c0_6], %4 {strides = array<i32>} : memref<272x128xf32, #tpu.memory_space<vmem>>, vector<272x128xf32>,
    %c0_7 = arith.constant 0 : index
    %c1 = arith.constant 1 : index
    %c0_8 = arith.constant 0 : index
    %6 = vector.load %arg1[%c0_7, %c1, %c0_8] : memref<1x296x12xbf16, #tpu.memory_space<vmem>>, vector<1x272x12xbf16>
    %7 = vector.shape_cast %6 : vector<1x272x12xbf16> to vector<272x12xbf16>
    %c1_9 = arith.constant 1 : index
    %c0_10 = arith.constant 0 : index
    %c0_11 = arith.constant 0 : index
    %8 = vector.load %arg2[%c1_9, %c0_10, %c0_11] : memref<4x12x128xbf16, #tpu.memory_space<vmem>>, vector<1x12x128xbf16>
    %9 = vector.shape_cast %8 : vector<1x12x128xbf16> to vector<12x128xbf16>
    %cst_12 = arith.constant dense<0.000000e+00> : vector<272x128xf32>
    %10 = tpu.matmul %7, %9, %cst_12 {dimension_numbers = #tpu.dot_dimension_numbers<[1], [0], [0], [1], [0, 0, 1, 1], [], []>} : vector<272x12xbf16>, vector<12x128xbf16>, vector<272x128xf32> -> vector<272x128xf32>
    %c0_13 = arith.constant 0 : index
    %c0_14 = arith.constant 0 : index
    %11 = vector.load %arg5[%c0_13, %c0_14] : memref<272x128xf32, #tpu.memory_space<vmem>>, vector<272x128xf32>
    %12 = arith.addf %11, %10 : vector<272x128xf32>
    %c0_15 = arith.constant 0 : index
    %c0_16 = arith.constant 0 : index
    %13 = vector.load %arg5[%c0_15, %c0_16] : memref<272x128xf32, #tpu.memory_space<vmem>>, vector<272x128xf32>
    tpu.vector_store %arg5[%c0_15, %c0_16], %12 {strides = array<i32>} : memref<272x128xf32, #tpu.memory_space<vmem>>, vector<272x128xf32>,
    %c0_17 = arith.constant 0 : index
    %c17 = arith.constant 17 : index
    %c0_18 = arith.constant 0 : index
    %14 = vector.load %arg1[%c0_17, %c17, %c0_18] : memref<1x296x12xbf16, #tpu.memory_space<vmem>>, vector<1x272x12xbf16>
    %15 = vector.shape_cast %14 : vector<1x272x12xbf16> to vector<272x12xbf16>
    %c2 = arith.constant 2 : index
    %c0_19 = arith.constant 0 : index
    %c0_20 = arith.constant 0 : index
    %16 = vector.load %arg2[%c2, %c0_19, %c0_20] : memref<4x12x128xbf16, #tpu.memory_space<vmem>>, vector<1x12x128xbf16>
    %17 = vector.shape_cast %16 : vector<1x12x128xbf16> to vector<12x128xbf16>
    %cst_21 = arith.constant dense<0.000000e+00> : vector<272x128xf32>
    %18 = tpu.matmul %15, %17, %cst_21 {dimension_numbers = #tpu.dot_dimension_numbers<[1], [0], [0], [1], [0, 0, 1, 1], [], []>} : vector<272x12xbf16>, vector<12x128xbf16>, vector<272x128xf32> -> vector<272x128xf32>
    %c0_22 = arith.constant 0 : index
    %c0_23 = arith.constant 0 : index
    %19 = vector.load %arg5[%c0_22, %c0_23] : memref<272x128xf32, #tpu.memory_space<vmem>>, vector<272x128xf32>
    %20 = arith.addf %19, %18 : vector<272x128xf32>
    %c0_24 = arith.constant 0 : index
    %c0_25 = arith.constant 0 : index
    %21 = vector.load %arg5[%c0_24, %c0_25] : memref<272x128xf32, #tpu.memory_space<vmem>>, vector<272x128xf32>
    tpu.vector_store %arg5[%c0_24, %c0_25], %20 {strides = array<i32>} : memref<272x128xf32, #tpu.memory_space<vmem>>, vector<272x128xf32>,
    %c0_26 = arith.constant 0 : index
    %c18 = arith.constant 18 : index
    %c0_27 = arith.constant 0 : index
    %22 = vector.load %arg1[%c0_26, %c18, %c0_27] : memref<1x296x12xbf16, #tpu.memory_space<vmem>>, vector<1x272x12xbf16>
    %23 = vector.shape_cast %22 : vector<1x272x12xbf16> to vector<272x12xbf16>
    %c3 = arith.constant 3 : index
    %c0_28 = arith.constant 0 : index
    %c0_29 = arith.constant 0 : index
    %24 = vector.load %arg2[%c3, %c0_28, %c0_29] : memref<4x12x128xbf16, #tpu.memory_space<vmem>>, vector<1x12x128xbf16>
    %25 = vector.shape_cast %24 : vector<1x12x128xbf16> to vector<12x128xbf16>
    %cst_30 = arith.constant dense<0.000000e+00> : vector<272x128xf32>
    %26 = tpu.matmul %23, %25, %cst_30 {dimension_numbers = #tpu.dot_dimension_numbers<[1], [0], [0], [1], [0, 0, 1, 1], [], []>} : vector<272x12xbf16>, vector<12x128xbf16>, vector<272x128xf32> -> vector<272x128xf32>
    %c0_31 = arith.constant 0 : index
    %c0_32 = arith.constant 0 : index
    %27 = vector.load %arg5[%c0_31, %c0_32] : memref<272x128xf32, #tpu.memory_space<vmem>>, vector<272x128xf32>
    %28 = arith.addf %27, %26 : vector<272x128xf32>
    %c0_33 = arith.constant 0 : index
    %c0_34 = arith.constant 0 : index
    %29 = vector.load %arg5[%c0_33, %c0_34] : memref<272x128xf32, #tpu.memory_space<vmem>>, vector<272x128xf32>
    tpu.vector_store %arg5[%c0_33, %c0_34], %28 {strides = array<i32>} : memref<272x128xf32, #tpu.memory_space<vmem>>, vector<272x128xf32>,
    %c0_35 = arith.constant 0 : index
    %c0_36 = arith.constant 0 : index
    %30 = vector.load %arg5[%c0_35, %c0_36] : memref<272x128xf32, #tpu.memory_space<vmem>>, vector<272x128xf32>
    %c0_37 = arith.constant 0 : index
    %c0_38 = arith.constant 0 : index
    %31 = vector.load %arg3[%c0_37, %c0_38] : memref<1x128xf32, #tpu.memory_space<vmem>>, vector<1x128xf32>
    %32 = vector.broadcast %31 : vector<1x128xf32> to vector<272x128xf32>
    %33 = arith.addf %30, %32 : vector<272x128xf32>
    %cst_39 = arith.constant 0.000000e+00 : f32
    %34 = vector.broadcast %cst_39 : f32 to vector<272x128xf32>
    %35 = arith.cmpf oge, %33, %34 : vector<272x128xf32>
    %cst_40 = arith.constant 2.000000e-01 : f32
    %36 = vector.broadcast %cst_40 : f32 to vector<272x128xf32>
    %37 = arith.mulf %36, %33 : vector<272x128xf32>
    %38 = arith.select %35, %33, %37 : vector<272x128xi1>, vector<272x128xf32>
    %39 = arith.truncf %38 : vector<272x128xf32> to vector<272x128xbf16>
    %c0_41 = arith.constant 0 : index
    %c0_42 = arith.constant 0 : index
    %c0_43 = arith.constant 0 : index
    %40 = vector.load %arg4[%c0_41, %c0_42, %c0_43] : memref<1x272x128xbf16, #tpu.memory_space<vmem>>, vector<1x272x128xbf16>
    %41 = vector.shape_cast %40 : vector<1x272x128xbf16> to vector<272x128xbf16>
    %42 = vector.shape_cast %39 : vector<272x128xbf16> to vector<1x272x128xbf16>
    tpu.vector_store %arg4[%c0_41, %c0_42, %c0_43], %42 {strides = array<i32>} : memref<1x272x128xbf16, #tpu.memory_space<vmem>>, vector<1x272x128xbf16>,
    return
  }
  func.func @transform_0(%arg0: i32) -> (i32, i32, i32) {
    %c0_i32 = arith.constant 0 : i32
    %c0_i32_0 = arith.constant 0 : i32
    %c0_i32_1 = arith.constant 0 : i32
    return %arg0, %c0_i32, %c0_i32_0 : i32, i32, i32
  }
  func.func @transform_1(%arg0: i32) -> (i32, i32, i32) {
    %c0_i32 = arith.constant 0 : i32
    %c0_i32_0 = arith.constant 0 : i32
    %c0_i32_1 = arith.constant 0 : i32
    %c0_i32_2 = arith.constant 0 : i32
    return %c0_i32, %c0_i32_0, %c0_i32_1 : i32, i32, i32
  }
  func.func @transform_2(%arg0: i32) -> (i32, i32) {
    %c0_i32 = arith.constant 0 : i32
    %c0_i32_0 = arith.constant 0 : i32
    %c0_i32_1 = arith.constant 0 : i32
    return %c0_i32, %c0_i32_0 : i32, i32
  }
  func.func @transform_3(%arg0: i32) -> (i32, i32, i32) {
    %c0_i32 = arith.constant 0 : i32
    %c0_i32_0 = arith.constant 0 : i32
    %c0_i32_1 = arith.constant 0 : i32
    return %arg0, %c0_i32, %c0_i32_0 : i32, i32, i32
  }
}

module attributes {stable_mosaic.version = 11 : i64} {
  func.func @_conv_block_kernel(%arg0: i32, %arg1: memref<1x88x512xbf16, #tpu.memory_space<vmem>>, %arg2: memref<4x512x128xbf16, #tpu.memory_space<vmem>>, %arg3: memref<1x128xf32, #tpu.memory_space<vmem>>, %arg4: memref<1x72x128xbf16, #tpu.memory_space<vmem>>, %arg5: memref<72x128xf32, #tpu.memory_space<vmem>>) attributes {dimension_semantics = [#tpu.dimension_semantics<parallel>], iteration_bounds = array<i64: 2>, scalar_prefetch = 0 : i64, scratch_operands = 1 : i64, tpu.core_type = #tpu.core_type<tc>, window_params = [{transform_indices = @transform_0, window_bounds = array<i64: 1, 88, 512>}, {pipeline_mode = #tpu.pipeline_mode<synchronous>, transform_indices = @transform_1, window_bounds = array<i64: 4, 512, 128>}, {pipeline_mode = #tpu.pipeline_mode<synchronous>, transform_indices = @transform_2, window_bounds = array<i64: 1, 128>}, {transform_indices = @transform_3, window_bounds = array<i64: 1, 72, 128>}]} {
    %c0 = arith.constant 0 : index
    %c0_0 = arith.constant 0 : index
    %c0_1 = arith.constant 0 : index
    %0 = vector.load %arg1[%c0, %c0_0, %c0_1] : memref<1x88x512xbf16, #tpu.memory_space<vmem>>, vector<1x72x512xbf16>
    %1 = vector.shape_cast %0 : vector<1x72x512xbf16> to vector<72x512xbf16>
    %c0_2 = arith.constant 0 : index
    %c0_3 = arith.constant 0 : index
    %c0_4 = arith.constant 0 : index
    %2 = vector.load %arg2[%c0_2, %c0_3, %c0_4] : memref<4x512x128xbf16, #tpu.memory_space<vmem>>, vector<1x512x128xbf16>
    %3 = vector.shape_cast %2 : vector<1x512x128xbf16> to vector<512x128xbf16>
    %cst = arith.constant dense<0.000000e+00> : vector<72x128xf32>
    %4 = tpu.matmul %1, %3, %cst {dimension_numbers = #tpu.dot_dimension_numbers<[1], [0], [0], [1], [0, 0, 1, 1], [], []>} : vector<72x512xbf16>, vector<512x128xbf16>, vector<72x128xf32> -> vector<72x128xf32>
    %c0_5 = arith.constant 0 : index
    %c0_6 = arith.constant 0 : index
    %5 = vector.load %arg5[%c0_5, %c0_6] : memref<72x128xf32, #tpu.memory_space<vmem>>, vector<72x128xf32>
    tpu.vector_store %arg5[%c0_5, %c0_6], %4 {strides = array<i32>} : memref<72x128xf32, #tpu.memory_space<vmem>>, vector<72x128xf32>,
    %c0_7 = arith.constant 0 : index
    %c1 = arith.constant 1 : index
    %c0_8 = arith.constant 0 : index
    %6 = vector.load %arg1[%c0_7, %c1, %c0_8] : memref<1x88x512xbf16, #tpu.memory_space<vmem>>, vector<1x72x512xbf16>
    %7 = vector.shape_cast %6 : vector<1x72x512xbf16> to vector<72x512xbf16>
    %c1_9 = arith.constant 1 : index
    %c0_10 = arith.constant 0 : index
    %c0_11 = arith.constant 0 : index
    %8 = vector.load %arg2[%c1_9, %c0_10, %c0_11] : memref<4x512x128xbf16, #tpu.memory_space<vmem>>, vector<1x512x128xbf16>
    %9 = vector.shape_cast %8 : vector<1x512x128xbf16> to vector<512x128xbf16>
    %cst_12 = arith.constant dense<0.000000e+00> : vector<72x128xf32>
    %10 = tpu.matmul %7, %9, %cst_12 {dimension_numbers = #tpu.dot_dimension_numbers<[1], [0], [0], [1], [0, 0, 1, 1], [], []>} : vector<72x512xbf16>, vector<512x128xbf16>, vector<72x128xf32> -> vector<72x128xf32>
    %c0_13 = arith.constant 0 : index
    %c0_14 = arith.constant 0 : index
    %11 = vector.load %arg5[%c0_13, %c0_14] : memref<72x128xf32, #tpu.memory_space<vmem>>, vector<72x128xf32>
    %12 = arith.addf %11, %10 : vector<72x128xf32>
    %c0_15 = arith.constant 0 : index
    %c0_16 = arith.constant 0 : index
    %13 = vector.load %arg5[%c0_15, %c0_16] : memref<72x128xf32, #tpu.memory_space<vmem>>, vector<72x128xf32>
    tpu.vector_store %arg5[%c0_15, %c0_16], %12 {strides = array<i32>} : memref<72x128xf32, #tpu.memory_space<vmem>>, vector<72x128xf32>,
    %c0_17 = arith.constant 0 : index
    %c9 = arith.constant 9 : index
    %c0_18 = arith.constant 0 : index
    %14 = vector.load %arg1[%c0_17, %c9, %c0_18] : memref<1x88x512xbf16, #tpu.memory_space<vmem>>, vector<1x72x512xbf16>
    %15 = vector.shape_cast %14 : vector<1x72x512xbf16> to vector<72x512xbf16>
    %c2 = arith.constant 2 : index
    %c0_19 = arith.constant 0 : index
    %c0_20 = arith.constant 0 : index
    %16 = vector.load %arg2[%c2, %c0_19, %c0_20] : memref<4x512x128xbf16, #tpu.memory_space<vmem>>, vector<1x512x128xbf16>
    %17 = vector.shape_cast %16 : vector<1x512x128xbf16> to vector<512x128xbf16>
    %cst_21 = arith.constant dense<0.000000e+00> : vector<72x128xf32>
    %18 = tpu.matmul %15, %17, %cst_21 {dimension_numbers = #tpu.dot_dimension_numbers<[1], [0], [0], [1], [0, 0, 1, 1], [], []>} : vector<72x512xbf16>, vector<512x128xbf16>, vector<72x128xf32> -> vector<72x128xf32>
    %c0_22 = arith.constant 0 : index
    %c0_23 = arith.constant 0 : index
    %19 = vector.load %arg5[%c0_22, %c0_23] : memref<72x128xf32, #tpu.memory_space<vmem>>, vector<72x128xf32>
    %20 = arith.addf %19, %18 : vector<72x128xf32>
    %c0_24 = arith.constant 0 : index
    %c0_25 = arith.constant 0 : index
    %21 = vector.load %arg5[%c0_24, %c0_25] : memref<72x128xf32, #tpu.memory_space<vmem>>, vector<72x128xf32>
    tpu.vector_store %arg5[%c0_24, %c0_25], %20 {strides = array<i32>} : memref<72x128xf32, #tpu.memory_space<vmem>>, vector<72x128xf32>,
    %c0_26 = arith.constant 0 : index
    %c10 = arith.constant 10 : index
    %c0_27 = arith.constant 0 : index
    %22 = vector.load %arg1[%c0_26, %c10, %c0_27] : memref<1x88x512xbf16, #tpu.memory_space<vmem>>, vector<1x72x512xbf16>
    %23 = vector.shape_cast %22 : vector<1x72x512xbf16> to vector<72x512xbf16>
    %c3 = arith.constant 3 : index
    %c0_28 = arith.constant 0 : index
    %c0_29 = arith.constant 0 : index
    %24 = vector.load %arg2[%c3, %c0_28, %c0_29] : memref<4x512x128xbf16, #tpu.memory_space<vmem>>, vector<1x512x128xbf16>
    %25 = vector.shape_cast %24 : vector<1x512x128xbf16> to vector<512x128xbf16>
    %cst_30 = arith.constant dense<0.000000e+00> : vector<72x128xf32>
    %26 = tpu.matmul %23, %25, %cst_30 {dimension_numbers = #tpu.dot_dimension_numbers<[1], [0], [0], [1], [0, 0, 1, 1], [], []>} : vector<72x512xbf16>, vector<512x128xbf16>, vector<72x128xf32> -> vector<72x128xf32>
    %c0_31 = arith.constant 0 : index
    %c0_32 = arith.constant 0 : index
    %27 = vector.load %arg5[%c0_31, %c0_32] : memref<72x128xf32, #tpu.memory_space<vmem>>, vector<72x128xf32>
    %28 = arith.addf %27, %26 : vector<72x128xf32>
    %c0_33 = arith.constant 0 : index
    %c0_34 = arith.constant 0 : index
    %29 = vector.load %arg5[%c0_33, %c0_34] : memref<72x128xf32, #tpu.memory_space<vmem>>, vector<72x128xf32>
    tpu.vector_store %arg5[%c0_33, %c0_34], %28 {strides = array<i32>} : memref<72x128xf32, #tpu.memory_space<vmem>>, vector<72x128xf32>,
    %c0_35 = arith.constant 0 : index
    %c0_36 = arith.constant 0 : index
    %30 = vector.load %arg5[%c0_35, %c0_36] : memref<72x128xf32, #tpu.memory_space<vmem>>, vector<72x128xf32>
    %c0_37 = arith.constant 0 : index
    %c0_38 = arith.constant 0 : index
    %31 = vector.load %arg3[%c0_37, %c0_38] : memref<1x128xf32, #tpu.memory_space<vmem>>, vector<1x128xf32>
    %32 = vector.broadcast %31 : vector<1x128xf32> to vector<72x128xf32>
    %33 = arith.addf %30, %32 : vector<72x128xf32>
    %34 = tpu.iota {dimensions = array<i32: 0>} : vector<72x1xi32>
    %c9_i32 = arith.constant 9 : i32
    %c0_i32 = arith.constant 0 : i32
    %35 = arith.cmpi eq, %c9_i32, %c0_i32 : i32
    %c1_i32 = arith.constant 1 : i32
    %36 = arith.select %35, %c1_i32, %c9_i32 : i32
    %37 = vector.broadcast %36 : i32 to vector<72x1xi32>
    %38 = arith.remsi %34, %37 : vector<72x1xi32>
    %c0_i32_39 = arith.constant 0 : i32
    %39 = vector.broadcast %c0_i32_39 : i32 to vector<72x1xi32>
    %40 = arith.cmpi ne, %38, %39 : vector<72x1xi32>
    %c0_i32_40 = arith.constant 0 : i32
    %41 = vector.broadcast %c0_i32_40 : i32 to vector<72x1xi32>
    %42 = arith.cmpi slt, %38, %41 : vector<72x1xi32>
    %c0_i32_41 = arith.constant 0 : i32
    %43 = arith.cmpi slt, %36, %c0_i32_41 : i32
    %44 = vector.broadcast %43 : i1 to vector<72x1xi1>
    %45 = vector.broadcast %44 : vector<72x1xi1> to vector<72x1xi1>
    %46 = arith.xori %42, %45 : vector<72x1xi1>
    %47 = arith.andi %46, %40 : vector<72x1xi1>
    %48 = vector.broadcast %36 : i32 to vector<72x1xi32>
    %49 = arith.addi %38, %48 : vector<72x1xi32>
    %50 = arith.select %47, %49, %38 : vector<72x1xi1>, vector<72x1xi32>
    %c8_i32 = arith.constant 8 : i32
    %51 = vector.broadcast %c8_i32 : i32 to vector<72x1xi32>
    %52 = arith.cmpi ne, %50, %51 : vector<72x1xi32>
    %53 = arith.extui %52 : vector<72x1xi1> to vector<72x1xi32>
    %54 = arith.sitofp %53 : vector<72x1xi32> to vector<72x1xf32>
    %55 = vector.broadcast %54 : vector<72x1xf32> to vector<72x128xf32>
    %56 = arith.mulf %33, %55 : vector<72x128xf32>
    %cst_42 = arith.constant dense<0.000000e+00> : vector<128xf32>
    %57 = vector.multi_reduction <add>, %56, %cst_42 [0] : vector<72x128xf32> to vector<128xf32>
    %58 = vector.shape_cast %57 : vector<128xf32> to vector<1x128xf32>
    %cst_43 = arith.constant 1.562500e-02 : f32
    %59 = vector.broadcast %cst_43 : f32 to vector<1x128xf32>
    %60 = arith.mulf %58, %59 : vector<1x128xf32>
    %61 = arith.mulf %56, %33 : vector<72x128xf32>
    %cst_44 = arith.constant dense<0.000000e+00> : vector<128xf32>
    %62 = vector.multi_reduction <add>, %61, %cst_44 [0] : vector<72x128xf32> to vector<128xf32>
    %63 = vector.shape_cast %62 : vector<128xf32> to vector<1x128xf32>
    %cst_45 = arith.constant 1.562500e-02 : f32
    %64 = vector.broadcast %cst_45 : f32 to vector<1x128xf32>
    %65 = arith.mulf %63, %64 : vector<1x128xf32>
    %66 = arith.mulf %60, %60 : vector<1x128xf32>
    %67 = arith.subf %65, %66 : vector<1x128xf32>
    %68 = vector.broadcast %60 : vector<1x128xf32> to vector<72x128xf32>
    %69 = arith.subf %33, %68 : vector<72x128xf32>
    %cst_46 = arith.constant 9.99999974E-6 : f32
    %70 = vector.broadcast %cst_46 : f32 to vector<1x128xf32>
    %71 = arith.addf %67, %70 : vector<1x128xf32>
    %72 = math.rsqrt %71 : vector<1x128xf32>
    %73 = vector.broadcast %72 : vector<1x128xf32> to vector<72x128xf32>
    %74 = arith.mulf %69, %73 : vector<72x128xf32>
    %cst_47 = arith.constant 0.000000e+00 : f32
    %75 = vector.broadcast %cst_47 : f32 to vector<72x128xf32>
    %76 = arith.cmpf oge, %74, %75 : vector<72x128xf32>
    %cst_48 = arith.constant 2.000000e-01 : f32
    %77 = vector.broadcast %cst_48 : f32 to vector<72x128xf32>
    %78 = arith.mulf %77, %74 : vector<72x128xf32>
    %79 = arith.select %76, %74, %78 : vector<72x128xi1>, vector<72x128xf32>
    %80 = arith.truncf %79 : vector<72x128xf32> to vector<72x128xbf16>
    %c0_49 = arith.constant 0 : index
    %c0_50 = arith.constant 0 : index
    %c0_51 = arith.constant 0 : index
    %81 = vector.load %arg4[%c0_49, %c0_50, %c0_51] : memref<1x72x128xbf16, #tpu.memory_space<vmem>>, vector<1x72x128xbf16>
    %82 = vector.shape_cast %81 : vector<1x72x128xbf16> to vector<72x128xbf16>
    %83 = vector.shape_cast %80 : vector<72x128xbf16> to vector<1x72x128xbf16>
    tpu.vector_store %arg4[%c0_49, %c0_50, %c0_51], %83 {strides = array<i32>} : memref<1x72x128xbf16, #tpu.memory_space<vmem>>, vector<1x72x128xbf16>,
    return
  }
  func.func @transform_0(%arg0: i32) -> (i32, i32, i32) {
    %c0_i32 = arith.constant 0 : i32
    %c0_i32_0 = arith.constant 0 : i32
    %c0_i32_1 = arith.constant 0 : i32
    return %arg0, %c0_i32, %c0_i32_0 : i32, i32, i32
  }
  func.func @transform_1(%arg0: i32) -> (i32, i32, i32) {
    %c0_i32 = arith.constant 0 : i32
    %c0_i32_0 = arith.constant 0 : i32
    %c0_i32_1 = arith.constant 0 : i32
    %c0_i32_2 = arith.constant 0 : i32
    return %c0_i32, %c0_i32_0, %c0_i32_1 : i32, i32, i32
  }
  func.func @transform_2(%arg0: i32) -> (i32, i32) {
    %c0_i32 = arith.constant 0 : i32
    %c0_i32_0 = arith.constant 0 : i32
    %c0_i32_1 = arith.constant 0 : i32
    return %c0_i32, %c0_i32_0 : i32, i32
  }
  func.func @transform_3(%arg0: i32) -> (i32, i32, i32) {
    %c0_i32 = arith.constant 0 : i32
    %c0_i32_0 = arith.constant 0 : i32
    %c0_i32_1 = arith.constant 0 : i32
    return %arg0, %c0_i32, %c0_i32_0 : i32, i32, i32
  }
}

module attributes {stable_mosaic.version = 11 : i64} {
  func.func @_conv_block_kernel(%arg0: i32, %arg1: memref<1x32x512xbf16, #tpu.memory_space<vmem>>, %arg2: memref<4x512x256xbf16, #tpu.memory_space<vmem>>, %arg3: memref<1x256xf32, #tpu.memory_space<vmem>>, %arg4: memref<1x20x256xbf16, #tpu.memory_space<vmem>>, %arg5: memref<20x256xf32, #tpu.memory_space<vmem>>) attributes {dimension_semantics = [#tpu.dimension_semantics<parallel>], iteration_bounds = array<i64: 2>, scalar_prefetch = 0 : i64, scratch_operands = 1 : i64, tpu.core_type = #tpu.core_type<tc>, window_params = [{transform_indices = @transform_0, window_bounds = array<i64: 1, 32, 512>}, {pipeline_mode = #tpu.pipeline_mode<synchronous>, transform_indices = @transform_1, window_bounds = array<i64: 4, 512, 256>}, {pipeline_mode = #tpu.pipeline_mode<synchronous>, transform_indices = @transform_2, window_bounds = array<i64: 1, 256>}, {transform_indices = @transform_3, window_bounds = array<i64: 1, 20, 256>}]} {
    %c0 = arith.constant 0 : index
    %c0_0 = arith.constant 0 : index
    %c0_1 = arith.constant 0 : index
    %0 = vector.load %arg1[%c0, %c0_0, %c0_1] : memref<1x32x512xbf16, #tpu.memory_space<vmem>>, vector<1x20x512xbf16>
    %1 = vector.shape_cast %0 : vector<1x20x512xbf16> to vector<20x512xbf16>
    %c0_2 = arith.constant 0 : index
    %c0_3 = arith.constant 0 : index
    %c0_4 = arith.constant 0 : index
    %2 = vector.load %arg2[%c0_2, %c0_3, %c0_4] : memref<4x512x256xbf16, #tpu.memory_space<vmem>>, vector<1x512x256xbf16>
    %3 = vector.shape_cast %2 : vector<1x512x256xbf16> to vector<512x256xbf16>
    %cst = arith.constant dense<0.000000e+00> : vector<20x256xf32>
    %4 = tpu.matmul %1, %3, %cst {dimension_numbers = #tpu.dot_dimension_numbers<[1], [0], [0], [1], [0, 0, 1, 1], [], []>} : vector<20x512xbf16>, vector<512x256xbf16>, vector<20x256xf32> -> vector<20x256xf32>
    %c0_5 = arith.constant 0 : index
    %c0_6 = arith.constant 0 : index
    %5 = vector.load %arg5[%c0_5, %c0_6] : memref<20x256xf32, #tpu.memory_space<vmem>>, vector<20x256xf32>
    tpu.vector_store %arg5[%c0_5, %c0_6], %4 {strides = array<i32>} : memref<20x256xf32, #tpu.memory_space<vmem>>, vector<20x256xf32>,
    %c0_7 = arith.constant 0 : index
    %c1 = arith.constant 1 : index
    %c0_8 = arith.constant 0 : index
    %6 = vector.load %arg1[%c0_7, %c1, %c0_8] : memref<1x32x512xbf16, #tpu.memory_space<vmem>>, vector<1x20x512xbf16>
    %7 = vector.shape_cast %6 : vector<1x20x512xbf16> to vector<20x512xbf16>
    %c1_9 = arith.constant 1 : index
    %c0_10 = arith.constant 0 : index
    %c0_11 = arith.constant 0 : index
    %8 = vector.load %arg2[%c1_9, %c0_10, %c0_11] : memref<4x512x256xbf16, #tpu.memory_space<vmem>>, vector<1x512x256xbf16>
    %9 = vector.shape_cast %8 : vector<1x512x256xbf16> to vector<512x256xbf16>
    %cst_12 = arith.constant dense<0.000000e+00> : vector<20x256xf32>
    %10 = tpu.matmul %7, %9, %cst_12 {dimension_numbers = #tpu.dot_dimension_numbers<[1], [0], [0], [1], [0, 0, 1, 1], [], []>} : vector<20x512xbf16>, vector<512x256xbf16>, vector<20x256xf32> -> vector<20x256xf32>
    %c0_13 = arith.constant 0 : index
    %c0_14 = arith.constant 0 : index
    %11 = vector.load %arg5[%c0_13, %c0_14] : memref<20x256xf32, #tpu.memory_space<vmem>>, vector<20x256xf32>
    %12 = arith.addf %11, %10 : vector<20x256xf32>
    %c0_15 = arith.constant 0 : index
    %c0_16 = arith.constant 0 : index
    %13 = vector.load %arg5[%c0_15, %c0_16] : memref<20x256xf32, #tpu.memory_space<vmem>>, vector<20x256xf32>
    tpu.vector_store %arg5[%c0_15, %c0_16], %12 {strides = array<i32>} : memref<20x256xf32, #tpu.memory_space<vmem>>, vector<20x256xf32>,
    %c0_17 = arith.constant 0 : index
    %c5 = arith.constant 5 : index
    %c0_18 = arith.constant 0 : index
    %14 = vector.load %arg1[%c0_17, %c5, %c0_18] : memref<1x32x512xbf16, #tpu.memory_space<vmem>>, vector<1x20x512xbf16>
    %15 = vector.shape_cast %14 : vector<1x20x512xbf16> to vector<20x512xbf16>
    %c2 = arith.constant 2 : index
    %c0_19 = arith.constant 0 : index
    %c0_20 = arith.constant 0 : index
    %16 = vector.load %arg2[%c2, %c0_19, %c0_20] : memref<4x512x256xbf16, #tpu.memory_space<vmem>>, vector<1x512x256xbf16>
    %17 = vector.shape_cast %16 : vector<1x512x256xbf16> to vector<512x256xbf16>
    %cst_21 = arith.constant dense<0.000000e+00> : vector<20x256xf32>
    %18 = tpu.matmul %15, %17, %cst_21 {dimension_numbers = #tpu.dot_dimension_numbers<[1], [0], [0], [1], [0, 0, 1, 1], [], []>} : vector<20x512xbf16>, vector<512x256xbf16>, vector<20x256xf32> -> vector<20x256xf32>
    %c0_22 = arith.constant 0 : index
    %c0_23 = arith.constant 0 : index
    %19 = vector.load %arg5[%c0_22, %c0_23] : memref<20x256xf32, #tpu.memory_space<vmem>>, vector<20x256xf32>
    %20 = arith.addf %19, %18 : vector<20x256xf32>
    %c0_24 = arith.constant 0 : index
    %c0_25 = arith.constant 0 : index
    %21 = vector.load %arg5[%c0_24, %c0_25] : memref<20x256xf32, #tpu.memory_space<vmem>>, vector<20x256xf32>
    tpu.vector_store %arg5[%c0_24, %c0_25], %20 {strides = array<i32>} : memref<20x256xf32, #tpu.memory_space<vmem>>, vector<20x256xf32>,
    %c0_26 = arith.constant 0 : index
    %c6 = arith.constant 6 : index
    %c0_27 = arith.constant 0 : index
    %22 = vector.load %arg1[%c0_26, %c6, %c0_27] : memref<1x32x512xbf16, #tpu.memory_space<vmem>>, vector<1x20x512xbf16>
    %23 = vector.shape_cast %22 : vector<1x20x512xbf16> to vector<20x512xbf16>
    %c3 = arith.constant 3 : index
    %c0_28 = arith.constant 0 : index
    %c0_29 = arith.constant 0 : index
    %24 = vector.load %arg2[%c3, %c0_28, %c0_29] : memref<4x512x256xbf16, #tpu.memory_space<vmem>>, vector<1x512x256xbf16>
    %25 = vector.shape_cast %24 : vector<1x512x256xbf16> to vector<512x256xbf16>
    %cst_30 = arith.constant dense<0.000000e+00> : vector<20x256xf32>
    %26 = tpu.matmul %23, %25, %cst_30 {dimension_numbers = #tpu.dot_dimension_numbers<[1], [0], [0], [1], [0, 0, 1, 1], [], []>} : vector<20x512xbf16>, vector<512x256xbf16>, vector<20x256xf32> -> vector<20x256xf32>
    %c0_31 = arith.constant 0 : index
    %c0_32 = arith.constant 0 : index
    %27 = vector.load %arg5[%c0_31, %c0_32] : memref<20x256xf32, #tpu.memory_space<vmem>>, vector<20x256xf32>
    %28 = arith.addf %27, %26 : vector<20x256xf32>
    %c0_33 = arith.constant 0 : index
    %c0_34 = arith.constant 0 : index
    %29 = vector.load %arg5[%c0_33, %c0_34] : memref<20x256xf32, #tpu.memory_space<vmem>>, vector<20x256xf32>
    tpu.vector_store %arg5[%c0_33, %c0_34], %28 {strides = array<i32>} : memref<20x256xf32, #tpu.memory_space<vmem>>, vector<20x256xf32>,
    %c0_35 = arith.constant 0 : index
    %c0_36 = arith.constant 0 : index
    %30 = vector.load %arg5[%c0_35, %c0_36] : memref<20x256xf32, #tpu.memory_space<vmem>>, vector<20x256xf32>
    %c0_37 = arith.constant 0 : index
    %c0_38 = arith.constant 0 : index
    %31 = vector.load %arg3[%c0_37, %c0_38] : memref<1x256xf32, #tpu.memory_space<vmem>>, vector<1x256xf32>
    %32 = vector.broadcast %31 : vector<1x256xf32> to vector<20x256xf32>
    %33 = arith.addf %30, %32 : vector<20x256xf32>
    %34 = tpu.iota {dimensions = array<i32: 0>} : vector<20x1xi32>
    %c5_i32 = arith.constant 5 : i32
    %c0_i32 = arith.constant 0 : i32
    %35 = arith.cmpi eq, %c5_i32, %c0_i32 : i32
    %c1_i32 = arith.constant 1 : i32
    %36 = arith.select %35, %c1_i32, %c5_i32 : i32
    %37 = vector.broadcast %36 : i32 to vector<20x1xi32>
    %38 = arith.remsi %34, %37 : vector<20x1xi32>
    %c0_i32_39 = arith.constant 0 : i32
    %39 = vector.broadcast %c0_i32_39 : i32 to vector<20x1xi32>
    %40 = arith.cmpi ne, %38, %39 : vector<20x1xi32>
    %c0_i32_40 = arith.constant 0 : i32
    %41 = vector.broadcast %c0_i32_40 : i32 to vector<20x1xi32>
    %42 = arith.cmpi slt, %38, %41 : vector<20x1xi32>
    %c0_i32_41 = arith.constant 0 : i32
    %43 = arith.cmpi slt, %36, %c0_i32_41 : i32
    %44 = vector.broadcast %43 : i1 to vector<20x1xi1>
    %45 = vector.broadcast %44 : vector<20x1xi1> to vector<20x1xi1>
    %46 = arith.xori %42, %45 : vector<20x1xi1>
    %47 = arith.andi %46, %40 : vector<20x1xi1>
    %48 = vector.broadcast %36 : i32 to vector<20x1xi32>
    %49 = arith.addi %38, %48 : vector<20x1xi32>
    %50 = arith.select %47, %49, %38 : vector<20x1xi1>, vector<20x1xi32>
    %c4_i32 = arith.constant 4 : i32
    %51 = vector.broadcast %c4_i32 : i32 to vector<20x1xi32>
    %52 = arith.cmpi ne, %50, %51 : vector<20x1xi32>
    %53 = arith.extui %52 : vector<20x1xi1> to vector<20x1xi32>
    %54 = arith.sitofp %53 : vector<20x1xi32> to vector<20x1xf32>
    %55 = vector.broadcast %54 : vector<20x1xf32> to vector<20x256xf32>
    %56 = arith.mulf %33, %55 : vector<20x256xf32>
    %cst_42 = arith.constant dense<0.000000e+00> : vector<256xf32>
    %57 = vector.multi_reduction <add>, %56, %cst_42 [0] : vector<20x256xf32> to vector<256xf32>
    %58 = vector.shape_cast %57 : vector<256xf32> to vector<1x256xf32>
    %cst_43 = arith.constant 6.250000e-02 : f32
    %59 = vector.broadcast %cst_43 : f32 to vector<1x256xf32>
    %60 = arith.mulf %58, %59 : vector<1x256xf32>
    %61 = arith.mulf %56, %33 : vector<20x256xf32>
    %cst_44 = arith.constant dense<0.000000e+00> : vector<256xf32>
    %62 = vector.multi_reduction <add>, %61, %cst_44 [0] : vector<20x256xf32> to vector<256xf32>
    %63 = vector.shape_cast %62 : vector<256xf32> to vector<1x256xf32>
    %cst_45 = arith.constant 6.250000e-02 : f32
    %64 = vector.broadcast %cst_45 : f32 to vector<1x256xf32>
    %65 = arith.mulf %63, %64 : vector<1x256xf32>
    %66 = arith.mulf %60, %60 : vector<1x256xf32>
    %67 = arith.subf %65, %66 : vector<1x256xf32>
    %68 = vector.broadcast %60 : vector<1x256xf32> to vector<20x256xf32>
    %69 = arith.subf %33, %68 : vector<20x256xf32>
    %cst_46 = arith.constant 9.99999974E-6 : f32
    %70 = vector.broadcast %cst_46 : f32 to vector<1x256xf32>
    %71 = arith.addf %67, %70 : vector<1x256xf32>
    %72 = math.rsqrt %71 : vector<1x256xf32>
    %73 = vector.broadcast %72 : vector<1x256xf32> to vector<20x256xf32>
    %74 = arith.mulf %69, %73 : vector<20x256xf32>
    %cst_47 = arith.constant 0.000000e+00 : f32
    %75 = vector.broadcast %cst_47 : f32 to vector<20x256xf32>
    %76 = arith.cmpf oge, %74, %75 : vector<20x256xf32>
    %cst_48 = arith.constant 2.000000e-01 : f32
    %77 = vector.broadcast %cst_48 : f32 to vector<20x256xf32>
    %78 = arith.mulf %77, %74 : vector<20x256xf32>
    %79 = arith.select %76, %74, %78 : vector<20x256xi1>, vector<20x256xf32>
    %80 = arith.truncf %79 : vector<20x256xf32> to vector<20x256xbf16>
    %c0_49 = arith.constant 0 : index
    %c0_50 = arith.constant 0 : index
    %c0_51 = arith.constant 0 : index
    %81 = vector.load %arg4[%c0_49, %c0_50, %c0_51] : memref<1x20x256xbf16, #tpu.memory_space<vmem>>, vector<1x20x256xbf16>
    %82 = vector.shape_cast %81 : vector<1x20x256xbf16> to vector<20x256xbf16>
    %83 = vector.shape_cast %80 : vector<20x256xbf16> to vector<1x20x256xbf16>
    tpu.vector_store %arg4[%c0_49, %c0_50, %c0_51], %83 {strides = array<i32>} : memref<1x20x256xbf16, #tpu.memory_space<vmem>>, vector<1x20x256xbf16>,
    return
  }
  func.func @transform_0(%arg0: i32) -> (i32, i32, i32) {
    %c0_i32 = arith.constant 0 : i32
    %c0_i32_0 = arith.constant 0 : i32
    %c0_i32_1 = arith.constant 0 : i32
    return %arg0, %c0_i32, %c0_i32_0 : i32, i32, i32
  }
  func.func @transform_1(%arg0: i32) -> (i32, i32, i32) {
    %c0_i32 = arith.constant 0 : i32
    %c0_i32_0 = arith.constant 0 : i32
    %c0_i32_1 = arith.constant 0 : i32
    %c0_i32_2 = arith.constant 0 : i32
    return %c0_i32, %c0_i32_0, %c0_i32_1 : i32, i32, i32
  }
  func.func @transform_2(%arg0: i32) -> (i32, i32) {
    %c0_i32 = arith.constant 0 : i32
    %c0_i32_0 = arith.constant 0 : i32
    %c0_i32_1 = arith.constant 0 : i32
    return %c0_i32, %c0_i32_0 : i32, i32
  }
  func.func @transform_3(%arg0: i32) -> (i32, i32, i32) {
    %c0_i32 = arith.constant 0 : i32
    %c0_i32_0 = arith.constant 0 : i32
    %c0_i32_1 = arith.constant 0 : i32
    return %arg0, %c0_i32, %c0_i32_0 : i32, i32, i32
  }
}

module attributes {stable_mosaic.version = 11 : i64} {
  func.func @_conv_block_kernel(%arg0: i32, %arg1: memref<1x16x1024xbf16, #tpu.memory_space<vmem>>, %arg2: memref<4x1024x512xbf16, #tpu.memory_space<vmem>>, %arg3: memref<1x512xf32, #tpu.memory_space<vmem>>, %arg4: memref<1x1x512xf32, #tpu.memory_space<vmem>>, %arg5: memref<6x512xf32, #tpu.memory_space<vmem>>) attributes {dimension_semantics = [#tpu.dimension_semantics<parallel>], iteration_bounds = array<i64: 2>, scalar_prefetch = 0 : i64, scratch_operands = 1 : i64, tpu.core_type = #tpu.core_type<tc>, window_params = [{transform_indices = @transform_0, window_bounds = array<i64: 1, 16, 1024>}, {pipeline_mode = #tpu.pipeline_mode<synchronous>, transform_indices = @transform_1, window_bounds = array<i64: 4, 1024, 512>}, {pipeline_mode = #tpu.pipeline_mode<synchronous>, transform_indices = @transform_2, window_bounds = array<i64: 1, 512>}, {transform_indices = @transform_3, window_bounds = array<i64: 1, 1, 512>}]} {
    %c0 = arith.constant 0 : index
    %c0_0 = arith.constant 0 : index
    %c0_1 = arith.constant 0 : index
    %0 = vector.load %arg1[%c0, %c0_0, %c0_1] : memref<1x16x1024xbf16, #tpu.memory_space<vmem>>, vector<1x6x1024xbf16>
    %1 = vector.shape_cast %0 : vector<1x6x1024xbf16> to vector<6x1024xbf16>
    %c0_2 = arith.constant 0 : index
    %c0_3 = arith.constant 0 : index
    %c0_4 = arith.constant 0 : index
    %2 = vector.load %arg2[%c0_2, %c0_3, %c0_4] : memref<4x1024x512xbf16, #tpu.memory_space<vmem>>, vector<1x1024x512xbf16>
    %3 = vector.shape_cast %2 : vector<1x1024x512xbf16> to vector<1024x512xbf16>
    %cst = arith.constant dense<0.000000e+00> : vector<6x512xf32>
    %4 = tpu.matmul %1, %3, %cst {dimension_numbers = #tpu.dot_dimension_numbers<[1], [0], [0], [1], [0, 0, 1, 1], [], []>} : vector<6x1024xbf16>, vector<1024x512xbf16>, vector<6x512xf32> -> vector<6x512xf32>
    %c0_5 = arith.constant 0 : index
    %c0_6 = arith.constant 0 : index
    %5 = vector.load %arg5[%c0_5, %c0_6] : memref<6x512xf32, #tpu.memory_space<vmem>>, vector<6x512xf32>
    tpu.vector_store %arg5[%c0_5, %c0_6], %4 {strides = array<i32>} : memref<6x512xf32, #tpu.memory_space<vmem>>, vector<6x512xf32>,
    %c0_7 = arith.constant 0 : index
    %c1 = arith.constant 1 : index
    %c0_8 = arith.constant 0 : index
    %6 = vector.load %arg1[%c0_7, %c1, %c0_8] : memref<1x16x1024xbf16, #tpu.memory_space<vmem>>, vector<1x6x1024xbf16>
    %7 = vector.shape_cast %6 : vector<1x6x1024xbf16> to vector<6x1024xbf16>
    %c1_9 = arith.constant 1 : index
    %c0_10 = arith.constant 0 : index
    %c0_11 = arith.constant 0 : index
    %8 = vector.load %arg2[%c1_9, %c0_10, %c0_11] : memref<4x1024x512xbf16, #tpu.memory_space<vmem>>, vector<1x1024x512xbf16>
    %9 = vector.shape_cast %8 : vector<1x1024x512xbf16> to vector<1024x512xbf16>
    %cst_12 = arith.constant dense<0.000000e+00> : vector<6x512xf32>
    %10 = tpu.matmul %7, %9, %cst_12 {dimension_numbers = #tpu.dot_dimension_numbers<[1], [0], [0], [1], [0, 0, 1, 1], [], []>} : vector<6x1024xbf16>, vector<1024x512xbf16>, vector<6x512xf32> -> vector<6x512xf32>
    %c0_13 = arith.constant 0 : index
    %c0_14 = arith.constant 0 : index
    %11 = vector.load %arg5[%c0_13, %c0_14] : memref<6x512xf32, #tpu.memory_space<vmem>>, vector<6x512xf32>
    %12 = arith.addf %11, %10 : vector<6x512xf32>
    %c0_15 = arith.constant 0 : index
    %c0_16 = arith.constant 0 : index
    %13 = vector.load %arg5[%c0_15, %c0_16] : memref<6x512xf32, #tpu.memory_space<vmem>>, vector<6x512xf32>
    tpu.vector_store %arg5[%c0_15, %c0_16], %12 {strides = array<i32>} : memref<6x512xf32, #tpu.memory_space<vmem>>, vector<6x512xf32>,
    %c0_17 = arith.constant 0 : index
    %c3 = arith.constant 3 : index
    %c0_18 = arith.constant 0 : index
    %14 = vector.load %arg1[%c0_17, %c3, %c0_18] : memref<1x16x1024xbf16, #tpu.memory_space<vmem>>, vector<1x6x1024xbf16>
    %15 = vector.shape_cast %14 : vector<1x6x1024xbf16> to vector<6x1024xbf16>
    %c2 = arith.constant 2 : index
    %c0_19 = arith.constant 0 : index
    %c0_20 = arith.constant 0 : index
    %16 = vector.load %arg2[%c2, %c0_19, %c0_20] : memref<4x1024x512xbf16, #tpu.memory_space<vmem>>, vector<1x1024x512xbf16>
    %17 = vector.shape_cast %16 : vector<1x1024x512xbf16> to vector<1024x512xbf16>
    %cst_21 = arith.constant dense<0.000000e+00> : vector<6x512xf32>
    %18 = tpu.matmul %15, %17, %cst_21 {dimension_numbers = #tpu.dot_dimension_numbers<[1], [0], [0], [1], [0, 0, 1, 1], [], []>} : vector<6x1024xbf16>, vector<1024x512xbf16>, vector<6x512xf32> -> vector<6x512xf32>
    %c0_22 = arith.constant 0 : index
    %c0_23 = arith.constant 0 : index
    %19 = vector.load %arg5[%c0_22, %c0_23] : memref<6x512xf32, #tpu.memory_space<vmem>>, vector<6x512xf32>
    %20 = arith.addf %19, %18 : vector<6x512xf32>
    %c0_24 = arith.constant 0 : index
    %c0_25 = arith.constant 0 : index
    %21 = vector.load %arg5[%c0_24, %c0_25] : memref<6x512xf32, #tpu.memory_space<vmem>>, vector<6x512xf32>
    tpu.vector_store %arg5[%c0_24, %c0_25], %20 {strides = array<i32>} : memref<6x512xf32, #tpu.memory_space<vmem>>, vector<6x512xf32>,
    %c0_26 = arith.constant 0 : index
    %c4 = arith.constant 4 : index
    %c0_27 = arith.constant 0 : index
    %22 = vector.load %arg1[%c0_26, %c4, %c0_27] : memref<1x16x1024xbf16, #tpu.memory_space<vmem>>, vector<1x6x1024xbf16>
    %23 = vector.shape_cast %22 : vector<1x6x1024xbf16> to vector<6x1024xbf16>
    %c3_28 = arith.constant 3 : index
    %c0_29 = arith.constant 0 : index
    %c0_30 = arith.constant 0 : index
    %24 = vector.load %arg2[%c3_28, %c0_29, %c0_30] : memref<4x1024x512xbf16, #tpu.memory_space<vmem>>, vector<1x1024x512xbf16>
    %25 = vector.shape_cast %24 : vector<1x1024x512xbf16> to vector<1024x512xbf16>
    %cst_31 = arith.constant dense<0.000000e+00> : vector<6x512xf32>
    %26 = tpu.matmul %23, %25, %cst_31 {dimension_numbers = #tpu.dot_dimension_numbers<[1], [0], [0], [1], [0, 0, 1, 1], [], []>} : vector<6x1024xbf16>, vector<1024x512xbf16>, vector<6x512xf32> -> vector<6x512xf32>
    %c0_32 = arith.constant 0 : index
    %c0_33 = arith.constant 0 : index
    %27 = vector.load %arg5[%c0_32, %c0_33] : memref<6x512xf32, #tpu.memory_space<vmem>>, vector<6x512xf32>
    %28 = arith.addf %27, %26 : vector<6x512xf32>
    %c0_34 = arith.constant 0 : index
    %c0_35 = arith.constant 0 : index
    %29 = vector.load %arg5[%c0_34, %c0_35] : memref<6x512xf32, #tpu.memory_space<vmem>>, vector<6x512xf32>
    tpu.vector_store %arg5[%c0_34, %c0_35], %28 {strides = array<i32>} : memref<6x512xf32, #tpu.memory_space<vmem>>, vector<6x512xf32>,
    %c0_36 = arith.constant 0 : index
    %c0_37 = arith.constant 0 : index
    %30 = vector.load %arg5[%c0_36, %c0_37] : memref<6x512xf32, #tpu.memory_space<vmem>>, vector<6x512xf32>
    %c0_38 = arith.constant 0 : index
    %c0_39 = arith.constant 0 : index
    %31 = vector.load %arg3[%c0_38, %c0_39] : memref<1x512xf32, #tpu.memory_space<vmem>>, vector<1x512xf32>
    %32 = vector.broadcast %31 : vector<1x512xf32> to vector<6x512xf32>
    %33 = arith.addf %30, %32 : vector<6x512xf32>
    %34 = tpu.iota {dimensions = array<i32: 0>} : vector<6x1xi32>
    %c3_i32 = arith.constant 3 : i32
    %c0_i32 = arith.constant 0 : i32
    %35 = arith.cmpi eq, %c3_i32, %c0_i32 : i32
    %c1_i32 = arith.constant 1 : i32
    %36 = arith.select %35, %c1_i32, %c3_i32 : i32
    %37 = vector.broadcast %36 : i32 to vector<6x1xi32>
    %38 = arith.remsi %34, %37 : vector<6x1xi32>
    %c0_i32_40 = arith.constant 0 : i32
    %39 = vector.broadcast %c0_i32_40 : i32 to vector<6x1xi32>
    %40 = arith.cmpi ne, %38, %39 : vector<6x1xi32>
    %c0_i32_41 = arith.constant 0 : i32
    %41 = vector.broadcast %c0_i32_41 : i32 to vector<6x1xi32>
    %42 = arith.cmpi slt, %38, %41 : vector<6x1xi32>
    %c0_i32_42 = arith.constant 0 : i32
    %43 = arith.cmpi slt, %36, %c0_i32_42 : i32
    %44 = vector.broadcast %43 : i1 to vector<6x1xi1>
    %45 = vector.broadcast %44 : vector<6x1xi1> to vector<6x1xi1>
    %46 = arith.xori %42, %45 : vector<6x1xi1>
    %47 = arith.andi %46, %40 : vector<6x1xi1>
    %48 = vector.broadcast %36 : i32 to vector<6x1xi32>
    %49 = arith.addi %38, %48 : vector<6x1xi32>
    %50 = arith.select %47, %49, %38 : vector<6x1xi1>, vector<6x1xi32>
    %c2_i32 = arith.constant 2 : i32
    %51 = vector.broadcast %c2_i32 : i32 to vector<6x1xi32>
    %52 = arith.cmpi ne, %50, %51 : vector<6x1xi32>
    %53 = arith.extui %52 : vector<6x1xi1> to vector<6x1xi32>
    %54 = arith.sitofp %53 : vector<6x1xi32> to vector<6x1xf32>
    %55 = vector.broadcast %54 : vector<6x1xf32> to vector<6x512xf32>
    %56 = arith.mulf %33, %55 : vector<6x512xf32>
    %cst_43 = arith.constant dense<0.000000e+00> : vector<512xf32>
    %57 = vector.multi_reduction <add>, %56, %cst_43 [0] : vector<6x512xf32> to vector<512xf32>
    %58 = vector.shape_cast %57 : vector<512xf32> to vector<1x512xf32>
    %cst_44 = arith.constant 2.500000e-01 : f32
    %59 = vector.broadcast %cst_44 : f32 to vector<1x512xf32>
    %60 = arith.mulf %58, %59 : vector<1x512xf32>
    %61 = arith.mulf %56, %33 : vector<6x512xf32>
    %cst_45 = arith.constant dense<0.000000e+00> : vector<512xf32>
    %62 = vector.multi_reduction <add>, %61, %cst_45 [0] : vector<6x512xf32> to vector<512xf32>
    %63 = vector.shape_cast %62 : vector<512xf32> to vector<1x512xf32>
    %cst_46 = arith.constant 2.500000e-01 : f32
    %64 = vector.broadcast %cst_46 : f32 to vector<1x512xf32>
    %65 = arith.mulf %63, %64 : vector<1x512xf32>
    %66 = arith.mulf %60, %60 : vector<1x512xf32>
    %67 = arith.subf %65, %66 : vector<1x512xf32>
    %68 = vector.broadcast %60 : vector<1x512xf32> to vector<6x512xf32>
    %69 = arith.subf %33, %68 : vector<6x512xf32>
    %cst_47 = arith.constant 9.99999974E-6 : f32
    %70 = vector.broadcast %cst_47 : f32 to vector<1x512xf32>
    %71 = arith.addf %67, %70 : vector<1x512xf32>
    %72 = math.rsqrt %71 : vector<1x512xf32>
    %73 = vector.broadcast %72 : vector<1x512xf32> to vector<6x512xf32>
    %74 = arith.mulf %69, %73 : vector<6x512xf32>
    %cst_48 = arith.constant 0.000000e+00 : f32
    %75 = vector.broadcast %cst_48 : f32 to vector<6x512xf32>
    %76 = arith.cmpf oge, %74, %75 : vector<6x512xf32>
    %cst_49 = arith.constant 2.000000e-01 : f32
    %77 = vector.broadcast %cst_49 : f32 to vector<6x512xf32>
    %78 = arith.mulf %77, %74 : vector<6x512xf32>
    %79 = arith.select %76, %74, %78 : vector<6x512xi1>, vector<6x512xf32>
    %80 = vector.broadcast %54 : vector<6x1xf32> to vector<6x512xf32>
    %81 = arith.mulf %79, %80 : vector<6x512xf32>
    %cst_50 = arith.constant dense<0.000000e+00> : vector<512xf32>
    %82 = vector.multi_reduction <add>, %81, %cst_50 [0] : vector<6x512xf32> to vector<512xf32>
    %83 = vector.shape_cast %82 : vector<512xf32> to vector<1x512xf32>
    %cst_51 = arith.constant 2.500000e-01 : f32
    %84 = vector.broadcast %cst_51 : f32 to vector<1x512xf32>
    %85 = arith.mulf %83, %84 : vector<1x512xf32>
    %c0_52 = arith.constant 0 : index
    %c0_53 = arith.constant 0 : index
    %c0_54 = arith.constant 0 : index
    %86 = vector.load %arg4[%c0_52, %c0_53, %c0_54] : memref<1x1x512xf32, #tpu.memory_space<vmem>>, vector<1x1x512xf32>
    %87 = vector.shape_cast %86 : vector<1x1x512xf32> to vector<1x512xf32>
    %88 = vector.shape_cast %85 : vector<1x512xf32> to vector<1x1x512xf32>
    tpu.vector_store %arg4[%c0_52, %c0_53, %c0_54], %88 {strides = array<i32>} : memref<1x1x512xf32, #tpu.memory_space<vmem>>, vector<1x1x512xf32>,
    return
  }
  func.func @transform_0(%arg0: i32) -> (i32, i32, i32) {
    %c0_i32 = arith.constant 0 : i32
    %c0_i32_0 = arith.constant 0 : i32
    %c0_i32_1 = arith.constant 0 : i32
    return %arg0, %c0_i32, %c0_i32_0 : i32, i32, i32
  }
  func.func @transform_1(%arg0: i32) -> (i32, i32, i32) {
    %c0_i32 = arith.constant 0 : i32
    %c0_i32_0 = arith.constant 0 : i32
    %c0_i32_1 = arith.constant 0 : i32
    %c0_i32_2 = arith.constant 0 : i32
    return %c0_i32, %c0_i32_0, %c0_i32_1 : i32, i32, i32
  }
  func.func @transform_2(%arg0: i32) -> (i32, i32) {
    %c0_i32 = arith.constant 0 : i32
    %c0_i32_0 = arith.constant 0 : i32
    %c0_i32_1 = arith.constant 0 : i32
    return %c0_i32, %c0_i32_0 : i32, i32
  }
  func.func @transform_3(%arg0: i32) -> (i32, i32, i32) {
    %c0_i32 = arith.constant 0 : i32
    %c0_i32_0 = arith.constant 0 : i32
    %c0_i32_1 = arith.constant 0 : i32
    return %arg0, %c0_i32, %c0_i32_0 : i32, i32, i32
  }
}

</mosaic_0001>

<bundles_post_ra>
// kernel: discriminator_forward.4
= control target key start
LH: loop header
LB: loop body
LE: loop exit
PB: predicated region body
PF: predicated region fallthrough
CT: control target
= control target key end

     0   :  { %8 = vsyncpa [#allocation4], 0  ;;  %s3512_s12 = smov 0   ;;  %s4077_s0 = inlined_call_operand.vmem [shape: bf16[2,296,12], index: 0, kind: input, shape index: {}]   ;;  %s4078_s1 = inlined_call_operand.vmem [shape: bf16[4,12,128], index: 1, kind: input, shape index: {}]   ;;  %s4079_s2 = inlined_call_operand.hbm [shape: f32[1,128], index: 2, kind: input, shape index: {}]   ;;  %s4080_s3 = inlined_call_operand.vmem [shape: bf16[2,272,128], index: 3, kind: output, shape index: {}]  }
   0x1 LB: > { %s3518_s13 = sadd.s32 4294967295, %s3487_s12   ;;  %p2671_p0 = scmp.ge.s32.totalorder %s3487_s12, 1  ;;  %s3487_s12 = sphi %s3512_s12, %s14_s12  }
   0x2   : > { %p113_p1 = scmp.lt.s32.totalorder %s3487_s12, 3  ;;  %p4081_p3 = scmp.eq.s32.totalorder %s3518_s13, 0 }
   0x3   : > { %s3489_s15 = smov [#allocation3]   ;;  %s3449_s20 = scalar_lea.hbm %s4079_s2, 16 }
   0x4   : > { %p3522_p2 = pnand %p2671_p0, %p113_p1  ;;  %s129_s16 = sshll.u32 %s3489_s15, 4  ;;  %s130_s16 = int_to_ptr.vmem [resolvable:$true] %s129_s16 }
   0x5   : > { %p3450_p6 = scmp.ne.s32.totalorder %s4079_s2, %s3449_s20  ;;  %p3456_p10 = scmp.lt.u32.totalorder %s3449_s20, %s4079_s2 }
   0x6   : > { %s4083_s14 = scalar_select %p3522_p2, 1, 0 }
   0x7   : > { %p3357_p4 = pneg %p3522_p2 }
   0x9   : > { %p3531_p5 = pnand %p4081_p3, %p3357_p4 }
   0xb   : > { %p3451_p7 = pneg %p3531_p5 }
   0xd   : > { %p3452_p8 = pnand %p3451_p7, %p3450_p6 }
   0xf   : > { %p3453_p9 = pneg %p3452_p8 }
  0x11   : > { %p3458_p11 = pnand %p3456_p10, %p3453_p9 }
  0x13   : > { %3461 = shalt.err (!%p3458_p11)
}
  0x14   : > { %s3462_s25 = scalar_lea.vmem %s130_s16, 16  ;;  %s3469_s26 = scalar_lea.vmem %s130_s16, 32 }
  0x15   : > { %p3463_p12 = scmp.ne.s32.totalorder %s130_s16, %s3462_s25  ;;  %p3470_p1 = scmp.lt.s32.totalorder %s130_s16, %s130_s16 }
  0x16   : > { %p3471_p4 = scmp.lt.s32.totalorder %s3469_s26, %s3462_s25 }
  0x17   : > { %p3465_p13 = pnand %p3463_p12, %p3451_p7 }
  0x18   : > { %p3472_p3 = por %p3471_p4, %p3470_p1 }
  0x19   : > { %p3466_p0 = pneg %p3465_p13 }
  0x1b   : > { %p3473_p2 = pnand %p3472_p3, %p3466_p0 }
  0x1d   : > { %3476 = shalt.err (!%p3473_p2)
}
  0x1e   : > { %3360 = dma.hbm_to_vmem [thread:$0]  (!%p3531_p5), %s4079_s2, 16, %s130_s16, [#allocation4]  }
  0x1f   : > { %p4085_p6 = scmp.ne.s32.totalorder %s4083_s14, 0 }
  0x20   : > { %p4086_p8 = scmp.eq.s32.totalorder (!%p4085_p6), %s3518_s13, 0 }
  0x21   : > { %150 = sbr.rel (%p4085_p6) target bundleno = 544 (0x220), region = 32 }
  0x28   : > { %3482 = dma.done.wait (%p4086_p8), [#allocation4], 16   ;;  %p4087_p7 = pmov %p4086_p8 }
  0x29   : > { %p174_p9 = scmp.lt.s32.totalorder %s3518_s13, 1  ;;  %v3490_v0 = vmov 0.0   ;;  %vm3491_vm0 = vmmov 0   ;;  %vm363_vm1 = vcmask 1045504   ;;  %vm311_vm2 = vcmask 97280  }
  0x2a   : > { %3484 = vsyncadd (%p4087_p7), [#allocation4], 4294967280  ;;  %3071 = vmatprep.subr.bf16.mxu0 %v3490_v0  ;;  %3141 = vmatprep.subr.bf16.mxu1 %v3490_v0  ;;  %v3374_v1 = vld [vmem:[%s4078_s1] sm:$0x3f]   ;;  %v3375_v2 = vld [vmem:[%s4078_s1 + $0x8] sm:$0x3f]  }
  0x2b   : > { %3073 = vmatprep.mubr.msk.bf16.mxu0 %vm3491_vm0, %v3490_v0  ;;  %s4089_s13 = smov (!%p174_p9, %s3518_s13), 1  ;;  %3143 = vmatprep.mubr.msk.bf16.mxu1 %vm3491_vm0, %v3490_v0  ;;  %v365_v3 = vsel %vm363_vm1, %v3374_v1, 0  ;;  %v894_v5 = vsel %vm363_vm1, %v3375_v2, 0  ;;  %v3377_v7 = vld [vmem:[%s4078_s1 + $0x10] sm:$0x3f]   ;;  %vm1889_vm4 = vcmask 1046528  }
  0x2c   : > { %s3351_s29 = smul.u32 148, %s4089_s13  ;;  %3072 = vmatpush3.bf16.msra.mxu0 %v365_v3  ;;  %3142 = vmatpush3.bf16.msra.mxu1 %v894_v5  ;;  %v1490_v10 = vsel %vm363_vm1, %v3377_v7, 0  ;;  %v3380_v13 = vld [vmem:[%s4078_s1 + $0x18] sm:$0x3f]   ;;  %vm696_vm3 = vsmask.f32 7424 }
  0x2d   : > { %3211 = vmatprep.subr.bf16.mxu0 %v3490_v0  ;;  %3281 = vmatprep.subr.bf16.mxu1 %v3490_v0  ;;  %v1982_v21 = vsel %vm363_vm1, %v3380_v13, 0  ;;  %s3352_s16 = smul.u32 136, %s4089_s13 }
  0x2e   : > { %s3574_s7 = scalar_lea.vmem %s4077_s0, %s3351_s29 }
  0x2f   : > { %v3376_v4 = vld [vmem:[%s3574_s7] sm:$0xff]   ;;  %v3379_v8 = vld [vmem:[%s3574_s7 + $0x8] sm:$0xff]   ;;  %v3382_v15 = vld [vmem:[%s3574_s7 + $0x10] sm:$0xff]   ;;  %s3993_s19 = scalar_lea.vmem %s4080_s3, %s3352_s16 }
  0x30   : > { %v3378_v6 = vld [vmem:[%s3574_s7] sm:$0xff]   ;;  %3074 = vmatmul.mubr.msk.bf16.vlgmr.msra.gmra.mrb[0].mxu0 %vm311_vm2, %v3376_v4  ;;  %v705_v12 = vshll.u32 %v3379_v8, 16  ;;  %v3381_v17 = vld [vmem:[%s3574_s7 + $0x8] sm:$0xff]   ;;  %v709_v19 = vshrl.u32 %v3379_v8, 16  ;;  %v713_v20 = vshll.u32 %v3382_v15, 16  ;;  %v3384_v25 = vld [vmem:[%s3574_s7 + $0x18] sm:$0xff]  }
  0x31   : > { %v698_v9 = vshrl.u32 %v3378_v6, 16  ;;  %v700_v11 = vshll.u32 %v3378_v6, 16  ;;  %3212 = vmatpush3.bf16.msra.mxu0 %v1490_v10  ;;  %3077 = vmatprep.mubr.msk.bf16.mxu0 %vm3491_vm0, %v3490_v0  ;;  %v3383_v26 = vld [vmem:[%s3574_s7 + $0x10] sm:$0xff]   ;;  %v717_v28 = vshrl.u32 %v3382_v15, 16  ;;  %v721_v29 = vshll.u32 %v3384_v25, 16  ;;  %v3386_v30 = vld [vmem:[%s3574_s7 + $0x20] sm:$0xff]  }
  0x32   : > { %v707_v16 = vrot.slane %v705_v12, 1  ;;  %v715_v24 = vrot.slane %v713_v20, 1  ;;  %v729_v33 = vshll.u32 %v3386_v30, 16  ;;  %v3385_v35 = vld [vmem:[%s3574_s7 + $0x18] sm:$0xff]   ;;  %v725_v36 = vshrl.u32 %v3384_v25, 16  ;;  %v3388_v38 = vld [vmem:[%s3574_s7 + $0x28] sm:$0xff]  }
  0x33   : > { %v702_v14 = vrot.slane %v700_v11, 1  ;;  %v723_v32 = vrot.slane %v721_v29, 1  ;;  %v3387_v40 = vld [vmem:[%s3574_s7 + $0x20] sm:$0xff]   ;;  %v733_v42 = vshrl.u32 %v3386_v30, 16  ;;  %v737_v43 = vshll.u32 %v3388_v38, 16  ;;  %v3390_v46 = vld [vmem:[%s3574_s7 + $0x30] sm:$0xff]  }
  0x34   : > { %v711_v23 = vor.u32 %v709_v19, %v707_v16  ;;  %v719_v31 = vor.u32 %v717_v28, %v715_v24  ;;  %v731_v37 = vrot.slane %v729_v33, 1  ;;  %v3389_v48 = vld [vmem:[%s3574_s7 + $0x28] sm:$0xff]   ;;  %v741_v49 = vshrl.u32 %v3388_v38, 16  ;;  %v3392_v51 = vld [vmem:[%s3574_s7 + $0x38] sm:$0xff]   ;;  %v3391_v56 = vld [vmem:[%s3574_s7 + $0x30] sm:$0xff]  }
  0x35   : > { %v703_v18 = vor.u32 %v702_v14, %v698_v9  ;;  %v727_v39 = vor.u32 %v725_v36, %v723_v32  ;;  %v739_v45 = vrot.slane %v737_v43, 1  ;;  %v745_v50 = vshll.u32 %v3390_v46, 16  ;;  %v3394_v59 = vld [vmem:[%s3574_s7 + $0x40] sm:$0xff]   ;;  %v3393_v62 = vld [vmem:[%s3574_s7 + $0x38] sm:$0xff]   ;;  %v3396_v2 = vld [vmem:[%s3574_s7 + $0x48] sm:$0xff]  }
  0x36   : > { %v716_v27 = vsel %vm696_vm3, %v711_v23, %v715_v24  ;;  %v724_v34 = vsel %vm696_vm3, %v719_v31, %v723_v32  ;;  %v735_v44 = vor.u32 %v733_v42, %v731_v37  ;;  %v753_v54 = vshll.u32 %v3392_v51, 16  ;;  %v3395_v5 = vld [vmem:[%s3574_s7 + $0x40] sm:$0xff]   ;;  %v3398_v9 = vld [vmem:[%s3574_s7 + $0x50] sm:$0xff]   ;;  %v3397_v12 = vld [vmem:[%s3574_s7 + $0x48] sm:$0xff]  }
  0x37   : > { %v708_v22 = vsel %vm696_vm3, %v703_v18, %v707_v16  ;;  %v732_v41 = vsel %vm696_vm3, %v727_v39, %v731_v37  ;;  %v743_v52 = vor.u32 %v741_v49, %v739_v45  ;;  %v747_v53 = vrot.slane %v745_v50, 1  ;;  %v3400_v18 = vld [vmem:[%s3574_s7 + $0x58] sm:$0xff]   ;;  %v3399_v20 = vld [vmem:[%s3574_s7 + $0x50] sm:$0xff]   ;;  %v3402_v25 = vld [vmem:[%s3574_s7 + $0x60] sm:$0xff]  }
  0x38   : > { %3144 = vmatmul.mubr.msk.bf16.vlgmr.msra.gmra.mrb[0].mxu1 %vm311_vm2, %v708_v22  ;;  %3078 = vmatmul.mubr.msk.bf16.gmra.mrb[4].mxu0 %vm311_vm2, %v3381_v17  ;;  %v740_v47 = vsel %vm696_vm3, %v735_v44, %v739_v45  ;;  %v749_v57 = vshrl.u32 %v3390_v46, 16  ;;  %v755_v58 = vrot.slane %v753_v54, 1  ;;  %v757_v63 = vshrl.u32 %v3392_v51, 16  ;;  %v3404_v32 = vld [vmem:[%s3574_s7 + $0x68] sm:$0xff]   ;;  %v3406_v39 = vld [vmem:[%s3574_s7 + $0x70] sm:$0xff]   ;;  %v3408_v46 = vld [vmem:[%s3574_s7 + $0x78] sm:$0xff]  }
  0x39   : > { %3282 = vmatpush3.bf16.msra.mxu1 %v1982_v21  ;;  %3147 = vmatprep.mubr.msk.bf16.mxu1 %vm3491_vm0, %v3490_v0  ;;  %v748_v55 = vsel %vm696_vm3, %v743_v52, %v747_v53  ;;  %v761_v1 = vshll.u32 %v3394_v59, 16  ;;  %v765_v6 = vshrl.u32 %v3394_v59, 16  ;;  %v769_v7 = vshll.u32 %v3396_v2, 16 }
  0x3a   : > { %3081 = vmatprep.mubr.msk.bf16.mxu0 %vm3491_vm0, %v3490_v0  ;;  %v751_v60 = vor.u32 %v749_v57, %v747_v53  ;;  %v759_v3 = vor.u32 %v757_v63, %v755_v58  ;;  %v773_v13 = vshrl.u32 %v3396_v2, 16  ;;  %v777_v14 = vshll.u32 %v3398_v9, 16  ;;  %v3410_v53 = vld [vmem:[%s3574_s7 + $0x80] sm:$0xff]  }
  0x3b   : > { %v763_v4 = vrot.slane %v761_v1, 1  ;;  %v771_v11 = vrot.slane %v769_v7, 1  ;;  %v781_v21 = vshrl.u32 %v3398_v9, 16  ;;  %v785_v22 = vshll.u32 %v3400_v18, 16  ;;  %v3411_v2 = vld [vmem:[%s3574_s7 + $0x80] sm:$0xff]  }
  0x3c   : > { %v756_v61 = vsel %vm696_vm3, %v751_v60, %v755_v58  ;;  %v779_v17 = vrot.slane %v777_v14, 1  ;;  %v789_v28 = vshrl.u32 %v3400_v18, 16  ;;  %v793_v29 = vshll.u32 %v3402_v25, 16  ;;  %v3413_v58 = vld [vmem:[%s3574_s7 + $0x8] sm:$0xff]  }
  0x3d   : > { %v764_v8 = vsel %vm696_vm3, %v759_v3, %v763_v4  ;;  %v767_v10 = vor.u32 %v765_v6, %v763_v4  ;;  %v775_v16 = vor.u32 %v773_v13, %v771_v11  ;;  %v787_v24 = vrot.slane %v785_v22, 1  ;;  %v3415_v14 = vld [vmem:[%s3574_s7 + $0x8] sm:$0xfe]  }
  0x3e   : > { %v783_v23 = vor.u32 %v781_v21, %v779_v17  ;;  %v795_v31 = vrot.slane %v793_v29, 1  ;;  %v801_v36 = vshll.u32 %v3404_v32, 16  ;;  %v805_v42 = vshrl.u32 %v3404_v32, 16  ;;  %v3421_v32 = vld [vmem:[%s3574_s7 + $0x28] sm:$0xff]  }
  0x3f   : > { %v772_v15 = vsel %vm696_vm3, %v767_v10, %v771_v11  ;;  %v780_v19 = vsel %vm696_vm3, %v775_v16, %v779_v17  ;;  %v791_v30 = vor.u32 %v789_v28, %v787_v24  ;;  %v809_v43 = vshll.u32 %v3406_v39, 16 }
  0x40   : > { %3148 = vmatmul.mubr.msk.bf16.gmra.mrb[4].mxu1 %vm311_vm2, %v716_v27  ;;  %3082 = vmatmul.mubr.msk.bf16.gmra.mrb[8].mxu0 %vm311_vm2, %v3383_v26  ;;  %v788_v26 = vsel %vm696_vm3, %v783_v23, %v787_v24  ;;  %v3401_v27 = vld [vmem:[%s3574_s7 + $0x58] sm:$0xff]   ;;  %v803_v38 = vrot.slane %v801_v36, 1  ;;  %v813_v49 = vshrl.u32 %v3406_v39, 16  ;;  %v817_v50 = vshll.u32 %v3408_v46, 16  ;;  %v3419_v23 = vld [vmem:[%s3574_s7 + $0x20] sm:$0xff]  }
  0x41   : > { %3151 = vmatprep.mubr.msk.bf16.mxu1 %vm3491_vm0, %v3490_v0  ;;  %3085 = vmatprep.mubr.msk.bf16.mxu0 %vm3491_vm0, %v3490_v0  ;;  %v796_v33 = vsel %vm696_vm3, %v791_v30, %v795_v31  ;;  %v811_v45 = vrot.slane %v809_v43, 1  ;;  %v825_v57 = vshll.u32 %v3410_v53, 16  ;;  %v1296_v63 = vshll.u32 %v3413_v58, 16  ;;  %v3422_v43 = vld [vmem:[%s3574_s7 + $0x28] sm:$0xff]  }
  0x42   : > { %v807_v44 = vor.u32 %v805_v42, %v803_v38  ;;  %v819_v52 = vrot.slane %v817_v50, 1  ;;  %v829_v3 = vshrl.u32 %v3410_v53, 16  ;;  %v1317_v28 = vshll.u32 %v3419_v23, 16  ;;  %v3425_v50 = vld [vmem:[%s3574_s7 + $0x38] sm:$0xff]  }
  0x43   : > { %v815_v51 = vor.u32 %v813_v49, %v811_v45  ;;  %v827_v60 = vrot.slane %v825_v57, 1  ;;  %v1298_v6 = vrot.slane %v1296_v63, 1  ;;  %v1321_v36 = vshrl.u32 %v3419_v23, 16  ;;  %v3433_v23 = vld [vmem:[%s3574_s7 + $0x58] sm:$0xff]  }
  0x44   : > { %v1345_v63 = vshrl.u32 %v3425_v50, 16 }
  0x45   : > { %v820_v54 = vsel %vm696_vm3, %v815_v51, %v819_v52 }
  0x48   : > { %3152 = vmatmul.mubr.msk.bf16.gmra.mrb[8].mxu1 %vm311_vm2, %v724_v34  ;;  %3086 = vmatmul.mubr.msk.bf16.gmra.mrb[12].mxu0 %vm311_vm2, %v3385_v35  ;;  %v3403_v34 = vld [vmem:[%s3574_s7 + $0x60] sm:$0xff]   ;;  %v797_v35 = vshrl.u32 %v3402_v25, 16  ;;  %v3418_v25 = vld [vmem:[%s3574_s7 + $0x18] sm:$0xff]  }
  0x49   : > { %3155 = vmatprep.mubr.msk.bf16.mxu1 %vm3491_vm0, %v3490_v0  ;;  %3089 = vmatprep.mubr.msk.bf16.mxu0 %vm3491_vm0, %v3490_v0  ;;  %v1893_v29 = vrot.slane %v3418_v25, 1  ;;  %v3432_v25 = vld [vmem:[%s3574_s7 + $0x50] sm:$0xff]  }
  0x4a   : > { %v799_v37 = vor.u32 %v797_v35, %v795_v31  ;;  %v1319_v31 = vrot.slane %v1317_v28, 1  ;;  %v1373_v28 = vshll.u32 %v3433_v23, 16 }
  0x4c   : > { %v1323_v39 = vor.u32 %v1321_v36, %v1319_v31  ;;  %v1377_v36 = vshrl.u32 %v3433_v23, 16 }
  0x50   : > { %3156 = vmatmul.mubr.msk.bf16.gmra.mrb[12].mxu1 %vm311_vm2, %v732_v41  ;;  %3090 = vmatmul.mubr.msk.bf16.gmra.mrb[16].mxu0 %vm311_vm2, %v3387_v40  ;;  %v804_v40 = vsel %vm696_vm3, %v799_v37, %v803_v38  ;;  %v3405_v41 = vld [vmem:[%s3574_s7 + $0x68] sm:$0xff]   ;;  %v1325_v37 = vshll.u32 %v3421_v32, 16 }
  0x51   : > { %3159 = vmatprep.mubr.msk.bf16.mxu1 %vm3491_vm0, %v3490_v0  ;;  %3093 = vmatprep.mubr.msk.bf16.mxu0 %vm3491_vm0, %v3490_v0 }
  0x58   : > { %3160 = vmatmul.mubr.msk.bf16.gmra.mrb[16].mxu1 %vm311_vm2, %v740_v47  ;;  %3094 = vmatmul.mubr.msk.bf16.gmra.mrb[20].mxu0 %vm311_vm2, %v3389_v48  ;;  %v812_v47 = vsel %vm696_vm3, %v807_v44, %v811_v45  ;;  %v3407_v48 = vld [vmem:[%s3574_s7 + $0x70] sm:$0xff]   ;;  %v1329_v45 = vshrl.u32 %v3421_v32, 16  ;;  %v3435_v32 = vld [vmem:[%s3574_s7 + $0x60] sm:$0xff]  }
  0x59   : > { %3163 = vmatprep.mubr.msk.bf16.mxu1 %vm3491_vm0, %v3490_v0  ;;  %3097 = vmatprep.mubr.msk.bf16.mxu0 %vm3491_vm0, %v3490_v0 }
  0x60   : > { %3164 = vmatmul.mubr.msk.bf16.gmra.mrb[20].mxu1 %vm311_vm2, %v748_v55  ;;  %3098 = vmatmul.mubr.msk.bf16.gmra.mrb[24].mxu0 %vm311_vm2, %v3391_v56  ;;  %v3409_v55 = vld [vmem:[%s3574_s7 + $0x78] sm:$0xff]   ;;  %v821_v56 = vshrl.u32 %v3408_v46, 16 }
  0x61   : > { %3167 = vmatprep.mubr.msk.bf16.mxu1 %vm3491_vm0, %v3490_v0  ;;  %3101 = vmatprep.mubr.msk.bf16.mxu0 %vm3491_vm0, %v3490_v0 }
  0x62   : > { %v823_v59 = vor.u32 %v821_v56, %v819_v52  ;;  %v3424_v52 = vld [vmem:[%s3574_s7 + $0x30] sm:$0xff]  }
  0x63   : > { %v1899_v56 = vrot.slane %v3424_v52, 1 }
  0x64   : > { %v828_v1 = vsel %vm696_vm3, %v823_v59, %v827_v60  ;;  %v3427_v59 = vld [vmem:[%s3574_s7 + $0x40] sm:$0xff]  }
  0x68   : > { %3168 = vmatmul.mubr.msk.bf16.gmra.mrb[24].mxu1 %vm311_vm2, %v756_v61  ;;  %3102 = vmatmul.mubr.msk.bf16.gmra.mrb[28].mxu0 %vm311_vm2, %v3393_v62  ;;  %v3412_v61 = vld [vmem:[%s3574_s7 + $0x88] ss:$0 sps:$4 sm:$0x11]   ;;  %v3414_v62 = vld [vmem:[%s3574_s7 + $0x10] sm:$0xff]  }
  0x69   : > { %3171 = vmatprep.mubr.msk.bf16.mxu1 %vm3491_vm0, %v3490_v0  ;;  %3105 = vmatprep.mubr.msk.bf16.mxu0 %vm3491_vm0, %v3490_v0  ;;  %v833_v4 = vshll.u32 %v3412_v61, 16  ;;  %v1301_v7 = vshll.u32 %v3414_v62, 16  ;;  %v1305_v17 = vshrl.u32 %v3414_v62, 16  ;;  %v3426_v61 = vld [vmem:[%s3574_s7 + $0x38] sm:$0xff]  }
  0x6b   : > { %v835_v9 = vrot.slane %v833_v4, 1  ;;  %v1303_v11 = vrot.slane %v1301_v7, 1  ;;  %v3428_v7 = vld [vmem:[%s3574_s7 + $0x40] sm:$0xff]  }
  0x6d   : > { %v1307_v21 = vor.u32 %v1305_v17, %v1303_v11 }
  0x70   : > { %3172 = vmatmul.mubr.msk.bf16.gmra.mrb[28].mxu1 %vm311_vm2, %v764_v8  ;;  %3106 = vmatmul.mubr.msk.bf16.gmra.mrb[32].mxu0 %vm311_vm2, %v3395_v5  ;;  %v1294_v5 = vshrl.u32 %v3413_v58, 16  ;;  %v831_v8 = vor.u32 %v829_v3, %v827_v60 }
  0x71   : > { %3175 = vmatprep.mubr.msk.bf16.mxu1 %vm3491_vm0, %v3490_v0  ;;  %3109 = vmatprep.mubr.msk.bf16.mxu0 %vm3491_vm0, %v3490_v0 }
  0x72   : > { %v1299_v10 = vor.u32 %v1298_v6, %v1294_v5  ;;  %v836_v13 = vsel %vm696_vm3, %v831_v8, %v835_v9  ;;  %v3429_v5 = vld [vmem:[%s3574_s7 + $0x48] sm:$0xff]   ;;  %v1353_v9 = vshrl.u32 %v3427_v59, 16 }
  0x74   : > { %v1304_v16 = vsel %vm696_vm3, %v1299_v10, %v1303_v11  ;;  %v1357_v10 = vshll.u32 %v3429_v5, 16  ;;  %v1903_v11 = vrot.slane %v3428_v7, 1 }
  0x78   : > { %3176 = vmatmul.mubr.msk.bf16.gmra.mrb[32].mxu1 %vm311_vm2, %v772_v15  ;;  %3110 = vmatmul.mubr.msk.bf16.gmra.mrb[36].mxu0 %vm311_vm2, %v3397_v12  ;;  %v3417_v12 = vld [vmem:[%s3574_s7 + $0x18] sm:$0xff]   ;;  %v3416_v15 = vld [vmem:[%s3574_s7 + $0x10] sm:$0xff]  }
  0x79   : > { %3179 = vmatprep.mubr.msk.bf16.mxu1 %vm3491_vm0, %v3490_v0  ;;  %3113 = vmatprep.mubr.msk.bf16.mxu0 %vm3491_vm0, %v3490_v0  ;;  %v1309_v18 = vshll.u32 %v3417_v12, 16 }
  0x7b   : > { %v1311_v22 = vrot.slane %v1309_v18, 1  ;;  %v1361_v18 = vshrl.u32 %v3429_v5, 16 }
  0x80   : > { %3180 = vmatmul.mubr.msk.bf16.gmra.mrb[36].mxu1 %vm311_vm2, %v780_v19  ;;  %3114 = vmatmul.mubr.msk.bf16.gmra.mrb[40].mxu0 %vm311_vm2, %v3399_v20  ;;  %v1890_v19 = vrot.slane %v3415_v14, 1  ;;  %v1891_v20 = vrot.slane %v3416_v15, 1  ;;  %v3431_v14 = vld [vmem:[%s3574_s7 + $0x50] sm:$0xff]  }
  0x81   : > { %3183 = vmatprep.mubr.msk.bf16.mxu1 %vm3491_vm0, %v3490_v0  ;;  %3117 = vmatprep.mubr.msk.bf16.mxu0 %vm3491_vm0, %v3490_v0 }
  0x82   : > { %v1892_v24 = vsel %vm1889_vm4, %v1890_v19, %v1891_v20  ;;  %v1365_v19 = vshll.u32 %v3431_v14, 16 }
  0x88   : > { %3184 = vmatmul.mubr.msk.bf16.gmra.mrb[40].mxu1 %vm311_vm2, %v788_v26  ;;  %3118 = vmatmul.mubr.msk.bf16.gmra.mrb[44].mxu0 %vm311_vm2, %v3401_v27  ;;  %v1312_v26 = vsel %vm696_vm3, %v1307_v21, %v1311_v22  ;;  %v1313_v27 = vshrl.u32 %v3417_v12, 16 }
  0x89   : > { %3187 = vmatprep.mubr.msk.bf16.mxu1 %vm3491_vm0, %v3490_v0  ;;  %3121 = vmatprep.mubr.msk.bf16.mxu0 %vm3491_vm0, %v3490_v0 }
  0x8a   : > { %v1315_v30 = vor.u32 %v1313_v27, %v1311_v22  ;;  %v1367_v22 = vrot.slane %v1365_v19, 1  ;;  %v1369_v27 = vshrl.u32 %v3431_v14, 16 }
  0x8c   : > { %v1320_v35 = vsel %vm696_vm3, %v1315_v30, %v1319_v31  ;;  %v1371_v30 = vor.u32 %v1369_v27, %v1367_v22  ;;  %v1375_v31 = vrot.slane %v1373_v28, 1 }
  0x90   : > { %3188 = vmatmul.mubr.msk.bf16.gmra.mrb[44].mxu1 %vm311_vm2, %v796_v33  ;;  %3122 = vmatmul.mubr.msk.bf16.gmra.mrb[48].mxu0 %vm311_vm2, %v3403_v34  ;;  %v1894_v33 = vsel %vm1889_vm4, %v1891_v20, %v1893_v29  ;;  %v3420_v34 = vld [vmem:[%s3574_s7 + $0x20] sm:$0xff]  }
  0x91   : > { %3191 = vmatprep.mubr.msk.bf16.mxu1 %vm3491_vm0, %v3490_v0  ;;  %3125 = vmatprep.mubr.msk.bf16.mxu0 %vm3491_vm0, %v3490_v0  ;;  %v1895_v38 = vrot.slane %v3420_v34, 1  ;;  %v3434_v34 = vld [vmem:[%s3574_s7 + $0x58] sm:$0xff]  }
  0x93   : > { %v1896_v42 = vsel %vm1889_vm4, %v1893_v29, %v1895_v38  ;;  %v1907_v29 = vrot.slane %v3432_v25, 1 }
  0x98   : > { %3192 = vmatmul.mubr.msk.bf16.gmra.mrb[48].mxu1 %vm311_vm2, %v804_v40  ;;  %3126 = vmatmul.mubr.msk.bf16.gmra.mrb[52].mxu0 %vm311_vm2, %v3405_v41  ;;  %v1327_v40 = vrot.slane %v1325_v37, 1  ;;  %v3423_v41 = vld [vmem:[%s3574_s7 + $0x30] sm:$0xff]   ;;  %v1381_v37 = vshll.u32 %v3435_v32, 16 }
  0x99   : > { %3195 = vmatprep.mubr.msk.bf16.mxu1 %vm3491_vm0, %v3490_v0  ;;  %3129 = vmatprep.mubr.msk.bf16.mxu0 %vm3491_vm0, %v3490_v0  ;;  %v1333_v46 = vshll.u32 %v3423_v41, 16 }
  0x9a   : > { %v1328_v44 = vsel %vm696_vm3, %v1323_v39, %v1327_v40  ;;  %v1379_v39 = vor.u32 %v1377_v36, %v1375_v31 }
  0x9b   : > { %v1335_v49 = vrot.slane %v1333_v46, 1 }
  0xa0   : > { %3196 = vmatmul.mubr.msk.bf16.gmra.mrb[52].mxu1 %vm311_vm2, %v812_v47  ;;  %3130 = vmatmul.mubr.msk.bf16.gmra.mrb[56].mxu0 %vm311_vm2, %v3407_v48  ;;  %v1897_v47 = vrot.slane %v3422_v43, 1  ;;  %v1331_v48 = vor.u32 %v1329_v45, %v1327_v40  ;;  %v1383_v40 = vrot.slane %v1381_v37, 1  ;;  %v3436_v45 = vld [vmem:[%s3574_s7 + $0x60] sm:$0xff]   ;;  %v3442_v37 = vld [vmem:[%s3574_s7 + $0x78] sm:$0xff]  }
  0xa1   : > { %3199 = vmatprep.mubr.msk.bf16.mxu1 %vm3491_vm0, %v3490_v0  ;;  %3133 = vmatprep.mubr.msk.bf16.mxu0 %vm3491_vm0, %v3490_v0 }
  0xa2   : > { %v1898_v51 = vsel %vm1889_vm4, %v1895_v38, %v1897_v47  ;;  %v1336_v53 = vsel %vm696_vm3, %v1331_v48, %v1335_v49  ;;  %v1900_v60 = vsel %vm1889_vm4, %v1897_v47, %v1899_v56  ;;  %v1909_v38 = vrot.slane %v3434_v34, 1 }
  0xa3   : > { %v1384_v47 = vsel %vm696_vm3, %v1379_v39, %v1383_v40  ;;  %v1385_v48 = vshrl.u32 %v3435_v32, 16 }
  0xa4   : > { %v1910_v43 = vsel %vm1889_vm4, %v1907_v29, %v1909_v38 }
  0xa5   : > { %v1387_v52 = vor.u32 %v1385_v48, %v1383_v40  ;;  %v3445_v48 = vld [vmem:[%s3574_s7 + $0x88] sm:$0xff]  }
  0xa8   : > { %3200 = vmatmul.mubr.msk.bf16.gmra.mrb[56].mxu1 %vm311_vm2, %v820_v54  ;;  %3134 = vmatmul.mubr.msk.bf16.gmra.mrb[60].mxu0 %vm311_vm2, %v3409_v55  ;;  %v1337_v54 = vshrl.u32 %v3423_v41, 16  ;;  %v1341_v55 = vshll.u32 %v3425_v50, 16  ;;  %v3437_v41 = vld [vmem:[%s3574_s7 + $0x68] sm:$0xff]  }
  0xa9   : > { %3203 = vmatprep.mubr.msk.bf16.mxu1 %vm3491_vm0, %v3490_v0  ;;  %3137 = vmatprep.mubr.msk.bf16.mxu0 %vm3491_vm0, %v3490_v0 }
  0xaa   : > { %v1339_v57 = vor.u32 %v1337_v54, %v1335_v49  ;;  %v1343_v58 = vrot.slane %v1341_v55, 1  ;;  %v1389_v49 = vshll.u32 %v3437_v41, 16  ;;  %v3439_v54 = vld [vmem:[%s3574_s7 + $0x70] sm:$0xff]  }
  0xab   : > { %v1397_v5 = vshll.u32 %v3439_v54, 16  ;;  %v1401_v23 = vshrl.u32 %v3439_v54, 16 }
  0xac   : > { %v1344_v62 = vsel %vm696_vm3, %v1339_v57, %v1343_v58  ;;  %v1347_v3 = vor.u32 %v1345_v63, %v1343_v58 }
  0xb0   : > { %3204 = vmatmul.mubr.msk.bf16.gmra.mrb[60].mxu1 %vm311_vm2, %v828_v1  ;;  %3138 = vmatmul.mubr.msk.bf16.gmra.mrb[64].mxu0 %vm311_vm2, %v3411_v2  ;;  %v1349_v1 = vshll.u32 %v3427_v59, 16  ;;  %v1901_v2 = vrot.slane %v3426_v61, 1 }
  0xb1   : > { %3207 = vmatprep.mubr.msk.bf16.mxu1 %vm3491_vm0, %v3490_v0  ;;  %3213 = vmatprep.mubr.msk.bf16.mxu0 %vm3491_vm0, %v3490_v0 }
  0xb2   : > { %v1351_v4 = vrot.slane %v1349_v1, 1  ;;  %v1902_v6 = vsel %vm1889_vm4, %v1899_v56, %v1901_v2  ;;  %v1904_v15 = vsel %vm1889_vm4, %v1901_v2, %v1903_v11 }
  0xb4   : > { %v1352_v8 = vsel %vm696_vm3, %v1347_v3, %v1351_v4  ;;  %v1355_v12 = vor.u32 %v1353_v9, %v1351_v4  ;;  %v1393_v4 = vshrl.u32 %v3437_v41, 16  ;;  %v1399_v9 = vrot.slane %v1397_v5, 1 }
  0xb6   : > { %v1403_v27 = vor.u32 %v1401_v23, %v1399_v9 }
  0xb8   : > { %3208 = vmatmul.mubr.msk.bf16.gmra.mrb[64].mxu1 %vm311_vm2, %v836_v13  ;;  %3214 = vmatmul.mubr.msk.bf16.vlgmr.msra.gmra.mrb[68].mxu0 %vm311_vm2, %v1304_v16  ;;  %v1359_v13 = vrot.slane %v1357_v10, 1  ;;  %v3430_v16 = vld [vmem:[%s3574_s7 + $0x48] sm:$0xff]   ;;  %v3441_v10 = vld [vmem:[%s3574_s7 + $0x78] sm:$0xff]  }
  0xb9   : > { %3283 = vmatprep.mubr.msk.bf16.mxu1 %vm3491_vm0, %v3490_v0  ;;  %3217 = vmatprep.mubr.msk.bf16.mxu0 %vm3491_vm0, %v3490_v0  ;;  %v1905_v20 = vrot.slane %v3430_v16, 1 }
  0xba   : > { %v1360_v17 = vsel %vm696_vm3, %v1355_v12, %v1359_v13  ;;  %v1363_v21 = vor.u32 %v1361_v18, %v1359_v13  ;;  %v3440_v18 = vld [vmem:[%s3574_s7 + $0x70] sm:$0xff]  }
  0xc0   : > { %3284 = vmatmul.mubr.msk.bf16.vlgmr.msra.gmra.mrb[68].mxu1 %vm311_vm2, %v1892_v24  ;;  %3218 = vmatmul.mubr.msk.bf16.gmra.mrb[72].mxu0 %vm311_vm2, %v1312_v26  ;;  %v1906_v24 = vsel %vm1889_vm4, %v1903_v11, %v1905_v20  ;;  %v1368_v26 = vsel %vm696_vm3, %v1363_v21, %v1367_v22 }
  0xc1   : > { %3287 = vmatprep.mubr.msk.bf16.mxu1 %vm3491_vm0, %v3490_v0  ;;  %3221 = vmatprep.mubr.msk.bf16.mxu0 %vm3491_vm0, %v3490_v0 }
  0xc8   : > { %3288 = vmatmul.mubr.msk.bf16.gmra.mrb[72].mxu1 %vm311_vm2, %v1894_v33  ;;  %3222 = vmatmul.mubr.msk.bf16.gmra.mrb[76].mxu0 %vm311_vm2, %v1320_v35  ;;  %v1908_v33 = vsel %vm1889_vm4, %v1905_v20, %v1907_v29  ;;  %v1376_v35 = vsel %vm696_vm3, %v1371_v30, %v1375_v31  ;;  %v3443_v29 = vld [vmem:[%s3574_s7 + $0x80] sm:$0xff]  }
  0xc9   : > { %3291 = vmatprep.mubr.msk.bf16.mxu1 %vm3491_vm0, %v3490_v0  ;;  %3225 = vmatprep.mubr.msk.bf16.mxu0 %vm3491_vm0, %v3490_v0 }
  0xd0   : > { %3292 = vmatmul.mubr.msk.bf16.gmra.mrb[76].mxu1 %vm311_vm2, %v1896_v42  ;;  %3226 = vmatmul.mubr.msk.bf16.gmra.mrb[80].mxu0 %vm311_vm2, %v1328_v44 }
  0xd1   : > { %3295 = vmatprep.mubr.msk.bf16.mxu1 %vm3491_vm0, %v3490_v0  ;;  %3229 = vmatprep.mubr.msk.bf16.mxu0 %vm3491_vm0, %v3490_v0 }
  0xd8   : > { %3296 = vmatmul.mubr.msk.bf16.gmra.mrb[80].mxu1 %vm311_vm2, %v1898_v51  ;;  %3230 = vmatmul.mubr.msk.bf16.gmra.mrb[84].mxu0 %vm311_vm2, %v1336_v53  ;;  %v1911_v51 = vrot.slane %v3436_v45, 1  ;;  %v1391_v53 = vrot.slane %v1389_v49, 1  ;;  %v1917_v45 = vrot.slane %v3442_v37, 1 }
  0xd9   : > { %3299 = vmatprep.mubr.msk.bf16.mxu1 %vm3491_vm0, %v3490_v0  ;;  %3233 = vmatprep.mubr.msk.bf16.mxu0 %vm3491_vm0, %v3490_v0 }
  0xda   : > { %v1392_v3 = vsel %vm696_vm3, %v1387_v52, %v1391_v53 }
  0xe0   : > { %3300 = vmatmul.mubr.msk.bf16.gmra.mrb[84].mxu1 %vm311_vm2, %v1900_v60  ;;  %3234 = vmatmul.mubr.msk.bf16.gmra.mrb[88].mxu0 %vm311_vm2, %v1344_v62  ;;  %v1912_v60 = vsel %vm1889_vm4, %v1909_v38, %v1911_v51  ;;  %v3438_v62 = vld [vmem:[%s3574_s7 + $0x68] sm:$0xff]  }
  0xe1   : > { %3303 = vmatprep.mubr.msk.bf16.mxu1 %vm3491_vm0, %v3490_v0  ;;  %3237 = vmatprep.mubr.msk.bf16.mxu0 %vm3491_vm0, %v3490_v0  ;;  %v1913_v7 = vrot.slane %v3438_v62, 1  ;;  %v1417_v62 = vshrl.u32 %v3443_v29, 16 }
  0xe3   : > { %v1914_v16 = vsel %vm1889_vm4, %v1911_v51, %v1913_v7 }
  0xe8   : > { %3304 = vmatmul.mubr.msk.bf16.gmra.mrb[88].mxu1 %vm311_vm2, %v1902_v6  ;;  %3238 = vmatmul.mubr.msk.bf16.gmra.mrb[92].mxu0 %vm311_vm2, %v1352_v8  ;;  %v1395_v8 = vor.u32 %v1393_v4, %v1391_v53 }
  0xe9   : > { %3307 = vmatprep.mubr.msk.bf16.mxu1 %vm3491_vm0, %v3490_v0  ;;  %3241 = vmatprep.mubr.msk.bf16.mxu0 %vm3491_vm0, %v3490_v0 }
  0xea   : > { %v1400_v22 = vsel %vm696_vm3, %v1395_v8, %v1399_v9 }
  0xf0   : > { %3308 = vmatmul.mubr.msk.bf16.gmra.mrb[92].mxu1 %vm311_vm2, %v1904_v15  ;;  %3242 = vmatmul.mubr.msk.bf16.gmra.mrb[96].mxu0 %vm311_vm2, %v1360_v17 }
  0xf1   : > { %3311 = vmatprep.mubr.msk.bf16.mxu1 %vm3491_vm0, %v3490_v0  ;;  %3245 = vmatprep.mubr.msk.bf16.mxu0 %vm3491_vm0, %v3490_v0 }
  0xf8   : > { %3312 = vmatmul.mubr.msk.bf16.gmra.mrb[96].mxu1 %vm311_vm2, %v1906_v24  ;;  %3246 = vmatmul.mubr.msk.bf16.gmra.mrb[100].mxu0 %vm311_vm2, %v1368_v26  ;;  %v1405_v24 = vshll.u32 %v3441_v10, 16  ;;  %v1915_v26 = vrot.slane %v3440_v18, 1 }
  0xf9   : > { %3315 = vmatprep.mubr.msk.bf16.mxu1 %vm3491_vm0, %v3490_v0  ;;  %3249 = vmatprep.mubr.msk.bf16.mxu0 %vm3491_vm0, %v3490_v0 }
  0xfa   : > { %v1407_v28 = vrot.slane %v1405_v24, 1  ;;  %v1918_v54 = vsel %vm1889_vm4, %v1915_v26, %v1917_v45 }
  0xfc   : > { %v1408_v41 = vsel %vm696_vm3, %v1403_v27, %v1407_v28 }
 0x100   : > { %3316 = vmatmul.mubr.msk.bf16.gmra.mrb[100].mxu1 %vm311_vm2, %v1908_v33  ;;  %3250 = vmatmul.mubr.msk.bf16.gmra.mrb[104].mxu0 %vm311_vm2, %v1376_v35  ;;  %v1916_v35 = vsel %vm1889_vm4, %v1913_v7, %v1915_v26 }
 0x101   : > { %3319 = vmatprep.mubr.msk.bf16.mxu1 %vm3491_vm0, %v3490_v0  ;;  %3253 = vmatprep.mubr.msk.bf16.mxu0 %vm3491_vm0, %v3490_v0 }
 0x103   : > { %v401_v42 = vpop.f32.mrb[0].mxu0 }
 0x104   : > { %v3075_v44 = vpop.f32.mrb[1].mxu0 }
 0x105   : > { %v404_v46 = vpop.f32.mrb[2].mxu0 }
 0x106   : > { %v3076_v50 = vpop.f32.mrb[3].mxu0 }
 0x108   : > { %3320 = vmatmul.mubr.msk.bf16.gmra.mrb[104].mxu1 %vm311_vm2, %v1910_v43  ;;  %3254 = vmatmul.mubr.msk.bf16.gmra.mrb[108].mxu0 %vm311_vm2, %v1384_v47  ;;  %v1413_v43 = vshll.u32 %v3443_v29, 16 }
 0x109   : > { %3323 = vmatprep.mubr.msk.bf16.mxu1 %vm3491_vm0, %v3490_v0  ;;  %3257 = vmatprep.mubr.msk.bf16.mxu0 %vm3491_vm0, %v3490_v0 }
 0x10a   : > { %v1415_v47 = vrot.slane %v1413_v43, 1 }
 0x10b   : > { %v930_v55 = vpop.f32.mrb[0].mxu1  ;;  %v409_v58 = vpop.f32.mrb[4].mxu0 }
 0x10c   : > { %v3855_v56 = vadd.f32 %v930_v55, %v401_v42  ;;  %v3145_v57 = vpop.f32.mrb[1].mxu1  ;;  %v3079_v61 = vpop.f32.mrb[5].mxu0  ;;  %v1409_v42 = vshrl.u32 %v3441_v10, 16  ;;  %v1419_v4 = vor.u32 %v1417_v62, %v1415_v47 }
 0x10d   : > { %v933_v59 = vpop.f32.mrb[2].mxu1  ;;  %v412_v2 = vpop.f32.mrb[6].mxu0  ;;  %v3444_v57 = vld [vmem:[%s3574_s7 + $0x80] sm:$0xff]  }
 0x10e   : > { %v3859_v63 = vadd.f32 %v933_v59, %v404_v46  ;;  %v3146_v1 = vpop.f32.mrb[3].mxu1  ;;  %v3080_v6 = vpop.f32.mrb[7].mxu0  ;;  %v1411_v46 = vor.u32 %v1409_v42, %v1407_v28 }
 0x10f   : > { %v1421_v1 = vshll.u32 %v3445_v48, 16  ;;  %v3447_v6 = vld [vmem:[%s3574_s7 + $0x90] ss:$0 sps:$4 sm:$0x11]  }
 0x110   : > { %3324 = vmatmul.mubr.msk.bf16.gmra.mrb[108].mxu1 %vm311_vm2, %v1912_v60  ;;  %3258 = vmatmul.mubr.msk.bf16.gmra.mrb[112].mxu0 %vm311_vm2, %v1392_v3  ;;  %v1416_v61 = vsel %vm696_vm3, %v1411_v46, %v1415_v47  ;;  %v1919_v3 = vrot.slane %v3444_v57, 1 }
 0x111   : > { %3327 = vmatprep.mubr.msk.bf16.mxu1 %vm3491_vm0, %v3490_v0  ;;  %3261 = vmatprep.mubr.msk.bf16.mxu0 %vm3491_vm0, %v3490_v0  ;;  %v1423_v5 = vrot.slane %v1421_v1, 1 }
 0x113   : > { %v938_v11 = vpop.f32.mrb[4].mxu1  ;;  %v417_v14 = vpop.f32.mrb[8].mxu0 }
 0x114   : > { %v3869_v12 = vadd.f32 %v938_v11, %v409_v58  ;;  %v3149_v13 = vpop.f32.mrb[5].mxu1  ;;  %v3083_v17 = vpop.f32.mrb[9].mxu0 }
 0x115   : > { %v941_v15 = vpop.f32.mrb[6].mxu1  ;;  %v420_v21 = vpop.f32.mrb[10].mxu0  ;;  %v1920_v13 = vsel %vm1889_vm4, %v1917_v45, %v1919_v3 }
 0x116   : > { %v3873_v19 = vadd.f32 %v941_v15, %v412_v2  ;;  %v3150_v20 = vpop.f32.mrb[7].mxu1  ;;  %v3084_v25 = vpop.f32.mrb[11].mxu0  ;;  %v3446_v15 = vld [vmem:[%s3574_s7 + $0x88] sm:$0xff]  }
 0x117   : > { %v1424_v20 = vsel %vm696_vm3, %v1419_v4, %v1423_v5  ;;  %v1921_v24 = vrot.slane %v3446_v15, 1 }
 0x118   : > { %3328 = vmatmul.mubr.msk.bf16.gmra.mrb[112].mxu1 %vm311_vm2, %v1914_v16  ;;  %3262 = vmatmul.mubr.msk.bf16.gmra.mrb[116].mxu0 %vm311_vm2, %v1400_v22  ;;  %v1429_v22 = vshll.u32 %v3447_v6, 16 }
 0x119   : > { %3331 = vmatprep.mubr.msk.bf16.mxu1 %vm3491_vm0, %v3490_v0  ;;  %3265 = vmatprep.mubr.msk.bf16.mxu0 %vm3491_vm0, %v3490_v0 }
 0x11a   : > { %v1431_v26 = vrot.slane %v1429_v22, 1 }
 0x11b   : > { %v946_v30 = vpop.f32.mrb[8].mxu1  ;;  %v425_v33 = vpop.f32.mrb[12].mxu0 }
 0x11c   : > { %v3883_v31 = vadd.f32 %v946_v30, %v417_v14  ;;  %v3153_v32 = vpop.f32.mrb[9].mxu1  ;;  %v3087_v36 = vpop.f32.mrb[13].mxu0 }
 0x11d   : > { %v949_v34 = vpop.f32.mrb[10].mxu1  ;;  %v428_v40 = vpop.f32.mrb[14].mxu0 }
 0x11e   : > { %v3887_v38 = vadd.f32 %v949_v34, %v420_v21  ;;  %v3154_v39 = vpop.f32.mrb[11].mxu1  ;;  %v3088_v44 = vpop.f32.mrb[15].mxu0  ;;  %v1425_v21 = vshrl.u32 %v3445_v48, 16 }
 0x120   : > { %3332 = vmatmul.mubr.msk.bf16.gmra.mrb[116].mxu1 %vm311_vm2, %v1916_v35  ;;  %3266 = vmatmul.mubr.msk.bf16.gmra.mrb[120].mxu0 %vm311_vm2, %v1408_v41  ;;  %v1427_v25 = vor.u32 %v1425_v21, %v1423_v5  ;;  %v3448_v35 = vld [vmem:[%s3574_s7 + $0x90] ss:$0 sps:$4 sm:$0x11]  }
 0x121   : > { %3335 = vmatprep.mubr.msk.bf16.mxu1 %vm3491_vm0, %v3490_v0  ;;  %3269 = vmatprep.mubr.msk.bf16.mxu0 %vm3491_vm0, %v3490_v0  ;;  %v1923_v42 = vrot.slane %v3448_v35, 1 }
 0x123   : > { %v954_v49 = vpop.f32.mrb[12].mxu1  ;;  %v433_v52 = vpop.f32.mrb[16].mxu0  ;;  %v1924_v48 = vsel %vm1889_vm4, %v1921_v24, %v1923_v42 }
 0x124   : > { %v3897_v50 = vadd.f32 %v954_v49, %v425_v33  ;;  %v3157_v51 = vpop.f32.mrb[13].mxu1  ;;  %v3091_v55 = vpop.f32.mrb[17].mxu0  ;;  %v1922_v33 = vsel %vm1889_vm4, %v1919_v3, %v1921_v24 }
 0x125   : > { %v957_v53 = vpop.f32.mrb[14].mxu1  ;;  %v436_v60 = vpop.f32.mrb[18].mxu0 }
 0x126   : > { %v3901_v58 = vadd.f32 %v957_v53, %v428_v40  ;;  %v3158_v59 = vpop.f32.mrb[15].mxu1  ;;  %v3092_v2 = vpop.f32.mrb[19].mxu0  ;;  %v1432_v40 = vsel %vm696_vm3, %v1427_v25, %v1431_v26 }
 0x128   : > { %3336 = vmatmul.mubr.msk.bf16.gmra.mrb[120].mxu1 %vm311_vm2, %v1918_v54  ;;  %3270 = vmatmul.mubr.msk.bf16.gmra.mrb[124].mxu0 %vm311_vm2, %v1416_v61 }
 0x129   : > { %3339 = vmatprep.mubr.msk.bf16.mxu1 %vm3491_vm0, %v3490_v0  ;;  %3273 = vmatprep.mubr.msk.bf16.mxu0 %vm3491_vm0, %v3490_v0 }
 0x12b   : > { %v962_v7 = vpop.f32.mrb[16].mxu1  ;;  %v441_v10 = vpop.f32.mrb[20].mxu0 }
 0x12c   : > { %v3911_v8 = vadd.f32 %v962_v7, %v433_v52  ;;  %v3161_v9 = vpop.f32.mrb[17].mxu1  ;;  %v3095_v14 = vpop.f32.mrb[21].mxu0 }
 0x12d   : > { %v965_v11 = vpop.f32.mrb[18].mxu1  ;;  %v444_v18 = vpop.f32.mrb[22].mxu0 }
 0x12e   : > { %v3915_v16 = vadd.f32 %v965_v11, %v436_v60  ;;  %v3162_v17 = vpop.f32.mrb[19].mxu1  ;;  %v3096_v23 = vpop.f32.mrb[23].mxu0 }
 0x130   : > { %3340 = vmatmul.mubr.msk.bf16.gmra.mrb[124].mxu1 %vm311_vm2, %v1920_v13  ;;  %3274 = vmatmul.mubr.msk.bf16.gmra.mrb[128].mxu0 %vm311_vm2, %v1424_v20 }
 0x131   : > { %3343 = vmatprep.mubr.msk.bf16.mxu1 %vm3491_vm0, %v3490_v0  ;;  %3277 = vmatprep.mubr.msk.bf16.mxu0 %vm3491_vm0, %v3490_v0 }
 0x133   : > { %v970_v27 = vpop.f32.mrb[20].mxu1  ;;  %v449_v30 = vpop.f32.mrb[24].mxu0 }
 0x134   : > { %v3924_v28 = vadd.f32 %v970_v27, %v441_v10  ;;  %v3165_v29 = vpop.f32.mrb[21].mxu1  ;;  %v3099_v34 = vpop.f32.mrb[25].mxu0 }
 0x135   : > { %v973_v32 = vpop.f32.mrb[22].mxu1  ;;  %v452_v39 = vpop.f32.mrb[26].mxu0 }
 0x136   : > { %v3928_v36 = vadd.f32 %v973_v32, %v444_v18  ;;  %v3166_v37 = vpop.f32.mrb[23].mxu1  ;;  %v3100_v41 = vpop.f32.mrb[27].mxu0 }
 0x138   : > { %3344 = vmatmul.mubr.msk.bf16.gmra.mrb[128].mxu1 %vm311_vm2, %v1922_v33  ;;  %3278 = vmatmul.mubr.msk.bf16.gmra.mrb[132].mxu0 %vm311_vm2, %v1432_v40 }
 0x139   : > { %3347 = vmatprep.mubr.msk.bf16.mxu1 %vm3491_vm0, %v3490_v0 }
 0x13b   : > { %v978_v43 = vpop.f32.mrb[24].mxu1  ;;  %v457_v46 = vpop.f32.mrb[28].mxu0 }
 0x13c   : > { %v3935_v44 = vadd.f32 %v978_v43, %v449_v30  ;;  %v3169_v45 = vpop.f32.mrb[25].mxu1  ;;  %v3103_v49 = vpop.f32.mrb[29].mxu0 }
 0x13d   : > { %v981_v47 = vpop.f32.mrb[26].mxu1  ;;  %v460_v53 = vpop.f32.mrb[30].mxu0 }
 0x13e   : > { %v3938_v51 = vadd.f32 %v981_v47, %v452_v39  ;;  %v3170_v52 = vpop.f32.mrb[27].mxu1  ;;  %v3104_v54 = vpop.f32.mrb[31].mxu0 }
 0x140   : > { %3348 = vmatmul.mubr.msk.bf16.gmra.mrb[132].mxu1 %vm311_vm2, %v1924_v48 }
 0x143   : > { %v986_v55 = vpop.f32.mrb[28].mxu1  ;;  %v465_v59 = vpop.f32.mrb[32].mxu0 }
 0x144   : > { %v3941_v57 = vadd.f32 %v986_v55, %v457_v46  ;;  %v3173_v0 = vpop.f32.mrb[29].mxu1  ;;  %v3107_v61 = vpop.f32.mrb[33].mxu0 }
 0x145   : > { %v989_v60 = vpop.f32.mrb[30].mxu1  ;;  %v468_v2 = vpop.f32.mrb[34].mxu0 }
 0x146   : > { %v3943_v62 = vadd.f32 %v989_v60, %v460_v53  ;;  %v3174_v1 = vpop.f32.mrb[31].mxu1  ;;  %v3108_v3 = vpop.f32.mrb[35].mxu0 }
 0x14b   : > { %v994_v4 = vpop.f32.mrb[32].mxu1  ;;  %v473_v7 = vpop.f32.mrb[36].mxu0 }
 0x14c   : > { %v3945_v5 = vadd.f32 %v994_v4, %v465_v59  ;;  %v3177_v6 = vpop.f32.mrb[33].mxu1  ;;  %v3111_v10 = vpop.f32.mrb[37].mxu0 }
 0x14d   : > { %v997_v9 = vpop.f32.mrb[34].mxu1  ;;  %v476_v14 = vpop.f32.mrb[38].mxu0 }
 0x14e   : > { %v3947_v11 = vadd.f32 %v997_v9, %v468_v2  ;;  %v3178_v13 = vpop.f32.mrb[35].mxu1  ;;  %v3112_v15 = vpop.f32.mrb[39].mxu0 }
 0x153   : > { %v1002_v17 = vpop.f32.mrb[36].mxu1  ;;  %v481_v21 = vpop.f32.mrb[40].mxu0 }
 0x154   : > { %v3949_v18 = vadd.f32 %v1002_v17, %v473_v7  ;;  %v3181_v20 = vpop.f32.mrb[37].mxu1  ;;  %v3115_v23 = vpop.f32.mrb[41].mxu0 }
 0x155   : > { %v1005_v22 = vpop.f32.mrb[38].mxu1  ;;  %v484_v26 = vpop.f32.mrb[42].mxu0 }
 0x156   : > { %v3951_v24 = vadd.f32 %v1005_v22, %v476_v14  ;;  %v3182_v25 = vpop.f32.mrb[39].mxu1  ;;  %v3116_v27 = vpop.f32.mrb[43].mxu0 }
 0x15b   : > { %v1010_v29 = vpop.f32.mrb[40].mxu1  ;;  %v489_v33 = vpop.f32.mrb[44].mxu0 }
 0x15c   : > { %v3953_v30 = vadd.f32 %v1010_v29, %v481_v21  ;;  %v3185_v32 = vpop.f32.mrb[41].mxu1  ;;  %v3119_v35 = vpop.f32.mrb[45].mxu0 }
 0x15d   : > { %v1013_v34 = vpop.f32.mrb[42].mxu1  ;;  %v492_v40 = vpop.f32.mrb[46].mxu0 }
 0x15e   : > { %v3955_v37 = vadd.f32 %v1013_v34, %v484_v26  ;;  %v3186_v39 = vpop.f32.mrb[43].mxu1  ;;  %v3120_v41 = vpop.f32.mrb[47].mxu0 }
 0x163   : > { %v1018_v42 = vpop.f32.mrb[44].mxu1  ;;  %v497_v46 = vpop.f32.mrb[48].mxu0 }
 0x164   : > { %v3957_v43 = vadd.f32 %v1018_v42, %v489_v33  ;;  %v3189_v45 = vpop.f32.mrb[45].mxu1  ;;  %v3123_v48 = vpop.f32.mrb[49].mxu0 }
 0x165   : > { %v1021_v47 = vpop.f32.mrb[46].mxu1  ;;  %v500_v53 = vpop.f32.mrb[50].mxu0 }
 0x166   : > { %v3959_v49 = vadd.f32 %v1021_v47, %v492_v40  ;;  %v3190_v52 = vpop.f32.mrb[47].mxu1  ;;  %v3124_v54 = vpop.f32.mrb[51].mxu0 }
 0x16b   : > { %v1026_v55 = vpop.f32.mrb[48].mxu1  ;;  %v505_v60 = vpop.f32.mrb[52].mxu0 }
 0x16c   : > { %v3961_v0 = vadd.f32 %v1026_v55, %v497_v46  ;;  %v3193_v59 = vpop.f32.mrb[49].mxu1  ;;  %v3127_v1 = vpop.f32.mrb[53].mxu0 }
 0x16d   : > { %v1029_v61 = vpop.f32.mrb[50].mxu1  ;;  %v508_v4 = vpop.f32.mrb[54].mxu0 }
 0x16e   : > { %v3963_v2 = vadd.f32 %v1029_v61, %v500_v53  ;;  %v3194_v3 = vpop.f32.mrb[51].mxu1  ;;  %v3128_v6 = vpop.f32.mrb[55].mxu0 }
 0x173   : > { %v1034_v7 = vpop.f32.mrb[52].mxu1  ;;  %v513_v13 = vpop.f32.mrb[56].mxu0 }
 0x174   : > { %v3965_v9 = vadd.f32 %v1034_v7, %v505_v60  ;;  %v3197_v10 = vpop.f32.mrb[53].mxu1  ;;  %v3131_v15 = vpop.f32.mrb[57].mxu0 }
 0x175   : > { %v1037_v14 = vpop.f32.mrb[54].mxu1  ;;  %v516_v21 = vpop.f32.mrb[58].mxu0 }
 0x176   : > { %v3967_v17 = vadd.f32 %v1037_v14, %v508_v4  ;;  %v3198_v20 = vpop.f32.mrb[55].mxu1  ;;  %v3132_v22 = vpop.f32.mrb[59].mxu0 }
 0x177   : > { %v3983_v20 = vld [vmem:[#allocation3] ss:$0 sm:$0xff] }
 0x17b   : > { %v1042_v23 = vpop.f32.mrb[56].mxu1  ;;  %v521_v27 = vpop.f32.mrb[60].mxu0 }
 0x17c   : > { %v3969_v25 = vadd.f32 %v1042_v23, %v513_v13  ;;  %v3201_v26 = vpop.f32.mrb[57].mxu1  ;;  %v3135_v32 = vpop.f32.mrb[61].mxu0 }
 0x17d   : > { %v1045_v29 = vpop.f32.mrb[58].mxu1  ;;  %v524_v35 = vpop.f32.mrb[62].mxu0 }
 0x17e   : > { %v3971_v33 = vadd.f32 %v1045_v29, %v516_v21  ;;  %v3202_v34 = vpop.f32.mrb[59].mxu1  ;;  %v3136_v39 = vpop.f32.mrb[63].mxu0 }
 0x183   : > { %v1050_v40 = vpop.f32.mrb[60].mxu1  ;;  %v529_v45 = vpop.f32.mrb[64].mxu0 }
 0x184   : > { %v3973_v41 = vadd.f32 %v1050_v40, %v521_v27  ;;  %v3205_v42 = vpop.f32.mrb[61].mxu1  ;;  %v3139_v47 = vpop.f32.mrb[65].mxu0 }
 0x185   : > { %v1053_v46 = vpop.f32.mrb[62].mxu1  ;;  %v532_v53 = vpop.f32.mrb[66].mxu0 }
 0x186   : > { %v3975_v48 = vadd.f32 %v1053_v46, %v524_v35  ;;  %v3206_v52 = vpop.f32.mrb[63].mxu1  ;;  %v3140_v54 = vpop.f32.mrb[67].mxu0 }
 0x18b   : > { %v1058_v55 = vpop.f32.mrb[64].mxu1  ;;  %v1526_v61 = vpop.f32.mrb[68].mxu0 }
 0x18c   : > { %v3977_v59 = vadd.f32 %v1058_v55, %v529_v45  ;;  %v3209_v60 = vpop.f32.mrb[65].mxu1  ;;  %v1695_v3 = vadd.f32 %v1526_v61, %v3855_v56  ;;  %v3215_v4 = vpop.f32.mrb[69].mxu0 }
 0x18d   : > { %v1061_v1 = vpop.f32.mrb[66].mxu1  ;;  %v1529_v10 = vpop.f32.mrb[70].mxu0 }
 0x18e   : > { %v3980_v6 = vadd.f32 %v1061_v1, %v532_v53  ;;  %v3210_v7 = vpop.f32.mrb[67].mxu1  ;;  %v1696_v13 = vadd.f32 %v1529_v10, %v3859_v63  ;;  %v3216_v14 = vpop.f32.mrb[71].mxu0 }
 0x193   : > { %v2018_v15 = vpop.f32.mrb[68].mxu1  ;;  %v1534_v23 = vpop.f32.mrb[72].mxu0 }
 0x194   : > { %v2187_v21 = vadd.f32 %v2018_v15, %v1695_v3  ;;  %v3285_v22 = vpop.f32.mrb[69].mxu1  ;;  %v1697_v27 = vadd.f32 %v1534_v23, %v3869_v12  ;;  %v3219_v29 = vpop.f32.mrb[73].mxu0 }
 0x195   : > { %v2021_v26 = vpop.f32.mrb[70].mxu1  ;;  %v1537_v35 = vpop.f32.mrb[74].mxu0 }
 0x196   : > { %v2296_v56 = vadd.f32 %v3983_v20, %v2187_v21  ;;  %v2188_v32 = vadd.f32 %v2021_v26, %v1696_v13  ;;  %v3286_v34 = vpop.f32.mrb[71].mxu1  ;;  %v1698_v39 = vadd.f32 %v1537_v35, %v3873_v19  ;;  %v3220_v63 = vpop.f32.mrb[75].mxu0 }
 0x198   : > { %v2364_v40 = vmul.f32 0.2, %v2296_v56  ;;  %v2297_v42 = vadd.f32 %v3983_v20, %v2188_v32  ;;  %vm2330_vm5 = vcmp.ge.f32.partialorder %v2296_v56, 0.0 }
 0x19a   : > { %vm2331_vm6 = vcmp.ge.f32.partialorder %v2297_v42, 0.0  ;;  %v2365_v45 = vmul.f32 0.2, %v2297_v42  ;;  %v2398_v47 = vsel %vm2330_vm5, %v2296_v56, %v2364_v40 }
 0x19b   : > { %v2026_v46 = vpop.f32.mrb[72].mxu1  ;;  %v1542_v19 = vpop.f32.mrb[76].mxu0 }
 0x19c   : > { %v2399_v12 = vsel %vm2331_vm6, %v2297_v42, %v2365_v45  ;;  %v2189_v52 = vadd.f32 %v2026_v46, %v1697_v27  ;;  %v3289_v53 = vpop.f32.mrb[73].mxu1  ;;  %v1699_v60 = vadd.f32 %v1542_v19, %v3883_v31  ;;  %v3223_v61 = vpop.f32.mrb[77].mxu0 }
 0x19d   : > { %v2901_v54 = vpack.c.bf16 %v2399_v12, %v2398_v47  ;;  %v2029_v55 = vpop.f32.mrb[74].mxu1  ;;  %v1545_v7 = vpop.f32.mrb[78].mxu0 }
 0x19e   : > { %v2298_v1 = vadd.f32 %v3983_v20, %v2189_v52  ;;  %v2190_v3 = vadd.f32 %v2029_v55, %v1698_v39  ;;  %v3290_v4 = vpop.f32.mrb[75].mxu1  ;;  %v1700_v10 = vadd.f32 %v1545_v7, %v3887_v38  ;;  %v3224_v13 = vpop.f32.mrb[79].mxu0 }
 0x19f   : > { %2902 = vst [vmem:[%s3993_s19] sm:$0xff] %v2901_v54  }
 0x1a0   : > { %v2366_v14 = vmul.f32 0.2, %v2298_v1  ;;  %v2299_v15 = vadd.f32 %v3983_v20, %v2190_v3  ;;  %vm2332_vm7 = vcmp.ge.f32.partialorder %v2298_v1, 0.0 }
 0x1a2   : > { %vm2333_vm8 = vcmp.ge.f32.partialorder %v2299_v15, 0.0  ;;  %v2367_v21 = vmul.f32 0.2, %v2299_v15  ;;  %v2400_v23 = vsel %vm2332_vm7, %v2298_v1, %v2366_v14 }
 0x1a3   : > { %v2034_v22 = vpop.f32.mrb[76].mxu1  ;;  %v1550_v29 = vpop.f32.mrb[80].mxu0 }
 0x1a4   : > { %v2401_v31 = vsel %vm2333_vm8, %v2299_v15, %v2367_v21  ;;  %v2191_v26 = vadd.f32 %v2034_v22, %v1699_v60  ;;  %v3293_v27 = vpop.f32.mrb[77].mxu1  ;;  %v1701_v34 = vadd.f32 %v1550_v29, %v3897_v50  ;;  %v3227_v35 = vpop.f32.mrb[81].mxu0 }
 0x1a5   : > { %v2906_v56 = vpack.c.bf16 %v2401_v31, %v2400_v23  ;;  %v2037_v32 = vpop.f32.mrb[78].mxu1  ;;  %v1553_v40 = vpop.f32.mrb[82].mxu0 }
 0x1a6   : > { %v2300_v38 = vadd.f32 %v3983_v20, %v2191_v26  ;;  %v2192_v39 = vadd.f32 %v2037_v32, %v1700_v10  ;;  %v3294_v63 = vpop.f32.mrb[79].mxu1  ;;  %v1702_v42 = vadd.f32 %v1553_v40, %v3901_v58  ;;  %v3228_v45 = vpop.f32.mrb[83].mxu0 }
 0x1a7   : > { %2983 = vst [vmem:[%s3993_s19 + $0x8] sm:$0xff] %v2906_v56  }
 0x1a8   : > { %v2368_v46 = vmul.f32 0.2, %v2300_v38  ;;  %v2301_v47 = vadd.f32 %v3983_v20, %v2192_v39  ;;  %vm2334_vm9 = vcmp.ge.f32.partialorder %v2300_v38, 0.0 }
 0x1aa   : > { %vm2335_vm10 = vcmp.ge.f32.partialorder %v2301_v47, 0.0  ;;  %v2369_v12 = vmul.f32 0.2, %v2301_v47  ;;  %v2402_v53 = vsel %vm2334_vm9, %v2300_v38, %v2368_v46 }
 0x1ab   : > { %v2042_v52 = vpop.f32.mrb[80].mxu1  ;;  %v1558_v55 = vpop.f32.mrb[84].mxu0 }
 0x1ac   : > { %v2403_v50 = vsel %vm2335_vm10, %v2301_v47, %v2369_v12  ;;  %v2193_v19 = vadd.f32 %v2042_v52, %v1701_v34  ;;  %v3297_v54 = vpop.f32.mrb[81].mxu1  ;;  %v1703_v1 = vadd.f32 %v1558_v55, %v3911_v8  ;;  %v3231_v3 = vpop.f32.mrb[85].mxu0 }
 0x1ad   : > { %v2911_v60 = vpack.c.bf16 %v2403_v50, %v2402_v53  ;;  %v2045_v61 = vpop.f32.mrb[82].mxu1  ;;  %v1561_v10 = vpop.f32.mrb[86].mxu0 }
 0x1ae   : > { %v2302_v58 = vadd.f32 %v3983_v20, %v2193_v19  ;;  %v2194_v4 = vadd.f32 %v2045_v61, %v1702_v42  ;;  %v3298_v7 = vpop.f32.mrb[83].mxu1  ;;  %v1704_v13 = vadd.f32 %v1561_v10, %v3915_v16  ;;  %v3232_v14 = vpop.f32.mrb[87].mxu0 }
 0x1af   : > { %2984 = vst [vmem:[%s3993_s19 + $0x10] sm:$0xff] %v2911_v60  }
 0x1b0   : > { %v2370_v15 = vmul.f32 0.2, %v2302_v58  ;;  %v2303_v21 = vadd.f32 %v3983_v20, %v2194_v4  ;;  %vm2336_vm11 = vcmp.ge.f32.partialorder %v2302_v58, 0.0 }
 0x1b2   : > { %vm2337_vm12 = vcmp.ge.f32.partialorder %v2303_v21, 0.0  ;;  %v2371_v22 = vmul.f32 0.2, %v2303_v21  ;;  %v2404_v31 = vsel %vm2336_vm11, %v2302_v58, %v2370_v15 }
 0x1b3   : > { %v2050_v23 = vpop.f32.mrb[84].mxu1  ;;  %v1566_v29 = vpop.f32.mrb[88].mxu0 }
 0x1b4   : > { %v2405_v8 = vsel %vm2337_vm12, %v2303_v21, %v2371_v22  ;;  %v2195_v26 = vadd.f32 %v2050_v23, %v1703_v1  ;;  %v3301_v27 = vpop.f32.mrb[85].mxu1  ;;  %v1705_v34 = vadd.f32 %v1566_v29, %v3924_v28  ;;  %v3235_v35 = vpop.f32.mrb[89].mxu0 }
 0x1b5   : > { %v2916_v56 = vpack.c.bf16 %v2405_v8, %v2404_v31  ;;  %v2053_v32 = vpop.f32.mrb[86].mxu1  ;;  %v1569_v63 = vpop.f32.mrb[90].mxu0 }
 0x1b6   : > { %v2304_v16 = vadd.f32 %v3983_v20, %v2195_v26  ;;  %v2196_v38 = vadd.f32 %v2053_v32, %v1704_v13  ;;  %v3302_v39 = vpop.f32.mrb[87].mxu1  ;;  %v1706_v40 = vadd.f32 %v1569_v63, %v3928_v36  ;;  %v3236_v42 = vpop.f32.mrb[91].mxu0 }
 0x1b7   : > { %2985 = vst [vmem:[%s3993_s19 + $0x18] sm:$0xff] %v2916_v56  }
 0x1b8   : > { %v2372_v45 = vmul.f32 0.2, %v2304_v16  ;;  %v2305_v46 = vadd.f32 %v3983_v20, %v2196_v38  ;;  %vm2338_vm13 = vcmp.ge.f32.partialorder %v2304_v16, 0.0 }
 0x1ba   : > { %vm2339_vm14 = vcmp.ge.f32.partialorder %v2305_v46, 0.0  ;;  %v2373_v47 = vmul.f32 0.2, %v2305_v46  ;;  %v2406_v52 = vsel %vm2338_vm13, %v2304_v16, %v2372_v45 }
 0x1bb   : > { %v2058_v12 = vpop.f32.mrb[88].mxu1  ;;  %v1574_v19 = vpop.f32.mrb[92].mxu0 }
 0x1bc   : > { %v2407_v28 = vsel %vm2339_vm14, %v2305_v46, %v2373_v47  ;;  %v2197_v53 = vadd.f32 %v2058_v12, %v1705_v34  ;;  %v3305_v50 = vpop.f32.mrb[89].mxu1  ;;  %v1707_v60 = vadd.f32 %v1574_v19, %v3935_v44  ;;  %v3239_v61 = vpop.f32.mrb[93].mxu0 }
 0x1bd   : > { %v2921_v54 = vpack.c.bf16 %v2407_v28, %v2406_v52  ;;  %v2061_v55 = vpop.f32.mrb[90].mxu1  ;;  %v1577_v58 = vpop.f32.mrb[94].mxu0 }
 0x1be   : > { %v2306_v36 = vadd.f32 %v3983_v20, %v2197_v53  ;;  %v2198_v1 = vadd.f32 %v2061_v55, %v1706_v40  ;;  %v3306_v3 = vpop.f32.mrb[91].mxu1  ;;  %v1708_v4 = vadd.f32 %v1577_v58, %v3938_v51  ;;  %v3240_v7 = vpop.f32.mrb[95].mxu0 }
 0x1bf   : > { %2986 = vst [vmem:[%s3993_s19 + $0x20] sm:$0xff] %v2921_v54  }
 0x1c0   : > { %v2374_v10 = vmul.f32 0.2, %v2306_v36  ;;  %v2307_v13 = vadd.f32 %v3983_v20, %v2198_v1  ;;  %vm2340_vm15 = vcmp.ge.f32.partialorder %v2306_v36, 0.0 }
 0x1c2   : > { %vm2341_vm0 = vcmp.ge.f32.partialorder %v2307_v13, 0.0  ;;  %v2375_v14 = vmul.f32 0.2, %v2307_v13  ;;  %v2408_v21 = vsel %vm2340_vm15, %v2306_v36, %v2374_v10 }
 0x1c3   : > { %v2066_v15 = vpop.f32.mrb[92].mxu1  ;;  %v1582_v31 = vpop.f32.mrb[96].mxu0 }
 0x1c4   : > { %v2409_v44 = vsel %vm2341_vm0, %v2307_v13, %v2375_v14  ;;  %v2199_v22 = vadd.f32 %v2066_v15, %v1707_v60  ;;  %v3309_v23 = vpop.f32.mrb[93].mxu1  ;;  %v1709_v27 = vadd.f32 %v1582_v31, %v3941_v57  ;;  %v3243_v29 = vpop.f32.mrb[97].mxu0 }
 0x1c5   : > { %v2926_v8 = vpack.c.bf16 %v2409_v44, %v2408_v21  ;;  %v2069_v26 = vpop.f32.mrb[94].mxu1  ;;  %v1585_v34 = vpop.f32.mrb[98].mxu0 }
 0x1c6   : > { %v2308_v51 = vadd.f32 %v3983_v20, %v2199_v22  ;;  %v2200_v56 = vadd.f32 %v2069_v26, %v1708_v4  ;;  %v3310_v32 = vpop.f32.mrb[95].mxu1  ;;  %v1710_v35 = vadd.f32 %v1585_v34, %v3943_v62  ;;  %v3244_v16 = vpop.f32.mrb[99].mxu0 }
 0x1c7   : > { %2987 = vst [vmem:[%s3993_s19 + $0x28] sm:$0xff] %v2926_v8  }
 0x1c8   : > { %v2376_v38 = vmul.f32 0.2, %v2308_v51  ;;  %v2309_v39 = vadd.f32 %v3983_v20, %v2200_v56  ;;  %vm2342_vm1 = vcmp.ge.f32.partialorder %v2308_v51, 0.0 }
 0x1ca   : > { %vm2343_vm2 = vcmp.ge.f32.partialorder %v2309_v39, 0.0  ;;  %v2377_v63 = vmul.f32 0.2, %v2309_v39  ;;  %v2410_v42 = vsel %vm2342_vm1, %v2308_v51, %v2376_v38 }
 0x1cb   : > { %v2074_v40 = vpop.f32.mrb[96].mxu1  ;;  %v1590_v47 = vpop.f32.mrb[100].mxu0 }
 0x1cc   : > { %v2411_v57 = vsel %vm2343_vm2, %v2309_v39, %v2377_v63  ;;  %v2201_v45 = vadd.f32 %v2074_v40, %v1709_v27  ;;  %v3313_v46 = vpop.f32.mrb[97].mxu1  ;;  %v1711_v28 = vadd.f32 %v1590_v47, %v3945_v5  ;;  %v3247_v53 = vpop.f32.mrb[101].mxu0 }
 0x1cd   : > { %v2931_v12 = vpack.c.bf16 %v2411_v57, %v2410_v42  ;;  %v2077_v52 = vpop.f32.mrb[98].mxu1  ;;  %v1593_v54 = vpop.f32.mrb[102].mxu0 }
 0x1ce   : > { %v2310_v62 = vadd.f32 %v3983_v20, %v2201_v45  ;;  %v2202_v50 = vadd.f32 %v2077_v52, %v1710_v35  ;;  %v3314_v19 = vpop.f32.mrb[99].mxu1  ;;  %v1712_v55 = vadd.f32 %v1593_v54, %v3947_v11  ;;  %v3248_v60 = vpop.f32.mrb[103].mxu0 }
 0x1cf   : > { %2988 = vst [vmem:[%s3993_s19 + $0x30] sm:$0xff] %v2931_v12  }
 0x1d0   : > { %v2378_v61 = vmul.f32 0.2, %v2310_v62  ;;  %v2311_v36 = vadd.f32 %v3983_v20, %v2202_v50  ;;  %vm2344_vm3 = vcmp.ge.f32.partialorder %v2310_v62, 0.0 }
 0x1d2   : > { %vm2345_vm4 = vcmp.ge.f32.partialorder %v2311_v36, 0.0  ;;  %v2379_v1 = vmul.f32 0.2, %v2311_v36  ;;  %v2412_v58 = vsel %vm2344_vm3, %v2310_v62, %v2378_v61 }
 0x1d3   : > { %v2082_v3 = vpop.f32.mrb[100].mxu1  ;;  %v1598_v10 = vpop.f32.mrb[104].mxu0 }
 0x1d4   : > { %v2413_v5 = vsel %vm2345_vm4, %v2311_v36, %v2379_v1  ;;  %v2203_v4 = vadd.f32 %v2082_v3, %v1711_v28  ;;  %v3317_v7 = vpop.f32.mrb[101].mxu1  ;;  %v1713_v15 = vadd.f32 %v1598_v10, %v3949_v18  ;;  %v3251_v21 = vpop.f32.mrb[105].mxu0 }
 0x1d5   : > { %v2936_v13 = vpack.c.bf16 %v2413_v5, %v2412_v58  ;;  %v2085_v14 = vpop.f32.mrb[102].mxu1  ;;  %v1601_v23 = vpop.f32.mrb[106].mxu0 }
 0x1d6   : > { %v2312_v11 = vadd.f32 %v3983_v20, %v2203_v4  ;;  %v2204_v44 = vadd.f32 %v2085_v14, %v1712_v55  ;;  %v3318_v22 = vpop.f32.mrb[103].mxu1  ;;  %v1714_v31 = vadd.f32 %v1601_v23, %v3951_v24  ;;  %v3252_v8 = vpop.f32.mrb[107].mxu0 }
 0x1d7   : > { %2989 = vst [vmem:[%s3993_s19 + $0x38] sm:$0xff] %v2936_v13  }
 0x1d8   : > { %v2380_v26 = vmul.f32 0.2, %v2312_v11  ;;  %v2313_v27 = vadd.f32 %v3983_v20, %v2204_v44  ;;  %vm2346_vm5 = vcmp.ge.f32.partialorder %v2312_v11, 0.0 }
 0x1da   : > { %vm2347_vm6 = vcmp.ge.f32.partialorder %v2313_v27, 0.0  ;;  %v2381_v29 = vmul.f32 0.2, %v2313_v27  ;;  %v2414_v56 = vsel %vm2346_vm5, %v2312_v11, %v2380_v26 }
 0x1db   : > { %v2090_v51 = vpop.f32.mrb[104].mxu1  ;;  %v1606_v35 = vpop.f32.mrb[108].mxu0 }
 0x1dc   : > { %v2415_v18 = vsel %vm2347_vm6, %v2313_v27, %v2381_v29  ;;  %v2205_v32 = vadd.f32 %v2090_v51, %v1713_v15  ;;  %v3321_v34 = vpop.f32.mrb[105].mxu1  ;;  %v1715_v39 = vadd.f32 %v1606_v35, %v3953_v30  ;;  %v3255_v63 = vpop.f32.mrb[109].mxu0 }
 0x1dd   : > { %v2941_v16 = vpack.c.bf16 %v2415_v18, %v2414_v56  ;;  %v2093_v38 = vpop.f32.mrb[106].mxu1  ;;  %v1609_v57 = vpop.f32.mrb[110].mxu0 }
 0x1de   : > { %v2314_v24 = vadd.f32 %v3983_v20, %v2205_v32  ;;  %v2206_v40 = vadd.f32 %v2093_v38, %v1714_v31  ;;  %v3322_v42 = vpop.f32.mrb[107].mxu1  ;;  %v1716_v45 = vadd.f32 %v1609_v57, %v3955_v37  ;;  %v3256_v46 = vpop.f32.mrb[111].mxu0 }
 0x1df   : > { %2990 = vst [vmem:[%s3993_s19 + $0x40] sm:$0xff] %v2941_v16  }
 0x1e0   : > { %v2382_v47 = vmul.f32 0.2, %v2314_v24  ;;  %v2315_v12 = vadd.f32 %v3983_v20, %v2206_v40  ;;  %vm2348_vm7 = vcmp.ge.f32.partialorder %v2314_v24, 0.0 }
 0x1e2   : > { %vm2349_vm8 = vcmp.ge.f32.partialorder %v2315_v12, 0.0  ;;  %v2383_v52 = vmul.f32 0.2, %v2315_v12  ;;  %v2416_v53 = vsel %vm2348_vm7, %v2314_v24, %v2382_v47 }
 0x1e3   : > { %v2098_v28 = vpop.f32.mrb[108].mxu1  ;;  %v1614_v19 = vpop.f32.mrb[112].mxu0 }
 0x1e4   : > { %v2417_v30 = vsel %vm2349_vm8, %v2315_v12, %v2383_v52  ;;  %v2207_v62 = vadd.f32 %v2098_v28, %v1715_v39  ;;  %v3325_v50 = vpop.f32.mrb[109].mxu1  ;;  %v1717_v60 = vadd.f32 %v1614_v19, %v3957_v43  ;;  %v3259_v61 = vpop.f32.mrb[113].mxu0 }
 0x1e5   : > { %v2946_v54 = vpack.c.bf16 %v2417_v30, %v2416_v53  ;;  %v2101_v55 = vpop.f32.mrb[110].mxu1  ;;  %v1617_v3 = vpop.f32.mrb[114].mxu0 }
 0x1e6   : > { %v2316_v37 = vadd.f32 %v3983_v20, %v2207_v62  ;;  %v2208_v36 = vadd.f32 %v2101_v55, %v1716_v45  ;;  %v3326_v1 = vpop.f32.mrb[111].mxu1  ;;  %v1718_v58 = vadd.f32 %v1617_v3, %v3959_v49  ;;  %v3260_v5 = vpop.f32.mrb[115].mxu0 }
 0x1e7   : > { %2991 = vst [vmem:[%s3993_s19 + $0x48] sm:$0xff] %v2946_v54  }
 0x1e8   : > { %v2384_v4 = vmul.f32 0.2, %v2316_v37  ;;  %v2317_v7 = vadd.f32 %v3983_v20, %v2208_v36  ;;  %vm2350_vm9 = vcmp.ge.f32.partialorder %v2316_v37, 0.0 }
 0x1ea   : > { %vm2351_vm10 = vcmp.ge.f32.partialorder %v2317_v7, 0.0  ;;  %v2385_v10 = vmul.f32 0.2, %v2317_v7  ;;  %v2418_v14 = vsel %vm2350_vm9, %v2316_v37, %v2384_v4 }
 0x1eb   : > { %v2106_v13 = vpop.f32.mrb[112].mxu1  ;;  %v1622_v11 = vpop.f32.mrb[116].mxu0 }
 0x1ec   : > { %v2419_v43 = vsel %vm2351_vm10, %v2317_v7, %v2385_v10  ;;  %v2209_v15 = vadd.f32 %v2106_v13, %v1717_v60  ;;  %v3329_v21 = vpop.f32.mrb[113].mxu1  ;;  %v1719_v23 = vadd.f32 %v1622_v11, %v3961_v0  ;;  %v3263_v31 = vpop.f32.mrb[117].mxu0 }
 0x1ed   : > { %v2951_v44 = vpack.c.bf16 %v2419_v43, %v2418_v14  ;;  %v2109_v22 = vpop.f32.mrb[114].mxu1  ;;  %v1625_v27 = vpop.f32.mrb[118].mxu0 }
 0x1ee   : > { %v2318_v49 = vadd.f32 %v3983_v20, %v2209_v15  ;;  %v2210_v8 = vadd.f32 %v2109_v22, %v1718_v58  ;;  %v3330_v26 = vpop.f32.mrb[115].mxu1  ;;  %v1720_v29 = vadd.f32 %v1625_v27, %v3963_v2  ;;  %v3264_v51 = vpop.f32.mrb[119].mxu0 }
 0x1ef   : > { %2992 = vst [vmem:[%s3993_s19 + $0x50] sm:$0xff] %v2951_v44  }
 0x1f0   : > { %v2386_v56 = vmul.f32 0.2, %v2318_v49  ;;  %v2319_v18 = vadd.f32 %v3983_v20, %v2210_v8  ;;  %vm2352_vm11 = vcmp.ge.f32.partialorder %v2318_v49, 0.0 }
 0x1f2   : > { %vm2353_vm12 = vcmp.ge.f32.partialorder %v2319_v18, 0.0  ;;  %v2387_v32 = vmul.f32 0.2, %v2319_v18  ;;  %v2420_v35 = vsel %vm2352_vm11, %v2318_v49, %v2386_v56 }
 0x1f3   : > { %v2114_v34 = vpop.f32.mrb[116].mxu1  ;;  %v1630_v39 = vpop.f32.mrb[120].mxu0 }
 0x1f4   : > { %v2421_v0 = vsel %vm2353_vm12, %v2319_v18, %v2387_v32  ;;  %v2211_v16 = vadd.f32 %v2114_v34, %v1719_v23  ;;  %v3333_v38 = vpop.f32.mrb[117].mxu1  ;;  %v1721_v40 = vadd.f32 %v1630_v39, %v3965_v9  ;;  %v3267_v42 = vpop.f32.mrb[121].mxu0 }
 0x1f5   : > { %v2956_v63 = vpack.c.bf16 %v2421_v0, %v2420_v35  ;;  %v2117_v24 = vpop.f32.mrb[118].mxu1  ;;  %v1633_v46 = vpop.f32.mrb[122].mxu0 }
 0x1f6   : > { %v2320_v2 = vadd.f32 %v3983_v20, %v2211_v16  ;;  %v2212_v57 = vadd.f32 %v2117_v24, %v1720_v29  ;;  %v3334_v45 = vpop.f32.mrb[119].mxu1  ;;  %v1722_v47 = vadd.f32 %v1633_v46, %v3967_v17  ;;  %v3268_v12 = vpop.f32.mrb[123].mxu0 }
 0x1f7   : > { %2993 = vst [vmem:[%s3993_s19 + $0x58] sm:$0xff] %v2956_v63  }
 0x1f8   : > { %v2388_v52 = vmul.f32 0.2, %v2320_v2  ;;  %v2321_v28 = vadd.f32 %v3983_v20, %v2212_v57  ;;  %vm2354_vm13 = vcmp.ge.f32.partialorder %v2320_v2, 0.0 }
 0x1fa   : > { %vm2355_vm14 = vcmp.ge.f32.partialorder %v2321_v28, 0.0  ;;  %v2389_v53 = vmul.f32 0.2, %v2321_v28  ;;  %v2422_v62 = vsel %vm2354_vm13, %v2320_v2, %v2388_v52 }
 0x1fb   : > { %v2122_v30 = vpop.f32.mrb[120].mxu1  ;;  %v1638_v54 = vpop.f32.mrb[124].mxu0 }
 0x1fc   : > { %v2423_v9 = vsel %vm2355_vm14, %v2321_v28, %v2389_v53  ;;  %v2213_v50 = vadd.f32 %v2122_v30, %v1721_v40  ;;  %v3337_v19 = vpop.f32.mrb[121].mxu1  ;;  %v1723_v61 = vadd.f32 %v1638_v54, %v3969_v25  ;;  %v3271_v37 = vpop.f32.mrb[125].mxu0 }
 0x1fd   : > { %v2961_v55 = vpack.c.bf16 %v2423_v9, %v2422_v62  ;;  %v2125_v60 = vpop.f32.mrb[122].mxu1  ;;  %v1641_v3 = vpop.f32.mrb[126].mxu0 }
 0x1fe   : > { %v2322_v17 = vadd.f32 %v3983_v20, %v2213_v50  ;;  %v2214_v36 = vadd.f32 %v2125_v60, %v1722_v47  ;;  %v3338_v1 = vpop.f32.mrb[123].mxu1  ;;  %v1724_v58 = vadd.f32 %v1641_v3, %v3971_v33  ;;  %v3272_v5 = vpop.f32.mrb[127].mxu0 }
 0x1ff   : > { %2994 = vst [vmem:[%s3993_s19 + $0x60] sm:$0xff] %v2961_v55  }
 0x200   : > { %v2390_v4 = vmul.f32 0.2, %v2322_v17  ;;  %v2323_v7 = vadd.f32 %v3983_v20, %v2214_v36  ;;  %vm2356_vm15 = vcmp.ge.f32.partialorder %v2322_v17, 0.0 }
 0x202   : > { %vm2357_vm0 = vcmp.ge.f32.partialorder %v2323_v7, 0.0  ;;  %v2391_v10 = vmul.f32 0.2, %v2323_v7  ;;  %v2424_v14 = vsel %vm2356_vm15, %v2322_v17, %v2390_v4 }
 0x203   : > { %v2130_v13 = vpop.f32.mrb[124].mxu1  ;;  %v1646_v21 = vpop.f32.mrb[128].mxu0 }
 0x204   : > { %v2425_v25 = vsel %vm2357_vm0, %v2323_v7, %v2391_v10  ;;  %v2215_v43 = vadd.f32 %v2130_v13, %v1723_v61  ;;  %v3341_v15 = vpop.f32.mrb[125].mxu1  ;;  %v1725_v22 = vadd.f32 %v1646_v21, %v3973_v41  ;;  %v3275_v23 = vpop.f32.mrb[129].mxu0 }
 0x205   : > { %v2966_v11 = vpack.c.bf16 %v2425_v25, %v2424_v14  ;;  %v2133_v44 = vpop.f32.mrb[126].mxu1  ;;  %v1649_v8 = vpop.f32.mrb[130].mxu0 }
 0x206   : > { %v2324_v33 = vadd.f32 %v3983_v20, %v2215_v43  ;;  %v2216_v31 = vadd.f32 %v2133_v44, %v1724_v58  ;;  %v3342_v49 = vpop.f32.mrb[127].mxu1  ;;  %v1726_v26 = vadd.f32 %v1649_v8, %v3975_v48  ;;  %v3276_v27 = vpop.f32.mrb[131].mxu0 }
 0x207   : > { %2995 = vst [vmem:[%s3993_s19 + $0x68] sm:$0xff] %v2966_v11  }
 0x208   : > { %v2392_v29 = vmul.f32 0.2, %v2324_v33  ;;  %v2325_v51 = vadd.f32 %v3983_v20, %v2216_v31  ;;  %vm2358_vm1 = vcmp.ge.f32.partialorder %v2324_v33, 0.0 }
 0x20a   : > { %vm2359_vm2 = vcmp.ge.f32.partialorder %v2325_v51, 0.0  ;;  %v2393_v56 = vmul.f32 0.2, %v2325_v51  ;;  %v2426_v32 = vsel %vm2358_vm1, %v2324_v33, %v2392_v29 }
 0x20b   : > { %v2138_v18 = vpop.f32.mrb[128].mxu1  ;;  %v1654_v0 = vpop.f32.mrb[132].mxu0 }
 0x20c   : > { %v2427_v41 = vsel %vm2359_vm2, %v2325_v51, %v2393_v56  ;;  %v2217_v34 = vadd.f32 %v2138_v18, %v1725_v22  ;;  %v3345_v35 = vpop.f32.mrb[129].mxu1  ;;  %v1727_v39 = vadd.f32 %v1654_v0, %v3977_v59  ;;  %v3279_v63 = vpop.f32.mrb[133].mxu0 }
 0x20d   : > { %v2971_v16 = vpack.c.bf16 %v2427_v41, %v2426_v32  ;;  %v2141_v38 = vpop.f32.mrb[130].mxu1  ;;  %v1657_v42 = vpop.f32.mrb[134].mxu0 }
 0x20e   : > { %v2326_v48 = vadd.f32 %v3983_v20, %v2217_v34  ;;  %v2218_v24 = vadd.f32 %v2141_v38, %v1726_v26  ;;  %v3346_v40 = vpop.f32.mrb[131].mxu1  ;;  %v1728_v2 = vadd.f32 %v1657_v42, %v3980_v6  ;;  %v3280_v57 = vpop.f32.mrb[135].mxu0 }
 0x20f   : > { %2996 = vst [vmem:[%s3993_s19 + $0x70] sm:$0xff] %v2971_v16  }
 0x210   : > { %v2394_v45 = vmul.f32 0.2, %v2326_v48  ;;  %v2327_v46 = vadd.f32 %v3983_v20, %v2218_v24  ;;  %vm2360_vm3 = vcmp.ge.f32.partialorder %v2326_v48, 0.0 }
 0x212   : > { %vm2361_vm4 = vcmp.ge.f32.partialorder %v2327_v46, 0.0  ;;  %v2395_v47 = vmul.f32 0.2, %v2327_v46  ;;  %v2428_v52 = vsel %vm2360_vm3, %v2326_v48, %v2394_v45 }
 0x213   : > { %v2146_v12 = vpop.f32.mrb[132].mxu1 }
 0x214   : > { %v2429_v59 = vsel %vm2361_vm4, %v2327_v46, %v2395_v47  ;;  %v2219_v28 = vadd.f32 %v2146_v12, %v1727_v39  ;;  %v3349_v53 = vpop.f32.mrb[133].mxu1 }
 0x215   : > { %v2976_v30 = vpack.c.bf16 %v2429_v59, %v2428_v52  ;;  %v2149_v62 = vpop.f32.mrb[134].mxu1 }
 0x216   : > { %v2328_v9 = vadd.f32 %v3983_v20, %v2219_v28  ;;  %v2220_v50 = vadd.f32 %v2149_v62, %v1728_v2  ;;  %v3350_v6 = vpop.f32.mrb[135].mxu1 }
 0x217   : > { %2997 = vst [vmem:[%s3993_s19 + $0x78] sm:$0xff] %v2976_v30  }
 0x218   : > { %v2396_v19 = vmul.f32 0.2, %v2328_v9  ;;  %v2329_v54 = vadd.f32 %v3983_v20, %v2220_v50  ;;  %vm2362_vm5 = vcmp.ge.f32.partialorder %v2328_v9, 0.0 }
 0x21a   : > { %vm2363_vm6 = vcmp.ge.f32.partialorder %v2329_v54, 0.0  ;;  %v2397_v55 = vmul.f32 0.2, %v2329_v54  ;;  %v2430_v60 = vsel %vm2362_vm5, %v2328_v9, %v2396_v19 }
 0x21c   : > { %v2431_v61 = vsel %vm2363_vm6, %v2329_v54, %v2397_v55 }
 0x21d   : > { %v2981_v37 = vpack.c.bf16 %v2431_v61, %v2430_v60 }
 0x21f   : > { %2998 = vst [vmem:[%s3993_s19 + $0x80] sm:$0xff] %v2981_v37  }
 0x220 PF: > { %s14_s12 = sadd.s32 1, %s3487_s12  }
 0x221   : > { %p11_p2 = scmp.ge.s32.totalorder %s14_s12, 4  }
 0x223   :  { %13 = sbr.rel (!%p11_p2) target bundleno = 1 (0x1), region = 70 }
 0x22a   :  { %2623 = vsyncpa [#allocation4], 1 }
 0x22b   :  { %2625 = vsyncpa [#allocation4 + $0x1], 1 }

// kernel: discriminator_forward.5
= control target key start
LH: loop header
LB: loop body
LE: loop exit
PB: predicated region body
PF: predicated region fallthrough
CT: control target
= control target key end

     0   :  { %s4179_s12 = smov 0   ;;  %s5453_s0 = inlined_call_operand.vmem [shape: bf16[2,88,512], index: 0, kind: input, shape index: {}]   ;;  %s5454_s1 = inlined_call_operand.vmem [shape: bf16[4,512,128], index: 1, kind: input, shape index: {}]   ;;  %s5455_s2 = inlined_call_operand.vmem [shape: f32[1,128], index: 2, kind: input, shape index: {}]   ;;  %s5456_s3 = inlined_call_operand.vmem [shape: bf16[2,72,128], index: 3, kind: output, shape index: {}]  }
   0x1 LB: > { %s3091_s13 = sadd.s32 4294967295, %s4156_s12   ;;  %p3095_p0 = scmp.ge.s32.totalorder %s4156_s12, 1  ;;  %s4156_s12 = sphi %s4179_s12, %s13_s12  }
   0x2   : > { %p137_p1 = scmp.lt.s32.totalorder %s4156_s12, 3 }
   0x4   : > { %p138_p2 = pnand %p3095_p0, %p137_p1 }
   0x5   : > { %v3948_v0 = vld [vmem:[%s5454_s1 + $0x40] sm:$0xff] (!%p138_p2)   ;;  %v3952_v4 = vld [vmem:[%s5454_s1 + $0x48] sm:$0xff] (!%p138_p2)   ;;  %v3956_v8 = vld [vmem:[%s5454_s1 + $0x50] sm:$0xff] (!%p138_p2)   ;;  %p161_p3 = scmp.lt.s32.totalorder (!%p138_p2), %s3091_s13, 1  ;;  %vm858_vm0 = vsmask.f32 (!%p138_p2), 7424 }
   0x6   : > { %141 = sbr.rel (%p138_p2) target bundleno = 462 (0x1ce), region = 32  ;;  %v3949_v1 = vld [vmem:[%s5454_s1 + $0xc0] sm:$0xff] (!%p138_p2)   ;;  %3551 = vmatprep.subr.bf16.mxu0 (!%p138_p2), %v3948_v0  ;;  %v3953_v5 = vld [vmem:[%s5454_s1 + $0xc8] sm:$0xff] (!%p138_p2)   ;;  %v3957_v9 = vld [vmem:[%s5454_s1 + $0xd0] sm:$0xff] (!%p138_p2)   ;;  %vm2267_vm1 = vcmask (!%p138_p2), 1046528  }
   0x7   : > { %v3950_v2 = vld [vmem:[%s5454_s1] sm:$0xff] (!%p138_p2)   ;;  %3597 = vmatprep.subr.bf16.mxu1 (!%p138_p2), %v3949_v1  ;;  %v3954_v6 = vld [vmem:[%s5454_s1 + $0x8] sm:$0xff] (!%p138_p2)   ;;  %v3958_v10 = vld [vmem:[%s5454_s1 + $0x10] sm:$0xff] (!%p138_p2)  }
   0x8   : > { %v3951_v3 = vld [vmem:[%s5454_s1 + $0x80] sm:$0xff] (!%p138_p2)   ;;  %3552 = vmatpush3.bf16.msra.mxu0 (!%p138_p2), %v3950_v2  ;;  %v3955_v7 = vld [vmem:[%s5454_s1 + $0x88] sm:$0xff] (!%p138_p2)   ;;  %v3959_v11 = vld [vmem:[%s5454_s1 + $0x90] sm:$0xff] (!%p138_p2)  }
   0x9   : > { %3598 = vmatpush3.bf16.msra.mxu1 (!%p138_p2), %v3951_v3  ;;  %3553 = vmatprep.subr.bf16.mxu0 (!%p138_p2), %v3952_v4  ;;  %v3960_v12 = vld [vmem:[%s5454_s1 + $0x58] sm:$0xff] (!%p138_p2)   ;;  %v3964_v16 = vld [vmem:[%s5454_s1 + $0x60] sm:$0xff] (!%p138_p2)   ;;  %v3968_v20 = vld [vmem:[%s5454_s1 + $0x68] sm:$0xff] (!%p138_p2)  }
   0xa   : > { %3599 = vmatprep.subr.bf16.mxu1 (!%p138_p2), %v3953_v5  ;;  %v3961_v13 = vld [vmem:[%s5454_s1 + $0xd8] sm:$0xff] (!%p138_p2)   ;;  %v3965_v17 = vld [vmem:[%s5454_s1 + $0xe0] sm:$0xff] (!%p138_p2)   ;;  %v3969_v21 = vld [vmem:[%s5454_s1 + $0xe8] sm:$0xff] (!%p138_p2)  }
   0xb   : > { %v3962_v14 = vld [vmem:[%s5454_s1 + $0x18] sm:$0xff] (!%p138_p2)   ;;  %v3966_v18 = vld [vmem:[%s5454_s1 + $0x20] sm:$0xff] (!%p138_p2)   ;;  %v3970_v22 = vld [vmem:[%s5454_s1 + $0x28] sm:$0xff] (!%p138_p2)  }
   0xc   : > { %3554 = vmatpush3.bf16.msra.mxu0 (!%p138_p2), %v3954_v6  ;;  %v3963_v15 = vld [vmem:[%s5454_s1 + $0x98] sm:$0xff] (!%p138_p2)   ;;  %v3967_v19 = vld [vmem:[%s5454_s1 + $0xa0] sm:$0xff] (!%p138_p2)   ;;  %v3971_v23 = vld [vmem:[%s5454_s1 + $0xa8] sm:$0xff] (!%p138_p2)  }
   0xd   : > { %3600 = vmatpush3.bf16.msra.mxu1 %v3955_v7  ;;  %3555 = vmatprep.subr.bf16.mxu0 %v3956_v8  ;;  %s5492_s13 = smov (!%p161_p3, %s3091_s13), 1  ;;  %v3972_v24 = vld [vmem:[%s5454_s1 + $0x70] sm:$0xff]   ;;  %v3976_v28 = vld [vmem:[%s5454_s1 + $0x78] sm:$0xff]   ;;  %v3984_v40 = vld [vmem:[%s5454_s1 + $0x140] sm:$0xff]  }
   0xe   : > { %3601 = vmatprep.subr.bf16.mxu1 %v3957_v9  ;;  %v3973_v25 = vld [vmem:[%s5454_s1 + $0xf0] sm:$0xff]   ;;  %s3919_s16 = smul.u32 176, %s5492_s13  ;;  %v3977_v29 = vld [vmem:[%s5454_s1 + $0xf8] sm:$0xff]   ;;  %v3985_v41 = vld [vmem:[%s5454_s1 + $0x1c0] sm:$0xff]  }
   0xf   : > { %v3974_v26 = vld [vmem:[%s5454_s1 + $0x30] sm:$0xff]   ;;  %v3978_v30 = vld [vmem:[%s5454_s1 + $0x38] sm:$0xff]   ;;  %v3986_v42 = vld [vmem:[%s5454_s1 + $0x100] sm:$0xff]   ;;  %s3920_s6 = smul.u32 36, %s5492_s13 }
  0x10   : > { %3556 = vmatpush3.bf16.msra.mxu0 %v3958_v10  ;;  %v3975_v27 = vld [vmem:[%s5454_s1 + $0xb0] sm:$0xff]   ;;  %s4287_s27 = scalar_lea.vmem %s5453_s0, %s3919_s16  ;;  %v3979_v31 = vld [vmem:[%s5454_s1 + $0xb8] sm:$0xff]   ;;  %v3987_v43 = vld [vmem:[%s5454_s1 + $0x180] sm:$0xff]  }
  0x11   : > { %3602 = vmatpush3.bf16.msra.mxu1 %v3959_v11  ;;  %3557 = vmatprep.subr.bf16.mxu0 %v3960_v12  ;;  %v172_v32 = vld [vmem:[%s4287_s27] sm:$0xff]  ;;  %v4297_v33 = vld [vmem:[%s4287_s27 + $0x10] sm:$0xff]  ;;  %v173_v34 = vld [vmem:[%s4287_s27 + $0x8] sm:$0xff]  ;;  %s170_s8 = scalar_lea.vmem %s5456_s3, %s3920_s6 }
  0x12   : > { %3603 = vmatprep.subr.bf16.mxu1 %v3961_v13  ;;  %v4301_v35 = vcombine.low %v172_v32, %v4297_v33  ;;  %v4304_v36 = vcombine.high %v172_v32, %v4297_v33  ;;  %v4307_v37 = vld [vmem:[%s4287_s27 + $0x18] sm:$0xff]  ;;  %v3988_v45 = vld [vmem:[%s5454_s1 + $0x148] sm:$0xff]   ;;  %v4347_v51 = vld [vmem:[%s4287_s27 + $0x20] sm:$0xff] }
  0x13   : > { %v4310_v38 = vcombine.low %v173_v34, %v4307_v37  ;;  %v4313_v39 = vcombine.high %v173_v34, %v4307_v37  ;;  %v3989_v46 = vld [vmem:[%s5454_s1 + $0x1c8] sm:$0xff]   ;;  %v4350_v52 = vld [vmem:[%s4287_s27 + $0x30] sm:$0xff]  ;;  %v4364_v58 = vld [vmem:[%s4287_s27 + $0x38] sm:$0xff]  ;;  %v4374_v61 = vcombine.low %v4297_v33, %v4347_v51 }
  0x14   : > { %3558 = vmatpush3.bf16.msra.mxu0 %v3962_v14  ;;  %572 = vmatprep.mubr.bf16.mxu0 %v4304_v36  ;;  %v874_v44 = vshll.u32 %v4304_v36, 16  ;;  %v3990_v48 = vld [vmem:[%s5454_s1 + $0x108] sm:$0xff]   ;;  %v872_v49 = vshrl.u32 %v4304_v36, 16  ;;  %v860_v55 = vshrl.u32 %v4301_v35, 16  ;;  %v4358_v56 = vcombine.high %v4347_v51, %v4350_v52  ;;  %v3996_v0 = vld [vmem:[%s5454_s1 + $0x150] sm:$0xff]   ;;  %v4408_v8 = vld [vmem:[%s4287_s27 + $0x40] sm:$0xff] }
  0x15   : > { %3604 = vmatpush3.bf16.msra.mxu1 %v3963_v15  ;;  %3559 = vmatprep.subr.bf16.mxu0 %v3964_v16  ;;  %v898_v47 = vshll.u32 %v4313_v39, 16  ;;  %v3991_v50 = vld [vmem:[%s5454_s1 + $0x188] sm:$0xff]   ;;  %v896_v54 = vshrl.u32 %v4313_v39, 16  ;;  %v4368_v59 = vcombine.low %v4347_v51, %v4350_v52  ;;  %v862_v1 = vshll.u32 %v4301_v35, 16  ;;  %v3997_v2 = vld [vmem:[%s5454_s1 + $0x1d0] sm:$0xff]   ;;  %v4419_v13 = vld [vmem:[%s4287_s27 + $0x58] sm:$0xff] }
  0x16   : > { %3605 = vmatprep.subr.bf16.mxu1 %v3965_v17  ;;  %644 = vmatprep.mubr.bf16.mxu1 %v4313_v39  ;;  %v4352_v53 = vrot.slane %v874_v44, 1  ;;  %v4361_v57 = vld [vmem:[%s4287_s27 + $0x28] sm:$0xff]  ;;  %v879_v3 = vshll.u32 %v4358_v56, 16  ;;  %v3998_v5 = vld [vmem:[%s5454_s1 + $0x110] sm:$0xff]   ;;  %v884_v9 = vshrl.u32 %v4310_v38, 16  ;;  %v886_v10 = vshll.u32 %v4310_v38, 16 }
  0x17   : > { %v4370_v60 = vrot.slane %v898_v47, 1  ;;  %v4378_v62 = vcombine.high %v4361_v57, %v4364_v58  ;;  %v4382_v63 = vcombine.low %v4361_v57, %v4364_v58  ;;  %v4395_v4 = vcombine.low %v4307_v37, %v4361_v57  ;;  %v3999_v7 = vld [vmem:[%s5454_s1 + $0x190] sm:$0xff]   ;;  %v4416_v12 = vld [vmem:[%s4287_s27 + $0x48] sm:$0xff]  ;;  %v4010_v34 = vld [vmem:[%s5454_s1 + $0x120] sm:$0xff]  }
  0x18   : > { %3560 = vmatpush3.bf16.msra.mxu0 %v3966_v18  ;;  %v4413_v11 = vld [vmem:[%s4287_s27 + $0x50] sm:$0xff]  ;;  %v4421_v14 = vrot.slane %v879_v3, 1  ;;  %v4423_v15 = vrot.slane %v862_v1, 1  ;;  %v867_v16 = vshll.u32 %v4368_v59, 16  ;;  %v4432_v18 = vcombine.high %v4416_v12, %v4419_v13  ;;  %v4029_v39 = vld [vmem:[%s5454_s1 + $0x1f8] sm:$0xff]  }
  0x19   : > { %3606 = vmatpush3.bf16.msra.mxu1 %v3967_v19  ;;  %3561 = vmatprep.subr.bf16.mxu0 %v3968_v20  ;;  %v903_v6 = vshll.u32 %v4378_v62, 16  ;;  %v4428_v17 = vcombine.high %v4408_v8, %v4413_v11  ;;  %v4002_v19 = vld [vmem:[%s5454_s1 + $0x158] sm:$0xff]   ;;  %v4486_v44 = vld [vmem:[%s4287_s27 + $0x70] sm:$0xff] }
  0x1a   : > { %3607 = vmatprep.subr.bf16.mxu1 %v3969_v21  ;;  %v4003_v21 = vld [vmem:[%s5454_s1 + $0x1d8] sm:$0xff]   ;;  %v935_v47 = vshll.u32 %v4432_v18, 16 }
  0x1b   : > { %v4437_v20 = vrot.slane %v903_v6, 1  ;;  %v4016_v6 = vld [vmem:[%s5454_s1 + $0x168] sm:$0xff]  }
  0x1c   : > { %3562 = vmatpush3.bf16.msra.mxu0 %v3970_v22  ;;  %v4444_v22 = vcombine.low %v4408_v8, %v4413_v11 }
  0x1d   : > { %3608 = vmatpush3.bf16.msra.mxu1 %v3971_v23  ;;  %3563 = vmatprep.subr.bf16.mxu0 %v3972_v24  ;;  %v891_v23 = vshll.u32 %v4382_v63, 16  ;;  %v4451_v24 = vcombine.low %v4416_v12, %v4419_v13 }
  0x1e   : > { %3609 = vmatprep.subr.bf16.mxu1 %v3973_v25  ;;  %v4006_v25 = vld [vmem:[%s5454_s1 + $0x118] sm:$0xff]  }
  0x1f   : > { %v4471_v32 = vrot.slane %v891_v23, 1  ;;  %v4019_v23 = vld [vmem:[%s5454_s1 + $0x1a8] sm:$0xff]  }
  0x20   : > { %3564 = vmatpush3.bf16.msra.mxu0 %v3974_v26  ;;  %v4456_v26 = vrot.slane %v886_v10, 1  ;;  %v4017_v10 = vld [vmem:[%s5454_s1 + $0x1e8] sm:$0xff]  }
  0x21   : > { %3610 = vmatpush3.bf16.msra.mxu1 %v3975_v27  ;;  %3565 = vmatprep.subr.bf16.mxu0 %v3976_v28  ;;  %v4007_v27 = vld [vmem:[%s5454_s1 + $0x198] sm:$0xff]   ;;  %v4461_v28 = vrot.slane %v867_v16, 1  ;;  %v927_v16 = vshll.u32 %v4451_v24, 16 }
  0x22   : > { %3611 = vmatprep.subr.bf16.mxu1 %v3977_v29  ;;  %v4008_v29 = vld [vmem:[%s5454_s1 + $0x160] sm:$0xff]  }
  0x24   : > { %3566 = vmatpush3.bf16.msra.mxu0 %v3978_v30  ;;  %v919_v30 = vshll.u32 %v4428_v17, 16 }
  0x25   : > { %3612 = vmatpush3.bf16.msra.mxu1 %v3979_v31  ;;  %3643 = vmatprep.subr.bf16.mxu0 %v3984_v40  ;;  %v4009_v31 = vld [vmem:[%s5454_s1 + $0x1e0] sm:$0xff]   ;;  %v915_v40 = vshrl.u32 %v4358_v56, 16 }
  0x26   : > { %3689 = vmatprep.subr.bf16.mxu1 %v3985_v41  ;;  %v4011_v41 = vld [vmem:[%s5454_s1 + $0x1a0] sm:$0xff]  }
  0x27   : > { %573 = vmatmul.mubr.bf16.vlgmr.msra.gmra.mrb[0].mxu0 %v4301_v35  ;;  %v4034_v35 = vld [vmem:[%s5454_s1 + $0x200] sm:$0xff]  }
  0x28   : > { %645 = vmatmul.mubr.bf16.vlgmr.msra.gmra.mrb[0].mxu1 %v4310_v38  ;;  %3644 = vmatpush3.bf16.msra.mxu0 %v3986_v42  ;;  %v931_v42 = vshrl.u32 %v4378_v62, 16  ;;  %v4035_v38 = vld [vmem:[%s5454_s1 + $0x280] sm:$0xff]  }
  0x29   : > { %3690 = vmatpush3.bf16.msra.mxu1 %v3987_v43  ;;  %3645 = vmatprep.subr.bf16.mxu0 %v3988_v45  ;;  %v4483_v43 = vld [vmem:[%s4287_s27 + $0x60] sm:$0xff]  ;;  %v4489_v45 = vld [vmem:[%s4287_s27 + $0x68] sm:$0xff] }
  0x2a   : > { %3691 = vmatprep.subr.bf16.mxu1 %v3989_v46  ;;  %580 = vmatprep.mubr.bf16.mxu0 %v4358_v56  ;;  %v4491_v46 = vrot.slane %v919_v30, 1  ;;  %v4504_v1 = vcombine.low %v4483_v43, %v4486_v44  ;;  %v4021_v30 = vld [vmem:[%s5454_s1 + $0x1f0] sm:$0xff]  }
  0x2b   : > { %652 = vmatprep.mubr.bf16.mxu1 %v4378_v62  ;;  %v4038_v62 = vld [vmem:[%s5454_s1 + $0x208] sm:$0xff]  }
  0x2c   : > { %3646 = vmatpush3.bf16.msra.mxu0 %v3990_v48  ;;  %v907_v48 = vshrl.u32 %v4368_v59, 16 }
  0x2d   : > { %3692 = vmatpush3.bf16.msra.mxu1 %v3991_v50  ;;  %3647 = vmatprep.subr.bf16.mxu0 %v3996_v0  ;;  %v4497_v50 = vcombine.high %v4483_v43, %v4486_v44  ;;  %v4500_v0 = vld [vmem:[%s4287_s27 + $0x78] sm:$0xff] }
  0x2e   : > { %3693 = vmatprep.subr.bf16.mxu1 %v3997_v2  ;;  %v911_v2 = vshll.u32 %v4444_v22, 16  ;;  %v4509_v3 = vcombine.high %v4489_v45, %v4500_v0 }
  0x2f   : > { %581 = vmatmul.mubr.bf16.gmra.mrb[4].mxu0 %v4368_v59  ;;  %v4041_v59 = vld [vmem:[%s5454_s1 + $0x2d0] sm:$0xff]  }
  0x30   : > { %653 = vmatmul.mubr.bf16.gmra.mrb[4].mxu1 %v4382_v63  ;;  %3648 = vmatpush3.bf16.msra.mxu0 %v3998_v5  ;;  %v4513_v5 = vcombine.low %v4489_v45, %v4500_v0  ;;  %v967_v36 = vshll.u32 %v4509_v3, 16  ;;  %v995_v56 = vshrl.u32 %v4509_v3, 16 }
  0x31   : > { %3694 = vmatpush3.bf16.msra.mxu1 %v3999_v7  ;;  %588 = vmatprep.mubr.bf16.mxu0 %v4428_v17  ;;  %v923_v7 = vshrl.u32 %v4382_v63, 16  ;;  %v4688_v63 = vcombine.high %v4364_v58, %v4416_v12 }
  0x32   : > { %660 = vmatprep.mubr.bf16.mxu1 %v4432_v18  ;;  %3649 = vmatprep.subr.bf16.mxu0 %v4002_v19  ;;  %v4018_v19 = vld [vmem:[%s5454_s1 + $0x128] sm:$0xff]  }
  0x33   : > { %3695 = vmatprep.subr.bf16.mxu1 %v4003_v21  ;;  %v4528_v21 = vrot.slane %v935_v47, 1  ;;  %v4553_v47 = vrot.slane %v927_v16, 1  ;;  %v901_v16 = vor.u32 %v4370_v60, %v896_v54  ;;  %v943_v60 = vshll.u32 %v4504_v1, 16 }
  0x34   : > { %3650 = vmatpush3.bf16.msra.mxu0 %v4006_v25  ;;  %v4534_v25 = vrot.slane %v911_v2, 1 }
  0x35   : > { %3696 = vmatpush3.bf16.msra.mxu1 %v4007_v27  ;;  %3651 = vmatprep.subr.bf16.mxu0 %v4008_v29  ;;  %v4020_v27 = vld [vmem:[%s5454_s1 + $0x170] sm:$0xff]   ;;  %v951_v29 = vshll.u32 %v4497_v50, 16 }
  0x36   : > { %3697 = vmatprep.subr.bf16.mxu1 %v4009_v31  ;;  %v4545_v31 = vld [vmem:[%s4287_s27 + $0x80] sm:$0xff] }
  0x37   : > { %589 = vmatmul.mubr.bf16.gmra.mrb[8].mxu0 %v4444_v22  ;;  %v4579_v2 = vrot.slane %v951_v29, 1  ;;  %v4031_v29 = vld [vmem:[%s5454_s1 + $0x1b8] sm:$0xff]  }
  0x38   : > { %661 = vmatmul.mubr.bf16.gmra.mrb[8].mxu1 %v4451_v24  ;;  %3652 = vmatpush3.bf16.msra.mxu0 %v4010_v34  ;;  %v4548_v34 = vld [vmem:[%s4287_s27 + $0x88] sm:$0xff] }
  0x39   : > { %3698 = vmatpush3.bf16.msra.mxu1 %v4011_v41  ;;  %596 = vmatprep.mubr.bf16.mxu0 %v4497_v50  ;;  %v877_v41 = vor.u32 %v4352_v53, %v872_v49  ;;  %v4025_v49 = vld [vmem:[%s5454_s1 + $0x1b0] sm:$0xff]   ;;  %v3114_v53 = vcombine.low %v4545_v31, %v4545_v31 }
  0x3a   : > { %668 = vmatprep.mubr.bf16.mxu1 %v4509_v3  ;;  %3653 = vmatprep.subr.bf16.mxu0 %v4016_v6  ;;  %v3116_v6 = vcombine.low %v4548_v34, %v4548_v34  ;;  %v4059_v3 = vld [vmem:[%s5454_s1 + $0x2a8] sm:$0xff]  }
  0x3b   : > { %3699 = vmatprep.subr.bf16.mxu1 %v4017_v10  ;;  %v3115_v10 = vcombine.high %v4545_v31, %v4545_v31  ;;  %v882_v54 = vsel %vm858_vm0, %v877_v41, %v4421_v14  ;;  %v955_v41 = vshrl.u32 %v4451_v24, 16  ;;  %v4050_v24 = vld [vmem:[%s5454_s1 + $0x220] sm:$0xff]  }
  0x3c   : > { %3654 = vmatpush3.bf16.msra.mxu0 %v4018_v19  ;;  %v3117_v19 = vcombine.high %v4548_v34, %v4548_v34 }
  0x3d   : > { %3700 = vmatpush3.bf16.msra.mxu1 %v4019_v23  ;;  %3655 = vmatprep.subr.bf16.mxu0 %v4020_v27  ;;  %v4024_v23 = vld [vmem:[%s5454_s1 + $0x130] sm:$0xff]   ;;  %v939_v27 = vshrl.u32 %v4444_v22, 16  ;;  %v1566_v22 = vshll.u32 %v4374_v61, 16 }
  0x3e   : > { %3701 = vmatprep.subr.bf16.mxu1 %v4021_v30  ;;  %v4028_v30 = vld [vmem:[%s5454_s1 + $0x178] sm:$0xff]  }
  0x3f   : > { %597 = vmatmul.mubr.bf16.gmra.mrb[12].mxu0 %v4504_v1 }
  0x40   : > { %669 = vmatmul.mubr.bf16.gmra.mrb[12].mxu1 %v4513_v5  ;;  %604 = vmatprep.mubr.bf16.mxu0 %v3115_v10  ;;  %v4030_v10 = vld [vmem:[%s5454_s1 + $0x138] sm:$0xff]  }
  0x41   : > { %676 = vmatprep.mubr.bf16.mxu1 %v3117_v19  ;;  %3656 = vmatpush3.bf16.msra.mxu0 %v4024_v23  ;;  %v4590_v19 = vrot.slane %v967_v36, 1  ;;  %v906_v23 = vsel %vm858_vm0, %v901_v16, %v4437_v20  ;;  %v4032_v36 = vld [vmem:[%s5454_s1 + $0x240] sm:$0xff]   ;;  %v889_v16 = vor.u32 %v4456_v26, %v884_v9  ;;  %v917_v9 = vor.u32 %v915_v40, %v4421_v14 }
  0x42   : > { %3702 = vmatpush3.bf16.msra.mxu1 %v4025_v49  ;;  %3657 = vmatprep.subr.bf16.mxu0 %v4028_v30  ;;  %v865_v49 = vor.u32 %v4423_v15, %v860_v55  ;;  %v4611_v30 = vrot.slane %v943_v60, 1  ;;  %v979_v55 = vshrl.u32 %v4497_v50, 16  ;;  %v4627_v26 = vcombine.high %v4297_v33, %v4347_v51  ;;  %v4037_v51 = vld [vmem:[%s5454_s1 + $0x2c8] sm:$0xff]  }
  0x43   : > { %3703 = vmatprep.subr.bf16.mxu1 %v4029_v39  ;;  %v933_v60 = vor.u32 %v931_v42, %v4437_v20  ;;  %v4640_v14 = vcombine.high %v4350_v52, %v4408_v8  ;;  %v894_v33 = vsel %vm858_vm0, %v889_v16, %v4471_v32  ;;  %v971_v40 = vshrl.u32 %v4504_v1, 16  ;;  %v4039_v42 = vld [vmem:[%s5454_s1 + $0x288] sm:$0xff]   ;;  %v4060_v1 = vld [vmem:[%s5454_s1 + $0x270] sm:$0xff]  }
  0x44   : > { %v870_v39 = vsel %vm858_vm0, %v865_v49, %v4461_v28  ;;  %v987_v20 = vshrl.u32 %v4513_v5, 16  ;;  %v909_v49 = vor.u32 %v907_v48, %v4461_v28  ;;  %v4669_v16 = vcombine.high %v4307_v37, %v4361_v57  ;;  %v4042_v48 = vld [vmem:[%s5454_s1 + $0x210] sm:$0xff]  }
  0x45   : > { %3658 = vmatpush3.bf16.msra.mxu0 %v4030_v10  ;;  %v922_v10 = vsel %vm858_vm0, %v917_v9, %v4491_v46  ;;  %v1576_v28 = vshrl.u32 %v4627_v26, 16  ;;  %v5457_v37 = vshrl.u32 %v4428_v17, 16 }
  0x46   : > { %3704 = vmatpush3.bf16.msra.mxu1 %v4031_v29  ;;  %3735 = vmatprep.subr.bf16.mxu0 %v4032_v36  ;;  %v1578_v29 = vshll.u32 %v4627_v26, 16  ;;  %v4040_v36 = vld [vmem:[%s5454_s1 + $0x250] sm:$0xff]   ;;  %v914_v17 = vsel %vm858_vm0, %v909_v49, %v4534_v25  ;;  %v1564_v49 = vshrl.u32 %v4374_v61, 16  ;;  %v4844_v26 = vcombine.high %v4413_v11, %v4483_v43 }
  0x47   : > { %605 = vmatmul.mubr.bf16.gmra.mrb[16].mxu0 %v3114_v53  ;;  %v959_v53 = vshll.u32 %v4513_v5, 16  ;;  %v949_v57 = vor.u32 %v5457_v37, %v4491_v46  ;;  %v4044_v46 = vld [vmem:[%s5454_s1 + $0x258] sm:$0xff]   ;;  %v4062_v5 = vld [vmem:[%s5454_s1 + $0x230] sm:$0xff]  }
  0x48   : > { %677 = vmatmul.mubr.bf16.gmra.mrb[16].mxu1 %v3116_v6  ;;  %1259 = vmatprep.mubr.bf16.mxu0 %v882_v54  ;;  %v4033_v6 = vld [vmem:[%s5454_s1 + $0x2c0] sm:$0xff]   ;;  %v4036_v54 = vld [vmem:[%s5454_s1 + $0x248] sm:$0xff]  }
  0x49   : > { %1331 = vmatprep.mubr.bf16.mxu1 %v906_v23  ;;  %3781 = vmatprep.subr.bf16.mxu1 %v4033_v6  ;;  %v4623_v15 = vrot.slane %v959_v53, 1  ;;  %v938_v23 = vsel %vm858_vm0, %v933_v60, %v4528_v21  ;;  %v1583_v53 = vshll.u32 %v4640_v14, 16  ;;  %v925_v6 = vor.u32 %v923_v7, %v4471_v32  ;;  %v4043_v32 = vld [vmem:[%s5454_s1 + $0x290] sm:$0xff]  }
  0x4a   : > { %v5458_v7 = vshrl.u32 %v4432_v18, 16  ;;  %v4045_v18 = vld [vmem:[%s5454_s1 + $0x2d8] sm:$0xff]   ;;  %v954_v60 = vsel %vm858_vm0, %v949_v57, %v4579_v2  ;;  %v4056_v57 = vld [vmem:[%s5454_s1 + $0x268] sm:$0xff]  }
  0x4b   : > { %v4696_v9 = vrot.slane %v1583_v53, 1  ;;  %v711_v53 = vld [vmem:[%s4287_s27 + $0x90] sm:$0x11] }
  0x4c   : > { %v4757_v37 = vcombine.low %v4545_v31, %v711_v53 }
  0x4e   : > { %v975_v50 = vshll.u32 %v4757_v37, 16 }
  0x4f   : > { %1260 = vmatmul.mubr.bf16.vlgmr.msra.gmra.mrb[20].mxu0 %v870_v39  ;;  %v1602_v39 = vshll.u32 %v4669_v16, 16 }
  0x50   : > { %1332 = vmatmul.mubr.bf16.vlgmr.msra.gmra.mrb[20].mxu1 %v894_v33  ;;  %3736 = vmatpush3.bf16.msra.mxu0 %v4034_v35  ;;  %v4684_v35 = vrot.slane %v1578_v29, 1  ;;  %v4046_v33 = vld [vmem:[%s5454_s1 + $0x218] sm:$0xff]  }
  0x51   : > { %3782 = vmatpush3.bf16.msra.mxu1 %v4035_v38  ;;  %3737 = vmatprep.subr.bf16.mxu0 %v4036_v54  ;;  %v965_v38 = vor.u32 %v5458_v7, %v4528_v21  ;;  %v930_v54 = vsel %vm858_vm0, %v925_v6, %v4553_v47  ;;  %v1600_v21 = vshrl.u32 %v4669_v16, 16  ;;  %v4725_v29 = vrot.slane %v1602_v39, 1  ;;  %v712_v6 = vld [vmem:[%s4287_s27 + $0x98] sm:$0x11]  ;;  %v4077_v16 = vld [vmem:[%s5454_s1 + $0x3c0] sm:$0xff]  }
  0x52   : > { %3783 = vmatprep.subr.bf16.mxu1 %v4037_v51  ;;  %1267 = vmatprep.mubr.bf16.mxu0 %v922_v10  ;;  %v4717_v51 = vcombine.low %v4350_v52, %v4408_v8  ;;  %v4047_v10 = vld [vmem:[%s5454_s1 + $0x298] sm:$0xff]   ;;  %v957_v52 = vor.u32 %v955_v41, %v4553_v47  ;;  %v4048_v8 = vld [vmem:[%s5454_s1 + $0x260] sm:$0xff]   ;;  %v981_v7 = vor.u32 %v979_v55, %v4579_v2  ;;  %v1588_v39 = vshrl.u32 %v4395_v4, 16  ;;  %v4058_v2 = vld [vmem:[%s5454_s1 + $0x228] sm:$0xff]  }
  0x53   : > { %1339 = vmatprep.mubr.bf16.mxu1 %v938_v23  ;;  %v941_v23 = vor.u32 %v939_v27, %v4534_v25  ;;  %v4051_v47 = vld [vmem:[%s5454_s1 + $0x2a0] sm:$0xff]   ;;  %v1568_v27 = vrot.slane %v1566_v22, 1  ;;  %v973_v55 = vor.u32 %v971_v40, %v4611_v30  ;;  %v4061_v40 = vld [vmem:[%s5454_s1 + $0x2f0] sm:$0xff]  }
  0x54   : > { %3738 = vmatpush3.bf16.msra.mxu0 %v4038_v62  ;;  %v1607_v62 = vshll.u32 %v4688_v63, 16  ;;  %v1571_v25 = vshll.u32 %v4717_v51, 16  ;;  %v962_v61 = vsel %vm858_vm0, %v957_v52, %v4623_v15  ;;  %v4063_v22 = vld [vmem:[%s5454_s1 + $0x2b0] sm:$0xff]  }
  0x55   : > { %3784 = vmatpush3.bf16.msra.mxu1 %v4039_v42  ;;  %3739 = vmatprep.subr.bf16.mxu0 %v4040_v36  ;;  %v970_v42 = vsel %vm858_vm0, %v965_v38, %v4590_v19  ;;  %v4049_v36 = vld [vmem:[%s5454_s1 + $0x2e0] sm:$0xff]   ;;  %v946_v41 = vsel %vm858_vm0, %v941_v23, %v4611_v30  ;;  %v4768_v38 = vcombine.low %v4548_v34, %v712_v6 }
  0x56   : > { %3785 = vmatprep.subr.bf16.mxu1 %v4041_v59  ;;  %v3231_v59 = vcombine.high %v4545_v31, %v711_v53  ;;  %v989_v23 = vor.u32 %v987_v20, %v4623_v15  ;;  %v4808_v15 = vcombine.low %v4364_v58, %v4416_v12  ;;  %v4064_v12 = vld [vmem:[%s5454_s1 + $0x278] sm:$0xff]  }
  0x57   : > { %1268 = vmatmul.mubr.bf16.gmra.mrb[24].mxu0 %v914_v17  ;;  %v4057_v17 = vld [vmem:[%s5454_s1 + $0x2e8] sm:$0xff]  }
  0x58   : > { %1340 = vmatmul.mubr.bf16.gmra.mrb[24].mxu1 %v930_v54  ;;  %3740 = vmatpush3.bf16.msra.mxu0 %v4042_v48  ;;  %v3233_v48 = vcombine.high %v4548_v34, %v712_v6  ;;  %v983_v54 = vshll.u32 %v3231_v59, 16  ;;  %v1595_v53 = vshll.u32 %v4808_v15, 16  ;;  %v4066_v6 = vld [vmem:[%s5454_s1 + $0x238] sm:$0xff]  }
  0x59   : > { %3786 = vmatpush3.bf16.msra.mxu1 %v4043_v32  ;;  %1275 = vmatprep.mubr.bf16.mxu0 %v954_v60  ;;  %v4762_v32 = vrot.slane %v1571_v25, 1 }
  0x5a   : > { %1347 = vmatprep.mubr.bf16.mxu1 %v970_v42  ;;  %3741 = vmatprep.subr.bf16.mxu0 %v4044_v46  ;;  %v1569_v46 = vor.u32 %v1568_v27, %v1564_v49  ;;  %v999_v60 = vshll.u32 %v3233_v48, 16  ;;  %v1006_v49 = vshrl.u32 %v3231_v59, 16  ;;  %v1009_v27 = vshrl.u32 %v4768_v38, 16 }
  0x5b   : > { %3787 = vmatprep.subr.bf16.mxu1 %v4045_v18  ;;  %v997_v18 = vor.u32 %v995_v56, %v4590_v19  ;;  %v985_v56 = vrot.slane %v983_v54, 1 }
  0x5c   : > { %3742 = vmatpush3.bf16.msra.mxu0 %v4046_v33  ;;  %v991_v33 = vshll.u32 %v4768_v38, 16  ;;  %v4790_v19 = vsel %vm858_vm0, %v1569_v46, %v4762_v32  ;;  %v1001_v42 = vrot.slane %v999_v60, 1  ;;  %v3338_v46 = vcombine.low %v4413_v11, %v4483_v43 }
  0x5d   : > { %3788 = vmatpush3.bf16.msra.mxu1 %v4047_v10  ;;  %3743 = vmatprep.subr.bf16.mxu0 %v4048_v8  ;;  %v977_v10 = vrot.slane %v975_v50, 1  ;;  %v986_v52 = vsel %vm858_vm0, %v981_v7, %v985_v56  ;;  %v1008_v25 = vor.u32 %v1006_v49, %v985_v56  ;;  %v1609_v7 = vrot.slane %v1607_v62, 1 }
  0x5e   : > { %3789 = vmatprep.subr.bf16.mxu1 %v4049_v36  ;;  %v993_v30 = vrot.slane %v991_v33, 1  ;;  %v1002_v8 = vsel %vm858_vm0, %v997_v18, %v1001_v42  ;;  %v1012_v36 = vshrl.u32 %v3233_v48, 16  ;;  %v1581_v48 = vor.u32 %v4684_v35, %v1576_v28 }
  0x5f   : > { %1276 = vmatmul.mubr.bf16.gmra.mrb[28].mxu0 %v946_v41  ;;  %v978_v20 = vsel %vm858_vm0, %v973_v55, %v977_v10  ;;  %v1590_v41 = vshll.u32 %v4395_v4, 16  ;;  %v4067_v4 = vld [vmem:[%s5454_s1 + $0x2b8] sm:$0xff]   ;;  %v4852_v62 = vcombine.high %v4419_v13, %v4489_v45  ;;  %v1623_v18 = vshll.u32 %v4844_v26, 16 }
  0x60   : > { %1348 = vmatmul.mubr.bf16.gmra.mrb[28].mxu1 %v962_v61  ;;  %3744 = vmatpush3.bf16.msra.mxu0 %v4050_v24  ;;  %v994_v24 = vsel %vm858_vm0, %v989_v23, %v993_v30  ;;  %v1014_v58 = vor.u32 %v1012_v36, %v1001_v42  ;;  %v4065_v61 = vld [vmem:[%s5454_s1 + $0x2f8] sm:$0xff]   ;;  %v1011_v35 = vor.u32 %v1009_v27, %v993_v30  ;;  %v1619_v60 = vshrl.u32 %v4640_v14, 16  ;;  %v4078_v14 = vld [vmem:[%s5454_s1 + $0x300] sm:$0xff]   ;;  %v4080_v23 = vld [vmem:[%s5454_s1 + $0x348] sm:$0xff]  }
  0x61   : > { %3790 = vmatpush3.bf16.msra.mxu1 %v4051_v47  ;;  %3745 = vmatprep.subr.bf16.mxu0 %v4056_v57  ;;  %v1003_v47 = vshrl.u32 %v4757_v37, 16  ;;  %v1592_v59 = vrot.slane %v1590_v41, 1  ;;  %v1597_v37 = vrot.slane %v1595_v53, 1  ;;  %v1605_v57 = vor.u32 %v4725_v29, %v1600_v21  ;;  %v4082_v36 = vld [vmem:[%s5454_s1 + $0x308] sm:$0xff]  }
  0x62   : > { %3791 = vmatprep.subr.bf16.mxu1 %v4057_v17  ;;  %1283 = vmatprep.mubr.bf16.mxu0 %v986_v52  ;;  %v4076_v17 = vld [vmem:[%s5454_s1 + $0x340] sm:$0xff]   ;;  %v1586_v29 = vsel %vm858_vm0, %v1581_v48, %v4696_v9  ;;  %v1611_v50 = vshrl.u32 %v4717_v51, 16  ;;  %v1635_v11 = vshrl.u32 %v4688_v63, 16  ;;  %v1639_v43 = vshll.u32 %v4852_v62, 16  ;;  %v4081_v52 = vld [vmem:[%s5454_s1 + $0x3c8] sm:$0xff]  }
  0x63   : > { %1355 = vmatprep.mubr.bf16.mxu1 %v1002_v8  ;;  %v1593_v38 = vor.u32 %v1592_v59, %v1588_v39  ;;  %v1005_v28 = vor.u32 %v1003_v47, %v977_v10  ;;  %v4860_v39 = vcombine.low %v4419_v13, %v4489_v45  ;;  %v1610_v54 = vsel %vm858_vm0, %v1605_v57, %v1609_v7  ;;  %v4094_v57 = vld [vmem:[%s5454_s1 + $0x358] sm:$0xff]  }
  0x64   : > { %3746 = vmatpush3.bf16.msra.mxu0 %v4058_v2  ;;  %v1613_v13 = vor.u32 %v1611_v50, %v4762_v32  ;;  %v1615_v45 = vshll.u32 %v3338_v46, 16  ;;  %v1627_v2 = vshrl.u32 %v4808_v15, 16  ;;  %v1625_v33 = vrot.slane %v1623_v18, 1  ;;  %v4079_v32 = vld [vmem:[%s5454_s1 + $0x380] sm:$0xff]  }
  0x65   : > { %3792 = vmatpush3.bf16.msra.mxu1 %v4059_v3  ;;  %3747 = vmatprep.subr.bf16.mxu0 %v4060_v1  ;;  %v1598_v21 = vsel %vm858_vm0, %v1593_v38, %v1597_v37  ;;  %v1631_v55 = vshll.u32 %v4860_v39, 16  ;;  %v4876_v51 = vcombine.high %v4486_v44, %v4545_v31  ;;  %v4880_v63 = vcombine.high %v4500_v0, %v4548_v34  ;;  %v4095_v38 = vld [vmem:[%s5454_s1 + $0x3d8] sm:$0xff]   ;;  %v4100_v18 = vld [vmem:[%s5454_s1 + $0x360] sm:$0xff]  }
  0x66   : > { %3793 = vmatprep.subr.bf16.mxu1 %v4061_v40  ;;  %v1621_v3 = vor.u32 %v1619_v60, %v4696_v9  ;;  %v1617_v56 = vrot.slane %v1615_v45, 1  ;;  %v1629_v42 = vor.u32 %v1627_v2, %v1597_v37  ;;  %v1637_v1 = vor.u32 %v1635_v11, %v1609_v7  ;;  %v4101_v11 = vld [vmem:[%s5454_s1 + $0x3e0] sm:$0xff]  }
  0x67   : > { %1284 = vmatmul.mubr.bf16.gmra.mrb[32].mxu0 %v978_v20  ;;  %v1633_v10 = vrot.slane %v1631_v55, 1  ;;  %v1641_v30 = vrot.slane %v1639_v43, 1  ;;  %v4891_v40 = vcombine.low %v4486_v44, %v4545_v31  ;;  %v4900_v49 = vcombine.low %v4500_v0, %v4548_v34  ;;  %v4083_v0 = vld [vmem:[%s5454_s1 + $0x388] sm:$0xff]   ;;  %v4102_v45 = vld [vmem:[%s5454_s1 + $0x320] sm:$0xff]  }
  0x68   : > { %1356 = vmatmul.mubr.bf16.gmra.mrb[32].mxu1 %v994_v24  ;;  %1291 = vmatprep.mubr.bf16.mxu0 %v1008_v25  ;;  %v1618_v8 = vsel %vm858_vm0, %v1613_v13, %v1617_v56  ;;  %v1655_v15 = vshll.u32 %v4876_v51, 16  ;;  %v1667_v20 = vshrl.u32 %v4852_v62, 16  ;;  %v1671_v44 = vshll.u32 %v4880_v63, 16  ;;  %v4089_v25 = vld [vmem:[%s5454_s1 + $0x3d0] sm:$0xff]   ;;  %v4099_v62 = vld [vmem:[%s5454_s1 + $0x398] sm:$0xff]  }
  0x69   : > { %1363 = vmatprep.mubr.bf16.mxu1 %v1014_v58  ;;  %3748 = vmatpush3.bf16.msra.mxu0 %v4062_v5  ;;  %v1634_v9 = vsel %vm858_vm0, %v1629_v42, %v1633_v10  ;;  %v1651_v5 = vshrl.u32 %v4844_v26, 16  ;;  %v1626_v31 = vsel %vm858_vm0, %v1621_v3, %v1625_v33  ;;  %v1642_v34 = vsel %vm858_vm0, %v1637_v1, %v1641_v30  ;;  %v4090_v58 = vld [vmem:[%s5454_s1 + $0x310] sm:$0xff]   ;;  %v4109_v1 = vld [vmem:[%s5454_s1 + $0x3e8] sm:$0xff]  }
  0x6a   : > { %3794 = vmatpush3.bf16.msra.mxu1 %v4063_v22  ;;  %3749 = vmatprep.subr.bf16.mxu0 %v4064_v12  ;;  %v1643_v22 = vshrl.u32 %v3338_v46, 16  ;;  %v1647_v24 = vshll.u32 %v4891_v40, 16  ;;  %v1659_v47 = vshrl.u32 %v4860_v39, 16  ;;  %v1663_v27 = vshll.u32 %v4900_v49, 16  ;;  %v4958_v46 = vld [vmem:[%s4287_s27 + $0x98] sm:$0xff] }
  0x6b   : > { %3795 = vmatprep.subr.bf16.mxu1 %v4065_v61  ;;  %v1653_v12 = vor.u32 %v1651_v5, %v1625_v33  ;;  %v1657_v41 = vrot.slane %v1655_v15, 1  ;;  %v1669_v59 = vor.u32 %v1667_v20, %v1641_v30  ;;  %v1417_v39 = vld [vmem:[%s4287_s27 + $0xa8] sm:$0x11]  ;;  %v4103_v33 = vld [vmem:[%s5454_s1 + $0x3a0] sm:$0xff]  }
  0x6c   : > { %v1645_v61 = vor.u32 %v1643_v22, %v1617_v56  ;;  %v4927_v53 = vrot.slane %v1647_v24, 1  ;;  %v1661_v48 = vor.u32 %v1659_v47, %v1633_v10  ;;  %v4932_v37 = vrot.slane %v1663_v27, 1  ;;  %v4115_v24 = vld [vmem:[%s5454_s1 + $0x3b0] sm:$0xff]   ;;  %v4116_v27 = vld [vmem:[%s5454_s1 + $0x378] sm:$0xff]  }
  0x6d   : > { %3750 = vmatpush3.bf16.msra.mxu0 %v4066_v6  ;;  %v4091_v6 = vld [vmem:[%s5454_s1 + $0x390] sm:$0xff]   ;;  %v1658_v26 = vsel %vm858_vm0, %v1653_v12, %v1657_v41  ;;  %v3349_v50 = vcombine.high %v4958_v46, %v1417_v39  ;;  %v4974_v13 = vcombine.low %v4958_v46, %v1417_v39  ;;  %v1691_v10 = vshrl.u32 %v4900_v49, 16  ;;  %v4134_v39 = vld [vmem:[%s4287_s27 + $0x5c] ss:$16 sps:$4 sm:$0xff]  }
  0x6e   : > { %3796 = vmatpush3.bf16.msra.mxu1 %v4067_v4  ;;  %3827 = vmatprep.subr.bf16.mxu0 %v4076_v17  ;;  %v1673_v4 = vrot.slane %v1671_v44, 1  ;;  %v1650_v7 = vsel %vm858_vm0, %v1645_v61, %v4927_v53  ;;  %v1666_v17 = vsel %vm858_vm0, %v1661_v48, %v4932_v37  ;;  %v4112_v44 = vld [vmem:[%s5454_s1 + $0x370] sm:$0xff]  }
  0x6f   : > { %1292 = vmatmul.mubr.bf16.gmra.mrb[36].mxu0 %v1005_v28  ;;  %3873 = vmatprep.subr.bf16.mxu1 %v4077_v16  ;;  %v4098_v28 = vld [vmem:[%s5454_s1 + $0x318] sm:$0xff]   ;;  %v4949_v16 = vld [vmem:[%s4287_s27 + $0x90] sm:$0xff]  ;;  %v1695_v3 = vshll.u32 %v4974_v13, 16  ;;  %v1693_v20 = vor.u32 %v1691_v10, %v4932_v37  ;;  %v1713_v61 = vshrl.u32 %v4974_v13, 16  ;;  %v2286_v13 = vrot.slane %v4134_v39, 1 }
  0x70   : > { %1364 = vmatmul.mubr.bf16.gmra.mrb[36].mxu1 %v1011_v35  ;;  %1963 = vmatprep.mubr.bf16.mxu0 %v1586_v29  ;;  %v1683_v35 = vshrl.u32 %v4876_v51, 16  ;;  %v1416_v29 = vld [vmem:[%s4287_s27 + $0xa0] sm:$0x11]  ;;  %v4128_v37 = vld [vmem:[%s4287_s27 + $0x1c] ss:$16 sps:$4 sm:$0xfe]  }
  0x71   : > { %2035 = vmatprep.mubr.bf16.mxu1 %v1610_v54  ;;  %v1699_v54 = vshrl.u32 %v4880_v63, 16  ;;  %v3347_v60 = vcombine.high %v4949_v16, %v1416_v29  ;;  %v4971_v43 = vcombine.low %v4949_v16, %v1416_v29  ;;  %v1675_v63 = vshrl.u32 %v4891_v40, 16  ;;  %v4110_v40 = vld [vmem:[%s5454_s1 + $0x328] sm:$0xff]   ;;  %v4122_v12 = vld [vmem:[%s4287_s27 + $0x14] ss:$16 sps:$4 sm:$0xfe]  }
  0x72   : > { %v1685_v2 = vor.u32 %v1683_v35, %v1657_v41  ;;  %v1697_v5 = vrot.slane %v1695_v3, 1  ;;  %v4125_v41 = vld [vmem:[%s4287_s27 + $0x34] ss:$16 sps:$4 sm:$0xff]   ;;  %v4120_v48 = vld [vmem:[%s4287_s27 + $0x10] ss:$16 sps:$4 sm:$0xfe]  }
  0x73   : > { %v1687_v55 = vshll.u32 %v3347_v60, 16  ;;  %v1701_v51 = vor.u32 %v1699_v54, %v1673_v4  ;;  %v1677_v49 = vor.u32 %v1675_v63, %v4927_v53  ;;  %v1710_v15 = vshrl.u32 %v3347_v60, 16  ;;  %v4118_v53 = vld [vmem:[%s5454_s1 + $0x338] sm:$0xff]   ;;  %v4132_v29 = vld [vmem:[%s4287_s27 + $0x54] ss:$16 sps:$4 sm:$0xff]  }
  0x74   : > { %v1707_v47 = vshrl.u32 %v4971_v43, 16 }
  0x75   : > { %v1689_v56 = vrot.slane %v1687_v55, 1 }
  0x77   : > { %1964 = vmatmul.mubr.bf16.vlgmr.msra.gmra.mrb[40].mxu0 %v4790_v19  ;;  %v4088_v19 = vld [vmem:[%s5454_s1 + $0x350] sm:$0xff]   ;;  %v1690_v30 = vsel %vm858_vm0, %v1685_v2, %v1689_v56  ;;  %v1712_v22 = vor.u32 %v1710_v15, %v1689_v56 }
  0x78   : > { %2036 = vmatmul.mubr.bf16.vlgmr.msra.gmra.mrb[40].mxu1 %v1598_v21  ;;  %3828 = vmatpush3.bf16.msra.mxu0 %v4078_v14  ;;  %v1674_v21 = vsel %vm858_vm0, %v1669_v59, %v1673_v4  ;;  %v1703_v14 = vshll.u32 %v3349_v50, 16  ;;  %v2272_v59 = vrot.slane %v4125_v41, 1  ;;  %v4119_v4 = vld [vmem:[%s5454_s1 + $0x3b8] sm:$0xff]   ;;  %v4136_v2 = vld [vmem:[%s4287_s27 + $0x50] ss:$16 sps:$4 sm:$0xff]  }
  0x79   : > { %3874 = vmatpush3.bf16.msra.mxu1 %v4079_v32  ;;  %3829 = vmatprep.subr.bf16.mxu0 %v4080_v23  ;;  %v1679_v32 = vshll.u32 %v4971_v43, 16  ;;  %v4108_v23 = vld [vmem:[%s5454_s1 + $0x368] sm:$0xff]   ;;  %v2282_v43 = vrot.slane %v4132_v29, 1  ;;  %v2280_v3 = vrot.slane %v4136_v2, 1 }
  0x7a   : > { %3875 = vmatprep.subr.bf16.mxu1 %v4081_v52  ;;  %1971 = vmatprep.mubr.bf16.mxu0 %v1626_v31  ;;  %v1705_v42 = vrot.slane %v1703_v14, 1  ;;  %v1716_v31 = vshrl.u32 %v3349_v50, 16 }
  0x7b   : > { %2043 = vmatprep.mubr.bf16.mxu1 %v1642_v34  ;;  %v2283_v14 = vsel %vm2267_vm1, %v2272_v59, %v2282_v43 }
  0x7c   : > { %3830 = vmatpush3.bf16.msra.mxu0 %v4082_v36  ;;  %v1706_v52 = vsel %vm858_vm0, %v1701_v51, %v1705_v42  ;;  %v4113_v36 = vld [vmem:[%s5454_s1 + $0x3f0] sm:$0xff]  }
  0x7d   : > { %3876 = vmatpush3.bf16.msra.mxu1 %v4083_v0  ;;  %3831 = vmatprep.subr.bf16.mxu0 %v4088_v19  ;;  %v4114_v0 = vld [vmem:[%s5454_s1 + $0x330] sm:$0xff]   ;;  %v1698_v19 = vsel %vm858_vm0, %v1693_v20, %v1697_v5 }
  0x7e   : > { %3877 = vmatprep.subr.bf16.mxu1 %v4089_v25  ;;  %v1718_v25 = vor.u32 %v1716_v31, %v1705_v42  ;;  %v4138_v51 = vld [vmem:[%s4287_s27 + $0x74] ss:$16 sps:$4 sm:$0xff]  }
  0x7f   : > { %1972 = vmatmul.mubr.bf16.gmra.mrb[44].mxu0 %v1618_v8  ;;  %v1681_v8 = vrot.slane %v1679_v32, 1  ;;  %v4140_v32 = vld [vmem:[%s4287_s27 + $0x7c] ss:$16 sps:$4 sm:$0xff]   ;;  %v2290_v42 = vrot.slane %v4138_v51, 1 }
  0x80   : > { %2044 = vmatmul.mubr.bf16.gmra.mrb[44].mxu1 %v1634_v9  ;;  %3832 = vmatpush3.bf16.msra.mxu0 %v4090_v58  ;;  %v4111_v9 = vld [vmem:[%s5454_s1 + $0x3a8] sm:$0xff]   ;;  %v4117_v58 = vld [vmem:[%s5454_s1 + $0x3f8] sm:$0xff]   ;;  %v2294_v10 = vrot.slane %v4140_v32, 1 }
  0x81   : > { %3878 = vmatpush3.bf16.msra.mxu1 %v4091_v6  ;;  %1979 = vmatprep.mubr.bf16.mxu0 %v1658_v26  ;;  %v1682_v34 = vsel %vm858_vm0, %v1677_v49, %v1681_v8  ;;  %v2271_v6 = vrot.slane %v4122_v12, 1  ;;  %v4126_v26 = vld [vmem:[%s4287_s27 + $0x18] ss:$16 sps:$4 sm:$0xfe]  }
  0x82   : > { %2051 = vmatprep.mubr.bf16.mxu1 %v1674_v21  ;;  %3833 = vmatprep.subr.bf16.mxu0 %v4094_v57  ;;  %v1709_v57 = vor.u32 %v1707_v47, %v1681_v8  ;;  %v4129_v21 = vld [vmem:[%s4287_s27 + $0x38] ss:$16 sps:$4 sm:$0xff]   ;;  %v2274_v50 = vrot.slane %v4126_v26, 1  ;;  %v2291_v8 = vsel %vm2267_vm1, %v2282_v43, %v2290_v42 }
  0x83   : > { %3879 = vmatprep.subr.bf16.mxu1 %v4095_v38  ;;  %v4131_v38 = vld [vmem:[%s4287_s27 + $0x3c] ss:$16 sps:$4 sm:$0xff]   ;;  %v2273_v35 = vsel %vm2267_vm1, %v2271_v6, %v2272_v59 }
  0x84   : > { %3834 = vmatpush3.bf16.msra.mxu0 %v4098_v28  ;;  %v2277_v28 = vrot.slane %v4128_v37, 1 }
  0x85   : > { %3880 = vmatpush3.bf16.msra.mxu1 %v4099_v62  ;;  %3835 = vmatprep.subr.bf16.mxu0 %v4100_v18  ;;  %v2278_v62 = vrot.slane %v4131_v38, 1  ;;  %v2268_v18 = vrot.slane %v4120_v48, 1 }
  0x86   : > { %3881 = vmatprep.subr.bf16.mxu1 %v4101_v11  ;;  %v2275_v11 = vrot.slane %v4129_v21, 1 }
  0x87   : > { %1980 = vmatmul.mubr.bf16.gmra.mrb[48].mxu0 %v1650_v7  ;;  %v4123_v7 = vld [vmem:[%s4287_s27 + $0x30] ss:$16 sps:$4 sm:$0xff]   ;;  %v2279_v54 = vsel %vm2267_vm1, %v2277_v28, %v2278_v62  ;;  %v2287_v63 = vsel %vm2267_vm1, %v2278_v62, %v2286_v13 }
  0x88   : > { %2052 = vmatmul.mubr.bf16.gmra.mrb[48].mxu1 %v1666_v17  ;;  %3836 = vmatpush3.bf16.msra.mxu0 %v4102_v45  ;;  %v1715_v17 = vor.u32 %v1713_v61, %v1697_v5  ;;  %v2269_v60 = vrot.slane %v4123_v7, 1  ;;  %v2276_v55 = vsel %vm2267_vm1, %v2274_v50, %v2275_v11  ;;  %v2295_v5 = vsel %vm2267_vm1, %v2286_v13, %v2294_v10 }
  0x89   : > { %3882 = vmatpush3.bf16.msra.mxu1 %v4103_v33  ;;  %1987 = vmatprep.mubr.bf16.mxu0 %v1690_v30  ;;  %v4137_v33 = vld [vmem:[%s4287_s27 + $0x58] ss:$16 sps:$4 sm:$0xff]  }
  0x8a   : > { %2059 = vmatprep.mubr.bf16.mxu1 %v1706_v52  ;;  %3837 = vmatprep.subr.bf16.mxu0 %v4108_v23  ;;  %v2270_v45 = vsel %vm2267_vm1, %v2268_v18, %v2269_v60  ;;  %v2284_v56 = vrot.slane %v4137_v33, 1  ;;  %v2120_v23 = vld [vmem:[%s4287_s27 + $0xa0] sm:$0x11]  ;;  %v2281_v30 = vsel %vm2267_vm1, %v2269_v60, %v2280_v3 }
  0x8b   : > { %3883 = vmatprep.subr.bf16.mxu1 %v4109_v1  ;;  %v2121_v1 = vld [vmem:[%s4287_s27 + $0xa8] sm:$0x11]  ;;  %v3463_v49 = vcombine.high %v4949_v16, %v2120_v23 }
  0x8c   : > { %3838 = vmatpush3.bf16.msra.mxu0 %v4110_v40  ;;  %v4142_v40 = vld [vmem:[%s4287_s27 + $0x70] ss:$16 sps:$4 sm:$0xff]   ;;  %v2285_v52 = vsel %vm2267_vm1, %v2275_v11, %v2284_v56  ;;  %v3465_v15 = vcombine.high %v4958_v46, %v2121_v1 }
  0x8d   : > { %3884 = vmatpush3.bf16.msra.mxu1 %v4111_v9  ;;  %3839 = vmatprep.subr.bf16.mxu0 %v4112_v44  ;;  %v4143_v9 = vld [vmem:[%s4287_s27 + $0x78] ss:$16 sps:$4 sm:$0xff]   ;;  %v2288_v20 = vrot.slane %v4142_v40, 1  ;;  %v2298_v31 = vrot.slane %v3463_v49, 1 }
  0x8e   : > { %3885 = vmatprep.subr.bf16.mxu1 %v4113_v36  ;;  %v2292_v44 = vrot.slane %v4143_v9, 1  ;;  %v2302_v36 = vrot.slane %v3465_v15, 1 }
  0x8f   : > { %1988 = vmatmul.mubr.bf16.gmra.mrb[52].mxu0 %v1682_v34  ;;  %v3462_v34 = vcombine.low %v4949_v16, %v2120_v23 }
  0x90   : > { %2060 = vmatmul.mubr.bf16.gmra.mrb[52].mxu1 %v1698_v19  ;;  %1995 = vmatprep.mubr.bf16.mxu0 %v1712_v22  ;;  %v2293_v22 = vsel %vm2267_vm1, %v2284_v56, %v2292_v44  ;;  %v3464_v19 = vcombine.low %v4958_v46, %v2121_v1 }
  0x91   : > { %2067 = vmatprep.mubr.bf16.mxu1 %v1718_v25  ;;  %3840 = vmatpush3.bf16.msra.mxu0 %v4114_v0  ;;  %v2289_v0 = vsel %vm2267_vm1, %v2280_v3, %v2288_v20  ;;  %v2303_v25 = vsel %vm2267_vm1, %v2294_v10, %v2302_v36  ;;  %v2296_v47 = vrot.slane %v3462_v34, 1 }
  0x92   : > { %3886 = vmatpush3.bf16.msra.mxu1 %v4115_v24  ;;  %3841 = vmatprep.subr.bf16.mxu0 %v4116_v27  ;;  %v2299_v24 = vsel %vm2267_vm1, %v2290_v42, %v2298_v31  ;;  %v2300_v27 = vrot.slane %v3464_v19, 1 }
  0x93   : > { %3887 = vmatprep.subr.bf16.mxu1 %v4117_v58  ;;  %v2297_v58 = vsel %vm2267_vm1, %v2288_v20, %v2296_v47 }
  0x94   : > { %v2301_v12 = vsel %vm2267_vm1, %v2292_v44, %v2300_v27 }
  0x95   : > { %3842 = vmatpush3.bf16.msra.mxu0 %v4118_v53 }
  0x96   : > { %3888 = vmatpush3.bf16.msra.mxu1 %v4119_v4 }
  0x97   : > { %1996 = vmatmul.mubr.bf16.gmra.mrb[56].mxu0 %v1709_v57 }
  0x98   : > { %2068 = vmatmul.mubr.bf16.gmra.mrb[56].mxu1 %v1715_v17  ;;  %2548 = vmatprep.mubr.bf16.mxu0 %v2273_v35 }
  0x99   : > { %2620 = vmatprep.mubr.bf16.mxu1 %v2279_v54 }
  0x9f   : > { %2549 = vmatmul.mubr.bf16.vlgmr.msra.gmra.mrb[60].mxu0 %v2270_v45 }
  0xa0   : > { %2621 = vmatmul.mubr.bf16.vlgmr.msra.gmra.mrb[60].mxu1 %v2276_v55  ;;  %2556 = vmatprep.mubr.bf16.mxu0 %v2283_v14 }
  0xa1   : > { %2628 = vmatprep.mubr.bf16.mxu1 %v2287_v63 }
  0xa7   : > { %2557 = vmatmul.mubr.bf16.gmra.mrb[64].mxu0 %v2281_v30 }
  0xa8   : > { %2629 = vmatmul.mubr.bf16.gmra.mrb[64].mxu1 %v2285_v52  ;;  %2564 = vmatprep.mubr.bf16.mxu0 %v2291_v8 }
  0xa9   : > { %2636 = vmatprep.mubr.bf16.mxu1 %v2295_v5 }
  0xaf   : > { %2565 = vmatmul.mubr.bf16.gmra.mrb[68].mxu0 %v2289_v0 }
  0xb0   : > { %2637 = vmatmul.mubr.bf16.gmra.mrb[68].mxu1 %v2293_v22  ;;  %2572 = vmatprep.mubr.bf16.mxu0 %v2299_v24 }
  0xb1   : > { %2644 = vmatprep.mubr.bf16.mxu1 %v2303_v25 }
  0xb7   : > { %2573 = vmatmul.mubr.bf16.gmra.mrb[72].mxu0 %v2297_v58 }
  0xb8   : > { %2645 = vmatmul.mubr.bf16.gmra.mrb[72].mxu1 %v2301_v12  ;;  %2580 = vmatprep.mubr.bf16.mxu0 %v2298_v31 }
  0xb9   : > { %2652 = vmatprep.mubr.bf16.mxu1 %v2302_v36 }
  0xbf   : > { %2581 = vmatmul.mubr.bf16.gmra.mrb[76].mxu0 %v2296_v47 }
  0xc0   : > { %2653 = vmatmul.mubr.bf16.gmra.mrb[76].mxu1 %v2300_v27 }
  0xfa   : > { %v3567_v16 = vpop.f32.mrb[0].mxu0 }
  0xfb   : > { %v3613_v46 = vpop.f32.mrb[0].mxu1  ;;  %v3568_v41 = vpop.f32.mrb[1].mxu0 }
  0xfc   : > { %v3569_v61 = vadd.f32 %v3568_v41, %v3567_v16  ;;  %v3614_v53 = vpop.f32.mrb[1].mxu1  ;;  %v3570_v6 = vpop.f32.mrb[2].mxu0 }
  0xfd   : > { %v3615_v59 = vadd.f32 %v3614_v53, %v3613_v46  ;;  %v3616_v4 = vpop.f32.mrb[2].mxu1  ;;  %v3571_v48 = vpop.f32.mrb[3].mxu0 }
  0xfe   : > { %v3572_v37 = vadd.f32 %v3571_v48, %v3570_v6  ;;  %v3617_v57 = vpop.f32.mrb[3].mxu1 }
  0xff   : > { %v5068_v7 = vadd.f32 %v3615_v59, %v3569_v61  ;;  %v3618_v38 = vadd.f32 %v3617_v57, %v3616_v4 }
 0x101   : > { %v5070_v17 = vadd.f32 %v3618_v38, %v3572_v37 }
 0x102   : > { %v3573_v26 = vpop.f32.mrb[4].mxu0 }
 0x103   : > { %v3619_v28 = vpop.f32.mrb[4].mxu1  ;;  %v3574_v35 = vpop.f32.mrb[5].mxu0 }
 0x104   : > { %v3575_v21 = vadd.f32 %v3574_v35, %v3573_v26  ;;  %v3620_v62 = vpop.f32.mrb[5].mxu1  ;;  %v3576_v29 = vpop.f32.mrb[6].mxu0 }
 0x105   : > { %v3621_v39 = vadd.f32 %v3620_v62, %v3619_v28  ;;  %v3622_v54 = vpop.f32.mrb[6].mxu1  ;;  %v3577_v18 = vpop.f32.mrb[7].mxu0 }
 0x106   : > { %v3578_v60 = vadd.f32 %v3577_v18, %v3576_v29  ;;  %v3623_v50 = vpop.f32.mrb[7].mxu1 }
 0x107   : > { %v5072_v11 = vadd.f32 %v3621_v39, %v3575_v21  ;;  %v3624_v43 = vadd.f32 %v3623_v50, %v3622_v54 }
 0x109   : > { %v5074_v13 = vadd.f32 %v3624_v43, %v3578_v60 }
 0x10a   : > { %v3579_v45 = vpop.f32.mrb[8].mxu0 }
 0x10b   : > { %v3625_v2 = vpop.f32.mrb[8].mxu1  ;;  %v3580_v55 = vpop.f32.mrb[9].mxu0 }
 0x10c   : > { %v3581_v14 = vadd.f32 %v3580_v55, %v3579_v45  ;;  %v3626_v33 = vpop.f32.mrb[9].mxu1  ;;  %v3582_v51 = vpop.f32.mrb[10].mxu0 }
 0x10d   : > { %v3627_v63 = vadd.f32 %v3626_v33, %v3625_v2  ;;  %v3628_v32 = vpop.f32.mrb[10].mxu1  ;;  %v3583_v3 = vpop.f32.mrb[11].mxu0 }
 0x10e   : > { %v3584_v56 = vadd.f32 %v3583_v3, %v3582_v51  ;;  %v3629_v42 = vpop.f32.mrb[11].mxu1 }
 0x10f   : > { %v5076_v10 = vadd.f32 %v3627_v63, %v3581_v14  ;;  %v3630_v23 = vadd.f32 %v3629_v42, %v3628_v32 }
 0x111   : > { %v5078_v1 = vadd.f32 %v3630_v23, %v3584_v56 }
 0x112   : > { %v3585_v30 = vpop.f32.mrb[12].mxu0 }
 0x113   : > { %v3631_v40 = vpop.f32.mrb[12].mxu1  ;;  %v3586_v52 = vpop.f32.mrb[13].mxu0 }
 0x114   : > { %v3587_v8 = vadd.f32 %v3586_v52, %v3585_v30  ;;  %v3632_v9 = vpop.f32.mrb[13].mxu1  ;;  %v3588_v49 = vpop.f32.mrb[14].mxu0 }
 0x115   : > { %v3633_v5 = vadd.f32 %v3632_v9, %v3631_v40  ;;  %v3634_v15 = vpop.f32.mrb[14].mxu1  ;;  %v3589_v20 = vpop.f32.mrb[15].mxu0 }
 0x116   : > { %v3590_v44 = vadd.f32 %v3589_v20, %v3588_v49  ;;  %v3635_v31 = vpop.f32.mrb[15].mxu1 }
 0x117   : > { %v5080_v36 = vadd.f32 %v3633_v5, %v3587_v8  ;;  %v3636_v0 = vadd.f32 %v3635_v31, %v3634_v15 }
 0x119   : > { %v5082_v34 = vadd.f32 %v3636_v0, %v3590_v44 }
 0x11a   : > { %v3591_v22 = vpop.f32.mrb[16].mxu0 }
 0x11b   : > { %v3637_v24 = vpop.f32.mrb[16].mxu1  ;;  %v3592_v19 = vpop.f32.mrb[17].mxu0 }
 0x11c   : > { %v3593_v25 = vadd.f32 %v3592_v19, %v3591_v22  ;;  %v3638_v47 = vpop.f32.mrb[17].mxu1  ;;  %v3594_v27 = vpop.f32.mrb[18].mxu0 }
 0x11d   : > { %v3639_v58 = vadd.f32 %v3638_v47, %v3637_v24  ;;  %v3640_v12 = vpop.f32.mrb[18].mxu1  ;;  %v3595_v16 = vpop.f32.mrb[19].mxu0 }
 0x11e   : > { %v3641_v46 = vpop.f32.mrb[19].mxu1 }
 0x11f   : > { %v5084_v41 = vadd.f32 %v3639_v58, %v3593_v25 }
 0x122   : > { %v3659_v61 = vpop.f32.mrb[20].mxu0 }
 0x123   : > { %v3705_v53 = vpop.f32.mrb[20].mxu1  ;;  %v3660_v6 = vpop.f32.mrb[21].mxu0 }
 0x124   : > { %v3661_v59 = vadd.f32 %v3660_v6, %v3659_v61  ;;  %v3706_v4 = vpop.f32.mrb[21].mxu1  ;;  %v3662_v48 = vpop.f32.mrb[22].mxu0 }
 0x125   : > { %v3707_v37 = vadd.f32 %v3706_v4, %v3705_v53  ;;  %v3708_v57 = vpop.f32.mrb[22].mxu1  ;;  %v3663_v38 = vpop.f32.mrb[23].mxu0 }
 0x126   : > { %v3664_v26 = vadd.f32 %v3663_v38, %v3662_v48  ;;  %v3709_v28 = vpop.f32.mrb[23].mxu1 }
 0x127   : > { %v1334_v35 = vadd.f32 %v3707_v37, %v3661_v59  ;;  %v3710_v21 = vadd.f32 %v3709_v28, %v3708_v57 }
 0x129   : > { %v5087_v62 = vadd.f32 %v1334_v35, %v5068_v7  ;;  %v1337_v29 = vadd.f32 %v3710_v21, %v3664_v26 }
 0x12a   : > { %v3665_v39 = vpop.f32.mrb[24].mxu0 }
 0x12b   : > { %v5090_v54 = vadd.f32 %v1337_v29, %v5070_v17  ;;  %v3711_v18 = vpop.f32.mrb[24].mxu1  ;;  %v3666_v60 = vpop.f32.mrb[25].mxu0 }
 0x12c   : > { %v3667_v50 = vadd.f32 %v3666_v60, %v3665_v39  ;;  %v3712_v43 = vpop.f32.mrb[25].mxu1  ;;  %v3668_v45 = vpop.f32.mrb[26].mxu0 }
 0x12d   : > { %v3713_v2 = vadd.f32 %v3712_v43, %v3711_v18  ;;  %v3714_v55 = vpop.f32.mrb[26].mxu1  ;;  %v3669_v14 = vpop.f32.mrb[27].mxu0 }
 0x12e   : > { %v3670_v33 = vadd.f32 %v3669_v14, %v3668_v45  ;;  %v3715_v51 = vpop.f32.mrb[27].mxu1 }
 0x12f   : > { %v1342_v63 = vadd.f32 %v3713_v2, %v3667_v50  ;;  %v3716_v32 = vadd.f32 %v3715_v51, %v3714_v55  ;;  %v2712_v50 = vlaneseq }
 0x131   : > { %v5093_v7 = vadd.f32 %v1342_v63, %v5072_v11  ;;  %v1345_v3 = vadd.f32 %v3716_v32, %v3670_v33 }
 0x132   : > { %v3671_v56 = vpop.f32.mrb[28].mxu0 }
 0x133   : > { %v5096_v17 = vadd.f32 %v1345_v3, %v5074_v13  ;;  %v3717_v42 = vpop.f32.mrb[28].mxu1  ;;  %v3672_v23 = vpop.f32.mrb[29].mxu0  ;;  %v5113_v3 = vshrl.u32 %v2712_v50, 7 }
 0x134   : > { %v3673_v30 = vadd.f32 %v3672_v23, %v3671_v56  ;;  %v3718_v40 = vpop.f32.mrb[29].mxu1  ;;  %v3674_v52 = vpop.f32.mrb[30].mxu0 }
 0x135   : > { %v3719_v8 = vadd.f32 %v3718_v40, %v3717_v42  ;;  %v3720_v9 = vpop.f32.mrb[30].mxu1  ;;  %v3675_v49 = vpop.f32.mrb[31].mxu0 }
 0x136   : > { %v3676_v5 = vadd.f32 %v3675_v49, %v3674_v52  ;;  %v3721_v15 = vpop.f32.mrb[31].mxu1  ;;  %v2714_v52 = vadd.s32 8, %v5113_v3 }
 0x137   : > { %v1350_v20 = vadd.f32 %v3719_v8, %v3673_v30  ;;  %v3722_v44 = vadd.f32 %v3721_v15, %v3720_v9 }
 0x139   : > { %v5099_v11 = vadd.f32 %v1350_v20, %v5076_v10  ;;  %v1353_v31 = vadd.f32 %v3722_v44, %v3676_v5 }
 0x13a   : > { %v3677_v0 = vpop.f32.mrb[32].mxu0 }
 0x13b   : > { %v5102_v13 = vadd.f32 %v1353_v31, %v5078_v1  ;;  %v3723_v22 = vpop.f32.mrb[32].mxu1  ;;  %v3678_v24 = vpop.f32.mrb[33].mxu0 }
 0x13c   : > { %v3679_v19 = vadd.f32 %v3678_v24, %v3677_v0  ;;  %v3724_v25 = vpop.f32.mrb[33].mxu1  ;;  %v3680_v47 = vpop.f32.mrb[34].mxu0 }
 0x13d   : > { %v3725_v27 = vadd.f32 %v3724_v25, %v3723_v22  ;;  %v3726_v58 = vpop.f32.mrb[34].mxu1  ;;  %v3681_v12 = vpop.f32.mrb[35].mxu0 }
 0x13e   : > { %v3682_v16 = vadd.f32 %v3681_v12, %v3680_v47  ;;  %v3727_v46 = vpop.f32.mrb[35].mxu1 }
 0x13f   : > { %v1358_v61 = vadd.f32 %v3725_v27, %v3679_v19  ;;  %v3728_v53 = vadd.f32 %v3727_v46, %v3726_v58  ;;  %v5133_v27 = vadd.s32 16, %v5113_v3 }
 0x141   : > { %v5105_v10 = vadd.f32 %v1358_v61, %v5080_v36  ;;  %v1361_v6 = vadd.f32 %v3728_v53, %v3682_v16 }
 0x142   : > { %v3683_v59 = vpop.f32.mrb[36].mxu0 }
 0x143   : > { %v5108_v1 = vadd.f32 %v1361_v6, %v5082_v34  ;;  %v3729_v4 = vpop.f32.mrb[36].mxu1  ;;  %v3684_v48 = vpop.f32.mrb[37].mxu0 }
 0x144   : > { %v3685_v37 = vadd.f32 %v3684_v48, %v3683_v59  ;;  %v3730_v57 = vpop.f32.mrb[37].mxu1  ;;  %v3686_v38 = vpop.f32.mrb[38].mxu0 }
 0x145   : > { %v3731_v26 = vadd.f32 %v3730_v57, %v3729_v4  ;;  %v3732_v28 = vpop.f32.mrb[38].mxu1  ;;  %v3687_v35 = vpop.f32.mrb[39].mxu0  ;;  %v5143_v57 = vadd.s32 24, %v5113_v3 }
 0x146   : > { %v3733_v21 = vpop.f32.mrb[39].mxu1 }
 0x147   : > { %v1366_v29 = vadd.f32 %v3731_v26, %v3685_v37 }
 0x149   : > { %v5111_v39 = vadd.f32 %v1366_v29, %v5084_v41 }
 0x14a   : > { %v3751_v36 = vpop.f32.mrb[40].mxu0 }
 0x14b   : > { %v3797_v18 = vpop.f32.mrb[40].mxu1  ;;  %v3752_v60 = vpop.f32.mrb[41].mxu0 }
 0x14c   : > { %v3753_v43 = vadd.f32 %v3752_v60, %v3751_v36  ;;  %v3798_v34 = vpop.f32.mrb[41].mxu1  ;;  %v3754_v45 = vpop.f32.mrb[42].mxu0 }
 0x14d   : > { %v3799_v2 = vadd.f32 %v3798_v34, %v3797_v18  ;;  %v3800_v55 = vpop.f32.mrb[42].mxu1  ;;  %v3755_v14 = vpop.f32.mrb[43].mxu0  ;;  %v5151_v18 = vmul.u32.u64.low 3817748708, %v5143_v57  ;;  %v5152_v60 = vmul.u32.u64.high 3817748708, %v5143_v57, %v5151_v18 }
 0x14e   : > { %v3756_v33 = vadd.f32 %v3755_v14, %v3754_v45  ;;  %v3801_v51 = vpop.f32.mrb[43].mxu1 }
 0x14f   : > { %v2038_v63 = vadd.f32 %v3799_v2, %v3753_v43  ;;  %v3802_v32 = vadd.f32 %v3801_v51, %v3800_v55 }
 0x151   : > { %v5116_v56 = vadd.f32 %v2038_v63, %v5087_v62  ;;  %v2041_v41 = vadd.f32 %v3802_v32, %v3756_v33  ;;  %v5123_v62 = vmul.u32.u64.low 3817748708, %v5113_v3  ;;  %v5124_v0 = vmul.u32.u64.high 3817748708, %v5113_v3, %v5123_v62 }
 0x152   : > { %v3757_v42 = vpop.f32.mrb[44].mxu0  ;;  %v5158_v63 = vadd.s32 32, %v5113_v3 }
 0x153   : > { %v5119_v23 = vadd.f32 %v2041_v41, %v5090_v54  ;;  %v3803_v30 = vpop.f32.mrb[44].mxu1  ;;  %v3758_v40 = vpop.f32.mrb[45].mxu0  ;;  %v5126_v54 = vmul.u32.u64.low 3817748708, %v2714_v52  ;;  %v5127_v19 = vmul.u32.u64.high 3817748708, %v2714_v52, %v5126_v54  ;;  %v2728_v35 = vshrl.u32 %v5124_v0, 3 }
 0x154   : > { %v3759_v8 = vadd.f32 %v3758_v40, %v3757_v42  ;;  %v3804_v9 = vpop.f32.mrb[45].mxu1  ;;  %v3760_v49 = vpop.f32.mrb[46].mxu0 }
 0x155   : > { %v3805_v5 = vadd.f32 %v3804_v9, %v3803_v30  ;;  %v3806_v15 = vpop.f32.mrb[46].mxu1  ;;  %v3761_v20 = vpop.f32.mrb[47].mxu0  ;;  %v2739_v21 = vshrl.u32 %v5127_v19, 3  ;;  %v2729_v2 = vmul.u32 9, %v2728_v35  ;;  %v5180_v19 = vadd.s32 48, %v5113_v3 }
 0x156   : > { %v3762_v44 = vadd.f32 %v3761_v20, %v3760_v49  ;;  %v3807_v31 = vpop.f32.mrb[47].mxu1 }
 0x157   : > { %v2046_v22 = vadd.f32 %v3805_v5, %v3759_v8  ;;  %v3808_v24 = vadd.f32 %v3807_v31, %v3806_v15  ;;  %v2740_v55 = vmul.u32 9, %v2739_v21  ;;  %v2730_v49 = vsub.s32 %v5113_v3, %v2729_v2 }
 0x158   : > { %v5168_v15 = vmul.u32.u64.low 3817748708, %v5158_v63  ;;  %v5169_v20 = vmul.u32.u64.high 3817748708, %v5158_v63, %v5168_v15 }
 0x159   : > { %v5130_v25 = vadd.f32 %v2046_v22, %v5093_v7  ;;  %v2049_v47 = vadd.f32 %v3808_v24, %v3762_v44  ;;  %v5139_v37 = vmul.u32.u64.low 3817748708, %v5133_v27  ;;  %v5140_v7 = vmul.u32.u64.high 3817748708, %v5133_v27, %v5139_v37 }
 0x15a   : > { %v3763_v58 = vpop.f32.mrb[48].mxu0  ;;  %v5165_v5 = vsub.s32 %v2714_v52, %v2740_v55  ;;  %v2761_v24 = vshrl.u32 %v5152_v60, 3  ;;  %vm2821_vm2 = vcmp.ne.s32.totalorder %v2730_v49, 0  ;;  %vm2830_vm3 = vcmp.lt.s32.totalorder %v2730_v49, 0 }
 0x15b   : > { %v5136_v12 = vadd.f32 %v2049_v47, %v5096_v17  ;;  %v3809_v16 = vpop.f32.mrb[48].mxu1  ;;  %v3764_v46 = vpop.f32.mrb[49].mxu0  ;;  %v2750_v30 = vshrl.u32 %v5140_v7, 3  ;;  %v5191_v37 = vmul.u32.u64.low 3817748708, %v5180_v19  ;;  %v5192_v7 = vmul.u32.u64.high 3817748708, %v5180_v19, %v5191_v37  ;;  %vm5199_vm6 = vmand %vm2830_vm3, %vm2821_vm2 }
 0x15c   : > { %v3765_v61 = vadd.f32 %v3764_v46, %v3763_v58  ;;  %v3810_v53 = vpop.f32.mrb[49].mxu1  ;;  %v3766_v6 = vpop.f32.mrb[50].mxu0  ;;  %vm2822_vm4 = vcmp.ne.s32.totalorder %v5165_v5, 0  ;;  %vm2831_vm5 = vcmp.lt.s32.totalorder %v5165_v5, 0  ;;  %v2772_v35 = vshrl.u32 %v5169_v20, 3 }
 0x15d   : > { %v3811_v59 = vadd.f32 %v3810_v53, %v3809_v16  ;;  %v3812_v4 = vpop.f32.mrb[50].mxu1  ;;  %v3767_v48 = vpop.f32.mrb[51].mxu0  ;;  %v2751_v22 = vmul.u32 9, %v2750_v30  ;;  %vm5206_vm7 = vmand %vm2831_vm5, %vm2822_vm4  ;;  %v5235_v30 = vadd.s32 64, %v5113_v3 }
 0x15e   : > { %v3768_v38 = vadd.f32 %v3767_v48, %v3766_v6  ;;  %v3813_v26 = vpop.f32.mrb[51].mxu1  ;;  %v2848_v48 = vadd.s32 9, %v2730_v49 }
 0x15f   : > { %v2054_v28 = vadd.f32 %v3811_v59, %v3765_v61  ;;  %v3814_v17 = vadd.f32 %v3813_v26, %v3812_v4  ;;  %v5188_v59 = vsub.s32 %v5133_v27, %v2751_v22  ;;  %v2762_v4 = vmul.u32 9, %v2761_v24  ;;  %v5255_v22 = vld [vmem:[%s5455_s2] ss:$0 sm:$0xff] }
 0x160   : > { %v2849_v27 = vadd.s32 9, %v5165_v5 }
 0x161   : > { %v5148_v29 = vadd.f32 %v2054_v28, %v5099_v11  ;;  %v2057_v36 = vadd.f32 %v3814_v17, %v3768_v38  ;;  %v5161_v11 = vadd.s32 40, %v5113_v3  ;;  %v5195_v38 = vadd.s32 56, %v5113_v3 }
 0x162   : > { %v3769_v50 = vpop.f32.mrb[52].mxu0  ;;  %vm2823_vm8 = vcmp.ne.s32.totalorder %v5188_v59, 0  ;;  %vm2832_vm9 = vcmp.lt.s32.totalorder %v5188_v59, 0  ;;  %v5218_v18 = vsub.s32 %v5143_v57, %v2762_v4  ;;  %v2794_v3 = vshrl.u32 %v5192_v7, 3 }
 0x163   : > { %v5155_v43 = vadd.f32 %v2057_v36, %v5102_v13  ;;  %v3815_v34 = vpop.f32.mrb[52].mxu1  ;;  %v3770_v45 = vpop.f32.mrb[53].mxu0  ;;  %v5172_v44 = vmul.u32.u64.low 3817748708, %v5161_v11  ;;  %v5173_v31 = vmul.u32.u64.high 3817748708, %v5161_v11, %v5172_v44  ;;  %vm5230_vm10 = vmand %vm2832_vm9, %vm2823_vm8 }
 0x164   : > { %v3771_v14 = vadd.f32 %v3770_v45, %v3769_v50  ;;  %v3816_v33 = vpop.f32.mrb[53].mxu1  ;;  %v3772_v51 = vpop.f32.mrb[54].mxu0  ;;  %v2857_v50 = vsel %vm5199_vm6, %v2848_v48, %v2730_v49  ;;  %vm2824_vm12 = vcmp.ne.s32.totalorder %v5218_v18, 0  ;;  %vm2833_vm13 = vcmp.lt.s32.totalorder %v5218_v18, 0 }
 0x165   : > { %v3817_v32 = vadd.f32 %v3816_v33, %v3815_v34  ;;  %v3818_v41 = vpop.f32.mrb[54].mxu1  ;;  %v3773_v42 = vpop.f32.mrb[55].mxu0  ;;  %v2783_v21 = vshrl.u32 %v5173_v31, 3  ;;  %v5223_v34 = vmul.u32.u64.low 3817748708, %v5195_v38  ;;  %v5224_v45 = vmul.u32.u64.high 3817748708, %v5195_v38, %v5223_v34  ;;  %vm5257_vm15 = vmand %vm2833_vm13, %vm2824_vm12 }
 0x166   : > { %v3774_v13 = vadd.f32 %v3773_v42, %v3772_v51  ;;  %v3819_v40 = vpop.f32.mrb[55].mxu1  ;;  %vm5237_vm11 = vcmp.ne.s32.totalorder %v2857_v50, 8 }
 0x167   : > { %v2062_v8 = vadd.f32 %v3817_v32, %v3771_v14  ;;  %v3820_v9 = vadd.f32 %v3819_v40, %v3818_v41  ;;  %v2850_v14 = vadd.s32 9, %v5188_v59  ;;  %v2773_v41 = vmul.u32 9, %v2772_v35 }
 0x168   : > { %v2784_v42 = vmul.u32 9, %v2783_v21 }
 0x169   : > { %v5176_v62 = vadd.f32 %v2062_v8, %v5105_v10  ;;  %v2065_v0 = vadd.f32 %v3820_v9, %v3774_v13  ;;  %v2859_v31 = vsel %vm5230_vm10, %v2850_v14, %v5188_v59  ;;  %v2795_v59 = vmul.u32 9, %v2794_v3 }
 0x16a   : > { %v3775_v54 = vpop.f32.mrb[56].mxu0  ;;  %vm5283_vm0 = vcmp.ne.s32.totalorder %v2859_v31, 8 }
 0x16b   : > { %v5183_v52 = vadd.f32 %v2065_v0, %v5108_v1  ;;  %v3821_v47 = vpop.f32.mrb[56].mxu1  ;;  %v3776_v58 = vpop.f32.mrb[57].mxu0  ;;  %v2851_v0 = vadd.s32 9, %v5218_v18 }
 0x16c   : > { %v3777_v16 = vadd.f32 %v3776_v58, %v3775_v54  ;;  %v3822_v46 = vpop.f32.mrb[57].mxu1  ;;  %v3778_v61 = vpop.f32.mrb[58].mxu0  ;;  %v5262_v54 = vsub.s32 %v5158_v63, %v2773_v41 }
 0x16d   : > { %v3823_v10 = vadd.f32 %v3822_v46, %v3821_v47  ;;  %v3824_v53 = vpop.f32.mrb[58].mxu1  ;;  %v3779_v6 = vpop.f32.mrb[59].mxu0  ;;  %v5265_v47 = vsub.s32 %v5161_v11, %v2784_v42  ;;  %v2805_v11 = vshrl.u32 %v5224_v45, 3  ;;  %v2860_v7 = vsel %vm5257_vm15, %v2851_v0, %v5218_v18 }
 0x16e   : > { %v3825_v1 = vpop.f32.mrb[59].mxu1  ;;  %vm2825_vm1 = vcmp.ne.s32.totalorder %v5262_v54, 0  ;;  %vm2834_vm2 = vcmp.lt.s32.totalorder %v5262_v54, 0  ;;  %v2852_v34 = vadd.s32 9, %v5262_v54  ;;  %v5300_v45 = vsub.s32 %v5180_v19, %v2795_v59 }
 0x16f   : > { %v2070_v26 = vadd.f32 %v3823_v10, %v3777_v16  ;;  %v5268_v58 = vmul.u32.u64.low 3817748708, %v5235_v30  ;;  %v5269_v16 = vmul.u32.u64.high 3817748708, %v5235_v30, %v5268_v58  ;;  %v4158_v10 = vmov 0.0   ;;  %vm5307_vm5 = vmand %vm2834_vm2, %vm2825_vm1 }
 0x170   : > { %v3499_v53 = vsel %vm5237_vm11, 1.0, %v4158_v10  ;;  %vm2826_vm3 = vcmp.ne.s32.totalorder %v5265_v47, 0  ;;  %vm2835_vm4 = vcmp.lt.s32.totalorder %v5265_v47, 0  ;;  %v3501_v19 = vsel %vm5283_vm0, 1.0, %v4158_v10 }
 0x171   : > { %v5213_v36 = vadd.f32 %v2070_v26, %v5111_v39  ;;  %v2858_v39 = vsel %vm5206_vm7, %v2849_v27, %v5165_v5  ;;  %vm5316_vm6 = vcmp.ne.s32.totalorder %v2860_v7, 8  ;;  %vm5322_vm7 = vmand %vm2835_vm4, %vm2826_vm3  ;;  %v2816_v42 = vshrl.u32 %v5269_v16, 3 }
 0x172   : > { %v3843_v60 = vpop.f32.mrb[60].mxu0  ;;  %vm5243_vm14 = vcmp.ne.s32.totalorder %v2858_v39, 8  ;;  %vm2827_vm8 = vcmp.ne.s32.totalorder %v5300_v45, 0  ;;  %vm2836_vm9 = vcmp.lt.s32.totalorder %v5300_v45, 0  ;;  %v3502_v24 = vsel %vm5316_vm6, 1.0, %v4158_v10 }
 0x173   : > { %v3889_v2 = vpop.f32.mrb[60].mxu1  ;;  %v3844_v55 = vpop.f32.mrb[61].mxu0  ;;  %v3500_v63 = vsel %vm5243_vm14, 1.0, %v4158_v10  ;;  %v2854_v16 = vadd.s32 9, %v5300_v45  ;;  %vm5356_vm10 = vmand %vm2836_vm9, %vm2827_vm8 }
 0x174   : > { %v3845_v33 = vadd.f32 %v3844_v55, %v3843_v60  ;;  %v3890_v51 = vpop.f32.mrb[61].mxu1  ;;  %v3846_v57 = vpop.f32.mrb[62].mxu0 }
 0x175   : > { %v3891_v13 = vadd.f32 %v3890_v51, %v3889_v2  ;;  %v3892_v8 = vpop.f32.mrb[62].mxu1  ;;  %v3847_v9 = vpop.f32.mrb[63].mxu0  ;;  %v2806_v2 = vmul.u32 9, %v2805_v11  ;;  %v2853_v51 = vadd.s32 9, %v5265_v47 }
 0x176   : > { %v3848_v49 = vadd.f32 %v3847_v9, %v3846_v57  ;;  %v3893_v5 = vpop.f32.mrb[63].mxu1 }
 0x177   : > { %v2623_v20 = vadd.f32 %v3891_v13, %v3845_v33  ;;  %v3894_v44 = vadd.f32 %v3893_v5, %v3892_v8  ;;  %v2861_v5 = vsel %vm5307_vm5, %v2852_v34, %v5262_v54  ;;  %v5335_v15 = vsub.s32 %v5195_v38, %v2806_v2 }
 0x178   : > { %v2862_v0 = vsel %vm5322_vm7, %v2853_v51, %v5265_v47  ;;  %vm5360_vm11 = vcmp.ne.s32.totalorder %v2861_v5, 8 }
 0x179   : > { %v2669_v46 = vadd.f32 %v2623_v20, %v5116_v56  ;;  %v2626_v61 = vadd.f32 %v3894_v44, %v3848_v49  ;;  %vm5364_vm12 = vcmp.ne.s32.totalorder %v2862_v0, 8  ;;  %vm2828_vm13 = vcmp.ne.s32.totalorder %v5335_v15, 0 }
 0x17a   : > { %v3849_v6 = vpop.f32.mrb[64].mxu0  ;;  %vm2837_vm14 = vcmp.lt.s32.totalorder %v5335_v15, 0  ;;  %v3504_v51 = vsel %vm5364_vm12, 1.0, %v4158_v10 }
 0x17b   : > { %v5280_v4 = vadd.f32 %v5255_v22, %v2669_v46  ;;  %v2670_v1 = vadd.f32 %v2626_v61, %v5119_v23  ;;  %v3895_v56 = vpop.f32.mrb[64].mxu1  ;;  %v3850_v48 = vpop.f32.mrb[65].mxu0  ;;  %v2817_v46 = vmul.u32 9, %v2816_v42  ;;  %vm5387_vm15 = vmand %vm2837_vm14, %vm2828_vm13 }
 0x17c   : > { %v3851_v26 = vadd.f32 %v3850_v48, %v3849_v6  ;;  %v3896_v28 = vpop.f32.mrb[65].mxu1  ;;  %v3852_v27 = vpop.f32.mrb[66].mxu0 }
 0x17d   : > { %v2893_v23 = vmul.f32 %v3499_v53, %v5280_v4  ;;  %v5295_v17 = vadd.f32 %v5255_v22, %v2670_v1  ;;  %v3897_v35 = vadd.f32 %v3896_v28, %v3895_v56  ;;  %v3898_v21 = vpop.f32.mrb[66].mxu1  ;;  %v3853_v60 = vpop.f32.mrb[67].mxu0 }
 0x17e   : > { %v3854_v18 = vadd.f32 %v3853_v60, %v3852_v27  ;;  %v3899_v50 = vpop.f32.mrb[67].mxu1  ;;  %v2863_v27 = vsel %vm5356_vm10, %v2854_v16, %v5300_v45 }
 0x17f   : > { %v2894_v55 = vmul.f32 %v3500_v63, %v5295_v17  ;;  %v2631_v39 = vadd.f32 %v3897_v35, %v3851_v26  ;;  %v3900_v14 = vadd.f32 %v3899_v50, %v3898_v21  ;;  %v2917_v57 = vmul.f32 %v2893_v23, %v5280_v4 }
 0x180   : > { %v3503_v50 = vsel %vm5360_vm11, 1.0, %v4158_v10  ;;  %vm5395_vm0 = vcmp.ne.s32.totalorder %v2863_v27, 8 }
 0x181   : > { %v2902_v13 = vadd.f32 %v2894_v55, %v2893_v23  ;;  %v2918_v40 = vmul.f32 %v2894_v55, %v5295_v17  ;;  %v2671_v8 = vadd.f32 %v2631_v39, %v5130_v25  ;;  %v2634_v9 = vadd.f32 %v3900_v14, %v3854_v18 }
 0x182   : > { %v3855_v49 = vpop.f32.mrb[68].mxu0  ;;  %v2818_v23 = vsub.s32 %v5235_v30, %v2817_v46  ;;  %v2855_v55 = vadd.s32 9, %v5335_v15 }
 0x183   : > { %v2926_v3 = vadd.f32 %v2918_v40, %v2917_v57  ;;  %v5338_v20 = vadd.f32 %v5255_v22, %v2671_v8  ;;  %v2672_v44 = vadd.f32 %v2634_v9, %v5136_v12  ;;  %v3901_v25 = vpop.f32.mrb[68].mxu1  ;;  %v3856_v31 = vpop.f32.mrb[69].mxu0 }
 0x184   : > { %v3857_v54 = vadd.f32 %v3856_v31, %v3855_v49  ;;  %v3902_v58 = vpop.f32.mrb[69].mxu1  ;;  %v3858_v38 = vpop.f32.mrb[70].mxu0  ;;  %vm2829_vm1 = vcmp.ne.s32.totalorder %v2818_v23, 0  ;;  %vm2838_vm2 = vcmp.lt.s32.totalorder %v2818_v23, 0  ;;  %v2864_v5 = vsel %vm5387_vm15, %v2855_v55, %v5335_v15 }
 0x185   : > { %v2895_v61 = vmul.f32 %v3501_v19, %v5338_v20  ;;  %v5350_v12 = vadd.f32 %v5255_v22, %v2672_v44  ;;  %v3903_v53 = vadd.f32 %v3902_v58, %v3901_v25  ;;  %v3904_v63 = vpop.f32.mrb[70].mxu1  ;;  %v3859_v6 = vpop.f32.mrb[71].mxu0  ;;  %vm5408_vm3 = vmand %vm2838_vm2, %vm2829_vm1  ;;  %vm2873_vm4 = vcmp.ne.s32.totalorder %v2864_v5, 8 }
 0x186   : > { %v3860_v11 = vadd.f32 %v3859_v6, %v3858_v38  ;;  %v3905_v1 = vpop.f32.mrb[71].mxu1 }
 0x187   : > { %v2903_v48 = vadd.f32 %v2902_v13, %v2895_v61  ;;  %v2919_v37 = vmul.f32 %v2895_v61, %v5338_v20  ;;  %v2896_v7 = vmul.f32 %v3502_v24, %v5350_v12  ;;  %v2639_v26 = vadd.f32 %v3903_v53, %v3857_v54 }
 0x188   : > { %v3906_v28 = vadd.f32 %v3905_v1, %v3904_v63  ;;  %v3505_v61 = vsel %vm5395_vm0, 1.0, %v4158_v10  ;;  %v3506_v1 = vsel %vm2873_vm4, 1.0, %v4158_v10 }
 0x189   : > { %v2927_v35 = vadd.f32 %v2926_v3, %v2919_v37  ;;  %v2904_v21 = vadd.f32 %v2903_v48, %v2896_v7  ;;  %v2920_v60 = vmul.f32 %v2896_v7, %v5350_v12  ;;  %v2673_v18 = vadd.f32 %v2639_v26, %v5148_v29 }
 0x18a   : > { %v2642_v34 = vadd.f32 %v3906_v28, %v3860_v11  ;;  %v3861_v2 = vpop.f32.mrb[72].mxu0  ;;  %v2856_v3 = vadd.s32 9, %v2818_v23 }
 0x18b   : > { %v2928_v39 = vadd.f32 %v2927_v35, %v2920_v60  ;;  %v5383_v45 = vadd.f32 %v5255_v22, %v2673_v18  ;;  %v3907_v14 = vpop.f32.mrb[72].mxu1  ;;  %v3862_v30 = vpop.f32.mrb[73].mxu0 }
 0x18c   : > { %v2674_v29 = vadd.f32 %v2642_v34, %v5155_v43  ;;  %v3863_v57 = vadd.f32 %v3862_v30, %v3861_v2  ;;  %v3908_v19 = vpop.f32.mrb[73].mxu1  ;;  %v3864_v41 = vpop.f32.mrb[74].mxu0 }
 0x18d   : > { %v2897_v42 = vmul.f32 %v3503_v50, %v5383_v45  ;;  %v3909_v13 = vadd.f32 %v3908_v19, %v3907_v14  ;;  %v3910_v40 = vpop.f32.mrb[74].mxu1  ;;  %v3865_v8 = vpop.f32.mrb[75].mxu0 }
 0x18e   : > { %v5401_v43 = vadd.f32 %v5255_v22, %v2674_v29  ;;  %v3866_v9 = vadd.f32 %v3865_v8, %v3864_v41  ;;  %v3911_v49 = vpop.f32.mrb[75].mxu1 }
 0x18f   : > { %v2905_v44 = vadd.f32 %v2904_v21, %v2897_v42  ;;  %v2921_v25 = vmul.f32 %v2897_v42, %v5383_v45  ;;  %v2647_v31 = vadd.f32 %v3909_v13, %v3863_v57  ;;  %v3912_v0 = vadd.f32 %v3911_v49, %v3910_v40 }
 0x190   : > { %v2898_v24 = vmul.f32 %v3504_v51, %v5401_v43 }
 0x191   : > { %v2929_v58 = vadd.f32 %v2928_v39, %v2921_v25  ;;  %v2675_v38 = vadd.f32 %v2647_v31, %v5176_v62  ;;  %v2650_v16 = vadd.f32 %v3912_v0, %v3866_v9  ;;  %v2865_v62 = vsel %vm5408_vm3, %v2856_v3, %v2818_v23 }
 0x192   : > { %v2906_v46 = vadd.f32 %v2905_v44, %v2898_v24  ;;  %v2922_v15 = vmul.f32 %v2898_v24, %v5401_v43  ;;  %v3867_v53 = vpop.f32.mrb[76].mxu0  ;;  %vm2874_vm5 = vcmp.ne.s32.totalorder %v2865_v62, 8 }
 0x193   : > { %v5418_v63 = vadd.f32 %v5255_v22, %v2675_v38  ;;  %v2676_v6 = vadd.f32 %v2650_v16, %v5183_v52  ;;  %v3913_v47 = vpop.f32.mrb[76].mxu1  ;;  %v3868_v59 = vpop.f32.mrb[77].mxu0  ;;  %v3507_v39 = vsel %vm2874_vm5, 1.0, %v4158_v10 }
 0x194   : > { %v2930_v11 = vadd.f32 %v2929_v58, %v2922_v15  ;;  %v3869_v56 = vadd.f32 %v3868_v59, %v3867_v53  ;;  %v3914_v48 = vpop.f32.mrb[77].mxu1  ;;  %v3870_v37 = vpop.f32.mrb[78].mxu0 }
 0x195   : > { %v2899_v7 = vmul.f32 %v3505_v61, %v5418_v63  ;;  %v2710_v26 = vadd.f32 %v5255_v22, %v2676_v6  ;;  %v3915_v28 = vadd.f32 %v3914_v48, %v3913_v47  ;;  %v3916_v27 = vpop.f32.mrb[78].mxu1  ;;  %v3871_v35 = vpop.f32.mrb[79].mxu0 }
 0x196   : > { %v3917_v52 = vpop.f32.mrb[79].mxu1 }
 0x197   : > { %v2907_v21 = vadd.f32 %v2906_v46, %v2899_v7  ;;  %v2923_v60 = vmul.f32 %v2899_v7, %v5418_v63  ;;  %v2900_v18 = vmul.f32 %v3506_v1, %v2710_v26  ;;  %v2655_v23 = vadd.f32 %v3915_v28, %v3869_v56 }
 0x199   : > { %v2931_v50 = vadd.f32 %v2930_v11, %v2923_v60  ;;  %v2908_v34 = vadd.f32 %v2907_v21, %v2900_v18  ;;  %v2924_v2 = vmul.f32 %v2900_v18, %v2710_v26  ;;  %v2677_v55 = vadd.f32 %v2655_v23, %v5213_v36 }
 0x19b   : > { %v2932_v14 = vadd.f32 %v2931_v50, %v2924_v2  ;;  %v2711_v30 = vadd.f32 %v5255_v22, %v2677_v55 }
 0x19d   : > { %v2901_v33 = vmul.f32 %v3507_v39, %v2711_v30 }
 0x19f   : > { %v2909_v29 = vadd.f32 %v2908_v34, %v2901_v33  ;;  %v2925_v51 = vmul.f32 %v2901_v33, %v2711_v30 }
 0x1a1   : > { %v2910_v57 = vrot.slane %v2909_v29, 4  ;;  %v2933_v19 = vadd.f32 %v2932_v14, %v2925_v51 }
 0x1a3   : > { %v2911_v32 = vadd.f32 %v2910_v57, %v2909_v29  ;;  %v2934_v41 = vrot.slane %v2933_v19, 4 }
 0x1a5   : > { %v2912_v42 = vrot.slane %v2911_v32, 2  ;;  %v2935_v13 = vadd.f32 %v2934_v41, %v2933_v19 }
 0x1a7   : > { %v2913_v40 = vadd.f32 %v2912_v42, %v2911_v32  ;;  %v2936_v8 = vrot.slane %v2935_v13, 2 }
 0x1a9   : > { %v2914_v9 = vrot.slane %v2913_v40, 1  ;;  %v2937_v49 = vadd.f32 %v2936_v8, %v2935_v13 }
 0x1ab   : > { %v2915_v5 = vadd.f32 %v2914_v9, %v2913_v40  ;;  %v2938_v36 = vrot.slane %v2937_v49, 1 }
 0x1ad   : > { %v2916_v3 = vmul.f32 0.015625, %v2915_v5  ;;  %v2939_v10 = vadd.f32 %v2938_v36, %v2937_v49 }
 0x1af   : > { %v2940_v44 = vmul.f32 0.015625, %v2939_v10  ;;  %v2941_v25 = vmul.f32 %v2916_v3, %v2916_v3  ;;  %v2943_v22 = vsub.f32 %v5280_v4, %v2916_v3  ;;  %v2944_v31 = vsub.f32 %v5295_v17, %v2916_v3 }
 0x1b0   : > { %v2945_v0 = vsub.f32 %v5338_v20, %v2916_v3  ;;  %v2946_v24 = vsub.f32 %v5350_v12, %v2916_v3  ;;  %v2947_v54 = vsub.f32 %v5383_v45, %v2916_v3  ;;  %v2948_v58 = vsub.f32 %v5401_v43, %v2916_v3 }
 0x1b1   : > { %v2942_v38 = vsub.f32 %v2940_v44, %v2941_v25  ;;  %v2949_v16 = vsub.f32 %v5418_v63, %v2916_v3  ;;  %v2950_v46 = vsub.f32 %v2710_v26, %v2916_v3  ;;  %v2951_v15 = vsub.f32 %v2711_v30, %v2916_v3 }
 0x1b3   : > { %v2952_v61 = vadd.f32 1e-05, %v2942_v38 }
 0x1b5   : > { %4148 = vrsqrt.f32 %v2952_v61 }
 0x1bf   : > { %v4149_v53 = vpop.eup %4148 }
 0x1c0   : > { %v2954_v4 = vmul.f32 %v4149_v53, %v2943_v22  ;;  %v2955_v6 = vmul.f32 %v4149_v53, %v2944_v31  ;;  %v2956_v17 = vmul.f32 %v4149_v53, %v2945_v0  ;;  %v2957_v47 = vmul.f32 %v4149_v53, %v2946_v24 }
 0x1c1   : > { %v2958_v20 = vmul.f32 %v4149_v53, %v2947_v54  ;;  %v2959_v59 = vmul.f32 %v4149_v53, %v2948_v58  ;;  %v2960_v12 = vmul.f32 %v4149_v53, %v2949_v16  ;;  %v2961_v62 = vmul.f32 %v4149_v53, %v2950_v46 }
 0x1c2   : > { %v2962_v45 = vmul.f32 %v4149_v53, %v2951_v15  ;;  %vm2963_vm6 = vcmp.ge.f32.partialorder %v2954_v4, 0.0  ;;  %vm2964_vm7 = vcmp.ge.f32.partialorder %v2955_v6, 0.0  ;;  %vm2965_vm8 = vcmp.ge.f32.partialorder %v2956_v17, 0.0 }
 0x1c3   : > { %vm2966_vm9 = vcmp.ge.f32.partialorder %v2957_v47, 0.0  ;;  %vm2967_vm10 = vcmp.ge.f32.partialorder %v2958_v20, 0.0  ;;  %vm2968_vm11 = vcmp.ge.f32.partialorder %v2959_v59, 0.0  ;;  %vm2969_vm12 = vcmp.ge.f32.partialorder %v2960_v12, 0.0 }
 0x1c4   : > { %vm2970_vm13 = vcmp.ge.f32.partialorder %v2961_v62, 0.0  ;;  %vm2971_vm14 = vcmp.ge.f32.partialorder %v2962_v45, 0.0  ;;  %v2972_v43 = vmul.f32 0.2, %v2954_v4  ;;  %v2973_v63 = vmul.f32 0.2, %v2955_v6 }
 0x1c5   : > { %v2974_v11 = vmul.f32 0.2, %v2956_v17  ;;  %v2975_v1 = vmul.f32 0.2, %v2957_v47  ;;  %v2976_v56 = vmul.f32 0.2, %v2958_v20 }
 0x1c6   : > { %v2977_v48 = vmul.f32 0.2, %v2959_v59  ;;  %v2978_v37 = vmul.f32 0.2, %v2960_v12  ;;  %v2979_v7 = vmul.f32 0.2, %v2961_v62  ;;  %v2981_v26 = vsel %vm2963_vm6, %v2954_v4, %v2972_v43 }
 0x1c7   : > { %v2980_v28 = vmul.f32 0.2, %v2962_v45  ;;  %v2982_v27 = vsel %vm2964_vm7, %v2955_v6, %v2973_v63  ;;  %v2983_v35 = vsel %vm2965_vm8, %v2956_v17, %v2974_v11  ;;  %v2984_v52 = vsel %vm2966_vm9, %v2957_v47, %v2975_v1 }
 0x1c8   : > { %v2985_v21 = vsel %vm2967_vm10, %v2958_v20, %v2976_v56  ;;  %v2986_v60 = vsel %vm2968_vm11, %v2959_v59, %v2977_v48  ;;  %v2987_v18 = vsel %vm2969_vm12, %v2960_v12, %v2978_v37  ;;  %v2988_v23 = vsel %vm2970_vm13, %v2961_v62, %v2979_v7 }
 0x1c9   : > { %v2989_v50 = vsel %vm2971_vm14, %v2962_v45, %v2980_v28  ;;  %v3531_v34 = vpack.c.bf16 %v2982_v27, %v2981_v26  ;;  %v3536_v2 = vpack.c.bf16 %v2984_v52, %v2983_v35  ;;  %v3541_v55 = vpack.c.bf16 %v2986_v60, %v2985_v21 }
 0x1ca   : > { %v3527_v39 = vpack.c.bf16 %v2989_v50, %v2989_v50  ;;  %v3546_v14 = vpack.c.bf16 %v2988_v23, %v2987_v18 }
 0x1cb   : > { %3532 = vst [vmem:[%s170_s8] sm:$0xff] %v3531_v34   ;;  %3548 = vst [vmem:[%s170_s8 + $0x8] sm:$0xff] %v3536_v2  }
 0x1cc   : > { %3549 = vst [vmem:[%s170_s8 + $0x10] sm:$0xff] %v3541_v55   ;;  %3550 = vst [vmem:[%s170_s8 + $0x18] sm:$0xff] %v3546_v14  }
 0x1cd   : > { %3035 = vst [vmem:[%s170_s8 + $0x20] sm:$0xf] %v3527_v39 }
 0x1ce PF: > { %s13_s12 = sadd.s32 1, %s4156_s12  }
 0x1cf   : > { %p10_p4 = scmp.ge.s32.totalorder %s13_s12, 4  }
 0x1d1   :  { %12 = sbr.rel (!%p10_p4) target bundleno = 1 (0x1), region = 65 }

// kernel: discriminator_forward.6
= control target key start
LH: loop header
LB: loop body
LE: loop exit
PB: predicated region body
PF: predicated region fallthrough
CT: control target
= control target key end

     0   :  { %s3756_s12 = smov 0   ;;  %s4778_s0 = inlined_call_operand.vmem [shape: bf16[2,32,512], index: 0, kind: input, shape index: {}]   ;;  %s4779_s1 = inlined_call_operand.vmem [shape: bf16[4,512,256], index: 1, kind: input, shape index: {}]   ;;  %s4780_s2 = inlined_call_operand.vmem [shape: f32[1,256], index: 2, kind: input, shape index: {}]   ;;  %s4781_s3 = inlined_call_operand.vmem [shape: bf16[2,20,256], index: 3, kind: output, shape index: {}]  }
   0x1 LB: > { %s2751_s13 = sadd.s32 4294967295, %s3733_s12   ;;  %p2755_p0 = scmp.ge.s32.totalorder %s3733_s12, 1  ;;  %s3733_s12 = sphi %s3756_s12, %s13_s12  }
   0x2   : > { %p137_p1 = scmp.lt.s32.totalorder %s3733_s12, 3 }
   0x4   : > { %p138_p2 = pnand %p2755_p0, %p137_p1 }
   0x5   : > { %v3307_v0 = vld [vmem:[%s4779_s1 + $0x4] ss:$8 sps:$4 sm:$0xff] (!%p138_p2)   ;;  %v3311_v2 = vld [vmem:[%s4779_s1] ss:$8 sps:$4 sm:$0xff] (!%p138_p2)   ;;  %v3313_v4 = vld [vmem:[%s4779_s1 + $0x14] ss:$8 sps:$4 sm:$0xff] (!%p138_p2)  }
   0x6   : > { %141 = sbr.rel (%p138_p2) target bundleno = 563 (0x233), region = 32  ;;  %v3309_v1 = vld [vmem:[%s4779_s1 + $0x404] ss:$8 sps:$4 sm:$0xff] (!%p138_p2)   ;;  %595 = vmatprep.subr.bf16.mxu1 (!%p138_p2), %v3307_v0  ;;  %v3312_v3 = vld [vmem:[%s4779_s1 + $0x400] ss:$8 sps:$4 sm:$0xff] (!%p138_p2)   ;;  %p161_p3 = scmp.lt.s32.totalorder (!%p138_p2), %s2751_s13, 1 }
   0x7   : > { %1811 = vmatprep.subr.bf16.mxu0 (!%p138_p2), %v3309_v1  ;;  %596 = vmatpush1.bf16.msra.mxu1 (!%p138_p2), %v3311_v2  ;;  %v3315_v5 = vld [vmem:[%s4779_s1 + $0x414] ss:$8 sps:$4 sm:$0xff] (!%p138_p2)   ;;  %v3317_v6 = vld [vmem:[%s4779_s1 + $0x10] ss:$8 sps:$4 sm:$0xff] (!%p138_p2)   ;;  %v3319_v8 = vld [vmem:[%s4779_s1 + $0x24] ss:$8 sps:$4 sm:$0xff] (!%p138_p2)  }
   0x8   : > { %1812 = vmatpush1.bf16.msra.mxu0 (!%p138_p2), %v3312_v3  ;;  %597 = vmatprep.subr.bf16.mxu1 (!%p138_p2), %v3313_v4  ;;  %v3318_v7 = vld [vmem:[%s4779_s1 + $0x410] ss:$8 sps:$4 sm:$0xff] (!%p138_p2)   ;;  %v3321_v9 = vld [vmem:[%s4779_s1 + $0x424] ss:$8 sps:$4 sm:$0xff] (!%p138_p2)   ;;  %v3323_v10 = vld [vmem:[%s4779_s1 + $0x20] ss:$8 sps:$4 sm:$0xff] (!%p138_p2)  }
   0x9   : > { %1813 = vmatprep.subr.bf16.mxu0 (!%p138_p2), %v3315_v5  ;;  %v3324_v11 = vld [vmem:[%s4779_s1 + $0x420] ss:$8 sps:$4 sm:$0xff] (!%p138_p2)   ;;  %v3325_v12 = vld [vmem:[%s4779_s1 + $0x34] ss:$8 sps:$4 sm:$0xff] (!%p138_p2)   ;;  %v3329_v14 = vld [vmem:[%s4779_s1 + $0x30] ss:$8 sps:$4 sm:$0xff] (!%p138_p2)  }
   0xa   : > { %v3327_v13 = vld [vmem:[%s4779_s1 + $0x434] ss:$8 sps:$4 sm:$0xff] (!%p138_p2)   ;;  %v3330_v15 = vld [vmem:[%s4779_s1 + $0x430] ss:$8 sps:$4 sm:$0xff] (!%p138_p2)   ;;  %v3331_v16 = vld [vmem:[%s4779_s1 + $0x44] ss:$8 sps:$4 sm:$0xff] (!%p138_p2)  }
   0xb   : > { %598 = vmatpush1.bf16.msra.mxu1 (!%p138_p2), %v3317_v6  ;;  %v3333_v17 = vld [vmem:[%s4779_s1 + $0x444] ss:$8 sps:$4 sm:$0xff] (!%p138_p2)   ;;  %v3335_v18 = vld [vmem:[%s4779_s1 + $0x40] ss:$8 sps:$4 sm:$0xff] (!%p138_p2)   ;;  %v3337_v20 = vld [vmem:[%s4779_s1 + $0x54] ss:$8 sps:$4 sm:$0xff] (!%p138_p2)  }
   0xc   : > { %1814 = vmatpush1.bf16.msra.mxu0 (!%p138_p2), %v3318_v7  ;;  %599 = vmatprep.subr.bf16.mxu1 (!%p138_p2), %v3319_v8  ;;  %v3336_v19 = vld [vmem:[%s4779_s1 + $0x440] ss:$8 sps:$4 sm:$0xff] (!%p138_p2)   ;;  %v3339_v21 = vld [vmem:[%s4779_s1 + $0x454] ss:$8 sps:$4 sm:$0xff] (!%p138_p2)   ;;  %v3341_v22 = vld [vmem:[%s4779_s1 + $0x50] ss:$8 sps:$4 sm:$0xff] (!%p138_p2)  }
   0xd   : > { %1815 = vmatprep.subr.bf16.mxu0 %v3321_v9  ;;  %v3342_v23 = vld [vmem:[%s4779_s1 + $0x450] ss:$8 sps:$4 sm:$0xff]   ;;  %v3343_v24 = vld [vmem:[%s4779_s1 + $0x64] ss:$8 sps:$4 sm:$0xff]   ;;  %v3347_v26 = vld [vmem:[%s4779_s1 + $0x60] ss:$8 sps:$4 sm:$0xff]  }
   0xe   : > { %v3345_v25 = vld [vmem:[%s4779_s1 + $0x464] ss:$8 sps:$4 sm:$0xff]   ;;  %v3348_v27 = vld [vmem:[%s4779_s1 + $0x460] ss:$8 sps:$4 sm:$0xff]   ;;  %v3349_v28 = vld [vmem:[%s4779_s1 + $0x74] ss:$8 sps:$4 sm:$0xff]  }
   0xf   : > { %600 = vmatpush1.bf16.msra.mxu1 %v3323_v10  ;;  %v3351_v29 = vld [vmem:[%s4779_s1 + $0x474] ss:$8 sps:$4 sm:$0xff]   ;;  %v3353_v30 = vld [vmem:[%s4779_s1 + $0x70] ss:$8 sps:$4 sm:$0xff]   ;;  %v3355_v32 = vld [vmem:[%s4779_s1 + $0x84] ss:$8 sps:$4 sm:$0xff]  }
  0x10   : > { %1816 = vmatpush1.bf16.msra.mxu0 %v3324_v11  ;;  %601 = vmatprep.subr.bf16.mxu1 %v3325_v12  ;;  %v3354_v31 = vld [vmem:[%s4779_s1 + $0x470] ss:$8 sps:$4 sm:$0xff]   ;;  %v3357_v33 = vld [vmem:[%s4779_s1 + $0x484] ss:$8 sps:$4 sm:$0xff]   ;;  %v3359_v34 = vld [vmem:[%s4779_s1 + $0x80] ss:$8 sps:$4 sm:$0xff]  }
  0x11   : > { %1817 = vmatprep.subr.bf16.mxu0 %v3327_v13  ;;  %v3360_v35 = vld [vmem:[%s4779_s1 + $0x480] ss:$8 sps:$4 sm:$0xff]   ;;  %v3361_v36 = vld [vmem:[%s4779_s1 + $0x94] ss:$8 sps:$4 sm:$0xff]   ;;  %s4783_s13 = smov (!%p161_p3, %s2751_s13), 1  ;;  %vm2036_vm2 = vcmask 1044480  }
  0x12   : > { %v3363_v37 = vld [vmem:[%s4779_s1 + $0x494] ss:$8 sps:$4 sm:$0xff]   ;;  %v3365_v38 = vld [vmem:[%s4779_s1 + $0x90] ss:$8 sps:$4 sm:$0xff]   ;;  %v3367_v40 = vld [vmem:[%s4779_s1 + $0xa4] ss:$8 sps:$4 sm:$0xff]  }
  0x13   : > { %602 = vmatpush1.bf16.msra.mxu1 %v3329_v14  ;;  %v3366_v39 = vld [vmem:[%s4779_s1 + $0x490] ss:$8 sps:$4 sm:$0xff]   ;;  %v3369_v41 = vld [vmem:[%s4779_s1 + $0x4a4] ss:$8 sps:$4 sm:$0xff]   ;;  %s3247_s23 = sshll.u32 %s4783_s13, 6  ;;  %vm2589_vm15 = vcmask 1043456  }
  0x14   : > { %1818 = vmatpush1.bf16.msra.mxu0 %v3330_v15  ;;  %603 = vmatprep.subr.bf16.mxu1 %v3331_v16  ;;  %v3371_v42 = vld [vmem:[%s4779_s1 + $0xa0] ss:$8 sps:$4 sm:$0xff]   ;;  %v3373_v44 = vld [vmem:[%s4779_s1 + $0xb4] ss:$8 sps:$4 sm:$0xff]   ;;  %s3909_s5 = scalar_lea.vmem %s4778_s0, %s3247_s23  ;;  %v3377_v46 = vld [vmem:[%s4779_s1 + $0xb0] ss:$8 sps:$4 sm:$0xff]  }
  0x15   : > { %1819 = vmatprep.subr.bf16.mxu0 %v3333_v17  ;;  %v3372_v43 = vld [vmem:[%s4779_s1 + $0x4a0] ss:$8 sps:$4 sm:$0xff]   ;;  %v3375_v45 = vld [vmem:[%s4779_s1 + $0x4b4] ss:$8 sps:$4 sm:$0xff]   ;;  %v3378_v47 = vld [vmem:[%s4779_s1 + $0x4b0] ss:$8 sps:$4 sm:$0xff]  }
  0x16   : > { %v3921_v48 = vld [vmem:[%s3909_s5] sm:$0xff]  ;;  %v3924_v49 = vld [vmem:[%s3909_s5 + $0x10] sm:$0xff]  ;;  %vm1414_vm0 = vsmask.f32 5376  ;;  %vm800_vm1 = vsmask.f32 7424 }
  0x17   : > { %604 = vmatpush1.bf16.msra.mxu1 %v3335_v18  ;;  %v3379_v50 = vld [vmem:[%s4779_s1 + $0xc4] ss:$8 sps:$4 sm:$0xff]   ;;  %v3934_v52 = vcombine.high %v3921_v48, %v3924_v49  ;;  %v1315_v55 = vld [vmem:[%s3909_s5 + $0x30] sm:$0x11]  ;;  %v3383_v61 = vld [vmem:[%s4779_s1 + $0xc0] ss:$8 sps:$4 sm:$0xff]  }
  0x18   : > { %1820 = vmatpush1.bf16.msra.mxu0 %v3336_v19  ;;  %605 = vmatprep.subr.bf16.mxu1 %v3337_v20  ;;  %v3381_v51 = vld [vmem:[%s4779_s1 + $0x4c4] ss:$8 sps:$4 sm:$0xff]   ;;  %v3384_v62 = vld [vmem:[%s4779_s1 + $0x4c0] ss:$8 sps:$4 sm:$0xff]   ;;  %v3385_v2 = vld [vmem:[%s4779_s1 + $0xd4] ss:$8 sps:$4 sm:$0xff]  }
  0x19   : > { %1821 = vmatprep.subr.bf16.mxu0 %v3339_v21  ;;  %v1309_v53 = vld [vmem:[%s3909_s5] sm:$0xcc]  ;;  %627 = vmatprep.mubr.bf16.mxu1 %v3934_v52  ;;  %v3387_v3 = vld [vmem:[%s4779_s1 + $0x4d4] ss:$8 sps:$4 sm:$0xff]   ;;  %v3389_v8 = vld [vmem:[%s4779_s1 + $0xd0] ss:$8 sps:$4 sm:$0xff]  }
  0x1a   : > { %v3938_v54 = vld [vmem:[%s3909_s5 + $0x20] sm:$0xff]  ;;  %v3032_v56 = vcombine.high %v1309_v53, %v3924_v49  ;;  %v3031_v60 = vcombine.low %v1309_v53, %v3924_v49  ;;  %v3390_v9 = vld [vmem:[%s4779_s1 + $0x4d0] ss:$8 sps:$4 sm:$0xff]   ;;  %v3397_v21 = vld [vmem:[%s4779_s1 + $0xf4] ss:$8 sps:$4 sm:$0xff]   ;;  %s3291_s23 = smul.u32 24, %s4783_s13 }
  0x1b   : > { %606 = vmatpush1.bf16.msra.mxu1 %v3341_v22  ;;  %v3036_v57 = vcombine.high %v3938_v54, %v1315_v55  ;;  %v3035_v1 = vcombine.low %v3938_v54, %v1315_v55  ;;  %v3391_v12 = vld [vmem:[%s4779_s1 + $0xe4] ss:$8 sps:$4 sm:$0xff]   ;;  %v3395_v18 = vld [vmem:[%s4779_s1 + $0xe0] ss:$8 sps:$4 sm:$0xff]  }
  0x1c   : > { %1822 = vmatpush1.bf16.msra.mxu0 %v3342_v23  ;;  %607 = vmatprep.subr.bf16.mxu1 %v3343_v24  ;;  %v1433_v58 = vshrl.u32 %v3032_v56, 16  ;;  %v1436_v59 = vshll.u32 %v3032_v56, 16  ;;  %v1416_v11 = vshrl.u32 %v3031_v60, 16  ;;  %v1419_v14 = vshll.u32 %v3031_v60, 16  ;;  %v3393_v17 = vld [vmem:[%s4779_s1 + $0x4e4] ss:$8 sps:$4 sm:$0xff]   ;;  %s170_s26 = scalar_lea.vmem %s4781_s3, %s3291_s23 }
  0x1d   : > { %1823 = vmatprep.subr.bf16.mxu0 %v3345_v25  ;;  %v1441_v63 = vshrl.u32 %v3036_v57, 16  ;;  %v1444_v0 = vshll.u32 %v3036_v57, 16  ;;  %v1424_v15 = vshrl.u32 %v3035_v1, 16  ;;  %v1427_v16 = vshll.u32 %v3035_v1, 16  ;;  %v3396_v20 = vld [vmem:[%s4779_s1 + $0x4e0] ss:$8 sps:$4 sm:$0xff]  }
  0x1e   : > { %v1435_v4 = vrot.slane %v1433_v58, 2  ;;  %v1438_v5 = vrot.slane %v1436_v59, 3  ;;  %v1418_v22 = vrot.slane %v1416_v11, 2  ;;  %v1421_v23 = vrot.slane %v1419_v14, 3  ;;  %v3433_v53 = vld [vmem:[%s4779_s1 + $0x140] ss:$8 sps:$4 sm:$0xff]  }
  0x1f   : > { %608 = vmatpush1.bf16.msra.mxu1 %v3347_v26  ;;  %v1443_v6 = vrot.slane %v1441_v63, 2  ;;  %v1446_v7 = vrot.slane %v1444_v0, 3  ;;  %v1426_v24 = vrot.slane %v1424_v15, 2  ;;  %v1429_v25 = vrot.slane %v1427_v16, 3  ;;  %v3399_v26 = vld [vmem:[%s4779_s1 + $0x4f4] ss:$8 sps:$4 sm:$0xff]  }
  0x20   : > { %1824 = vmatpush1.bf16.msra.mxu0 %v3348_v27  ;;  %609 = vmatprep.subr.bf16.mxu1 %v3349_v28  ;;  %v1439_v10 = vor.u32 %v1438_v5, %v1435_v4  ;;  %v3401_v27 = vld [vmem:[%s4779_s1 + $0xf0] ss:$8 sps:$4 sm:$0xff]   ;;  %v3436_v55 = vld [vmem:[%s4779_s1 + $0x540] ss:$8 sps:$4 sm:$0xff]   ;;  %v3441_v56 = vld [vmem:[%s4779_s1 + $0x154] ss:$8 sps:$4 sm:$0xff]  }
  0x21   : > { %1825 = vmatprep.subr.bf16.mxu0 %v3351_v29  ;;  %v1447_v13 = vor.u32 %v1446_v7, %v1443_v6  ;;  %v3402_v28 = vld [vmem:[%s4779_s1 + $0x4f0] ss:$8 sps:$4 sm:$0xff]   ;;  %v3407_v29 = vld [vmem:[%s4779_s1 + $0x104] ss:$8 sps:$4 sm:$0xff]   ;;  %v3444_v57 = vld [vmem:[%s4779_s1 + $0x554] ss:$8 sps:$4 sm:$0xff]  }
  0x22   : > { %v3439_v58 = vld [vmem:[%s4779_s1 + $0x150] ss:$8 sps:$4 sm:$0xff]   ;;  %v175_v60 = vld [vmem:[%s3909_s5 + $0x20] sm:$0x33]  ;;  %v3456_v4 = vld [vmem:[%s4779_s1 + $0x574] ss:$8 sps:$4 sm:$0xff]  }
  0x23   : > { %610 = vmatpush1.bf16.msra.mxu1 %v3353_v30  ;;  %v1448_v19 = vsel %vm1414_vm0, %v1439_v10, %v1447_v13  ;;  %v1422_v30 = vor.u32 %v1421_v23, %v1418_v22  ;;  %v3442_v59 = vld [vmem:[%s4779_s1 + $0x550] ss:$8 sps:$4 sm:$0xff]   ;;  %v2763_v63 = vcombine.low %v175_v60, %v175_v60  ;;  %v3450_v0 = vld [vmem:[%s4779_s1 + $0x564] ss:$8 sps:$4 sm:$0xff]   ;;  %v3445_v1 = vld [vmem:[%s4779_s1 + $0x160] ss:$8 sps:$4 sm:$0xff]  }
  0x24   : > { %1826 = vmatpush1.bf16.msra.mxu0 %v3354_v31  ;;  %611 = vmatprep.subr.bf16.mxu1 %v3355_v32  ;;  %v1430_v31 = vor.u32 %v1429_v25, %v1426_v24  ;;  %v3412_v32 = vld [vmem:[%s4779_s1 + $0x504] ss:$8 sps:$4 sm:$0xff]   ;;  %v4090_v6 = vld [vmem:[%s3909_s5 + $0x18] sm:$0xff]  ;;  %v3460_v22 = vld [vmem:[%s4779_s1 + $0x580] ss:$8 sps:$4 sm:$0xff]  }
  0x25   : > { %1827 = vmatprep.subr.bf16.mxu0 %v3357_v33  ;;  %1843 = vmatprep.mubr.bf16.mxu0 %v1448_v19  ;;  %v3997_v33 = vcombine.low %v3921_v48, %v3924_v49  ;;  %v3430_v48 = vld [vmem:[%s4779_s1 + $0x530] ss:$8 sps:$4 sm:$0xff]   ;;  %v4087_v5 = vld [vmem:[%s3909_s5 + $0x8] sm:$0xff]  ;;  %v3465_v23 = vld [vmem:[%s4779_s1 + $0x194] ss:$8 sps:$4 sm:$0xff]  }
  0x26   : > { %v3451_v7 = vld [vmem:[%s4779_s1 + $0x170] ss:$8 sps:$4 sm:$0xff]   ;;  %v1310_v10 = vld [vmem:[%s3909_s5 + $0x8] sm:$0xcc] }
  0x27   : > { %612 = vmatpush1.bf16.msra.mxu1 %v3359_v34  ;;  %v3405_v34 = vld [vmem:[%s4779_s1 + $0x100] ss:$8 sps:$4 sm:$0xff]   ;;  %v3459_v14 = vld [vmem:[%s4779_s1 + $0x184] ss:$8 sps:$4 sm:$0xff]  }
  0x28   : > { %1828 = vmatpush1.bf16.msra.mxu0 %v3360_v35  ;;  %613 = vmatprep.subr.bf16.mxu1 %v3361_v36  ;;  %v3410_v35 = vld [vmem:[%s4779_s1 + $0x500] ss:$8 sps:$4 sm:$0xff]   ;;  %v1431_v36 = vsel %vm1414_vm0, %v1422_v30, %v1430_v31  ;;  %v3462_v15 = vld [vmem:[%s4779_s1 + $0x584] ss:$8 sps:$4 sm:$0xff]   ;;  %v3463_v30 = vld [vmem:[%s4779_s1 + $0x190] ss:$8 sps:$4 sm:$0xff]  }
  0x29   : > { %1829 = vmatprep.subr.bf16.mxu0 %v3363_v37  ;;  %v3417_v37 = vld [vmem:[%s4779_s1 + $0x114] ss:$8 sps:$4 sm:$0xff]   ;;  %v4104_v11 = vld [vmem:[%s3909_s5 + $0x28] sm:$0xff] }
  0x2a   : > { %v3457_v19 = vld [vmem:[%s4779_s1 + $0x180] ss:$8 sps:$4 sm:$0xff]  }
  0x2b   : > { %614 = vmatpush1.bf16.msra.mxu1 %v3365_v38  ;;  %v3420_v38 = vld [vmem:[%s4779_s1 + $0x514] ss:$8 sps:$4 sm:$0xff]  }
  0x2c   : > { %1830 = vmatpush1.bf16.msra.mxu0 %v3366_v39  ;;  %615 = vmatprep.subr.bf16.mxu1 %v3367_v40  ;;  %v3415_v39 = vld [vmem:[%s4779_s1 + $0x110] ss:$8 sps:$4 sm:$0xff]  }
  0x2d   : > { %1831 = vmatprep.subr.bf16.mxu0 %v3369_v41  ;;  %v3418_v40 = vld [vmem:[%s4779_s1 + $0x510] ss:$8 sps:$4 sm:$0xff]   ;;  %v3423_v41 = vld [vmem:[%s4779_s1 + $0x124] ss:$8 sps:$4 sm:$0xff]  }
  0x2f   : > { %616 = vmatpush1.bf16.msra.mxu1 %v3371_v42  ;;  %v3426_v42 = vld [vmem:[%s4779_s1 + $0x524] ss:$8 sps:$4 sm:$0xff]  }
  0x30   : > { %1832 = vmatpush1.bf16.msra.mxu0 %v3372_v43  ;;  %617 = vmatprep.subr.bf16.mxu1 %v3373_v44  ;;  %v3421_v43 = vld [vmem:[%s4779_s1 + $0x120] ss:$8 sps:$4 sm:$0xff]  }
  0x31   : > { %1833 = vmatprep.subr.bf16.mxu0 %v3375_v45  ;;  %v3424_v44 = vld [vmem:[%s4779_s1 + $0x520] ss:$8 sps:$4 sm:$0xff]   ;;  %v3429_v45 = vld [vmem:[%s4779_s1 + $0x134] ss:$8 sps:$4 sm:$0xff]  }
  0x33   : > { %618 = vmatpush1.bf16.msra.mxu1 %v3377_v46  ;;  %v3432_v46 = vld [vmem:[%s4779_s1 + $0x534] ss:$8 sps:$4 sm:$0xff]  }
  0x34   : > { %1834 = vmatpush1.bf16.msra.mxu0 %v3378_v47  ;;  %619 = vmatprep.subr.bf16.mxu1 %v3379_v50  ;;  %v3427_v47 = vld [vmem:[%s4779_s1 + $0x130] ss:$8 sps:$4 sm:$0xff]   ;;  %v3435_v50 = vld [vmem:[%s4779_s1 + $0x144] ss:$8 sps:$4 sm:$0xff]  }
  0x35   : > { %1835 = vmatprep.subr.bf16.mxu0 %v3381_v51  ;;  %v3438_v51 = vld [vmem:[%s4779_s1 + $0x544] ss:$8 sps:$4 sm:$0xff]  }
  0x37   : > { %620 = vmatpush1.bf16.msra.mxu1 %v3383_v61  ;;  %v3447_v61 = vld [vmem:[%s4779_s1 + $0x164] ss:$8 sps:$4 sm:$0xff]  }
  0x38   : > { %1836 = vmatpush1.bf16.msra.mxu0 %v3384_v62  ;;  %621 = vmatprep.subr.bf16.mxu1 %v3385_v2  ;;  %v2764_v62 = vcombine.high %v175_v60, %v175_v60  ;;  %v3448_v2 = vld [vmem:[%s4779_s1 + $0x560] ss:$8 sps:$4 sm:$0xff]  }
  0x39   : > { %1837 = vmatprep.subr.bf16.mxu0 %v3387_v3  ;;  %v3453_v3 = vld [vmem:[%s4779_s1 + $0x174] ss:$8 sps:$4 sm:$0xff]  }
  0x3b   : > { %622 = vmatpush1.bf16.msra.mxu1 %v3389_v8  ;;  %v4097_v8 = vcombine.high %v4087_v5, %v4090_v6 }
  0x3c   : > { %1838 = vmatpush1.bf16.msra.mxu0 %v3390_v9  ;;  %623 = vmatprep.subr.bf16.mxu1 %v3391_v12  ;;  %v3454_v9 = vld [vmem:[%s4779_s1 + $0x570] ss:$8 sps:$4 sm:$0xff]  }
  0x3d   : > { %1839 = vmatprep.subr.bf16.mxu0 %v3393_v17  ;;  %v1316_v12 = vld [vmem:[%s3909_s5 + $0x38] sm:$0x11] }
  0x3e   : > { %v3038_v16 = vcombine.high %v4104_v11, %v1316_v12 }
  0x3f   : > { %624 = vmatpush1.bf16.msra.mxu1 %v3395_v18 }
  0x40   : > { %1840 = vmatpush1.bf16.msra.mxu0 %v3396_v20  ;;  %625 = vmatprep.subr.bf16.mxu1 %v3397_v21  ;;  %v1475_v20 = vshrl.u32 %v3038_v16, 16  ;;  %v1478_v21 = vshll.u32 %v3038_v16, 16  ;;  %v3509_v16 = vld [vmem:[%s4779_s1 + $0x200] ss:$8 sps:$4 sm:$0xff]  }
  0x41   : > { %1841 = vmatprep.subr.bf16.mxu0 %v3399_v26  ;;  %v3468_v26 = vld [vmem:[%s4779_s1 + $0x594] ss:$8 sps:$4 sm:$0xff]  }
  0x43   : > { %626 = vmatpush1.bf16.msra.mxu1 %v3401_v27  ;;  %v1477_v27 = vrot.slane %v1475_v20, 2 }
  0x44   : > { %1842 = vmatpush1.bf16.msra.mxu0 %v3402_v28  ;;  %646 = vmatprep.subr.bf16.mxu1 %v3407_v29  ;;  %v1480_v28 = vrot.slane %v1478_v21, 3  ;;  %v3521_v21 = vld [vmem:[%s4779_s1 + $0x214] ss:$8 sps:$4 sm:$0xff]  }
  0x45   : > { %1862 = vmatprep.subr.bf16.mxu0 %v3412_v32 }
  0x46   : > { %628 = vmatmul.mubr.bf16.vlgmr.msra.gmra.mrb[0].mxu1 %v3997_v33  ;;  %v4134_v32 = vor.u32 %v1480_v28, %v1477_v27  ;;  %v3532_v27 = vld [vmem:[%s4779_s1 + $0x624] ss:$8 sps:$4 sm:$0xff]   ;;  %v814_v28 = vshrl.u32 %v3934_v52, 16 }
  0x47   : > { %1844 = vmatmul.mubr.bf16.vlgmr.msra.gmra.mrb[0].mxu0 %v1431_v36  ;;  %647 = vmatpush1.bf16.msra.mxu1 %v3405_v34  ;;  %v3471_v34 = vld [vmem:[%s4779_s1 + $0x1a4] ss:$8 sps:$4 sm:$0xff]  }
  0x48   : > { %1863 = vmatpush1.bf16.msra.mxu0 %v3410_v35  ;;  %648 = vmatprep.subr.bf16.mxu1 %v3417_v37  ;;  %v3474_v35 = vld [vmem:[%s4779_s1 + $0x5a4] ss:$8 sps:$4 sm:$0xff]   ;;  %v3469_v37 = vld [vmem:[%s4779_s1 + $0x1a0] ss:$8 sps:$4 sm:$0xff]  }
  0x49   : > { %1864 = vmatprep.subr.bf16.mxu0 %v3420_v38  ;;  %1853 = vmatprep.mubr.bf16.mxu0 %v1447_v13  ;;  %v3034_v13 = vcombine.high %v1310_v10, %v4090_v6  ;;  %v3472_v38 = vld [vmem:[%s4779_s1 + $0x5a0] ss:$8 sps:$4 sm:$0xff]  }
  0x4a   : > { %637 = vmatprep.mubr.bf16.mxu1 %v2764_v62  ;;  %v3495_v62 = vld [vmem:[%s4779_s1 + $0x1e0] ss:$8 sps:$4 sm:$0xff]  }
  0x4b   : > { %649 = vmatpush1.bf16.msra.mxu1 %v3415_v39  ;;  %v1467_v17 = vshrl.u32 %v3034_v13, 16  ;;  %v1470_v18 = vshll.u32 %v3034_v13, 16  ;;  %v3477_v39 = vld [vmem:[%s4779_s1 + $0x1b4] ss:$8 sps:$4 sm:$0xff]  }
  0x4c   : > { %1865 = vmatpush1.bf16.msra.mxu0 %v3418_v40  ;;  %650 = vmatprep.subr.bf16.mxu1 %v3423_v41  ;;  %v3480_v40 = vld [vmem:[%s4779_s1 + $0x5b4] ss:$8 sps:$4 sm:$0xff]   ;;  %v3475_v41 = vld [vmem:[%s4779_s1 + $0x1b0] ss:$8 sps:$4 sm:$0xff]  }
  0x4d   : > { %1866 = vmatprep.subr.bf16.mxu0 %v3426_v42  ;;  %v1469_v24 = vrot.slane %v1467_v17, 2  ;;  %v1472_v25 = vrot.slane %v1470_v18, 3  ;;  %v3478_v42 = vld [vmem:[%s4779_s1 + $0x5b0] ss:$8 sps:$4 sm:$0xff]   ;;  %v4223_v17 = vcombine.low %v4087_v5, %v4090_v6  ;;  %v3516_v18 = vld [vmem:[%s4779_s1 + $0x600] ss:$8 sps:$4 sm:$0xff]  }
  0x4e   : > { %638 = vmatmul.mubr.bf16.gmra.mrb[4].mxu1 %v2763_v63  ;;  %v3498_v63 = vld [vmem:[%s4779_s1 + $0x5e0] ss:$8 sps:$4 sm:$0xff]   ;;  %v3524_v5 = vld [vmem:[%s4779_s1 + $0x614] ss:$8 sps:$4 sm:$0xff]  }
  0x4f   : > { %1854 = vmatmul.mubr.bf16.gmra.mrb[4].mxu0 %v1430_v31  ;;  %651 = vmatpush1.bf16.msra.mxu1 %v3421_v43  ;;  %v1473_v29 = vor.u32 %v1472_v25, %v1469_v24  ;;  %v3466_v31 = vld [vmem:[%s4779_s1 + $0x590] ss:$8 sps:$4 sm:$0xff]   ;;  %v3483_v43 = vld [vmem:[%s4779_s1 + $0x1c4] ss:$8 sps:$4 sm:$0xff]   ;;  %v816_v25 = vshll.u32 %v3934_v52, 16 }
  0x50   : > { %1867 = vmatpush1.bf16.msra.mxu0 %v3424_v44  ;;  %652 = vmatprep.subr.bf16.mxu1 %v3429_v45  ;;  %v3486_v44 = vld [vmem:[%s4779_s1 + $0x5c4] ss:$8 sps:$4 sm:$0xff]   ;;  %v3481_v45 = vld [vmem:[%s4779_s1 + $0x1c0] ss:$8 sps:$4 sm:$0xff]   ;;  %v3522_v24 = vld [vmem:[%s4779_s1 + $0x610] ss:$8 sps:$4 sm:$0xff]  }
  0x51   : > { %1868 = vmatprep.subr.bf16.mxu0 %v3432_v46  ;;  %678 = vmatprep.mubr.bf16.mxu1 %v4097_v8  ;;  %v1482_v36 = vsel %vm1414_vm0, %v1473_v29, %v4134_v32  ;;  %v3484_v46 = vld [vmem:[%s4779_s1 + $0x5c0] ss:$8 sps:$4 sm:$0xff]   ;;  %v3535_v52 = vld [vmem:[%s4779_s1 + $0x234] ss:$8 sps:$4 sm:$0xff]  }
  0x52   : > { %1894 = vmatprep.mubr.bf16.mxu0 %v1482_v36 }
  0x53   : > { %653 = vmatpush1.bf16.msra.mxu1 %v3427_v47  ;;  %v3489_v47 = vld [vmem:[%s4779_s1 + $0x1d4] ss:$8 sps:$4 sm:$0xff]  }
  0x54   : > { %1869 = vmatpush1.bf16.msra.mxu0 %v3430_v48  ;;  %654 = vmatprep.subr.bf16.mxu1 %v3435_v50  ;;  %v3033_v48 = vcombine.low %v1310_v10, %v4090_v6  ;;  %v3037_v50 = vcombine.low %v4104_v11, %v1316_v12  ;;  %v3504_v10 = vld [vmem:[%s4779_s1 + $0x5f0] ss:$8 sps:$4 sm:$0xff]   ;;  %v3511_v12 = vld [vmem:[%s4779_s1 + $0x204] ss:$8 sps:$4 sm:$0xff]  }
  0x55   : > { %1870 = vmatprep.subr.bf16.mxu0 %v3438_v51  ;;  %v3492_v51 = vld [vmem:[%s4779_s1 + $0x5d4] ss:$8 sps:$4 sm:$0xff]  }
  0x56   : > { %v1461_v60 = vshll.u32 %v3037_v50, 16 }
  0x57   : > { %655 = vmatpush1.bf16.msra.mxu1 %v3433_v53  ;;  %v3487_v53 = vld [vmem:[%s4779_s1 + $0x1d0] ss:$8 sps:$4 sm:$0xff]  }
  0x58   : > { %1871 = vmatpush1.bf16.msra.mxu0 %v3436_v55  ;;  %656 = vmatprep.subr.bf16.mxu1 %v3441_v56  ;;  %v3490_v55 = vld [vmem:[%s4779_s1 + $0x5d0] ss:$8 sps:$4 sm:$0xff]   ;;  %v3497_v56 = vld [vmem:[%s4779_s1 + $0x1e4] ss:$8 sps:$4 sm:$0xff]  }
  0x59   : > { %1872 = vmatprep.subr.bf16.mxu0 %v3444_v57  ;;  %v1450_v57 = vshrl.u32 %v3033_v48, 16 }
  0x5b   : > { %657 = vmatpush1.bf16.msra.mxu1 %v3439_v58  ;;  %v1453_v58 = vshll.u32 %v3033_v48, 16 }
  0x5c   : > { %1873 = vmatpush1.bf16.msra.mxu0 %v3442_v59  ;;  %658 = vmatprep.subr.bf16.mxu1 %v3447_v61  ;;  %v1458_v59 = vshrl.u32 %v3037_v50, 16  ;;  %v3500_v61 = vld [vmem:[%s4779_s1 + $0x5e4] ss:$8 sps:$4 sm:$0xff]  }
  0x5d   : > { %1874 = vmatprep.subr.bf16.mxu0 %v3450_v0  ;;  %v3503_v0 = vld [vmem:[%s4779_s1 + $0x1f4] ss:$8 sps:$4 sm:$0xff]  }
  0x5f   : > { %659 = vmatpush1.bf16.msra.mxu1 %v3445_v1  ;;  %v1452_v1 = vrot.slane %v1450_v57, 2  ;;  %v3545_v57 = vld [vmem:[%s4779_s1 + $0x250] ss:$8 sps:$4 sm:$0xff]  }
  0x60   : > { %1875 = vmatpush1.bf16.msra.mxu0 %v3448_v2  ;;  %660 = vmatprep.subr.bf16.mxu1 %v3453_v3  ;;  %v1455_v2 = vrot.slane %v1453_v58, 3  ;;  %v1460_v3 = vrot.slane %v1458_v59, 2  ;;  %v3548_v58 = vld [vmem:[%s4779_s1 + $0x650] ss:$8 sps:$4 sm:$0xff]   ;;  %v3553_v59 = vld [vmem:[%s4779_s1 + $0x264] ss:$8 sps:$4 sm:$0xff]  }
  0x61   : > { %1876 = vmatprep.subr.bf16.mxu0 %v3456_v4  ;;  %v1463_v4 = vrot.slane %v1461_v60, 3  ;;  %v3556_v60 = vld [vmem:[%s4779_s1 + $0x664] ss:$8 sps:$4 sm:$0xff]  }
  0x62   : > { %v1456_v13 = vor.u32 %v1455_v2, %v1452_v1  ;;  %v3557_v1 = vld [vmem:[%s4779_s1 + $0x270] ss:$8 sps:$4 sm:$0xff]  }
  0x63   : > { %661 = vmatpush1.bf16.msra.mxu1 %v3451_v7  ;;  %v3506_v7 = vld [vmem:[%s4779_s1 + $0x5f4] ss:$8 sps:$4 sm:$0xff]   ;;  %v3560_v2 = vld [vmem:[%s4779_s1 + $0x670] ss:$8 sps:$4 sm:$0xff]  }
  0x64   : > { %1877 = vmatpush1.bf16.msra.mxu0 %v3454_v9  ;;  %662 = vmatprep.subr.bf16.mxu1 %v3459_v14  ;;  %v3501_v9 = vld [vmem:[%s4779_s1 + $0x1f0] ss:$8 sps:$4 sm:$0xff]   ;;  %v1464_v14 = vor.u32 %v1463_v4, %v1460_v3  ;;  %v3565_v3 = vld [vmem:[%s4779_s1 + $0x284] ss:$8 sps:$4 sm:$0xff]  }
  0x65   : > { %1878 = vmatprep.subr.bf16.mxu0 %v3462_v15  ;;  %v3518_v15 = vld [vmem:[%s4779_s1 + $0x604] ss:$8 sps:$4 sm:$0xff]  }
  0x66   : > { %v1465_v20 = vsel %vm1414_vm0, %v1456_v13, %v1464_v14  ;;  %v3568_v4 = vld [vmem:[%s4779_s1 + $0x684] ss:$8 sps:$4 sm:$0xff]   ;;  %v3569_v13 = vld [vmem:[%s4779_s1 + $0x290] ss:$8 sps:$4 sm:$0xff]  }
  0x67   : > { %663 = vmatpush1.bf16.msra.mxu1 %v3457_v19  ;;  %v176_v19 = vld [vmem:[%s3909_s5 + $0x28] sm:$0x33] }
  0x68   : > { %1879 = vmatpush1.bf16.msra.mxu0 %v3460_v22  ;;  %664 = vmatprep.subr.bf16.mxu1 %v3465_v23  ;;  %v2766_v22 = vcombine.high %v176_v19, %v176_v19  ;;  %v3519_v23 = vld [vmem:[%s4779_s1 + $0x210] ss:$8 sps:$4 sm:$0xff]   ;;  %v2765_v29 = vcombine.low %v176_v19, %v176_v19  ;;  %v3578_v19 = vld [vmem:[%s4779_s1 + $0x6a0] ss:$8 sps:$4 sm:$0xff]  }
  0x69   : > { %1880 = vmatprep.subr.bf16.mxu0 %v3468_v26  ;;  %v3529_v26 = vld [vmem:[%s4779_s1 + $0x224] ss:$8 sps:$4 sm:$0xff]  }
  0x6b   : > { %665 = vmatpush1.bf16.msra.mxu1 %v3463_v30  ;;  %v3527_v30 = vld [vmem:[%s4779_s1 + $0x220] ss:$8 sps:$4 sm:$0xff]  }
  0x6c   : > { %1881 = vmatpush1.bf16.msra.mxu0 %v3466_v31  ;;  %666 = vmatprep.subr.bf16.mxu1 %v3471_v34  ;;  %v3530_v31 = vld [vmem:[%s4779_s1 + $0x620] ss:$8 sps:$4 sm:$0xff]   ;;  %v818_v34 = vrot.slane %v816_v25, 1  ;;  %v828_v25 = vshll.u32 %v4223_v17, 16 }
  0x6d   : > { %1882 = vmatprep.subr.bf16.mxu0 %v3474_v35  ;;  %v4259_v35 = vld [vmem:[%s3909_s5 + $0x20] sm:$0x77] }
  0x6e   : > { %v4269_v36 = vcombine.high %v4259_v35, %v4259_v35 }
  0x6f   : > { %667 = vmatpush1.bf16.msra.mxu1 %v3469_v37  ;;  %v4272_v37 = vld [vmem:[%s3909_s5] sm:$0x88] }
  0x70   : > { %1883 = vmatpush1.bf16.msra.mxu0 %v3472_v38  ;;  %668 = vmatprep.subr.bf16.mxu1 %v3477_v39  ;;  %v4275_v38 = vld [vmem:[%s3909_s5 + $0x30] sm:$0x11]  ;;  %v3168_v39 = vcombine.high %v4272_v37, %v3924_v49 }
  0x71   : > { %1884 = vmatprep.subr.bf16.mxu0 %v3480_v40  ;;  %v3533_v40 = vld [vmem:[%s4779_s1 + $0x230] ss:$8 sps:$4 sm:$0xff]  }
  0x72   : > { %v2040_v49 = vrot.slane %v3168_v39, 3  ;;  %v4421_v39 = vcombine.low %v4259_v35, %v4259_v35 }
  0x73   : > { %669 = vmatpush1.bf16.msra.mxu1 %v3475_v41  ;;  %v819_v41 = vor.u32 %v818_v34, %v814_v28  ;;  %v3595_v28 = vld [vmem:[%s4779_s1 + $0x2d4] ss:$8 sps:$4 sm:$0xff]   ;;  %v830_v34 = vrot.slane %v828_v25, 1 }
  0x74   : > { %1885 = vmatpush1.bf16.msra.mxu0 %v3478_v42  ;;  %670 = vmatprep.subr.bf16.mxu1 %v3483_v43  ;;  %v821_v42 = vshll.u32 %v4269_v36, 16  ;;  %v3172_v43 = vcombine.high %v3938_v54, %v4275_v38 }
  0x75   : > { %1886 = vmatprep.subr.bf16.mxu0 %v3486_v44  ;;  %v3536_v44 = vld [vmem:[%s4779_s1 + $0x630] ss:$8 sps:$4 sm:$0xff]  }
  0x76   : > { %v4296_v54 = vrot.slane %v3172_v43, 3  ;;  %v802_v43 = vshrl.u32 %v3997_v33, 16 }
  0x77   : > { %671 = vmatpush1.bf16.msra.mxu1 %v3481_v45  ;;  %v3541_v45 = vld [vmem:[%s4779_s1 + $0x244] ss:$8 sps:$4 sm:$0xff]  }
  0x78   : > { %1887 = vmatpush1.bf16.msra.mxu0 %v3484_v46  ;;  %672 = vmatprep.subr.bf16.mxu1 %v3489_v47  ;;  %v3544_v46 = vld [vmem:[%s4779_s1 + $0x644] ss:$8 sps:$4 sm:$0xff]   ;;  %v4294_v47 = vrot.slane %v821_v42, 1  ;;  %v2042_v50 = vsel %vm2036_vm2, %v2040_v49, %v4296_v54  ;;  %v3599_v49 = vld [vmem:[%s4779_s1 + $0x2e0] ss:$8 sps:$4 sm:$0xff]  }
  0x79   : > { %1888 = vmatprep.subr.bf16.mxu0 %v3492_v51  ;;  %v3539_v51 = vld [vmem:[%s4779_s1 + $0x240] ss:$8 sps:$4 sm:$0xff]  }
  0x7a   : > { %v824_v48 = vsel %vm800_vm1, %v819_v41, %v4294_v47  ;;  %v3604_v41 = vld [vmem:[%s4779_s1 + $0x6e4] ss:$8 sps:$4 sm:$0xff]  }
  0x7b   : > { %673 = vmatpush1.bf16.msra.mxu1 %v3487_v53  ;;  %v3542_v53 = vld [vmem:[%s4779_s1 + $0x640] ss:$8 sps:$4 sm:$0xff]  }
  0x7c   : > { %1889 = vmatpush1.bf16.msra.mxu0 %v3490_v55  ;;  %674 = vmatprep.subr.bf16.mxu1 %v3497_v56  ;;  %v3547_v55 = vld [vmem:[%s4779_s1 + $0x254] ss:$8 sps:$4 sm:$0xff]  }
  0x7d   : > { %1890 = vmatprep.subr.bf16.mxu0 %v3500_v61  ;;  %v3550_v56 = vld [vmem:[%s4779_s1 + $0x654] ss:$8 sps:$4 sm:$0xff]   ;;  %v3551_v61 = vld [vmem:[%s4779_s1 + $0x260] ss:$8 sps:$4 sm:$0xff]  }
  0x7f   : > { %675 = vmatpush1.bf16.msra.mxu1 %v3495_v62  ;;  %v3554_v62 = vld [vmem:[%s4779_s1 + $0x660] ss:$8 sps:$4 sm:$0xff]  }
  0x80   : > { %1891 = vmatpush1.bf16.msra.mxu0 %v3498_v63  ;;  %676 = vmatprep.subr.bf16.mxu1 %v3503_v0  ;;  %v3559_v63 = vld [vmem:[%s4779_s1 + $0x274] ss:$8 sps:$4 sm:$0xff]  }
  0x81   : > { %1892 = vmatprep.subr.bf16.mxu0 %v3506_v7  ;;  %v3562_v0 = vld [vmem:[%s4779_s1 + $0x674] ss:$8 sps:$4 sm:$0xff]   ;;  %v3563_v7 = vld [vmem:[%s4779_s1 + $0x280] ss:$8 sps:$4 sm:$0xff]  }
  0x83   : > { %677 = vmatpush1.bf16.msra.mxu1 %v3501_v9  ;;  %v3566_v9 = vld [vmem:[%s4779_s1 + $0x680] ss:$8 sps:$4 sm:$0xff]  }
  0x84   : > { %1893 = vmatpush1.bf16.msra.mxu0 %v3504_v10  ;;  %1189 = vmatprep.subr.bf16.mxu1 %v3511_v12  ;;  %v3571_v10 = vld [vmem:[%s4779_s1 + $0x294] ss:$8 sps:$4 sm:$0xff]  }
  0x85   : > { %2377 = vmatprep.subr.bf16.mxu0 %v3518_v15  ;;  %v3574_v12 = vld [vmem:[%s4779_s1 + $0x694] ss:$8 sps:$4 sm:$0xff]   ;;  %v3577_v15 = vld [vmem:[%s4779_s1 + $0x2a4] ss:$8 sps:$4 sm:$0xff]  }
  0x86   : > { %679 = vmatmul.mubr.bf16.vlgmr.msra.gmra.mrb[0].mxu1 %v4223_v17 }
  0x87   : > { %1895 = vmatmul.mubr.bf16.vlgmr.msra.gmra.mrb[0].mxu0 %v1465_v20  ;;  %1190 = vmatpush1.bf16.msra.mxu1 %v3509_v16  ;;  %v3580_v16 = vld [vmem:[%s4779_s1 + $0x6a4] ss:$8 sps:$4 sm:$0xff]   ;;  %v3583_v20 = vld [vmem:[%s4779_s1 + $0x2b4] ss:$8 sps:$4 sm:$0xff]  }
  0x88   : > { %2378 = vmatpush1.bf16.msra.mxu0 %v3516_v18  ;;  %1191 = vmatprep.subr.bf16.mxu1 %v3521_v21  ;;  %v3575_v18 = vld [vmem:[%s4779_s1 + $0x2a0] ss:$8 sps:$4 sm:$0xff]   ;;  %v3586_v21 = vld [vmem:[%s4779_s1 + $0x6b4] ss:$8 sps:$4 sm:$0xff]  }
  0x89   : > { %2379 = vmatprep.subr.bf16.mxu0 %v3524_v5  ;;  %688 = vmatprep.mubr.bf16.mxu1 %v2766_v22  ;;  %v3581_v5 = vld [vmem:[%s4779_s1 + $0x2b0] ss:$8 sps:$4 sm:$0xff]  }
  0x8a   : > { %1904 = vmatprep.mubr.bf16.mxu0 %v4134_v32  ;;  %v3538_v32 = vld [vmem:[%s4779_s1 + $0x634] ss:$8 sps:$4 sm:$0xff]   ;;  %v3584_v22 = vld [vmem:[%s4779_s1 + $0x6b0] ss:$8 sps:$4 sm:$0xff]  }
  0x8b   : > { %1192 = vmatpush1.bf16.msra.mxu1 %v3519_v23  ;;  %v3589_v23 = vld [vmem:[%s4779_s1 + $0x2c4] ss:$8 sps:$4 sm:$0xff]  }
  0x8c   : > { %2380 = vmatpush1.bf16.msra.mxu0 %v3522_v24  ;;  %1193 = vmatprep.subr.bf16.mxu1 %v3529_v26  ;;  %v3592_v24 = vld [vmem:[%s4779_s1 + $0x6c4] ss:$8 sps:$4 sm:$0xff]   ;;  %v3587_v26 = vld [vmem:[%s4779_s1 + $0x2c0] ss:$8 sps:$4 sm:$0xff]  }
  0x8d   : > { %2381 = vmatprep.subr.bf16.mxu0 %v3532_v27  ;;  %v3590_v27 = vld [vmem:[%s4779_s1 + $0x6c0] ss:$8 sps:$4 sm:$0xff]  }
  0x8e   : > { %689 = vmatmul.mubr.bf16.gmra.mrb[4].mxu1 %v2765_v29  ;;  %v3598_v29 = vld [vmem:[%s4779_s1 + $0x6d4] ss:$8 sps:$4 sm:$0xff]  }
  0x8f   : > { %1905 = vmatmul.mubr.bf16.gmra.mrb[8].mxu0 %v1464_v14  ;;  %1194 = vmatpush1.bf16.msra.mxu1 %v3527_v30  ;;  %v3572_v14 = vld [vmem:[%s4779_s1 + $0x690] ss:$8 sps:$4 sm:$0xff]   ;;  %v804_v30 = vshll.u32 %v3997_v33, 16 }
  0x90   : > { %2382 = vmatpush1.bf16.msra.mxu0 %v3530_v31  ;;  %1195 = vmatprep.subr.bf16.mxu1 %v3535_v52  ;;  %v826_v31 = vshrl.u32 %v4223_v17, 16  ;;  %v3593_v52 = vld [vmem:[%s4779_s1 + $0x2d0] ss:$8 sps:$4 sm:$0xff]   ;;  %v3601_v17 = vld [vmem:[%s4779_s1 + $0x2e4] ss:$8 sps:$4 sm:$0xff]  }
  0x91   : > { %2383 = vmatprep.subr.bf16.mxu0 %v3538_v32  ;;  %1221 = vmatprep.mubr.bf16.mxu1 %v824_v48  ;;  %v3596_v32 = vld [vmem:[%s4779_s1 + $0x6d0] ss:$8 sps:$4 sm:$0xff]   ;;  %v806_v33 = vrot.slane %v804_v30, 1 }
  0x92   : > { %2409 = vmatprep.mubr.bf16.mxu0 %v2042_v50  ;;  %v3724_v50 = vld [vmem:[%s3909_s5 + $0x20] sm:$0xff] }
  0x93   : > { %1196 = vmatpush1.bf16.msra.mxu1 %v3533_v40  ;;  %v708_v40 = vld [vmem:[%s3909_s5 + $0x28] sm:$0x77] }
  0x94   : > { %2384 = vmatpush1.bf16.msra.mxu0 %v3536_v44  ;;  %1197 = vmatprep.subr.bf16.mxu1 %v3541_v45  ;;  %v4430_v42 = vcombine.low %v708_v40, %v708_v40  ;;  %v831_v44 = vor.u32 %v830_v34, %v826_v31  ;;  %v3602_v45 = vld [vmem:[%s4779_s1 + $0x6e0] ss:$8 sps:$4 sm:$0xff]   ;;  %v3635_v34 = vld [vmem:[%s4779_s1 + $0x330] ss:$8 sps:$4 sm:$0xff]  }
  0x95   : > { %2385 = vmatprep.subr.bf16.mxu0 %v3544_v46  ;;  %v3723_v46 = vld [vmem:[%s3909_s5 + $0x10] sm:$0xff] }
  0x96   : > { %v833_v35 = vshll.u32 %v4430_v42, 16  ;;  %v3167_v48 = vcombine.low %v4272_v37, %v3723_v46  ;;  %v3605_v37 = vld [vmem:[%s4779_s1 + $0x2f0] ss:$8 sps:$4 sm:$0xff]   ;;  %v3653_v46 = vld [vmem:[%s4779_s1 + $0x360] ss:$8 sps:$4 sm:$0xff]  }
  0x97   : > { %1198 = vmatpush1.bf16.msra.mxu1 %v3539_v51  ;;  %v3171_v51 = vcombine.low %v3724_v50, %v4275_v38  ;;  %v3661_v50 = vld [vmem:[%s4779_s1 + $0x374] ss:$8 sps:$4 sm:$0xff]  }
  0x98   : > { %2386 = vmatpush1.bf16.msra.mxu0 %v3542_v53  ;;  %1199 = vmatprep.subr.bf16.mxu1 %v3547_v55  ;;  %v809_v53 = vshll.u32 %v4421_v39, 16  ;;  %v3607_v55 = vld [vmem:[%s4779_s1 + $0x2f4] ss:$8 sps:$4 sm:$0xff]  }
  0x99   : > { %2387 = vmatprep.subr.bf16.mxu0 %v3550_v56  ;;  %v3610_v56 = vld [vmem:[%s4779_s1 + $0x6f4] ss:$8 sps:$4 sm:$0xff]  }
  0x9b   : > { %1200 = vmatpush1.bf16.msra.mxu1 %v3545_v57  ;;  %v4451_v57 = vrot.slane %v833_v35, 1  ;;  %v3650_v35 = vld [vmem:[%s4779_s1 + $0x750] ss:$8 sps:$4 sm:$0xff]  }
  0x9c   : > { %2388 = vmatpush1.bf16.msra.mxu0 %v3548_v58  ;;  %1201 = vmatprep.subr.bf16.mxu1 %v3553_v59  ;;  %v3608_v58 = vld [vmem:[%s4779_s1 + $0x6f0] ss:$8 sps:$4 sm:$0xff]   ;;  %v2037_v59 = vrot.slane %v3167_v48, 3  ;;  %v3656_v48 = vld [vmem:[%s4779_s1 + $0x760] ss:$8 sps:$4 sm:$0xff]  }
  0x9d   : > { %2389 = vmatprep.subr.bf16.mxu0 %v3556_v60  ;;  %v4458_v38 = vsel %vm800_vm1, %v831_v44, %v4451_v57  ;;  %v2038_v60 = vrot.slane %v3171_v51, 3  ;;  %v3647_v44 = vld [vmem:[%s4779_s1 + $0x350] ss:$8 sps:$4 sm:$0xff]   ;;  %v3664_v51 = vld [vmem:[%s4779_s1 + $0x774] ss:$8 sps:$4 sm:$0xff]  }
  0x9f   : > { %1202 = vmatpush1.bf16.msra.mxu1 %v3551_v61  ;;  %v807_v61 = vor.u32 %v806_v33, %v802_v43  ;;  %v3652_v43 = vld [vmem:[%s4779_s1 + $0x754] ss:$8 sps:$4 sm:$0xff]   ;;  %v3659_v33 = vld [vmem:[%s4779_s1 + $0x370] ss:$8 sps:$4 sm:$0xff]  }
  0xa0   : > { %2390 = vmatpush1.bf16.msra.mxu0 %v3554_v62  ;;  %1203 = vmatprep.subr.bf16.mxu1 %v3559_v63  ;;  %v811_v62 = vrot.slane %v809_v53, 1  ;;  %v3615_v63 = vld [vmem:[%s4779_s1 + $0x304] ss:$8 sps:$4 sm:$0xff]   ;;  %v3662_v53 = vld [vmem:[%s4779_s1 + $0x770] ss:$8 sps:$4 sm:$0xff]  }
  0xa1   : > { %2391 = vmatprep.subr.bf16.mxu0 %v3562_v0  ;;  %v3622_v0 = vld [vmem:[%s4779_s1 + $0x704] ss:$8 sps:$4 sm:$0xff]  }
  0xa3   : > { %1204 = vmatpush1.bf16.msra.mxu1 %v3557_v1  ;;  %v852_v1 = vshrl.u32 %v4269_v36, 16  ;;  %v4485_v36 = vld [vmem:[%s3909_s5 + $0x38] sm:$0x11] }
  0xa4   : > { %2392 = vmatpush1.bf16.msra.mxu0 %v3560_v2  ;;  %1205 = vmatprep.subr.bf16.mxu1 %v3565_v3  ;;  %v840_v2 = vshll.u32 %v4097_v8, 16  ;;  %v3613_v3 = vld [vmem:[%s4779_s1 + $0x300] ss:$8 sps:$4 sm:$0xff]  }
  0xa5   : > { %2393 = vmatprep.subr.bf16.mxu0 %v3568_v4  ;;  %v4474_v4 = vcombine.high %v708_v40, %v708_v40  ;;  %v3641_v40 = vld [vmem:[%s4779_s1 + $0x340] ss:$8 sps:$4 sm:$0xff]  }
  0xa7   : > { %1206 = vmatpush1.bf16.msra.mxu1 %v3563_v7  ;;  %v3620_v7 = vld [vmem:[%s4779_s1 + $0x700] ss:$8 sps:$4 sm:$0xff]  }
  0xa8   : > { %2394 = vmatpush1.bf16.msra.mxu0 %v3566_v9  ;;  %1207 = vmatprep.subr.bf16.mxu1 %v3571_v10  ;;  %v812_v9 = vsel %vm800_vm1, %v807_v61, %v811_v62  ;;  %v2039_v10 = vsel %vm2036_vm2, %v2037_v59, %v2038_v60  ;;  %v3673_v59 = vld [vmem:[%s4779_s1 + $0x394] ss:$8 sps:$4 sm:$0xff]   ;;  %v3671_v61 = vld [vmem:[%s4779_s1 + $0x390] ss:$8 sps:$4 sm:$0xff]  }
  0xa9   : > { %2395 = vmatprep.subr.bf16.mxu0 %v3574_v12  ;;  %v4482_v12 = vld [vmem:[%s3909_s5 + $0x8] sm:$0x88] }
  0xab   : > { %1208 = vmatpush1.bf16.msra.mxu1 %v3569_v13  ;;  %v3625_v13 = vld [vmem:[%s4779_s1 + $0x314] ss:$8 sps:$4 sm:$0xff]  }
  0xac   : > { %2396 = vmatpush1.bf16.msra.mxu0 %v3572_v14  ;;  %1209 = vmatprep.subr.bf16.mxu1 %v3577_v15  ;;  %v3628_v14 = vld [vmem:[%s4779_s1 + $0x714] ss:$8 sps:$4 sm:$0xff]   ;;  %v854_v15 = vor.u32 %v852_v1, %v4294_v47  ;;  %v3623_v47 = vld [vmem:[%s4779_s1 + $0x310] ss:$8 sps:$4 sm:$0xff]   ;;  %v3677_v1 = vld [vmem:[%s4779_s1 + $0x3a0] ss:$8 sps:$4 sm:$0xff]  }
  0xad   : > { %2397 = vmatprep.subr.bf16.mxu0 %v3580_v16  ;;  %v838_v16 = vshrl.u32 %v4097_v8, 16  ;;  %v3626_v8 = vld [vmem:[%s4779_s1 + $0x710] ss:$8 sps:$4 sm:$0xff]  }
  0xaf   : > { %1210 = vmatpush1.bf16.msra.mxu1 %v3575_v18  ;;  %v842_v18 = vrot.slane %v840_v2, 1  ;;  %v3680_v2 = vld [vmem:[%s4779_s1 + $0x7a0] ss:$8 sps:$4 sm:$0xff]  }
  0xb0   : > { %2398 = vmatpush1.bf16.msra.mxu0 %v3578_v19  ;;  %1211 = vmatprep.subr.bf16.mxu1 %v3583_v20  ;;  %v849_v19 = vshrl.u32 %v4421_v39, 16  ;;  %v845_v20 = vshll.u32 %v4474_v4, 16  ;;  %v3646_v39 = vld [vmem:[%s4779_s1 + $0x744] ss:$8 sps:$4 sm:$0xff]  }
  0xb1   : > { %2399 = vmatprep.subr.bf16.mxu0 %v3586_v21  ;;  %v3170_v21 = vcombine.high %v4482_v12, %v4090_v6  ;;  %v3634_v6 = vld [vmem:[%s4779_s1 + $0x724] ss:$8 sps:$4 sm:$0xff]  }
  0xb3   : > { %1212 = vmatpush1.bf16.msra.mxu1 %v3581_v5  ;;  %v3174_v5 = vcombine.high %v4104_v11, %v4485_v36  ;;  %v843_v11 = vor.u32 %v842_v18, %v838_v16  ;;  %v2046_v25 = vrot.slane %v3170_v21, 3  ;;  %v3692_v16 = vld [vmem:[%s4779_s1 + $0x7c0] ss:$8 sps:$4 sm:$0xff]   ;;  %v3697_v18 = vld [vmem:[%s4779_s1 + $0x3d4] ss:$8 sps:$4 sm:$0xff]  }
  0xb4   : > { %2400 = vmatpush1.bf16.msra.mxu0 %v3584_v22  ;;  %1213 = vmatprep.subr.bf16.mxu1 %v3589_v23  ;;  %v3631_v22 = vld [vmem:[%s4779_s1 + $0x324] ss:$8 sps:$4 sm:$0xff]   ;;  %v851_v23 = vor.u32 %v849_v19, %v811_v62  ;;  %v3674_v62 = vld [vmem:[%s4779_s1 + $0x790] ss:$8 sps:$4 sm:$0xff]   ;;  %v3700_v19 = vld [vmem:[%s4779_s1 + $0x7d4] ss:$8 sps:$4 sm:$0xff]  }
  0xb5   : > { %2401 = vmatprep.subr.bf16.mxu0 %v3592_v24  ;;  %v4514_v24 = vrot.slane %v845_v20, 1  ;;  %v3695_v20 = vld [vmem:[%s4779_s1 + $0x3d0] ss:$8 sps:$4 sm:$0xff]  }
  0xb6   : > { %v3698_v21 = vld [vmem:[%s4779_s1 + $0x7d0] ss:$8 sps:$4 sm:$0xff]  }
  0xb7   : > { %1214 = vmatpush1.bf16.msra.mxu1 %v3587_v26  ;;  %v4516_v26 = vrot.slane %v3174_v5, 3  ;;  %v848_v30 = vsel %vm800_vm1, %v843_v11, %v4514_v24  ;;  %v3703_v5 = vld [vmem:[%s4779_s1 + $0x3e4] ss:$8 sps:$4 sm:$0xff]  }
  0xb8   : > { %2402 = vmatpush1.bf16.msra.mxu0 %v3590_v27  ;;  %1215 = vmatprep.subr.bf16.mxu1 %v3595_v28  ;;  %v3629_v27 = vld [vmem:[%s4779_s1 + $0x320] ss:$8 sps:$4 sm:$0xff]  }
  0xb9   : > { %2403 = vmatprep.subr.bf16.mxu0 %v3598_v29  ;;  %v3632_v28 = vld [vmem:[%s4779_s1 + $0x720] ss:$8 sps:$4 sm:$0xff]   ;;  %v3640_v29 = vld [vmem:[%s4779_s1 + $0x734] ss:$8 sps:$4 sm:$0xff]   ;;  %v2048_v31 = vsel %vm2036_vm2, %v2046_v25, %v4516_v26 }
  0xbb   : > { %1216 = vmatpush1.bf16.msra.mxu1 %v3593_v52  ;;  %v3638_v52 = vld [vmem:[%s4779_s1 + $0x730] ss:$8 sps:$4 sm:$0xff]  }
  0xbc   : > { %2404 = vmatpush1.bf16.msra.mxu0 %v3596_v32  ;;  %1217 = vmatprep.subr.bf16.mxu1 %v3601_v17  ;;  %v3643_v32 = vld [vmem:[%s4779_s1 + $0x344] ss:$8 sps:$4 sm:$0xff]   ;;  %v3644_v17 = vld [vmem:[%s4779_s1 + $0x740] ss:$8 sps:$4 sm:$0xff]  }
  0xbd   : > { %2405 = vmatprep.subr.bf16.mxu0 %v3604_v41  ;;  %v3649_v41 = vld [vmem:[%s4779_s1 + $0x354] ss:$8 sps:$4 sm:$0xff]  }
  0xbf   : > { %1218 = vmatpush1.bf16.msra.mxu1 %v3599_v49  ;;  %v3655_v49 = vld [vmem:[%s4779_s1 + $0x364] ss:$8 sps:$4 sm:$0xff]  }
  0xc0   : > { %2406 = vmatpush1.bf16.msra.mxu0 %v3602_v45  ;;  %1219 = vmatprep.subr.bf16.mxu1 %v3607_v55  ;;  %v3658_v45 = vld [vmem:[%s4779_s1 + $0x764] ss:$8 sps:$4 sm:$0xff]  }
  0xc1   : > { %2407 = vmatprep.subr.bf16.mxu0 %v3610_v56  ;;  %v3667_v55 = vld [vmem:[%s4779_s1 + $0x384] ss:$8 sps:$4 sm:$0xff]  }
  0xc2   : > { %v3670_v56 = vld [vmem:[%s4779_s1 + $0x784] ss:$8 sps:$4 sm:$0xff]  }
  0xc3   : > { %1220 = vmatpush1.bf16.msra.mxu1 %v3605_v37  ;;  %v3665_v37 = vld [vmem:[%s4779_s1 + $0x380] ss:$8 sps:$4 sm:$0xff]  }
  0xc4   : > { %2408 = vmatpush1.bf16.msra.mxu0 %v3608_v58  ;;  %1240 = vmatprep.subr.bf16.mxu1 %v3615_v63  ;;  %v3668_v58 = vld [vmem:[%s4779_s1 + $0x780] ss:$8 sps:$4 sm:$0xff]   ;;  %v3679_v63 = vld [vmem:[%s4779_s1 + $0x3a4] ss:$8 sps:$4 sm:$0xff]  }
  0xc5   : > { %2428 = vmatprep.subr.bf16.mxu0 %v3622_v0  ;;  %v3682_v0 = vld [vmem:[%s4779_s1 + $0x7a4] ss:$8 sps:$4 sm:$0xff]  }
  0xc6   : > { %1222 = vmatmul.mubr.bf16.vlgmr.msra.gmra.mrb[0].mxu1 %v812_v9  ;;  %v3683_v9 = vld [vmem:[%s4779_s1 + $0x3b0] ss:$8 sps:$4 sm:$0xff]  }
  0xc7   : > { %2410 = vmatmul.mubr.bf16.vlgmr.msra.gmra.mrb[0].mxu0 %v2039_v10  ;;  %1241 = vmatpush1.bf16.msra.mxu1 %v3613_v3  ;;  %v3685_v3 = vld [vmem:[%s4779_s1 + $0x3b4] ss:$8 sps:$4 sm:$0xff]   ;;  %v3686_v10 = vld [vmem:[%s4779_s1 + $0x7b0] ss:$8 sps:$4 sm:$0xff]  }
  0xc8   : > { %2429 = vmatpush1.bf16.msra.mxu0 %v3620_v7  ;;  %1242 = vmatprep.subr.bf16.mxu1 %v3625_v13  ;;  %v3688_v7 = vld [vmem:[%s4779_s1 + $0x7b4] ss:$8 sps:$4 sm:$0xff]   ;;  %v3691_v13 = vld [vmem:[%s4779_s1 + $0x3c4] ss:$8 sps:$4 sm:$0xff]  }
  0xc9   : > { %2430 = vmatprep.subr.bf16.mxu0 %v3628_v14  ;;  %1231 = vmatprep.mubr.bf16.mxu1 %v854_v15  ;;  %v3694_v14 = vld [vmem:[%s4779_s1 + $0x7c4] ss:$8 sps:$4 sm:$0xff]   ;;  %v3689_v15 = vld [vmem:[%s4779_s1 + $0x3c0] ss:$8 sps:$4 sm:$0xff]  }
  0xca   : > { %2419 = vmatprep.mubr.bf16.mxu0 %v4296_v54  ;;  %v3637_v54 = vld [vmem:[%s4779_s1 + $0x334] ss:$8 sps:$4 sm:$0xff]  }
  0xcb   : > { %1243 = vmatpush1.bf16.msra.mxu1 %v3623_v47  ;;  %v3706_v47 = vld [vmem:[%s4779_s1 + $0x7e4] ss:$8 sps:$4 sm:$0xff]  }
  0xcc   : > { %2431 = vmatpush1.bf16.msra.mxu0 %v3626_v8  ;;  %1244 = vmatprep.subr.bf16.mxu1 %v3631_v22  ;;  %v3701_v8 = vld [vmem:[%s4779_s1 + $0x3e0] ss:$8 sps:$4 sm:$0xff]  }
  0xcd   : > { %2432 = vmatprep.subr.bf16.mxu0 %v3634_v6  ;;  %v3704_v22 = vld [vmem:[%s4779_s1 + $0x7e0] ss:$8 sps:$4 sm:$0xff]   ;;  %v3725_v6 = vld [vmem:[%s3909_s5 + $0x18] sm:$0xff] }
  0xce   : > { %1232 = vmatmul.mubr.bf16.gmra.mrb[8].mxu1 %v851_v23  ;;  %v3169_v11 = vcombine.low %v4482_v12, %v3725_v6  ;;  %v3726_v23 = vld [vmem:[%s3909_s5 + $0x28] sm:$0xff]  ;;  %v3710_v12 = vld [vmem:[%s4779_s1 + $0x7f0] ss:$8 sps:$4 sm:$0xff]   ;;  %v3735_v6 = vmov 0.0  }
  0xcf   : > { %2420 = vmatmul.mubr.bf16.gmra.mrb[12].mxu0 %v2038_v60  ;;  %1245 = vmatpush1.bf16.msra.mxu1 %v3629_v27  ;;  %v3676_v60 = vld [vmem:[%s4779_s1 + $0x794] ss:$8 sps:$4 sm:$0xff]   ;;  %v3173_v25 = vcombine.low %v3726_v23, %v4485_v36 }
  0xd0   : > { %2433 = vmatpush1.bf16.msra.mxu0 %v3632_v28  ;;  %1246 = vmatprep.subr.bf16.mxu1 %v3637_v54  ;;  %v3709_v27 = vld [vmem:[%s4779_s1 + $0x3f4] ss:$8 sps:$4 sm:$0xff]   ;;  %v3707_v54 = vld [vmem:[%s4779_s1 + $0x3f0] ss:$8 sps:$4 sm:$0xff]   ;;  %v2043_v36 = vrot.slane %v3169_v11, 3 }
  0xd1   : > { %2434 = vmatprep.subr.bf16.mxu0 %v3640_v29  ;;  %1272 = vmatprep.mubr.bf16.mxu1 %v848_v30  ;;  %v3712_v28 = vld [vmem:[%s4779_s1 + $0x7f4] ss:$8 sps:$4 sm:$0xff]   ;;  %v2044_v29 = vrot.slane %v3173_v25, 3  ;;  %v858_v30 = vshrl.u32 %v4474_v4, 16 }
  0xd2   : > { %2460 = vmatprep.mubr.bf16.mxu0 %v2048_v31 }
  0xd3   : > { %1247 = vmatpush1.bf16.msra.mxu1 %v3635_v34  ;;  %v2045_v31 = vsel %vm2036_vm2, %v2043_v36, %v2044_v29  ;;  %v860_v34 = vor.u32 %v858_v30, %v4514_v24 }
  0xd4   : > { %2435 = vmatpush1.bf16.msra.mxu0 %v3638_v52  ;;  %1248 = vmatprep.subr.bf16.mxu1 %v3643_v32  ;;  %v855_v52 = vshrl.u32 %v4430_v42, 16 }
  0xd5   : > { %2436 = vmatprep.subr.bf16.mxu0 %v3646_v39 }
  0xd6   : > { %v857_v32 = vor.u32 %v855_v52, %v4451_v57 }
  0xd7   : > { %1249 = vmatpush1.bf16.msra.mxu1 %v3641_v40 }
  0xd8   : > { %2437 = vmatpush1.bf16.msra.mxu0 %v3644_v17  ;;  %1250 = vmatprep.subr.bf16.mxu1 %v3649_v41 }
  0xd9   : > { %2438 = vmatprep.subr.bf16.mxu0 %v3652_v43 }
  0xdb   : > { %1251 = vmatpush1.bf16.msra.mxu1 %v3647_v44 }
  0xdc   : > { %2439 = vmatpush1.bf16.msra.mxu0 %v3650_v35  ;;  %1252 = vmatprep.subr.bf16.mxu1 %v3655_v49 }
  0xdd   : > { %2440 = vmatprep.subr.bf16.mxu0 %v3658_v45 }
  0xdf   : > { %1253 = vmatpush1.bf16.msra.mxu1 %v3653_v46 }
  0xe0   : > { %2441 = vmatpush1.bf16.msra.mxu0 %v3656_v48  ;;  %1254 = vmatprep.subr.bf16.mxu1 %v3661_v50 }
  0xe1   : > { %2442 = vmatprep.subr.bf16.mxu0 %v3664_v51 }
  0xe3   : > { %1255 = vmatpush1.bf16.msra.mxu1 %v3659_v33 }
  0xe4   : > { %2443 = vmatpush1.bf16.msra.mxu0 %v3662_v53  ;;  %1256 = vmatprep.subr.bf16.mxu1 %v3667_v55 }
  0xe5   : > { %2444 = vmatprep.subr.bf16.mxu0 %v3670_v56  ;;  %v2505_v56 = vlaneseq }
  0xe7   : > { %1257 = vmatpush1.bf16.msra.mxu1 %v3665_v37  ;;  %v2506_v37 = vshrl.u32 %v2505_v56, 7 }
  0xe8   : > { %2445 = vmatpush1.bf16.msra.mxu0 %v3668_v58  ;;  %1258 = vmatprep.subr.bf16.mxu1 %v3673_v59 }
  0xe9   : > { %2446 = vmatprep.subr.bf16.mxu0 %v3676_v60  ;;  %v2523_v58 = vadd.s32 8, %v2506_v37  ;;  %v4707_v59 = vmul.u32.u64.low 3435973837, %v2506_v37  ;;  %v4708_v60 = vmul.u32.u64.high 3435973837, %v2506_v37, %v4707_v59 }
  0xeb   : > { %1259 = vmatpush1.bf16.msra.mxu1 %v3671_v61 }
  0xec   : > { %2447 = vmatpush1.bf16.msra.mxu0 %v3674_v62  ;;  %1260 = vmatprep.subr.bf16.mxu1 %v3679_v63  ;;  %v4710_v61 = vmul.u32.u64.low 3435973837, %v2523_v58  ;;  %v4711_v62 = vmul.u32.u64.high 3435973837, %v2523_v58, %v4710_v61  ;;  %v2531_v63 = vshrl.u32 %v4708_v60, 2 }
  0xed   : > { %2448 = vmatprep.subr.bf16.mxu0 %v3682_v0 }
  0xee   : > { %v2542_v0 = vshrl.u32 %v4711_v62, 2 }
  0xef   : > { %1261 = vmatpush1.bf16.msra.mxu1 %v3677_v1  ;;  %v2532_v1 = vmul.u32 5, %v2531_v63 }
  0xf0   : > { %2449 = vmatpush1.bf16.msra.mxu0 %v3680_v2  ;;  %1262 = vmatprep.subr.bf16.mxu1 %v3685_v3  ;;  %v2543_v2 = vmul.u32 5, %v2542_v0 }
  0xf1   : > { %2450 = vmatprep.subr.bf16.mxu0 %v3688_v7  ;;  %v2533_v3 = vsub.s32 %v2506_v37, %v2532_v1 }
  0xf2   : > { %v2544_v7 = vsub.s32 %v2523_v58, %v2543_v2 }
  0xf3   : > { %1263 = vmatpush1.bf16.msra.mxu1 %v3683_v9  ;;  %vm2558_vm3 = vcmp.ne.s32.totalorder %v2533_v3, 0  ;;  %vm2561_vm4 = vcmp.lt.s32.totalorder %v2533_v3, 0  ;;  %v2567_v9 = vadd.s32 5, %v2533_v3 }
  0xf4   : > { %2451 = vmatpush1.bf16.msra.mxu0 %v3686_v10  ;;  %1264 = vmatprep.subr.bf16.mxu1 %v3691_v13  ;;  %vm2559_vm5 = vcmp.ne.s32.totalorder %v2544_v7, 0  ;;  %vm2562_vm6 = vcmp.lt.s32.totalorder %v2544_v7, 0  ;;  %vm2564_vm7 = vmand %vm2561_vm4, %vm2558_vm3  ;;  %v2568_v10 = vadd.s32 5, %v2544_v7  ;;  %v2507_v13 = vsub.s32 0, %v2506_v37 }
  0xf5   : > { %2452 = vmatprep.subr.bf16.mxu0 %v3694_v14  ;;  %vm2565_vm8 = vmand %vm2562_vm6, %vm2559_vm5  ;;  %v2503_v14 = vld [vmem:[%s4780_s2] sm:$0x3] }
  0xf7   : > { %1265 = vmatpush1.bf16.msra.mxu1 %v3689_v15  ;;  %v2570_v15 = vsel %vm2564_vm7, %v2567_v9, %v2533_v3 }
  0xf8   : > { %2453 = vmatpush1.bf16.msra.mxu0 %v3692_v16  ;;  %1266 = vmatprep.subr.bf16.mxu1 %v3697_v18  ;;  %v2511_v16 = vsub.s32 1, %v2506_v37  ;;  %v2571_v18 = vsel %vm2565_vm8, %v2568_v10, %v2544_v7  ;;  %vm2573_vm9 = vcmp.ne.s32.totalorder %v2570_v15, 4 }
  0xf9   : > { %2454 = vmatprep.subr.bf16.mxu0 %v3700_v19  ;;  %v4718_v19 = vrot.slane %v2503_v14, %v2507_v13  ;;  %vm2574_vm10 = vcmp.ne.s32.totalorder %v2571_v18, 4  ;;  %v3239_v11 = vsel %vm2573_vm9, 1.0, %v3735_v6 }
  0xfb   : > { %1267 = vmatpush1.bf16.msra.mxu1 %v3695_v20 }
  0xfc   : > { %2455 = vmatpush1.bf16.msra.mxu0 %v3698_v21  ;;  %1268 = vmatprep.subr.bf16.mxu1 %v3703_v5  ;;  %v4720_v5 = vrot.slane %v2503_v14, %v2511_v16 }
  0xfd   : > { %2456 = vmatprep.subr.bf16.mxu0 %v3706_v47 }
  0xff   : > { %1269 = vmatpush1.bf16.msra.mxu1 %v3701_v8 }
 0x100   : > { %2457 = vmatpush1.bf16.msra.mxu0 %v3704_v22  ;;  %1270 = vmatprep.subr.bf16.mxu1 %v3709_v27 }
 0x101   : > { %2458 = vmatprep.subr.bf16.mxu0 %v3712_v28 }
 0x103   : > { %1271 = vmatpush1.bf16.msra.mxu1 %v3707_v54  ;;  %v2524_v54 = vadd.s32 16, %v2506_v37 }
 0x104   : > { %2459 = vmatpush1.bf16.msra.mxu0 %v3710_v12 }
 0x106   : > { %1273 = vmatmul.mubr.bf16.vlgmr.msra.gmra.mrb[0].mxu1 %v4458_v38 }
 0x107   : > { %2461 = vmatmul.mubr.bf16.vlgmr.msra.gmra.mrb[0].mxu0 %v2045_v31  ;;  %1282 = vmatprep.mubr.bf16.mxu1 %v860_v34  ;;  %v3240_v31 = vsel %vm2574_vm10, 1.0, %v3735_v6 }
 0x108   : > { %2470 = vmatprep.mubr.bf16.mxu0 %v4516_v26 }
 0x10e   : > { %1283 = vmatmul.mubr.bf16.gmra.mrb[12].mxu1 %v857_v32 }
 0x10f   : > { %2471 = vmatmul.mubr.bf16.gmra.mrb[16].mxu0 %v2044_v29 }
 0x122   : > { %v1855_v4 = vpop.f32.mrb[4].mxu0 }
 0x123   : > { %v1857_v39 = vpop.f32.mrb[5].mxu0 }
 0x124   : > { %v1859_v40 = vpop.f32.mrb[6].mxu0 }
 0x125   : > { %v1860_v17 = vpop.f32.mrb[7].mxu0 }
 0x126   : > { %v4738_v40 = vmul.u32.u64.low 3435973837, %v2524_v54  ;;  %v4739_v17 = vmul.u32.u64.high 3435973837, %v2524_v54, %v4738_v40 }
 0x161   : > { %v690_v41 = vpop.f32.mrb[4].mxu1 }
 0x162   : > { %v1906_v43 = vpop.f32.mrb[8].mxu0  ;;  %701 = vst [vmem:[#allocation2 + $0x20] sm:$0xf] %v690_v41  ;;  %v692_v24 = vpop.f32.mrb[5].mxu1 }
 0x163   : > { %v4695_v44 = vadd.f32 %v1906_v43, %v1855_v4  ;;  %v1908_v38 = vpop.f32.mrb[9].mxu0  ;;  %702 = vst [vmem:[#allocation2 + $0x28] sm:$0xf] %v692_v24  ;;  %v694_v42 = vpop.f32.mrb[6].mxu1 }
 0x164   : > { %v4697_v35 = vadd.f32 %v1908_v38, %v1857_v39  ;;  %v1910_v26 = vpop.f32.mrb[10].mxu0  ;;  %v695_v49 = vpop.f32.mrb[7].mxu1 }
 0x165   : > { %v1911_v57 = vpop.f32.mrb[11].mxu0 }
 0x169   : > { %v1295_v58 = vld [vmem:[#allocation2 + $0x20] sm:$0xf] }
 0x16a   : > { %v1296_v1 = vld [vmem:[#allocation2 + $0x28] sm:$0xf] }
 0x1a1   : > { %v4699_v45 = vpop.f32.mrb[8].mxu1 }
 0x1a2   : > { %v4701_v46 = vpop.f32.mrb[12].mxu0  ;;  %v4703_v48 = vpop.f32.mrb[9].mxu1 }
 0x1a3   : > { %v4705_v50 = vpop.f32.mrb[13].mxu0  ;;  %v1237_v51 = vpop.f32.mrb[10].mxu1 }
 0x1a4   : > { %v2425_v33 = vpop.f32.mrb[14].mxu0  ;;  %v1238_v53 = vpop.f32.mrb[11].mxu1 }
 0x1a5   : > { %v2426_v55 = vpop.f32.mrb[15].mxu0 }
 0x1d9   : > { %v1274_v20 = vpop.f32.mrb[0].mxu1 }
 0x1da   : > { %v2462_v21 = vpop.f32.mrb[0].mxu0  ;;  %v1276_v8 = vpop.f32.mrb[1].mxu1 }
 0x1db   : > { %v3253_v47 = vadd.f32 %v2462_v21, %v1274_v20  ;;  %v2464_v22 = vpop.f32.mrb[1].mxu0  ;;  %v1278_v25 = vpop.f32.mrb[2].mxu1 }
 0x1dc   : > { %v3256_v23 = vadd.f32 %v2464_v22, %v1276_v8  ;;  %v2466_v27 = vpop.f32.mrb[2].mxu0  ;;  %v1280_v36 = vpop.f32.mrb[3].mxu1 }
 0x1dd   : > { %v4724_v28 = vadd.f32 %v3253_v47, %v4718_v19  ;;  %v3259_v12 = vadd.f32 %v2466_v27, %v1278_v25  ;;  %v2468_v29 = vpop.f32.mrb[3].mxu0 }
 0x1de   : > { %v4727_v30 = vadd.f32 %v3256_v23, %v4720_v5  ;;  %v3262_v34 = vadd.f32 %v2468_v29, %v1280_v36 }
 0x1df   : > { %v2582_v52 = vmul.f32 %v3239_v11, %v4724_v28  ;;  %v4732_v32 = vadd.f32 %v3259_v12, %v4718_v19 }
 0x1e0   : > { %v2583_v4 = vmul.f32 %v3239_v11, %v4727_v30  ;;  %v4736_v39 = vadd.f32 %v3262_v34, %v4720_v5 }
 0x1e1   : > { %v2584_v41 = vmul.f32 %v3240_v31, %v4732_v32  ;;  %v2609_v43 = vmul.f32 %v2582_v52, %v4724_v28  ;;  %v1284_v42 = vpop.f32.mrb[12].mxu1 }
 0x1e2   : > { %v2610_v24 = vmul.f32 %v2583_v4, %v4727_v30  ;;  %v2585_v38 = vmul.f32 %v3240_v31, %v4736_v39  ;;  %v2472_v26 = vpop.f32.mrb[16].mxu0  ;;  %v1285_v51 = vadd.f32 %v1284_v42, %v4699_v45  ;;  %v1286_v33 = vpop.f32.mrb[13].mxu1 }
 0x1e3   : > { %v2588_v49 = vadd.f32 %v2584_v41, %v2582_v52  ;;  %v2611_v57 = vmul.f32 %v2584_v41, %v4732_v32  ;;  %v2473_v53 = vadd.f32 %v2472_v26, %v4701_v46  ;;  %v2474_v55 = vpop.f32.mrb[17].mxu0  ;;  %v1287_v59 = vadd.f32 %v1286_v33, %v4703_v48  ;;  %v1288_v60 = vpop.f32.mrb[14].mxu1 }
 0x1e4   : > { %v2598_v56 = vadd.f32 %v2585_v38, %v2583_v4  ;;  %v2612_v37 = vmul.f32 %v2585_v38, %v4736_v39  ;;  %v2475_v61 = vadd.f32 %v2474_v55, %v4705_v50  ;;  %v2476_v62 = vpop.f32.mrb[18].mxu0  ;;  %v1301_v0 = vadd.f32 %v1295_v58, %v1285_v51  ;;  %v1289_v2 = vpop.f32.mrb[15].mxu1 }
 0x1e5   : > { %v2615_v63 = vadd.f32 %v2611_v57, %v2609_v43  ;;  %v2477_v3 = vpop.f32.mrb[19].mxu0  ;;  %v1302_v7 = vadd.f32 %v1296_v1, %v1287_v59  ;;  %v2553_v46 = vshrl.u32 %v4739_v17, 2 }
 0x1e6   : > { %v2624_v45 = vadd.f32 %v2612_v37, %v2610_v24  ;;  %1307 = vst [vmem:[#allocation2 + $0x20] sm:$0xf] %v1301_v0 }
 0x1e7   : > { %1308 = vst [vmem:[#allocation2 + $0x28] sm:$0xf] %v1302_v7  ;;  %v2554_v9 = vmul.u32 5, %v2553_v46 }
 0x1e9   : > { %v2555_v50 = vsub.s32 %v2524_v54, %v2554_v9 }
 0x1eb   : > { %vm2560_vm11 = vcmp.ne.s32.totalorder %v2555_v50, 0  ;;  %vm2563_vm12 = vcmp.lt.s32.totalorder %v2555_v50, 0  ;;  %v2569_v15 = vadd.s32 5, %v2555_v50 }
 0x1ec   : > { %vm2566_vm13 = vmand %vm2563_vm12, %vm2560_vm11 }
 0x1ed   : > { %v1917_v10 = vld [vmem:[#allocation2 + $0x20] sm:$0xf]  ;;  %v2572_v47 = vsel %vm2566_vm13, %v2569_v15, %v2555_v50 }
 0x1ee   : > { %v1923_v13 = vadd.f32 %v1917_v10, %v4695_v44  ;;  %v1918_v48 = vld [vmem:[#allocation2 + $0x28] sm:$0xf]  ;;  %vm2575_vm14 = vcmp.ne.s32.totalorder %v2572_v47, 4 }
 0x1ef   : > { %v1924_v14 = vadd.f32 %v1918_v48, %v4697_v35  ;;  %v3241_v44 = vsel %vm2575_vm14, 1.0, %v3735_v6 }
 0x1f0   : > { %1929 = vst [vmem:[#allocation2 + $0x20] sm:$0xf] %v1923_v13 }
 0x1f1   : > { %1930 = vst [vmem:[#allocation2 + $0x28] sm:$0xf] %v1924_v14 }
 0x1f7   : > { %v2483_v16 = vld [vmem:[#allocation2 + $0x20] sm:$0xf] }
 0x1f8   : > { %v2489_v18 = vadd.f32 %v2483_v16, %v2473_v53  ;;  %v2484_v20 = vld [vmem:[#allocation2 + $0x28] sm:$0xf] }
 0x1f9   : > { %v2490_v21 = vadd.f32 %v2484_v20, %v2475_v61 }
 0x1fa   : > { %2495 = vst [vmem:[#allocation2 + $0x20] sm:$0xf] %v2489_v18 }
 0x1fb   : > { %2496 = vst [vmem:[#allocation2 + $0x28] sm:$0xf] %v2490_v21 }
 0x201   : > { %v2501_v8 = vld [vmem:[#allocation2 + $0x20] sm:$0xf] }
 0x202   : > { %v4756_v35 = vadd.f32 %v4718_v19, %v2501_v8  ;;  %v2502_v22 = vld [vmem:[#allocation2 + $0x28] sm:$0xf] }
 0x203   : > { %v4759_v11 = vadd.f32 %v4720_v5, %v2502_v22 }
 0x204   : > { %v2586_v23 = vmul.f32 %v3241_v44, %v4756_v35 }
 0x205   : > { %v2587_v25 = vmul.f32 %v3241_v44, %v4759_v11 }
 0x206   : > { %v2590_v27 = vsel %vm2589_vm15, %v2586_v23, 0.0  ;;  %v2613_v54 = vmul.f32 %v2586_v23, %v4756_v35 }
 0x207   : > { %v2591_v12 = vadd.f32 %v2590_v27, %v2588_v49  ;;  %v2599_v36 = vsel %vm2589_vm15, %v2587_v25, 0.0  ;;  %v2614_v6 = vmul.f32 %v2587_v25, %v4759_v11 }
 0x208   : > { %v2616_v29 = vsel %vm2589_vm15, %v2613_v54, 0.0  ;;  %v2600_v31 = vadd.f32 %v2599_v36, %v2598_v56 }
 0x209   : > { %v2592_v19 = vrot.slane %v2591_v12, 4  ;;  %v2617_v34 = vadd.f32 %v2616_v29, %v2615_v63  ;;  %v2625_v52 = vsel %vm2589_vm15, %v2614_v6, 0.0 }
 0x20a   : > { %v2601_v4 = vrot.slane %v2600_v31, 4  ;;  %v2626_v40 = vadd.f32 %v2625_v52, %v2624_v45 }
 0x20b   : > { %v2593_v5 = vadd.f32 %v2592_v19, %v2591_v12  ;;  %v2618_v17 = vrot.slane %v2617_v34, 4 }
 0x20c   : > { %v2602_v41 = vadd.f32 %v2601_v4, %v2600_v31  ;;  %v2627_v43 = vrot.slane %v2626_v40, 4 }
 0x20d   : > { %v2594_v24 = vrot.slane %v2593_v5, 2  ;;  %v2619_v38 = vadd.f32 %v2618_v17, %v2617_v34 }
 0x20e   : > { %v2603_v42 = vrot.slane %v2602_v41, 2  ;;  %v2628_v26 = vadd.f32 %v2627_v43, %v2626_v40 }
 0x20f   : > { %v2595_v57 = vadd.f32 %v2594_v24, %v2593_v5  ;;  %v2620_v49 = vrot.slane %v2619_v38, 2 }
 0x210   : > { %v2604_v51 = vadd.f32 %v2603_v42, %v2602_v41  ;;  %v2629_v33 = vrot.slane %v2628_v26, 2 }
 0x211   : > { %v2596_v53 = vrot.slane %v2595_v57, 1  ;;  %v2621_v55 = vadd.f32 %v2620_v49, %v2619_v38 }
 0x212   : > { %v2605_v56 = vrot.slane %v2604_v51, 1  ;;  %v2630_v37 = vadd.f32 %v2629_v33, %v2628_v26 }
 0x213   : > { %v2597_v58 = vadd.f32 %v2596_v53, %v2595_v57  ;;  %v2622_v59 = vrot.slane %v2621_v55, 1 }
 0x214   : > { %v2606_v60 = vadd.f32 %v2605_v56, %v2604_v51  ;;  %v2631_v61 = vrot.slane %v2630_v37, 1 }
 0x215   : > { %v2607_v62 = vmul.f32 0.0625, %v2597_v58  ;;  %v2623_v63 = vadd.f32 %v2622_v59, %v2621_v55 }
 0x216   : > { %v2608_v0 = vmul.f32 0.0625, %v2606_v60  ;;  %v2632_v1 = vadd.f32 %v2631_v61, %v2630_v37 }
 0x217   : > { %v2633_v2 = vmul.f32 0.0625, %v2623_v63  ;;  %v2635_v3 = vmul.f32 %v2607_v62, %v2607_v62  ;;  %v2639_v45 = vsub.f32 %v4724_v28, %v2607_v62  ;;  %v2641_v7 = vsub.f32 %v4732_v32, %v2607_v62 }
 0x218   : > { %v2634_v46 = vmul.f32 0.0625, %v2632_v1  ;;  %v2636_v9 = vmul.f32 %v2608_v0, %v2608_v0  ;;  %v2640_v10 = vsub.f32 %v4727_v30, %v2608_v0  ;;  %v2642_v48 = vsub.f32 %v4736_v39, %v2608_v0 }
 0x219   : > { %v2637_v13 = vsub.f32 %v2633_v2, %v2635_v3  ;;  %v2643_v16 = vsub.f32 %v4756_v35, %v2607_v62  ;;  %v2644_v28 = vsub.f32 %v4759_v11, %v2608_v0 }
 0x21a   : > { %v2638_v14 = vsub.f32 %v2634_v46, %v2636_v9 }
 0x21b   : > { %v2645_v50 = vadd.f32 1e-05, %v2637_v13 }
 0x21c   : > { %v2646_v15 = vadd.f32 1e-05, %v2638_v14 }
 0x21d   : > { %3719 = vrsqrt.f32 %v2645_v50 }
 0x21e   : > { %3721 = vrsqrt.f32 %v2646_v15 }
 0x227   : > { %v3720_v18 = vpop.eup %3719 }
 0x228   : > { %v3722_v20 = vpop.eup %3721  ;;  %v2649_v32 = vmul.f32 %v3720_v18, %v2639_v45  ;;  %v2651_v21 = vmul.f32 %v3720_v18, %v2641_v7  ;;  %v2653_v47 = vmul.f32 %v3720_v18, %v2643_v16 }
 0x229   : > { %v2650_v44 = vmul.f32 %v3722_v20, %v2640_v10  ;;  %v2652_v30 = vmul.f32 %v3722_v20, %v2642_v48  ;;  %v2654_v8 = vmul.f32 %v3722_v20, %v2644_v28 }
 0x22a   : > { %vm2659_vm0 = vcmp.ge.f32.partialorder %v2653_v47, 0.0  ;;  %v2665_v39 = vmul.f32 0.2, %v2653_v47  ;;  %vm2655_vm1 = vcmp.ge.f32.partialorder %v2649_v32, 0.0  ;;  %vm2657_vm2 = vcmp.ge.f32.partialorder %v2651_v21, 0.0 }
 0x22b   : > { %vm2656_vm3 = vcmp.ge.f32.partialorder %v2650_v44, 0.0  ;;  %vm2658_vm4 = vcmp.ge.f32.partialorder %v2652_v30, 0.0  ;;  %vm2660_vm5 = vcmp.ge.f32.partialorder %v2654_v8, 0.0  ;;  %v2661_v22 = vmul.f32 0.2, %v2649_v32 }
 0x22c   : > { %v2662_v35 = vmul.f32 0.2, %v2650_v44  ;;  %v2663_v23 = vmul.f32 0.2, %v2651_v21  ;;  %v2664_v25 = vmul.f32 0.2, %v2652_v30  ;;  %v2671_v11 = vsel %vm2659_vm0, %v2653_v47, %v2665_v39 }
 0x22d   : > { %v2666_v27 = vmul.f32 0.2, %v2654_v8  ;;  %v2667_v54 = vsel %vm2655_vm1, %v2649_v32, %v2661_v22 }
 0x22e   : > { %v2668_v12 = vsel %vm2656_vm3, %v2650_v44, %v2662_v35  ;;  %v2669_v36 = vsel %vm2657_vm2, %v2651_v21, %v2663_v23  ;;  %v2670_v6 = vsel %vm2658_vm4, %v2652_v30, %v2664_v25 }
 0x22f   : > { %v2672_v29 = vsel %vm2660_vm5, %v2654_v8, %v2666_v27  ;;  %v3248_v31 = vpack.c.bf16 %v2668_v12, %v2667_v54  ;;  %v3249_v19 = vpack.c.bf16 %v2670_v6, %v2669_v36 }
 0x230   : > { %v3250_v34 = vpack.c.bf16 %v2672_v29, %v2671_v11 }
 0x231   : > { %2693 = vst [vmem:[%s170_s26] sm:$0xff] %v3248_v31  ;;  %2694 = vst [vmem:[%s170_s26 + $0x8] sm:$0xff] %v3249_v19 }
 0x232   : > { %2695 = vst [vmem:[%s170_s26 + $0x10] sm:$0x33] %v3250_v34 }
 0x233 PF: > { %s13_s12 = sadd.s32 1, %s3733_s12  }
 0x234   : > { %p10_p4 = scmp.ge.s32.totalorder %s13_s12, 4  }
 0x236   :  { %12 = sbr.rel (!%p10_p4) target bundleno = 1 (0x1), region = 65 }

// kernel: discriminator_forward.7
= control target key start
LH: loop header
LB: loop body
LE: loop exit
PB: predicated region body
PF: predicated region fallthrough
CT: control target
= control target key end

     0   :  { %s11701_s12 = smov 0   ;;  %s15127_s0 = inlined_call_operand.vmem [shape: bf16[2,16,1024], index: 0, kind: input, shape index: {}]   ;;  %s15128_s1 = inlined_call_operand.vmem [shape: bf16[4,1024,512], index: 1, kind: input, shape index: {}]   ;;  %s15129_s2 = inlined_call_operand.vmem [shape: f32[1,512], index: 2, kind: input, shape index: {}]   ;;  %s15130_s3 = inlined_call_operand.vmem [shape: f32[2,1,512], index: 3, kind: output, shape index: {}]  }
   0x1 LB: > { %s8239_s13 = sadd.s32 4294967295, %s11677_s12   ;;  %p8243_p0 = scmp.ge.s32.totalorder %s11677_s12, 1  ;;  %s11677_s12 = sphi %s11701_s12, %s13_s12  }
   0x2   : > { %p137_p1 = scmp.lt.s32.totalorder %s11677_s12, 3 }
   0x4   : > { %p138_p2 = pnand %p8243_p0, %p137_p1 }
   0x5   : > { %v10111_v0 = vld [vmem:[%s15128_s1 + $0x4] ss:$16 sps:$4 sm:$0xff] (!%p138_p2)   ;;  %v10113_v1 = vld [vmem:[%s15128_s1 + $0xc] ss:$16 sps:$4 sm:$0xff] (!%p138_p2)   ;;  %v10115_v2 = vld [vmem:[%s15128_s1] ss:$16 sps:$4 sm:$0xff] (!%p138_p2)  }
   0x6   : > { %141 = sbr.rel (%p138_p2) target bundleno = 1324 (0x52c), region = 32  ;;  %1737 = vmatprep.subr.bf16.mxu0 (!%p138_p2), %v10111_v0  ;;  %v10116_v3 = vld [vmem:[%s15128_s1 + $0x8] ss:$16 sps:$4 sm:$0xff] (!%p138_p2)   ;;  %1901 = vmatprep.subr.bf16.mxu1 (!%p138_p2), %v10113_v1  ;;  %v10117_v4 = vld [vmem:[%s15128_s1 + $0x24] ss:$16 sps:$4 sm:$0xff] (!%p138_p2)   ;;  %p160_p3 = scmp.lt.s32.totalorder (!%p138_p2), %s8239_s13, 1 }
   0x7   : > { %1738 = vmatpush1.bf16.msra.mxu0 (!%p138_p2), %v10115_v2  ;;  %1902 = vmatpush1.bf16.msra.mxu1 (!%p138_p2), %v10116_v3  ;;  %v10119_v5 = vld [vmem:[%s15128_s1 + $0x2c] ss:$16 sps:$4 sm:$0xff] (!%p138_p2)   ;;  %v10121_v6 = vld [vmem:[%s15128_s1 + $0x20] ss:$16 sps:$4 sm:$0xff] (!%p138_p2)   ;;  %v10122_v7 = vld [vmem:[%s15128_s1 + $0x28] ss:$16 sps:$4 sm:$0xff] (!%p138_p2)  }
   0x8   : > { %1739 = vmatprep.subr.bf16.mxu0 (!%p138_p2), %v10117_v4  ;;  %1903 = vmatprep.subr.bf16.mxu1 (!%p138_p2), %v10119_v5  ;;  %v10123_v8 = vld [vmem:[%s15128_s1 + $0x44] ss:$16 sps:$4 sm:$0xff] (!%p138_p2)   ;;  %v10125_v9 = vld [vmem:[%s15128_s1 + $0x4c] ss:$16 sps:$4 sm:$0xff] (!%p138_p2)   ;;  %v10127_v10 = vld [vmem:[%s15128_s1 + $0x40] ss:$16 sps:$4 sm:$0xff] (!%p138_p2)  }
   0x9   : > { %v10128_v11 = vld [vmem:[%s15128_s1 + $0x48] ss:$16 sps:$4 sm:$0xff] (!%p138_p2)   ;;  %v10129_v12 = vld [vmem:[%s15128_s1 + $0x64] ss:$16 sps:$4 sm:$0xff] (!%p138_p2)   ;;  %v10131_v13 = vld [vmem:[%s15128_s1 + $0x6c] ss:$16 sps:$4 sm:$0xff] (!%p138_p2)  }
   0xa   : > { %v10133_v14 = vld [vmem:[%s15128_s1 + $0x60] ss:$16 sps:$4 sm:$0xff] (!%p138_p2)   ;;  %v10134_v15 = vld [vmem:[%s15128_s1 + $0x68] ss:$16 sps:$4 sm:$0xff] (!%p138_p2)   ;;  %v10135_v16 = vld [vmem:[%s15128_s1 + $0x84] ss:$16 sps:$4 sm:$0xff] (!%p138_p2)  }
   0xb   : > { %1740 = vmatpush1.bf16.msra.mxu0 (!%p138_p2), %v10121_v6  ;;  %1904 = vmatpush1.bf16.msra.mxu1 (!%p138_p2), %v10122_v7  ;;  %v10137_v17 = vld [vmem:[%s15128_s1 + $0x8c] ss:$16 sps:$4 sm:$0xff] (!%p138_p2)   ;;  %v10139_v18 = vld [vmem:[%s15128_s1 + $0x80] ss:$16 sps:$4 sm:$0xff] (!%p138_p2)   ;;  %v10140_v19 = vld [vmem:[%s15128_s1 + $0x88] ss:$16 sps:$4 sm:$0xff] (!%p138_p2)  }
   0xc   : > { %1741 = vmatprep.subr.bf16.mxu0 (!%p138_p2), %v10123_v8  ;;  %1905 = vmatprep.subr.bf16.mxu1 (!%p138_p2), %v10125_v9  ;;  %v10141_v20 = vld [vmem:[%s15128_s1 + $0xa4] ss:$16 sps:$4 sm:$0xff] (!%p138_p2)   ;;  %v10143_v21 = vld [vmem:[%s15128_s1 + $0xac] ss:$16 sps:$4 sm:$0xff] (!%p138_p2)   ;;  %v10145_v22 = vld [vmem:[%s15128_s1 + $0xa0] ss:$16 sps:$4 sm:$0xff] (!%p138_p2)  }
   0xd   : > { %v10146_v23 = vld [vmem:[%s15128_s1 + $0xa8] ss:$16 sps:$4 sm:$0xff]   ;;  %v10147_v24 = vld [vmem:[%s15128_s1 + $0xc4] ss:$16 sps:$4 sm:$0xff]   ;;  %v10149_v25 = vld [vmem:[%s15128_s1 + $0xcc] ss:$16 sps:$4 sm:$0xff]  }
   0xe   : > { %v10151_v26 = vld [vmem:[%s15128_s1 + $0xc0] ss:$16 sps:$4 sm:$0xff]   ;;  %v10152_v27 = vld [vmem:[%s15128_s1 + $0xc8] ss:$16 sps:$4 sm:$0xff]   ;;  %v10153_v28 = vld [vmem:[%s15128_s1 + $0xe4] ss:$16 sps:$4 sm:$0xff]  }
   0xf   : > { %1742 = vmatpush1.bf16.msra.mxu0 %v10127_v10  ;;  %1906 = vmatpush1.bf16.msra.mxu1 %v10128_v11  ;;  %v10155_v29 = vld [vmem:[%s15128_s1 + $0xec] ss:$16 sps:$4 sm:$0xff]   ;;  %v10157_v30 = vld [vmem:[%s15128_s1 + $0xe0] ss:$16 sps:$4 sm:$0xff]   ;;  %v10158_v31 = vld [vmem:[%s15128_s1 + $0xe8] ss:$16 sps:$4 sm:$0xff]  }
  0x10   : > { %1743 = vmatprep.subr.bf16.mxu0 %v10129_v12  ;;  %1907 = vmatprep.subr.bf16.mxu1 %v10131_v13  ;;  %v10159_v32 = vld [vmem:[%s15128_s1 + $0x104] ss:$16 sps:$4 sm:$0xff]   ;;  %v10161_v33 = vld [vmem:[%s15128_s1 + $0x10c] ss:$16 sps:$4 sm:$0xff]   ;;  %v10163_v34 = vld [vmem:[%s15128_s1 + $0x100] ss:$16 sps:$4 sm:$0xff]  }
  0x11   : > { %v10164_v35 = vld [vmem:[%s15128_s1 + $0x108] ss:$16 sps:$4 sm:$0xff]   ;;  %v10165_v36 = vld [vmem:[%s15128_s1 + $0x124] ss:$16 sps:$4 sm:$0xff]   ;;  %s15132_s13 = smov (!%p160_p3, %s8239_s13), 1  ;;  %vm8011_vm4 = vcmask 1045504  }
  0x12   : > { %v10167_v37 = vld [vmem:[%s15128_s1 + $0x12c] ss:$16 sps:$4 sm:$0xff]   ;;  %v10169_v38 = vld [vmem:[%s15128_s1 + $0x120] ss:$16 sps:$4 sm:$0xff]   ;;  %v10170_v39 = vld [vmem:[%s15128_s1 + $0x128] ss:$16 sps:$4 sm:$0xff]  }
  0x13   : > { %1744 = vmatpush1.bf16.msra.mxu0 %v10133_v14  ;;  %1908 = vmatpush1.bf16.msra.mxu1 %v10134_v15  ;;  %v10171_v40 = vld [vmem:[%s15128_s1 + $0x144] ss:$16 sps:$4 sm:$0xff]   ;;  %s10074_s21 = sshll.u32 %s15132_s13, 6  ;;  %v10173_v41 = vld [vmem:[%s15128_s1 + $0x14c] ss:$16 sps:$4 sm:$0xff]   ;;  %s8246_s6 = sshll.u32 %s15132_s13, 2 }
  0x14   : > { %1745 = vmatprep.subr.bf16.mxu0 %v10135_v16  ;;  %1909 = vmatprep.subr.bf16.mxu1 %v10137_v17  ;;  %v10175_v42 = vld [vmem:[%s15128_s1 + $0x140] ss:$16 sps:$4 sm:$0xff]   ;;  %v10176_v43 = vld [vmem:[%s15128_s1 + $0x148] ss:$16 sps:$4 sm:$0xff]   ;;  %s11851_s30 = scalar_lea.vmem %s15127_s0, %s10074_s21  ;;  %v10177_v44 = vld [vmem:[%s15128_s1 + $0x164] ss:$16 sps:$4 sm:$0xff]   ;;  %s168_s9 = scalar_lea.vmem %s15130_s3, %s8246_s6 }
  0x15   : > { %v10179_v45 = vld [vmem:[%s15128_s1 + $0x16c] ss:$16 sps:$4 sm:$0xff]   ;;  %v169_v46 = vld [vmem:[%s11851_s30] sm:$0x77]  ;;  %v10182_v49 = vld [vmem:[%s15128_s1 + $0x168] ss:$16 sps:$4 sm:$0xff]  }
  0x16   : > { %v10181_v47 = vld [vmem:[%s15128_s1 + $0x160] ss:$16 sps:$4 sm:$0xff]   ;;  %v8248_v48 = vcombine.high %v169_v46, %v169_v46  ;;  %v10183_v50 = vld [vmem:[%s15128_s1 + $0x184] ss:$16 sps:$4 sm:$0xff]   ;;  %v10185_v51 = vld [vmem:[%s15128_s1 + $0x18c] ss:$16 sps:$4 sm:$0xff]   ;;  %v8247_v4 = vcombine.low %v169_v46, %v169_v46 }
  0x17   : > { %1746 = vmatpush1.bf16.msra.mxu0 %v10139_v18  ;;  %1910 = vmatpush1.bf16.msra.mxu1 %v10140_v19  ;;  %v10187_v52 = vld [vmem:[%s15128_s1 + $0x180] ss:$16 sps:$4 sm:$0xff]   ;;  %v10188_v53 = vld [vmem:[%s15128_s1 + $0x188] ss:$16 sps:$4 sm:$0xff]   ;;  %v10189_v54 = vld [vmem:[%s15128_s1 + $0x1a4] ss:$16 sps:$4 sm:$0xff]  }
  0x18   : > { %1747 = vmatprep.subr.bf16.mxu0 %v10141_v20  ;;  %1911 = vmatprep.subr.bf16.mxu1 %v10143_v21  ;;  %v10191_v55 = vld [vmem:[%s15128_s1 + $0x1ac] ss:$16 sps:$4 sm:$0xff]   ;;  %v10193_v56 = vld [vmem:[%s15128_s1 + $0x1a0] ss:$16 sps:$4 sm:$0xff]   ;;  %v10194_v57 = vld [vmem:[%s15128_s1 + $0x1a8] ss:$16 sps:$4 sm:$0xff]  }
  0x19   : > { %1769 = vmatprep.mubr.bf16.mxu0 %v8248_v48  ;;  %1933 = vmatprep.mubr.bf16.mxu1 %v8248_v48  ;;  %v10195_v58 = vld [vmem:[%s15128_s1 + $0x1c4] ss:$16 sps:$4 sm:$0xff]   ;;  %v10197_v59 = vld [vmem:[%s15128_s1 + $0x1cc] ss:$16 sps:$4 sm:$0xff]   ;;  %v10199_v60 = vld [vmem:[%s15128_s1 + $0x1c0] ss:$16 sps:$4 sm:$0xff]  }
  0x1a   : > { %v10200_v61 = vld [vmem:[%s15128_s1 + $0x1c8] ss:$16 sps:$4 sm:$0xff]   ;;  %v10201_v62 = vld [vmem:[%s15128_s1 + $0x1e4] ss:$16 sps:$4 sm:$0xff]   ;;  %v10203_v63 = vld [vmem:[%s15128_s1 + $0x1ec] ss:$16 sps:$4 sm:$0xff]  }
  0x1b   : > { %1748 = vmatpush1.bf16.msra.mxu0 %v10145_v22  ;;  %1912 = vmatpush1.bf16.msra.mxu1 %v10146_v23  ;;  %v10205_v0 = vld [vmem:[%s15128_s1 + $0x1e0] ss:$16 sps:$4 sm:$0xff]   ;;  %v10206_v1 = vld [vmem:[%s15128_s1 + $0x1e8] ss:$16 sps:$4 sm:$0xff]   ;;  %v10211_v2 = vld [vmem:[%s15128_s1 + $0x204] ss:$16 sps:$4 sm:$0xff]  }
  0x1c   : > { %1749 = vmatprep.subr.bf16.mxu0 %v10147_v24  ;;  %1913 = vmatprep.subr.bf16.mxu1 %v10149_v25  ;;  %v10214_v3 = vld [vmem:[%s15128_s1 + $0x20c] ss:$16 sps:$4 sm:$0xff]   ;;  %v10209_v5 = vld [vmem:[%s15128_s1 + $0x200] ss:$16 sps:$4 sm:$0xff]   ;;  %v10212_v6 = vld [vmem:[%s15128_s1 + $0x208] ss:$16 sps:$4 sm:$0xff]  }
  0x1d   : > { %v10217_v7 = vld [vmem:[%s15128_s1 + $0x224] ss:$16 sps:$4 sm:$0xff]   ;;  %v10220_v8 = vld [vmem:[%s15128_s1 + $0x22c] ss:$16 sps:$4 sm:$0xff]   ;;  %v10215_v9 = vld [vmem:[%s15128_s1 + $0x220] ss:$16 sps:$4 sm:$0xff]  }
  0x1e   : > { %v10218_v10 = vld [vmem:[%s15128_s1 + $0x228] ss:$16 sps:$4 sm:$0xff]   ;;  %v10223_v11 = vld [vmem:[%s15128_s1 + $0x244] ss:$16 sps:$4 sm:$0xff]   ;;  %v10226_v12 = vld [vmem:[%s15128_s1 + $0x24c] ss:$16 sps:$4 sm:$0xff]  }
  0x1f   : > { %1750 = vmatpush1.bf16.msra.mxu0 %v10151_v26  ;;  %1914 = vmatpush1.bf16.msra.mxu1 %v10152_v27  ;;  %v10221_v13 = vld [vmem:[%s15128_s1 + $0x240] ss:$16 sps:$4 sm:$0xff]   ;;  %v10224_v14 = vld [vmem:[%s15128_s1 + $0x248] ss:$16 sps:$4 sm:$0xff]   ;;  %v10229_v15 = vld [vmem:[%s15128_s1 + $0x264] ss:$16 sps:$4 sm:$0xff]  }
  0x20   : > { %1751 = vmatprep.subr.bf16.mxu0 %v10153_v28  ;;  %1915 = vmatprep.subr.bf16.mxu1 %v10155_v29  ;;  %v10232_v16 = vld [vmem:[%s15128_s1 + $0x26c] ss:$16 sps:$4 sm:$0xff]   ;;  %v10227_v17 = vld [vmem:[%s15128_s1 + $0x260] ss:$16 sps:$4 sm:$0xff]   ;;  %v10230_v18 = vld [vmem:[%s15128_s1 + $0x268] ss:$16 sps:$4 sm:$0xff]  }
  0x21   : > { %v10235_v19 = vld [vmem:[%s15128_s1 + $0x284] ss:$16 sps:$4 sm:$0xff]   ;;  %v10238_v20 = vld [vmem:[%s15128_s1 + $0x28c] ss:$16 sps:$4 sm:$0xff]   ;;  %v10233_v21 = vld [vmem:[%s15128_s1 + $0x280] ss:$16 sps:$4 sm:$0xff]  }
  0x22   : > { %v10236_v22 = vld [vmem:[%s15128_s1 + $0x288] ss:$16 sps:$4 sm:$0xff]   ;;  %v10241_v23 = vld [vmem:[%s15128_s1 + $0x2a4] ss:$16 sps:$4 sm:$0xff]   ;;  %v10244_v24 = vld [vmem:[%s15128_s1 + $0x2ac] ss:$16 sps:$4 sm:$0xff]  }
  0x23   : > { %1752 = vmatpush1.bf16.msra.mxu0 %v10157_v30  ;;  %1916 = vmatpush1.bf16.msra.mxu1 %v10158_v31  ;;  %v10239_v25 = vld [vmem:[%s15128_s1 + $0x2a0] ss:$16 sps:$4 sm:$0xff]   ;;  %v10242_v26 = vld [vmem:[%s15128_s1 + $0x2a8] ss:$16 sps:$4 sm:$0xff]   ;;  %v10247_v27 = vld [vmem:[%s15128_s1 + $0x2c4] ss:$16 sps:$4 sm:$0xff]  }
  0x24   : > { %1753 = vmatprep.subr.bf16.mxu0 %v10159_v32  ;;  %1917 = vmatprep.subr.bf16.mxu1 %v10161_v33  ;;  %v10250_v28 = vld [vmem:[%s15128_s1 + $0x2cc] ss:$16 sps:$4 sm:$0xff]   ;;  %v10245_v31 = vld [vmem:[%s15128_s1 + $0x2c0] ss:$16 sps:$4 sm:$0xff]   ;;  %v10248_v32 = vld [vmem:[%s15128_s1 + $0x2c8] ss:$16 sps:$4 sm:$0xff]  }
  0x25   : > { %v11993_v29 = vld [vmem:[%s11851_s30 + $0x8] sm:$0x77]  ;;  %v10253_v33 = vld [vmem:[%s15128_s1 + $0x2e4] ss:$16 sps:$4 sm:$0xff]  }
  0x26   : > { %v8250_v30 = vcombine.high %v11993_v29, %v11993_v29  ;;  %v10274_v46 = vld [vmem:[%s15128_s1 + $0x34c] ss:$16 sps:$4 sm:$0xff]   ;;  %v10272_v48 = vld [vmem:[%s15128_s1 + $0x348] ss:$16 sps:$4 sm:$0xff]  }
  0x27   : > { %1754 = vmatpush1.bf16.msra.mxu0 %v10163_v34  ;;  %1918 = vmatpush1.bf16.msra.mxu1 %v10164_v35  ;;  %v10256_v34 = vld [vmem:[%s15128_s1 + $0x2ec] ss:$16 sps:$4 sm:$0xff]   ;;  %v10251_v35 = vld [vmem:[%s15128_s1 + $0x2e0] ss:$16 sps:$4 sm:$0xff]  }
  0x28   : > { %1755 = vmatprep.subr.bf16.mxu0 %v10165_v36  ;;  %1919 = vmatprep.subr.bf16.mxu1 %v10167_v37  ;;  %v10254_v36 = vld [vmem:[%s15128_s1 + $0x2e8] ss:$16 sps:$4 sm:$0xff]   ;;  %v10259_v37 = vld [vmem:[%s15128_s1 + $0x304] ss:$16 sps:$4 sm:$0xff]  }
  0x2b   : > { %1756 = vmatpush1.bf16.msra.mxu0 %v10169_v38  ;;  %1920 = vmatpush1.bf16.msra.mxu1 %v10170_v39  ;;  %v10262_v38 = vld [vmem:[%s15128_s1 + $0x30c] ss:$16 sps:$4 sm:$0xff]   ;;  %v10257_v39 = vld [vmem:[%s15128_s1 + $0x300] ss:$16 sps:$4 sm:$0xff]  }
  0x2c   : > { %1757 = vmatprep.subr.bf16.mxu0 %v10171_v40  ;;  %1921 = vmatprep.subr.bf16.mxu1 %v10173_v41  ;;  %v10260_v40 = vld [vmem:[%s15128_s1 + $0x308] ss:$16 sps:$4 sm:$0xff]   ;;  %v10265_v41 = vld [vmem:[%s15128_s1 + $0x324] ss:$16 sps:$4 sm:$0xff]  }
  0x2f   : > { %1758 = vmatpush1.bf16.msra.mxu0 %v10175_v42  ;;  %1922 = vmatpush1.bf16.msra.mxu1 %v10176_v43  ;;  %v10268_v42 = vld [vmem:[%s15128_s1 + $0x32c] ss:$16 sps:$4 sm:$0xff]   ;;  %v10263_v43 = vld [vmem:[%s15128_s1 + $0x320] ss:$16 sps:$4 sm:$0xff]  }
  0x30   : > { %1759 = vmatprep.subr.bf16.mxu0 %v10177_v44  ;;  %1923 = vmatprep.subr.bf16.mxu1 %v10179_v45  ;;  %v10266_v44 = vld [vmem:[%s15128_s1 + $0x328] ss:$16 sps:$4 sm:$0xff]   ;;  %v10271_v45 = vld [vmem:[%s15128_s1 + $0x344] ss:$16 sps:$4 sm:$0xff]  }
  0x33   : > { %1760 = vmatpush1.bf16.msra.mxu0 %v10181_v47  ;;  %1924 = vmatpush1.bf16.msra.mxu1 %v10182_v49  ;;  %v10269_v47 = vld [vmem:[%s15128_s1 + $0x340] ss:$16 sps:$4 sm:$0xff]   ;;  %v10277_v49 = vld [vmem:[%s15128_s1 + $0x364] ss:$16 sps:$4 sm:$0xff]  }
  0x34   : > { %1761 = vmatprep.subr.bf16.mxu0 %v10183_v50  ;;  %1925 = vmatprep.subr.bf16.mxu1 %v10185_v51  ;;  %v10280_v50 = vld [vmem:[%s15128_s1 + $0x36c] ss:$16 sps:$4 sm:$0xff]   ;;  %v10275_v51 = vld [vmem:[%s15128_s1 + $0x360] ss:$16 sps:$4 sm:$0xff]  }
  0x37   : > { %1762 = vmatpush1.bf16.msra.mxu0 %v10187_v52  ;;  %1926 = vmatpush1.bf16.msra.mxu1 %v10188_v53  ;;  %v10278_v52 = vld [vmem:[%s15128_s1 + $0x368] ss:$16 sps:$4 sm:$0xff]   ;;  %v10283_v53 = vld [vmem:[%s15128_s1 + $0x384] ss:$16 sps:$4 sm:$0xff]  }
  0x38   : > { %1763 = vmatprep.subr.bf16.mxu0 %v10189_v54  ;;  %1927 = vmatprep.subr.bf16.mxu1 %v10191_v55  ;;  %v10286_v54 = vld [vmem:[%s15128_s1 + $0x38c] ss:$16 sps:$4 sm:$0xff]   ;;  %v10281_v55 = vld [vmem:[%s15128_s1 + $0x380] ss:$16 sps:$4 sm:$0xff]  }
  0x3b   : > { %1764 = vmatpush1.bf16.msra.mxu0 %v10193_v56  ;;  %1928 = vmatpush1.bf16.msra.mxu1 %v10194_v57  ;;  %v10284_v56 = vld [vmem:[%s15128_s1 + $0x388] ss:$16 sps:$4 sm:$0xff]   ;;  %v10289_v57 = vld [vmem:[%s15128_s1 + $0x3a4] ss:$16 sps:$4 sm:$0xff]  }
  0x3c   : > { %1765 = vmatprep.subr.bf16.mxu0 %v10195_v58  ;;  %1929 = vmatprep.subr.bf16.mxu1 %v10197_v59  ;;  %v10292_v58 = vld [vmem:[%s15128_s1 + $0x3ac] ss:$16 sps:$4 sm:$0xff]   ;;  %v10287_v59 = vld [vmem:[%s15128_s1 + $0x3a0] ss:$16 sps:$4 sm:$0xff]  }
  0x3f   : > { %1766 = vmatpush1.bf16.msra.mxu0 %v10199_v60  ;;  %1930 = vmatpush1.bf16.msra.mxu1 %v10200_v61  ;;  %v10290_v60 = vld [vmem:[%s15128_s1 + $0x3a8] ss:$16 sps:$4 sm:$0xff]   ;;  %v10295_v61 = vld [vmem:[%s15128_s1 + $0x3c4] ss:$16 sps:$4 sm:$0xff]  }
  0x40   : > { %1767 = vmatprep.subr.bf16.mxu0 %v10201_v62  ;;  %1931 = vmatprep.subr.bf16.mxu1 %v10203_v63  ;;  %v10298_v62 = vld [vmem:[%s15128_s1 + $0x3cc] ss:$16 sps:$4 sm:$0xff]   ;;  %v10293_v63 = vld [vmem:[%s15128_s1 + $0x3c0] ss:$16 sps:$4 sm:$0xff]  }
  0x43   : > { %1768 = vmatpush1.bf16.msra.mxu0 %v10205_v0  ;;  %1932 = vmatpush1.bf16.msra.mxu1 %v10206_v1  ;;  %v10296_v0 = vld [vmem:[%s15128_s1 + $0x3c8] ss:$16 sps:$4 sm:$0xff]   ;;  %v10301_v1 = vld [vmem:[%s15128_s1 + $0x3e4] ss:$16 sps:$4 sm:$0xff]  }
  0x44   : > { %1778 = vmatprep.subr.bf16.mxu0 %v10211_v2  ;;  %1942 = vmatprep.subr.bf16.mxu1 %v10214_v3  ;;  %v10304_v2 = vld [vmem:[%s15128_s1 + $0x3ec] ss:$16 sps:$4 sm:$0xff]   ;;  %v10299_v3 = vld [vmem:[%s15128_s1 + $0x3e0] ss:$16 sps:$4 sm:$0xff]  }
  0x46   : > { %1770 = vmatmul.mubr.bf16.vlgmr.msra.gmra.mrb[0].mxu0 %v8247_v4  ;;  %1934 = vmatmul.mubr.bf16.vlgmr.msra.gmra.mrb[0].mxu1 %v8247_v4  ;;  %v10302_v4 = vld [vmem:[%s15128_s1 + $0x3e8] ss:$16 sps:$4 sm:$0xff]  }
  0x47   : > { %1779 = vmatpush1.bf16.msra.mxu0 %v10209_v5  ;;  %1943 = vmatpush1.bf16.msra.mxu1 %v10212_v6  ;;  %v10309_v5 = vld [vmem:[%s15128_s1 + $0x404] ss:$16 sps:$4 sm:$0xff]   ;;  %v10312_v6 = vld [vmem:[%s15128_s1 + $0x40c] ss:$16 sps:$4 sm:$0xff]  }
  0x48   : > { %1780 = vmatprep.subr.bf16.mxu0 %v10217_v7  ;;  %1944 = vmatprep.subr.bf16.mxu1 %v10220_v8  ;;  %v8249_v7 = vcombine.low %v11993_v29, %v11993_v29  ;;  %v10307_v8 = vld [vmem:[%s15128_s1 + $0x400] ss:$16 sps:$4 sm:$0xff]   ;;  %v10342_v29 = vld [vmem:[%s15128_s1 + $0x4ac] ss:$16 sps:$4 sm:$0xff]  }
  0x49   : > { %1810 = vmatprep.mubr.bf16.mxu0 %v8250_v30  ;;  %1974 = vmatprep.mubr.bf16.mxu1 %v8250_v30  ;;  %v10337_v30 = vld [vmem:[%s15128_s1 + $0x4a0] ss:$16 sps:$4 sm:$0xff]  }
  0x4b   : > { %1781 = vmatpush1.bf16.msra.mxu0 %v10215_v9  ;;  %1945 = vmatpush1.bf16.msra.mxu1 %v10218_v10  ;;  %v10310_v9 = vld [vmem:[%s15128_s1 + $0x408] ss:$16 sps:$4 sm:$0xff]   ;;  %v10315_v10 = vld [vmem:[%s15128_s1 + $0x424] ss:$16 sps:$4 sm:$0xff]  }
  0x4c   : > { %1782 = vmatprep.subr.bf16.mxu0 %v10223_v11  ;;  %1946 = vmatprep.subr.bf16.mxu1 %v10226_v12  ;;  %v12129_v11 = vld [vmem:[%s11851_s30 + $0x10] sm:$0x77]  ;;  %v10318_v12 = vld [vmem:[%s15128_s1 + $0x42c] ss:$16 sps:$4 sm:$0xff]  }
  0x4f   : > { %1783 = vmatpush1.bf16.msra.mxu0 %v10221_v13  ;;  %1947 = vmatpush1.bf16.msra.mxu1 %v10224_v14  ;;  %v8252_v13 = vcombine.high %v12129_v11, %v12129_v11  ;;  %v10313_v14 = vld [vmem:[%s15128_s1 + $0x420] ss:$16 sps:$4 sm:$0xff]  }
  0x50   : > { %1784 = vmatprep.subr.bf16.mxu0 %v10229_v15  ;;  %1948 = vmatprep.subr.bf16.mxu1 %v10232_v16  ;;  %v10316_v15 = vld [vmem:[%s15128_s1 + $0x428] ss:$16 sps:$4 sm:$0xff]   ;;  %v10321_v16 = vld [vmem:[%s15128_s1 + $0x444] ss:$16 sps:$4 sm:$0xff]  }
  0x53   : > { %1785 = vmatpush1.bf16.msra.mxu0 %v10227_v17  ;;  %1949 = vmatpush1.bf16.msra.mxu1 %v10230_v18  ;;  %v10324_v17 = vld [vmem:[%s15128_s1 + $0x44c] ss:$16 sps:$4 sm:$0xff]   ;;  %v10319_v18 = vld [vmem:[%s15128_s1 + $0x440] ss:$16 sps:$4 sm:$0xff]  }
  0x54   : > { %1786 = vmatprep.subr.bf16.mxu0 %v10235_v19  ;;  %1950 = vmatprep.subr.bf16.mxu1 %v10238_v20  ;;  %v10322_v19 = vld [vmem:[%s15128_s1 + $0x448] ss:$16 sps:$4 sm:$0xff]   ;;  %v10327_v20 = vld [vmem:[%s15128_s1 + $0x464] ss:$16 sps:$4 sm:$0xff]  }
  0x57   : > { %1787 = vmatpush1.bf16.msra.mxu0 %v10233_v21  ;;  %1951 = vmatpush1.bf16.msra.mxu1 %v10236_v22  ;;  %v10330_v21 = vld [vmem:[%s15128_s1 + $0x46c] ss:$16 sps:$4 sm:$0xff]   ;;  %v10325_v22 = vld [vmem:[%s15128_s1 + $0x460] ss:$16 sps:$4 sm:$0xff]  }
  0x58   : > { %1788 = vmatprep.subr.bf16.mxu0 %v10241_v23  ;;  %1952 = vmatprep.subr.bf16.mxu1 %v10244_v24  ;;  %v10328_v23 = vld [vmem:[%s15128_s1 + $0x468] ss:$16 sps:$4 sm:$0xff]   ;;  %v10333_v24 = vld [vmem:[%s15128_s1 + $0x484] ss:$16 sps:$4 sm:$0xff]  }
  0x5b   : > { %1789 = vmatpush1.bf16.msra.mxu0 %v10239_v25  ;;  %1953 = vmatpush1.bf16.msra.mxu1 %v10242_v26  ;;  %v10336_v25 = vld [vmem:[%s15128_s1 + $0x48c] ss:$16 sps:$4 sm:$0xff]   ;;  %v10331_v26 = vld [vmem:[%s15128_s1 + $0x480] ss:$16 sps:$4 sm:$0xff]  }
  0x5c   : > { %1790 = vmatprep.subr.bf16.mxu0 %v10247_v27  ;;  %1954 = vmatprep.subr.bf16.mxu1 %v10250_v28  ;;  %v10334_v27 = vld [vmem:[%s15128_s1 + $0x488] ss:$16 sps:$4 sm:$0xff]   ;;  %v10339_v28 = vld [vmem:[%s15128_s1 + $0x4a4] ss:$16 sps:$4 sm:$0xff]  }
  0x5f   : > { %1791 = vmatpush1.bf16.msra.mxu0 %v10245_v31  ;;  %1955 = vmatpush1.bf16.msra.mxu1 %v10248_v32  ;;  %v10340_v31 = vld [vmem:[%s15128_s1 + $0x4a8] ss:$16 sps:$4 sm:$0xff]   ;;  %v10345_v32 = vld [vmem:[%s15128_s1 + $0x4c4] ss:$16 sps:$4 sm:$0xff]  }
  0x60   : > { %1792 = vmatprep.subr.bf16.mxu0 %v10253_v33  ;;  %1956 = vmatprep.subr.bf16.mxu1 %v10256_v34  ;;  %v10348_v33 = vld [vmem:[%s15128_s1 + $0x4cc] ss:$16 sps:$4 sm:$0xff]   ;;  %v10343_v34 = vld [vmem:[%s15128_s1 + $0x4c0] ss:$16 sps:$4 sm:$0xff]  }
  0x63   : > { %1793 = vmatpush1.bf16.msra.mxu0 %v10251_v35  ;;  %1957 = vmatpush1.bf16.msra.mxu1 %v10254_v36  ;;  %v10346_v35 = vld [vmem:[%s15128_s1 + $0x4c8] ss:$16 sps:$4 sm:$0xff]   ;;  %v10351_v36 = vld [vmem:[%s15128_s1 + $0x4e4] ss:$16 sps:$4 sm:$0xff]  }
  0x64   : > { %1794 = vmatprep.subr.bf16.mxu0 %v10259_v37  ;;  %1958 = vmatprep.subr.bf16.mxu1 %v10262_v38  ;;  %v10354_v37 = vld [vmem:[%s15128_s1 + $0x4ec] ss:$16 sps:$4 sm:$0xff]   ;;  %v10349_v38 = vld [vmem:[%s15128_s1 + $0x4e0] ss:$16 sps:$4 sm:$0xff]  }
  0x67   : > { %1795 = vmatpush1.bf16.msra.mxu0 %v10257_v39  ;;  %1959 = vmatpush1.bf16.msra.mxu1 %v10260_v40  ;;  %v10352_v39 = vld [vmem:[%s15128_s1 + $0x4e8] ss:$16 sps:$4 sm:$0xff]   ;;  %v10357_v40 = vld [vmem:[%s15128_s1 + $0x504] ss:$16 sps:$4 sm:$0xff]  }
  0x68   : > { %1796 = vmatprep.subr.bf16.mxu0 %v10265_v41  ;;  %1960 = vmatprep.subr.bf16.mxu1 %v10268_v42  ;;  %v10360_v41 = vld [vmem:[%s15128_s1 + $0x50c] ss:$16 sps:$4 sm:$0xff]   ;;  %v10355_v42 = vld [vmem:[%s15128_s1 + $0x500] ss:$16 sps:$4 sm:$0xff]  }
  0x6b   : > { %1797 = vmatpush1.bf16.msra.mxu0 %v10263_v43  ;;  %1961 = vmatpush1.bf16.msra.mxu1 %v10266_v44  ;;  %v10358_v43 = vld [vmem:[%s15128_s1 + $0x508] ss:$16 sps:$4 sm:$0xff]   ;;  %v10363_v44 = vld [vmem:[%s15128_s1 + $0x524] ss:$16 sps:$4 sm:$0xff]  }
  0x6c   : > { %1798 = vmatprep.subr.bf16.mxu0 %v10271_v45  ;;  %1962 = vmatprep.subr.bf16.mxu1 %v10274_v46  ;;  %v10366_v45 = vld [vmem:[%s15128_s1 + $0x52c] ss:$16 sps:$4 sm:$0xff]   ;;  %v10361_v46 = vld [vmem:[%s15128_s1 + $0x520] ss:$16 sps:$4 sm:$0xff]  }
  0x6f   : > { %1799 = vmatpush1.bf16.msra.mxu0 %v10269_v47  ;;  %1963 = vmatpush1.bf16.msra.mxu1 %v10272_v48  ;;  %v10364_v47 = vld [vmem:[%s15128_s1 + $0x528] ss:$16 sps:$4 sm:$0xff]   ;;  %v10369_v48 = vld [vmem:[%s15128_s1 + $0x544] ss:$16 sps:$4 sm:$0xff]  }
  0x70   : > { %1800 = vmatprep.subr.bf16.mxu0 %v10277_v49  ;;  %1964 = vmatprep.subr.bf16.mxu1 %v10280_v50  ;;  %v10372_v49 = vld [vmem:[%s15128_s1 + $0x54c] ss:$16 sps:$4 sm:$0xff]   ;;  %v10367_v50 = vld [vmem:[%s15128_s1 + $0x540] ss:$16 sps:$4 sm:$0xff]  }
  0x73   : > { %1801 = vmatpush1.bf16.msra.mxu0 %v10275_v51  ;;  %1965 = vmatpush1.bf16.msra.mxu1 %v10278_v52  ;;  %v10370_v51 = vld [vmem:[%s15128_s1 + $0x548] ss:$16 sps:$4 sm:$0xff]   ;;  %v10375_v52 = vld [vmem:[%s15128_s1 + $0x564] ss:$16 sps:$4 sm:$0xff]  }
  0x74   : > { %1802 = vmatprep.subr.bf16.mxu0 %v10283_v53  ;;  %1966 = vmatprep.subr.bf16.mxu1 %v10286_v54  ;;  %v10378_v53 = vld [vmem:[%s15128_s1 + $0x56c] ss:$16 sps:$4 sm:$0xff]   ;;  %v10373_v54 = vld [vmem:[%s15128_s1 + $0x560] ss:$16 sps:$4 sm:$0xff]  }
  0x77   : > { %1803 = vmatpush1.bf16.msra.mxu0 %v10281_v55  ;;  %1967 = vmatpush1.bf16.msra.mxu1 %v10284_v56  ;;  %v10376_v55 = vld [vmem:[%s15128_s1 + $0x568] ss:$16 sps:$4 sm:$0xff]   ;;  %v10381_v56 = vld [vmem:[%s15128_s1 + $0x584] ss:$16 sps:$4 sm:$0xff]  }
  0x78   : > { %1804 = vmatprep.subr.bf16.mxu0 %v10289_v57  ;;  %1968 = vmatprep.subr.bf16.mxu1 %v10292_v58  ;;  %v10384_v57 = vld [vmem:[%s15128_s1 + $0x58c] ss:$16 sps:$4 sm:$0xff]   ;;  %v10379_v58 = vld [vmem:[%s15128_s1 + $0x580] ss:$16 sps:$4 sm:$0xff]  }
  0x7b   : > { %1805 = vmatpush1.bf16.msra.mxu0 %v10287_v59  ;;  %1969 = vmatpush1.bf16.msra.mxu1 %v10290_v60  ;;  %v10382_v59 = vld [vmem:[%s15128_s1 + $0x588] ss:$16 sps:$4 sm:$0xff]   ;;  %v10387_v60 = vld [vmem:[%s15128_s1 + $0x5a4] ss:$16 sps:$4 sm:$0xff]  }
  0x7c   : > { %1806 = vmatprep.subr.bf16.mxu0 %v10295_v61  ;;  %1970 = vmatprep.subr.bf16.mxu1 %v10298_v62  ;;  %v10390_v61 = vld [vmem:[%s15128_s1 + $0x5ac] ss:$16 sps:$4 sm:$0xff]   ;;  %v10385_v62 = vld [vmem:[%s15128_s1 + $0x5a0] ss:$16 sps:$4 sm:$0xff]  }
  0x7f   : > { %1807 = vmatpush1.bf16.msra.mxu0 %v10293_v63  ;;  %1971 = vmatpush1.bf16.msra.mxu1 %v10296_v0  ;;  %v10388_v63 = vld [vmem:[%s15128_s1 + $0x5a8] ss:$16 sps:$4 sm:$0xff]   ;;  %v10393_v0 = vld [vmem:[%s15128_s1 + $0x5c4] ss:$16 sps:$4 sm:$0xff]  }
  0x80   : > { %1808 = vmatprep.subr.bf16.mxu0 %v10301_v1  ;;  %1972 = vmatprep.subr.bf16.mxu1 %v10304_v2  ;;  %v10396_v1 = vld [vmem:[%s15128_s1 + $0x5cc] ss:$16 sps:$4 sm:$0xff]   ;;  %v10391_v2 = vld [vmem:[%s15128_s1 + $0x5c0] ss:$16 sps:$4 sm:$0xff]  }
  0x83   : > { %1809 = vmatpush1.bf16.msra.mxu0 %v10299_v3  ;;  %1973 = vmatpush1.bf16.msra.mxu1 %v10302_v4  ;;  %v10394_v3 = vld [vmem:[%s15128_s1 + $0x5c8] ss:$16 sps:$4 sm:$0xff]   ;;  %v10399_v4 = vld [vmem:[%s15128_s1 + $0x5e4] ss:$16 sps:$4 sm:$0xff]  }
  0x84   : > { %1819 = vmatprep.subr.bf16.mxu0 %v10309_v5  ;;  %1983 = vmatprep.subr.bf16.mxu1 %v10312_v6  ;;  %v10402_v5 = vld [vmem:[%s15128_s1 + $0x5ec] ss:$16 sps:$4 sm:$0xff]   ;;  %v10397_v6 = vld [vmem:[%s15128_s1 + $0x5e0] ss:$16 sps:$4 sm:$0xff]  }
  0x86   : > { %1811 = vmatmul.mubr.bf16.vlgmr.msra.gmra.mrb[0].mxu0 %v8249_v7  ;;  %1975 = vmatmul.mubr.bf16.vlgmr.msra.gmra.mrb[0].mxu1 %v8249_v7  ;;  %v10400_v7 = vld [vmem:[%s15128_s1 + $0x5e8] ss:$16 sps:$4 sm:$0xff]  }
  0x87   : > { %1820 = vmatpush1.bf16.msra.mxu0 %v10307_v8  ;;  %1984 = vmatpush1.bf16.msra.mxu1 %v10310_v9  ;;  %v10407_v8 = vld [vmem:[%s15128_s1 + $0x604] ss:$16 sps:$4 sm:$0xff]   ;;  %v10410_v9 = vld [vmem:[%s15128_s1 + $0x60c] ss:$16 sps:$4 sm:$0xff]  }
  0x88   : > { %1821 = vmatprep.subr.bf16.mxu0 %v10315_v10  ;;  %1985 = vmatprep.subr.bf16.mxu1 %v10318_v12  ;;  %v10405_v10 = vld [vmem:[%s15128_s1 + $0x600] ss:$16 sps:$4 sm:$0xff]   ;;  %v8251_v12 = vcombine.low %v12129_v11, %v12129_v11 }
  0x89   : > { %1851 = vmatprep.mubr.bf16.mxu0 %v8252_v13  ;;  %2015 = vmatprep.mubr.bf16.mxu1 %v8252_v13  ;;  %v10408_v13 = vld [vmem:[%s15128_s1 + $0x608] ss:$16 sps:$4 sm:$0xff]  }
  0x8b   : > { %1822 = vmatpush1.bf16.msra.mxu0 %v10313_v14  ;;  %1986 = vmatpush1.bf16.msra.mxu1 %v10316_v15  ;;  %v12325_v14 = vld [vmem:[%s11851_s30 + $0x18] sm:$0x77]  ;;  %v10413_v15 = vld [vmem:[%s15128_s1 + $0x624] ss:$16 sps:$4 sm:$0xff]  }
  0x8c   : > { %1823 = vmatprep.subr.bf16.mxu0 %v10321_v16  ;;  %1987 = vmatprep.subr.bf16.mxu1 %v10324_v17  ;;  %v10416_v16 = vld [vmem:[%s15128_s1 + $0x62c] ss:$16 sps:$4 sm:$0xff]   ;;  %v8254_v11 = vcombine.high %v12325_v14, %v12325_v14  ;;  %v10411_v17 = vld [vmem:[%s15128_s1 + $0x620] ss:$16 sps:$4 sm:$0xff]  }
  0x8f   : > { %1824 = vmatpush1.bf16.msra.mxu0 %v10319_v18  ;;  %1988 = vmatpush1.bf16.msra.mxu1 %v10322_v19  ;;  %v10414_v18 = vld [vmem:[%s15128_s1 + $0x628] ss:$16 sps:$4 sm:$0xff]   ;;  %v10419_v19 = vld [vmem:[%s15128_s1 + $0x644] ss:$16 sps:$4 sm:$0xff]  }
  0x90   : > { %1825 = vmatprep.subr.bf16.mxu0 %v10327_v20  ;;  %1989 = vmatprep.subr.bf16.mxu1 %v10330_v21  ;;  %v10422_v20 = vld [vmem:[%s15128_s1 + $0x64c] ss:$16 sps:$4 sm:$0xff]   ;;  %v10417_v21 = vld [vmem:[%s15128_s1 + $0x640] ss:$16 sps:$4 sm:$0xff]  }
  0x93   : > { %1826 = vmatpush1.bf16.msra.mxu0 %v10325_v22  ;;  %1990 = vmatpush1.bf16.msra.mxu1 %v10328_v23  ;;  %v10420_v22 = vld [vmem:[%s15128_s1 + $0x648] ss:$16 sps:$4 sm:$0xff]   ;;  %v10425_v23 = vld [vmem:[%s15128_s1 + $0x664] ss:$16 sps:$4 sm:$0xff]  }
  0x94   : > { %1827 = vmatprep.subr.bf16.mxu0 %v10333_v24  ;;  %1991 = vmatprep.subr.bf16.mxu1 %v10336_v25  ;;  %v10428_v24 = vld [vmem:[%s15128_s1 + $0x66c] ss:$16 sps:$4 sm:$0xff]   ;;  %v10423_v25 = vld [vmem:[%s15128_s1 + $0x660] ss:$16 sps:$4 sm:$0xff]  }
  0x97   : > { %1828 = vmatpush1.bf16.msra.mxu0 %v10331_v26  ;;  %1992 = vmatpush1.bf16.msra.mxu1 %v10334_v27  ;;  %v10426_v26 = vld [vmem:[%s15128_s1 + $0x668] ss:$16 sps:$4 sm:$0xff]   ;;  %v10431_v27 = vld [vmem:[%s15128_s1 + $0x684] ss:$16 sps:$4 sm:$0xff]  }
  0x98   : > { %1829 = vmatprep.subr.bf16.mxu0 %v10339_v28  ;;  %1993 = vmatprep.subr.bf16.mxu1 %v10342_v29  ;;  %v10434_v28 = vld [vmem:[%s15128_s1 + $0x68c] ss:$16 sps:$4 sm:$0xff]   ;;  %v10429_v29 = vld [vmem:[%s15128_s1 + $0x680] ss:$16 sps:$4 sm:$0xff]  }
  0x9b   : > { %1830 = vmatpush1.bf16.msra.mxu0 %v10337_v30  ;;  %1994 = vmatpush1.bf16.msra.mxu1 %v10340_v31  ;;  %v10432_v30 = vld [vmem:[%s15128_s1 + $0x688] ss:$16 sps:$4 sm:$0xff]   ;;  %v10437_v31 = vld [vmem:[%s15128_s1 + $0x6a4] ss:$16 sps:$4 sm:$0xff]  }
  0x9c   : > { %1831 = vmatprep.subr.bf16.mxu0 %v10345_v32  ;;  %1995 = vmatprep.subr.bf16.mxu1 %v10348_v33  ;;  %v10440_v32 = vld [vmem:[%s15128_s1 + $0x6ac] ss:$16 sps:$4 sm:$0xff]   ;;  %v10435_v33 = vld [vmem:[%s15128_s1 + $0x6a0] ss:$16 sps:$4 sm:$0xff]  }
  0x9f   : > { %1832 = vmatpush1.bf16.msra.mxu0 %v10343_v34  ;;  %1996 = vmatpush1.bf16.msra.mxu1 %v10346_v35  ;;  %v10438_v34 = vld [vmem:[%s15128_s1 + $0x6a8] ss:$16 sps:$4 sm:$0xff]   ;;  %v10443_v35 = vld [vmem:[%s15128_s1 + $0x6c4] ss:$16 sps:$4 sm:$0xff]  }
  0xa0   : > { %1833 = vmatprep.subr.bf16.mxu0 %v10351_v36  ;;  %1997 = vmatprep.subr.bf16.mxu1 %v10354_v37  ;;  %v10446_v36 = vld [vmem:[%s15128_s1 + $0x6cc] ss:$16 sps:$4 sm:$0xff]   ;;  %v10441_v37 = vld [vmem:[%s15128_s1 + $0x6c0] ss:$16 sps:$4 sm:$0xff]  }
  0xa3   : > { %1834 = vmatpush1.bf16.msra.mxu0 %v10349_v38  ;;  %1998 = vmatpush1.bf16.msra.mxu1 %v10352_v39  ;;  %v10444_v38 = vld [vmem:[%s15128_s1 + $0x6c8] ss:$16 sps:$4 sm:$0xff]   ;;  %v10449_v39 = vld [vmem:[%s15128_s1 + $0x6e4] ss:$16 sps:$4 sm:$0xff]  }
  0xa4   : > { %1835 = vmatprep.subr.bf16.mxu0 %v10357_v40  ;;  %1999 = vmatprep.subr.bf16.mxu1 %v10360_v41  ;;  %v10452_v40 = vld [vmem:[%s15128_s1 + $0x6ec] ss:$16 sps:$4 sm:$0xff]   ;;  %v10447_v41 = vld [vmem:[%s15128_s1 + $0x6e0] ss:$16 sps:$4 sm:$0xff]  }
  0xa7   : > { %1836 = vmatpush1.bf16.msra.mxu0 %v10355_v42  ;;  %2000 = vmatpush1.bf16.msra.mxu1 %v10358_v43  ;;  %v10450_v42 = vld [vmem:[%s15128_s1 + $0x6e8] ss:$16 sps:$4 sm:$0xff]   ;;  %v10455_v43 = vld [vmem:[%s15128_s1 + $0x704] ss:$16 sps:$4 sm:$0xff]  }
  0xa8   : > { %1837 = vmatprep.subr.bf16.mxu0 %v10363_v44  ;;  %2001 = vmatprep.subr.bf16.mxu1 %v10366_v45  ;;  %v10458_v44 = vld [vmem:[%s15128_s1 + $0x70c] ss:$16 sps:$4 sm:$0xff]   ;;  %v10453_v45 = vld [vmem:[%s15128_s1 + $0x700] ss:$16 sps:$4 sm:$0xff]  }
  0xab   : > { %1838 = vmatpush1.bf16.msra.mxu0 %v10361_v46  ;;  %2002 = vmatpush1.bf16.msra.mxu1 %v10364_v47  ;;  %v10456_v46 = vld [vmem:[%s15128_s1 + $0x708] ss:$16 sps:$4 sm:$0xff]   ;;  %v10461_v47 = vld [vmem:[%s15128_s1 + $0x724] ss:$16 sps:$4 sm:$0xff]  }
  0xac   : > { %1839 = vmatprep.subr.bf16.mxu0 %v10369_v48  ;;  %2003 = vmatprep.subr.bf16.mxu1 %v10372_v49  ;;  %v10464_v48 = vld [vmem:[%s15128_s1 + $0x72c] ss:$16 sps:$4 sm:$0xff]   ;;  %v10459_v49 = vld [vmem:[%s15128_s1 + $0x720] ss:$16 sps:$4 sm:$0xff]  }
  0xaf   : > { %1840 = vmatpush1.bf16.msra.mxu0 %v10367_v50  ;;  %2004 = vmatpush1.bf16.msra.mxu1 %v10370_v51  ;;  %v10462_v50 = vld [vmem:[%s15128_s1 + $0x728] ss:$16 sps:$4 sm:$0xff]   ;;  %v10467_v51 = vld [vmem:[%s15128_s1 + $0x744] ss:$16 sps:$4 sm:$0xff]  }
  0xb0   : > { %1841 = vmatprep.subr.bf16.mxu0 %v10375_v52  ;;  %2005 = vmatprep.subr.bf16.mxu1 %v10378_v53  ;;  %v10470_v52 = vld [vmem:[%s15128_s1 + $0x74c] ss:$16 sps:$4 sm:$0xff]   ;;  %v10465_v53 = vld [vmem:[%s15128_s1 + $0x740] ss:$16 sps:$4 sm:$0xff]  }
  0xb3   : > { %1842 = vmatpush1.bf16.msra.mxu0 %v10373_v54  ;;  %2006 = vmatpush1.bf16.msra.mxu1 %v10376_v55  ;;  %v10468_v54 = vld [vmem:[%s15128_s1 + $0x748] ss:$16 sps:$4 sm:$0xff]   ;;  %v10473_v55 = vld [vmem:[%s15128_s1 + $0x764] ss:$16 sps:$4 sm:$0xff]  }
  0xb4   : > { %1843 = vmatprep.subr.bf16.mxu0 %v10381_v56  ;;  %2007 = vmatprep.subr.bf16.mxu1 %v10384_v57  ;;  %v10476_v56 = vld [vmem:[%s15128_s1 + $0x76c] ss:$16 sps:$4 sm:$0xff]   ;;  %v10471_v57 = vld [vmem:[%s15128_s1 + $0x760] ss:$16 sps:$4 sm:$0xff]  }
  0xb7   : > { %1844 = vmatpush1.bf16.msra.mxu0 %v10379_v58  ;;  %2008 = vmatpush1.bf16.msra.mxu1 %v10382_v59  ;;  %v10474_v58 = vld [vmem:[%s15128_s1 + $0x768] ss:$16 sps:$4 sm:$0xff]   ;;  %v10479_v59 = vld [vmem:[%s15128_s1 + $0x784] ss:$16 sps:$4 sm:$0xff]  }
  0xb8   : > { %1845 = vmatprep.subr.bf16.mxu0 %v10387_v60  ;;  %2009 = vmatprep.subr.bf16.mxu1 %v10390_v61  ;;  %v10482_v60 = vld [vmem:[%s15128_s1 + $0x78c] ss:$16 sps:$4 sm:$0xff]   ;;  %v10477_v61 = vld [vmem:[%s15128_s1 + $0x780] ss:$16 sps:$4 sm:$0xff]  }
  0xbb   : > { %1846 = vmatpush1.bf16.msra.mxu0 %v10385_v62  ;;  %2010 = vmatpush1.bf16.msra.mxu1 %v10388_v63  ;;  %v10480_v62 = vld [vmem:[%s15128_s1 + $0x788] ss:$16 sps:$4 sm:$0xff]   ;;  %v10485_v63 = vld [vmem:[%s15128_s1 + $0x7a4] ss:$16 sps:$4 sm:$0xff]  }
  0xbc   : > { %1847 = vmatprep.subr.bf16.mxu0 %v10393_v0  ;;  %2011 = vmatprep.subr.bf16.mxu1 %v10396_v1  ;;  %v10488_v0 = vld [vmem:[%s15128_s1 + $0x7ac] ss:$16 sps:$4 sm:$0xff]   ;;  %v12480_v1 = vld [vmem:[%s11851_s30] sm:$0xff] }
  0xbf   : > { %1848 = vmatpush1.bf16.msra.mxu0 %v10391_v2  ;;  %2012 = vmatpush1.bf16.msra.mxu1 %v10394_v3  ;;  %v12483_v2 = vld [vmem:[%s11851_s30 + $0x8] sm:$0xff]  ;;  %v10483_v3 = vld [vmem:[%s15128_s1 + $0x7a0] ss:$16 sps:$4 sm:$0xff]  }
  0xc0   : > { %1849 = vmatprep.subr.bf16.mxu0 %v10399_v4  ;;  %2013 = vmatprep.subr.bf16.mxu1 %v10402_v5  ;;  %v10486_v4 = vld [vmem:[%s15128_s1 + $0x7a8] ss:$16 sps:$4 sm:$0xff]   ;;  %v10491_v5 = vld [vmem:[%s15128_s1 + $0x7c4] ss:$16 sps:$4 sm:$0xff]  }
  0xc3   : > { %1850 = vmatpush1.bf16.msra.mxu0 %v10397_v6  ;;  %2014 = vmatpush1.bf16.msra.mxu1 %v10400_v7  ;;  %v10494_v6 = vld [vmem:[%s15128_s1 + $0x7cc] ss:$16 sps:$4 sm:$0xff]   ;;  %v8768_v7 = vcombine.high %v12480_v1, %v12480_v1 }
  0xc4   : > { %1860 = vmatprep.subr.bf16.mxu0 %v10407_v8  ;;  %2024 = vmatprep.subr.bf16.mxu1 %v10410_v9  ;;  %v8770_v8 = vcombine.high %v12483_v2, %v12483_v2  ;;  %v10489_v9 = vld [vmem:[%s15128_s1 + $0x7c0] ss:$16 sps:$4 sm:$0xff]  }
  0xc6   : > { %1852 = vmatmul.mubr.bf16.vlgmr.msra.gmra.mrb[0].mxu0 %v8251_v12  ;;  %2016 = vmatmul.mubr.bf16.vlgmr.msra.gmra.mrb[0].mxu1 %v8251_v12  ;;  %v10497_v12 = vld [vmem:[%s15128_s1 + $0x7e4] ss:$16 sps:$4 sm:$0xff]  }
  0xc7   : > { %1861 = vmatpush1.bf16.msra.mxu0 %v10405_v10  ;;  %2025 = vmatpush1.bf16.msra.mxu1 %v10408_v13  ;;  %v10492_v10 = vld [vmem:[%s15128_s1 + $0x7c8] ss:$16 sps:$4 sm:$0xff]   ;;  %v10500_v13 = vld [vmem:[%s15128_s1 + $0x7ec] ss:$16 sps:$4 sm:$0xff]  }
  0xc8   : > { %1862 = vmatprep.subr.bf16.mxu0 %v10413_v15  ;;  %2026 = vmatprep.subr.bf16.mxu1 %v10416_v16  ;;  %v2360_v15 = vshll.u32 %v8768_v7, 16  ;;  %v2374_v16 = vshll.u32 %v8770_v8, 16 }
  0xc9   : > { %1892 = vmatprep.mubr.bf16.mxu0 %v8254_v11  ;;  %2056 = vmatprep.mubr.bf16.mxu1 %v8254_v11  ;;  %v10495_v11 = vld [vmem:[%s15128_s1 + $0x7e0] ss:$16 sps:$4 sm:$0xff]  }
  0xcb   : > { %1863 = vmatpush1.bf16.msra.mxu0 %v10411_v17  ;;  %2027 = vmatpush1.bf16.msra.mxu1 %v10414_v18  ;;  %v10498_v17 = vld [vmem:[%s15128_s1 + $0x7e8] ss:$16 sps:$4 sm:$0xff]   ;;  %v10505_v18 = vld [vmem:[%s15128_s1 + $0x804] ss:$16 sps:$4 sm:$0xff]  }
  0xcc   : > { %1864 = vmatprep.subr.bf16.mxu0 %v10419_v19  ;;  %2028 = vmatprep.subr.bf16.mxu1 %v10422_v20  ;;  %v10508_v19 = vld [vmem:[%s15128_s1 + $0xa04] ss:$16 sps:$4 sm:$0xff]   ;;  %v2358_v20 = vshrl.u32 %v8768_v7, 16 }
  0xcd   : > { %v10574_v7 = vld [vmem:[%s15128_s1 + $0xb64] ss:$16 sps:$4 sm:$0xff]  }
  0xcf   : > { %1865 = vmatpush1.bf16.msra.mxu0 %v10417_v21  ;;  %2029 = vmatpush1.bf16.msra.mxu1 %v10420_v22  ;;  %v2362_v21 = vrot.slane %v2360_v15, 1  ;;  %v2372_v22 = vshrl.u32 %v8770_v8, 16  ;;  %v10569_v8 = vld [vmem:[%s15128_s1 + $0x960] ss:$16 sps:$4 sm:$0xff]  }
  0xd0   : > { %1866 = vmatprep.subr.bf16.mxu0 %v10425_v23  ;;  %2030 = vmatprep.subr.bf16.mxu1 %v10428_v24  ;;  %v2376_v23 = vrot.slane %v2374_v16, 1  ;;  %v8253_v24 = vcombine.low %v12325_v14, %v12325_v14  ;;  %v10514_v14 = vld [vmem:[%s15128_s1 + $0xa24] ss:$16 sps:$4 sm:$0xff]   ;;  %v10578_v15 = vld [vmem:[%s15128_s1 + $0xb80] ss:$16 sps:$4 sm:$0xff]  }
  0xd1   : > { %v10583_v16 = vld [vmem:[%s15128_s1 + $0x9a4] ss:$16 sps:$4 sm:$0xff]  }
  0xd3   : > { %1867 = vmatpush1.bf16.msra.mxu0 %v10423_v25  ;;  %2031 = vmatpush1.bf16.msra.mxu1 %v10426_v26  ;;  %v10503_v25 = vld [vmem:[%s15128_s1 + $0x800] ss:$16 sps:$4 sm:$0xff]  }
  0xd4   : > { %1868 = vmatprep.subr.bf16.mxu0 %v10431_v27  ;;  %2032 = vmatprep.subr.bf16.mxu1 %v10434_v28  ;;  %v10506_v26 = vld [vmem:[%s15128_s1 + $0xa00] ss:$16 sps:$4 sm:$0xff]   ;;  %v10511_v27 = vld [vmem:[%s15128_s1 + $0x824] ss:$16 sps:$4 sm:$0xff]   ;;  %v12539_v28 = vor.u32 %v2362_v21, %v2358_v20  ;;  %v8769_v20 = vcombine.low %v12483_v2, %v12483_v2 }
  0xd5   : > { %v10581_v21 = vld [vmem:[%s15128_s1 + $0x9a0] ss:$16 sps:$4 sm:$0xff]  }
  0xd7   : > { %1869 = vmatpush1.bf16.msra.mxu0 %v10429_v29  ;;  %2033 = vmatpush1.bf16.msra.mxu1 %v10432_v30  ;;  %v12541_v29 = vor.u32 %v2376_v23, %v2372_v22  ;;  %v10509_v30 = vld [vmem:[%s15128_s1 + $0x820] ss:$16 sps:$4 sm:$0xff]   ;;  %v10589_v23 = vld [vmem:[%s15128_s1 + $0x9c4] ss:$16 sps:$4 sm:$0xff]  }
  0xd8   : > { %1870 = vmatprep.subr.bf16.mxu0 %v10437_v31  ;;  %2034 = vmatprep.subr.bf16.mxu1 %v10440_v32  ;;  %v10512_v31 = vld [vmem:[%s15128_s1 + $0xa20] ss:$16 sps:$4 sm:$0xff]   ;;  %v10517_v32 = vld [vmem:[%s15128_s1 + $0x844] ss:$16 sps:$4 sm:$0xff]  }
  0xd9   : > { %v10584_v22 = vld [vmem:[%s15128_s1 + $0xba0] ss:$16 sps:$4 sm:$0xff]  }
  0xdb   : > { %1871 = vmatpush1.bf16.msra.mxu0 %v10435_v33  ;;  %2035 = vmatpush1.bf16.msra.mxu1 %v10438_v34  ;;  %v10520_v33 = vld [vmem:[%s15128_s1 + $0xa44] ss:$16 sps:$4 sm:$0xff]   ;;  %v10515_v34 = vld [vmem:[%s15128_s1 + $0x840] ss:$16 sps:$4 sm:$0xff]  }
  0xdc   : > { %1872 = vmatprep.subr.bf16.mxu0 %v10443_v35  ;;  %2036 = vmatprep.subr.bf16.mxu1 %v10446_v36  ;;  %v10518_v35 = vld [vmem:[%s15128_s1 + $0xa40] ss:$16 sps:$4 sm:$0xff]   ;;  %v10523_v36 = vld [vmem:[%s15128_s1 + $0x864] ss:$16 sps:$4 sm:$0xff]  }
  0xdf   : > { %1873 = vmatpush1.bf16.msra.mxu0 %v10441_v37  ;;  %2037 = vmatpush1.bf16.msra.mxu1 %v10444_v38  ;;  %v10526_v37 = vld [vmem:[%s15128_s1 + $0xa64] ss:$16 sps:$4 sm:$0xff]   ;;  %v10521_v38 = vld [vmem:[%s15128_s1 + $0x860] ss:$16 sps:$4 sm:$0xff]  }
  0xe0   : > { %1874 = vmatprep.subr.bf16.mxu0 %v10449_v39  ;;  %2038 = vmatprep.subr.bf16.mxu1 %v10452_v40  ;;  %v10524_v39 = vld [vmem:[%s15128_s1 + $0xa60] ss:$16 sps:$4 sm:$0xff]   ;;  %v10529_v40 = vld [vmem:[%s15128_s1 + $0x884] ss:$16 sps:$4 sm:$0xff]  }
  0xe3   : > { %1875 = vmatpush1.bf16.msra.mxu0 %v10447_v41  ;;  %2039 = vmatpush1.bf16.msra.mxu1 %v10450_v42  ;;  %v10532_v41 = vld [vmem:[%s15128_s1 + $0xa84] ss:$16 sps:$4 sm:$0xff]   ;;  %v10527_v42 = vld [vmem:[%s15128_s1 + $0x880] ss:$16 sps:$4 sm:$0xff]  }
  0xe4   : > { %1876 = vmatprep.subr.bf16.mxu0 %v10455_v43  ;;  %2040 = vmatprep.subr.bf16.mxu1 %v10458_v44  ;;  %v10530_v43 = vld [vmem:[%s15128_s1 + $0xa80] ss:$16 sps:$4 sm:$0xff]   ;;  %v10535_v44 = vld [vmem:[%s15128_s1 + $0x8a4] ss:$16 sps:$4 sm:$0xff]  }
  0xe7   : > { %1877 = vmatpush1.bf16.msra.mxu0 %v10453_v45  ;;  %2041 = vmatpush1.bf16.msra.mxu1 %v10456_v46  ;;  %v10538_v45 = vld [vmem:[%s15128_s1 + $0xaa4] ss:$16 sps:$4 sm:$0xff]   ;;  %v10533_v46 = vld [vmem:[%s15128_s1 + $0x8a0] ss:$16 sps:$4 sm:$0xff]  }
  0xe8   : > { %1878 = vmatprep.subr.bf16.mxu0 %v10461_v47  ;;  %2042 = vmatprep.subr.bf16.mxu1 %v10464_v48  ;;  %v10536_v47 = vld [vmem:[%s15128_s1 + $0xaa0] ss:$16 sps:$4 sm:$0xff]   ;;  %v10541_v48 = vld [vmem:[%s15128_s1 + $0x8c4] ss:$16 sps:$4 sm:$0xff]  }
  0xeb   : > { %1879 = vmatpush1.bf16.msra.mxu0 %v10459_v49  ;;  %2043 = vmatpush1.bf16.msra.mxu1 %v10462_v50  ;;  %v10544_v49 = vld [vmem:[%s15128_s1 + $0xac4] ss:$16 sps:$4 sm:$0xff]   ;;  %v10539_v50 = vld [vmem:[%s15128_s1 + $0x8c0] ss:$16 sps:$4 sm:$0xff]  }
  0xec   : > { %1880 = vmatprep.subr.bf16.mxu0 %v10467_v51  ;;  %2044 = vmatprep.subr.bf16.mxu1 %v10470_v52  ;;  %v10542_v51 = vld [vmem:[%s15128_s1 + $0xac0] ss:$16 sps:$4 sm:$0xff]   ;;  %v10547_v52 = vld [vmem:[%s15128_s1 + $0x8e4] ss:$16 sps:$4 sm:$0xff]  }
  0xef   : > { %1881 = vmatpush1.bf16.msra.mxu0 %v10465_v53  ;;  %2045 = vmatpush1.bf16.msra.mxu1 %v10468_v54  ;;  %v10550_v53 = vld [vmem:[%s15128_s1 + $0xae4] ss:$16 sps:$4 sm:$0xff]   ;;  %v10545_v54 = vld [vmem:[%s15128_s1 + $0x8e0] ss:$16 sps:$4 sm:$0xff]  }
  0xf0   : > { %1882 = vmatprep.subr.bf16.mxu0 %v10473_v55  ;;  %2046 = vmatprep.subr.bf16.mxu1 %v10476_v56  ;;  %v10548_v55 = vld [vmem:[%s15128_s1 + $0xae0] ss:$16 sps:$4 sm:$0xff]   ;;  %v10553_v56 = vld [vmem:[%s15128_s1 + $0x904] ss:$16 sps:$4 sm:$0xff]  }
  0xf3   : > { %1883 = vmatpush1.bf16.msra.mxu0 %v10471_v57  ;;  %2047 = vmatpush1.bf16.msra.mxu1 %v10474_v58  ;;  %v10556_v57 = vld [vmem:[%s15128_s1 + $0xb04] ss:$16 sps:$4 sm:$0xff]   ;;  %v10551_v58 = vld [vmem:[%s15128_s1 + $0x900] ss:$16 sps:$4 sm:$0xff]  }
  0xf4   : > { %1884 = vmatprep.subr.bf16.mxu0 %v10479_v59  ;;  %2048 = vmatprep.subr.bf16.mxu1 %v10482_v60  ;;  %v10554_v59 = vld [vmem:[%s15128_s1 + $0xb00] ss:$16 sps:$4 sm:$0xff]   ;;  %v10559_v60 = vld [vmem:[%s15128_s1 + $0x924] ss:$16 sps:$4 sm:$0xff]  }
  0xf7   : > { %1885 = vmatpush1.bf16.msra.mxu0 %v10477_v61  ;;  %2049 = vmatpush1.bf16.msra.mxu1 %v10480_v62  ;;  %v10562_v61 = vld [vmem:[%s15128_s1 + $0xb24] ss:$16 sps:$4 sm:$0xff]   ;;  %v10557_v62 = vld [vmem:[%s15128_s1 + $0x920] ss:$16 sps:$4 sm:$0xff]  }
  0xf8   : > { %1886 = vmatprep.subr.bf16.mxu0 %v10485_v63  ;;  %2050 = vmatprep.subr.bf16.mxu1 %v10488_v0  ;;  %v10560_v63 = vld [vmem:[%s15128_s1 + $0xb20] ss:$16 sps:$4 sm:$0xff]   ;;  %v10565_v0 = vld [vmem:[%s15128_s1 + $0x944] ss:$16 sps:$4 sm:$0xff]  }
  0xfb   : > { %1887 = vmatpush1.bf16.msra.mxu0 %v10483_v3  ;;  %2051 = vmatpush1.bf16.msra.mxu1 %v10486_v4  ;;  %v10568_v3 = vld [vmem:[%s15128_s1 + $0xb44] ss:$16 sps:$4 sm:$0xff]   ;;  %v10563_v4 = vld [vmem:[%s15128_s1 + $0x940] ss:$16 sps:$4 sm:$0xff]  }
  0xfc   : > { %1888 = vmatprep.subr.bf16.mxu0 %v10491_v5  ;;  %2052 = vmatprep.subr.bf16.mxu1 %v10494_v6  ;;  %v10566_v5 = vld [vmem:[%s15128_s1 + $0xb40] ss:$16 sps:$4 sm:$0xff]   ;;  %v10571_v6 = vld [vmem:[%s15128_s1 + $0x964] ss:$16 sps:$4 sm:$0xff]  }
  0xff   : > { %1889 = vmatpush1.bf16.msra.mxu0 %v10489_v9  ;;  %2053 = vmatpush1.bf16.msra.mxu1 %v10492_v10  ;;  %v10572_v9 = vld [vmem:[%s15128_s1 + $0xb60] ss:$16 sps:$4 sm:$0xff]   ;;  %v10577_v10 = vld [vmem:[%s15128_s1 + $0x984] ss:$16 sps:$4 sm:$0xff]  }
 0x100   : > { %1890 = vmatprep.subr.bf16.mxu0 %v10497_v12  ;;  %2054 = vmatprep.subr.bf16.mxu1 %v10500_v13  ;;  %v10580_v12 = vld [vmem:[%s15128_s1 + $0xb84] ss:$16 sps:$4 sm:$0xff]   ;;  %v10575_v13 = vld [vmem:[%s15128_s1 + $0x980] ss:$16 sps:$4 sm:$0xff]  }
 0x103   : > { %1891 = vmatpush1.bf16.msra.mxu0 %v10495_v11  ;;  %2055 = vmatpush1.bf16.msra.mxu1 %v10498_v17  ;;  %v10586_v11 = vld [vmem:[%s15128_s1 + $0xba4] ss:$16 sps:$4 sm:$0xff]  }
 0x104   : > { %3694 = vmatprep.subr.bf16.mxu0 %v10505_v18  ;;  %3735 = vmatprep.subr.bf16.mxu1 %v10508_v19  ;;  %v12690_v17 = vld [vmem:[%s11851_s30 + $0x10] sm:$0xff]  ;;  %v12693_v18 = vld [vmem:[%s11851_s30 + $0x18] sm:$0xff]  ;;  %v8767_v19 = vcombine.low %v12480_v1, %v12480_v1 }
 0x105   : > { %v10592_v1 = vld [vmem:[%s15128_s1 + $0xbc4] ss:$16 sps:$4 sm:$0xff]   ;;  %v8772_v2 = vcombine.high %v12690_v17, %v12690_v17 }
 0x106   : > { %1893 = vmatmul.mubr.bf16.vlgmr.msra.gmra.mrb[0].mxu0 %v8253_v24  ;;  %2057 = vmatmul.mubr.bf16.vlgmr.msra.gmra.mrb[0].mxu1 %v8253_v24  ;;  %v8774_v24 = vcombine.high %v12693_v18, %v12693_v18 }
 0x107   : > { %3695 = vmatpush1.bf16.msra.mxu0 %v10503_v25  ;;  %3736 = vmatpush1.bf16.msra.mxu1 %v10506_v26  ;;  %v2353_v25 = vshll.u32 %v8767_v19, 16  ;;  %v2367_v26 = vshll.u32 %v8769_v20, 16 }
 0x108   : > { %3696 = vmatprep.subr.bf16.mxu0 %v10511_v27  ;;  %3737 = vmatprep.subr.bf16.mxu1 %v10514_v14  ;;  %v10587_v27 = vld [vmem:[%s15128_s1 + $0x9c0] ss:$16 sps:$4 sm:$0xff]  }
 0x109   : > { %3726 = vmatprep.mubr.bf16.mxu0 %v12539_v28  ;;  %3767 = vmatprep.mubr.bf16.mxu1 %v12541_v29  ;;  %v10590_v14 = vld [vmem:[%s15128_s1 + $0xbc0] ss:$16 sps:$4 sm:$0xff]  }
 0x10b   : > { %3697 = vmatpush1.bf16.msra.mxu0 %v10509_v30  ;;  %3738 = vmatpush1.bf16.msra.mxu1 %v10512_v31  ;;  %v10595_v30 = vld [vmem:[%s15128_s1 + $0x9e4] ss:$16 sps:$4 sm:$0xff]  }
 0x10c   : > { %3698 = vmatprep.subr.bf16.mxu0 %v10517_v32  ;;  %3739 = vmatprep.subr.bf16.mxu1 %v10520_v33  ;;  %v10598_v31 = vld [vmem:[%s15128_s1 + $0xbe4] ss:$16 sps:$4 sm:$0xff]   ;;  %v2351_v32 = vshrl.u32 %v8767_v19, 16  ;;  %v2388_v33 = vshll.u32 %v8772_v2, 16  ;;  %v10645_v19 = vld [vmem:[%s15128_s1 + $0xce0] ss:$16 sps:$4 sm:$0xff]  }
 0x10f   : > { %3699 = vmatpush1.bf16.msra.mxu0 %v10515_v34  ;;  %3740 = vmatpush1.bf16.msra.mxu1 %v10518_v35  ;;  %v2402_v34 = vshll.u32 %v8774_v24, 16  ;;  %v2355_v35 = vrot.slane %v2353_v25, 1  ;;  %v10657_v25 = vld [vmem:[%s15128_s1 + $0xd20] ss:$16 sps:$4 sm:$0xff]  }
 0x110   : > { %3700 = vmatprep.subr.bf16.mxu0 %v10523_v36  ;;  %3741 = vmatprep.subr.bf16.mxu1 %v10526_v37  ;;  %v2365_v36 = vshrl.u32 %v8769_v20, 16  ;;  %v2369_v37 = vrot.slane %v2367_v26, 1  ;;  %v10648_v20 = vld [vmem:[%s15128_s1 + $0xee0] ss:$16 sps:$4 sm:$0xff]  }
 0x111   : > { %v10660_v26 = vld [vmem:[%s15128_s1 + $0xf20] ss:$16 sps:$4 sm:$0xff]  }
 0x113   : > { %3701 = vmatpush1.bf16.msra.mxu0 %v10521_v38  ;;  %3742 = vmatpush1.bf16.msra.mxu1 %v10524_v39  ;;  %v10593_v38 = vld [vmem:[%s15128_s1 + $0x9e0] ss:$16 sps:$4 sm:$0xff]  }
 0x114   : > { %3702 = vmatprep.subr.bf16.mxu0 %v10529_v40  ;;  %3743 = vmatprep.subr.bf16.mxu1 %v10532_v41  ;;  %v10596_v39 = vld [vmem:[%s15128_s1 + $0xbe0] ss:$16 sps:$4 sm:$0xff]   ;;  %v10605_v40 = vld [vmem:[%s15128_s1 + $0xc04] ss:$16 sps:$4 sm:$0xff]  }
 0x115   : > { %v10608_v41 = vld [vmem:[%s15128_s1 + $0xe04] ss:$16 sps:$4 sm:$0xff]  }
 0x117   : > { %3703 = vmatpush1.bf16.msra.mxu0 %v10527_v42  ;;  %3744 = vmatpush1.bf16.msra.mxu1 %v10530_v43  ;;  %v2386_v42 = vshrl.u32 %v8772_v2, 16  ;;  %v10603_v43 = vld [vmem:[%s15128_s1 + $0xc00] ss:$16 sps:$4 sm:$0xff]   ;;  %v10659_v2 = vld [vmem:[%s15128_s1 + $0xd24] ss:$16 sps:$4 sm:$0xff]  }
 0x118   : > { %3704 = vmatprep.subr.bf16.mxu0 %v10535_v44  ;;  %3745 = vmatprep.subr.bf16.mxu1 %v10538_v45  ;;  %v10606_v44 = vld [vmem:[%s15128_s1 + $0xe00] ss:$16 sps:$4 sm:$0xff]   ;;  %v2390_v45 = vrot.slane %v2388_v33, 1  ;;  %v10674_v33 = vld [vmem:[%s15128_s1 + $0xf64] ss:$16 sps:$4 sm:$0xff]  }
 0x11b   : > { %3705 = vmatpush1.bf16.msra.mxu0 %v10533_v46  ;;  %3746 = vmatpush1.bf16.msra.mxu1 %v10536_v47  ;;  %v2400_v46 = vshrl.u32 %v8774_v24, 16  ;;  %v2404_v47 = vrot.slane %v2402_v34, 1  ;;  %v10662_v24 = vld [vmem:[%s15128_s1 + $0xf24] ss:$16 sps:$4 sm:$0xff]   ;;  %v10669_v34 = vld [vmem:[%s15128_s1 + $0xd60] ss:$16 sps:$4 sm:$0xff]  }
 0x11c   : > { %3706 = vmatprep.subr.bf16.mxu0 %v10541_v48  ;;  %3747 = vmatprep.subr.bf16.mxu1 %v10544_v49  ;;  %v12745_v48 = vor.u32 %v2355_v35, %v2351_v32  ;;  %v12747_v49 = vor.u32 %v2369_v37, %v2365_v36  ;;  %v10671_v32 = vld [vmem:[%s15128_s1 + $0xd64] ss:$16 sps:$4 sm:$0xff]   ;;  %v10672_v35 = vld [vmem:[%s15128_s1 + $0xf60] ss:$16 sps:$4 sm:$0xff]  }
 0x11d   : > { %v10677_v36 = vld [vmem:[%s15128_s1 + $0xd84] ss:$16 sps:$4 sm:$0xff]  }
 0x11e   : > { %v10680_v37 = vld [vmem:[%s15128_s1 + $0xf84] ss:$16 sps:$4 sm:$0xff]  }
 0x11f   : > { %3707 = vmatpush1.bf16.msra.mxu0 %v10539_v50  ;;  %3748 = vmatpush1.bf16.msra.mxu1 %v10542_v51  ;;  %v10611_v50 = vld [vmem:[%s15128_s1 + $0xc24] ss:$16 sps:$4 sm:$0xff]  }
 0x120   : > { %3708 = vmatprep.subr.bf16.mxu0 %v10547_v52  ;;  %3749 = vmatprep.subr.bf16.mxu1 %v10550_v53  ;;  %v10614_v51 = vld [vmem:[%s15128_s1 + $0xe24] ss:$16 sps:$4 sm:$0xff]   ;;  %v12755_v52 = vor.u32 %v2390_v45, %v2386_v42  ;;  %v12757_v53 = vor.u32 %v2404_v47, %v2400_v46  ;;  %v8771_v42 = vcombine.low %v12690_v17, %v12690_v17  ;;  %v10684_v45 = vld [vmem:[%s15128_s1 + $0xfa0] ss:$16 sps:$4 sm:$0xff]  }
 0x121   : > { %v10689_v46 = vld [vmem:[%s15128_s1 + $0xdc4] ss:$16 sps:$4 sm:$0xff]  }
 0x122   : > { %v10692_v17 = vld [vmem:[%s15128_s1 + $0xfc4] ss:$16 sps:$4 sm:$0xff]  }
 0x123   : > { %3709 = vmatpush1.bf16.msra.mxu0 %v10545_v54  ;;  %3750 = vmatpush1.bf16.msra.mxu1 %v10548_v55  ;;  %v10609_v54 = vld [vmem:[%s15128_s1 + $0xc20] ss:$16 sps:$4 sm:$0xff]  }
 0x124   : > { %3710 = vmatprep.subr.bf16.mxu0 %v10553_v56  ;;  %3751 = vmatprep.subr.bf16.mxu1 %v10556_v57  ;;  %v10612_v55 = vld [vmem:[%s15128_s1 + $0xe20] ss:$16 sps:$4 sm:$0xff]   ;;  %v10617_v56 = vld [vmem:[%s15128_s1 + $0xc44] ss:$16 sps:$4 sm:$0xff]  }
 0x125   : > { %v10620_v57 = vld [vmem:[%s15128_s1 + $0xe44] ss:$16 sps:$4 sm:$0xff]  }
 0x127   : > { %3711 = vmatpush1.bf16.msra.mxu0 %v10551_v58  ;;  %3752 = vmatpush1.bf16.msra.mxu1 %v10554_v59  ;;  %v10615_v58 = vld [vmem:[%s15128_s1 + $0xc40] ss:$16 sps:$4 sm:$0xff]  }
 0x128   : > { %3712 = vmatprep.subr.bf16.mxu0 %v10559_v60  ;;  %3753 = vmatprep.subr.bf16.mxu1 %v10562_v61  ;;  %v10618_v59 = vld [vmem:[%s15128_s1 + $0xe40] ss:$16 sps:$4 sm:$0xff]   ;;  %v10623_v60 = vld [vmem:[%s15128_s1 + $0xc64] ss:$16 sps:$4 sm:$0xff]  }
 0x129   : > { %v10626_v61 = vld [vmem:[%s15128_s1 + $0xe64] ss:$16 sps:$4 sm:$0xff]  }
 0x12b   : > { %3713 = vmatpush1.bf16.msra.mxu0 %v10557_v62  ;;  %3754 = vmatpush1.bf16.msra.mxu1 %v10560_v63  ;;  %v10621_v62 = vld [vmem:[%s15128_s1 + $0xc60] ss:$16 sps:$4 sm:$0xff]  }
 0x12c   : > { %3714 = vmatprep.subr.bf16.mxu0 %v10565_v0  ;;  %3755 = vmatprep.subr.bf16.mxu1 %v10568_v3  ;;  %v10624_v63 = vld [vmem:[%s15128_s1 + $0xe60] ss:$16 sps:$4 sm:$0xff]   ;;  %v10629_v0 = vld [vmem:[%s15128_s1 + $0xc84] ss:$16 sps:$4 sm:$0xff]  }
 0x12d   : > { %v10632_v3 = vld [vmem:[%s15128_s1 + $0xe84] ss:$16 sps:$4 sm:$0xff]  }
 0x12f   : > { %3715 = vmatpush1.bf16.msra.mxu0 %v10563_v4  ;;  %3756 = vmatpush1.bf16.msra.mxu1 %v10566_v5  ;;  %v10627_v4 = vld [vmem:[%s15128_s1 + $0xc80] ss:$16 sps:$4 sm:$0xff]  }
 0x130   : > { %3716 = vmatprep.subr.bf16.mxu0 %v10571_v6  ;;  %3757 = vmatprep.subr.bf16.mxu1 %v10574_v7  ;;  %v10630_v5 = vld [vmem:[%s15128_s1 + $0xe80] ss:$16 sps:$4 sm:$0xff]   ;;  %v10635_v6 = vld [vmem:[%s15128_s1 + $0xca4] ss:$16 sps:$4 sm:$0xff]  }
 0x131   : > { %v10638_v7 = vld [vmem:[%s15128_s1 + $0xea4] ss:$16 sps:$4 sm:$0xff]  }
 0x133   : > { %3717 = vmatpush1.bf16.msra.mxu0 %v10569_v8  ;;  %3758 = vmatpush1.bf16.msra.mxu1 %v10572_v9  ;;  %v10633_v8 = vld [vmem:[%s15128_s1 + $0xca0] ss:$16 sps:$4 sm:$0xff]  }
 0x134   : > { %3718 = vmatprep.subr.bf16.mxu0 %v10577_v10  ;;  %3759 = vmatprep.subr.bf16.mxu1 %v10580_v12  ;;  %v10636_v9 = vld [vmem:[%s15128_s1 + $0xea0] ss:$16 sps:$4 sm:$0xff]   ;;  %v10641_v10 = vld [vmem:[%s15128_s1 + $0xcc4] ss:$16 sps:$4 sm:$0xff]  }
 0x135   : > { %v10644_v12 = vld [vmem:[%s15128_s1 + $0xec4] ss:$16 sps:$4 sm:$0xff]  }
 0x137   : > { %3719 = vmatpush1.bf16.msra.mxu0 %v10575_v13  ;;  %3760 = vmatpush1.bf16.msra.mxu1 %v10578_v15  ;;  %v10639_v13 = vld [vmem:[%s15128_s1 + $0xcc0] ss:$16 sps:$4 sm:$0xff]  }
 0x138   : > { %3720 = vmatprep.subr.bf16.mxu0 %v10583_v16  ;;  %3761 = vmatprep.subr.bf16.mxu1 %v10586_v11  ;;  %v10642_v15 = vld [vmem:[%s15128_s1 + $0xec0] ss:$16 sps:$4 sm:$0xff]   ;;  %v10647_v16 = vld [vmem:[%s15128_s1 + $0xce4] ss:$16 sps:$4 sm:$0xff]  }
 0x139   : > { %v10650_v11 = vld [vmem:[%s15128_s1 + $0xee4] ss:$16 sps:$4 sm:$0xff]  }
 0x13b   : > { %3721 = vmatpush1.bf16.msra.mxu0 %v10581_v21  ;;  %3762 = vmatpush1.bf16.msra.mxu1 %v10584_v22  ;;  %v10653_v21 = vld [vmem:[%s15128_s1 + $0xd04] ss:$16 sps:$4 sm:$0xff]  }
 0x13c   : > { %3722 = vmatprep.subr.bf16.mxu0 %v10589_v23  ;;  %3763 = vmatprep.subr.bf16.mxu1 %v10592_v1  ;;  %v10656_v22 = vld [vmem:[%s15128_s1 + $0xf04] ss:$16 sps:$4 sm:$0xff]   ;;  %v10651_v23 = vld [vmem:[%s15128_s1 + $0xd00] ss:$16 sps:$4 sm:$0xff]  }
 0x13d   : > { %v10654_v1 = vld [vmem:[%s15128_s1 + $0xf00] ss:$16 sps:$4 sm:$0xff]  }
 0x13f   : > { %3723 = vmatpush1.bf16.msra.mxu0 %v10587_v27  ;;  %3764 = vmatpush1.bf16.msra.mxu1 %v10590_v14  ;;  %v10665_v27 = vld [vmem:[%s15128_s1 + $0xd44] ss:$16 sps:$4 sm:$0xff]  }
 0x140   : > { %3724 = vmatprep.subr.bf16.mxu0 %v10595_v30  ;;  %3765 = vmatprep.subr.bf16.mxu1 %v10598_v31  ;;  %v10668_v14 = vld [vmem:[%s15128_s1 + $0xf44] ss:$16 sps:$4 sm:$0xff]   ;;  %v10663_v30 = vld [vmem:[%s15128_s1 + $0xd40] ss:$16 sps:$4 sm:$0xff]  }
 0x141   : > { %v10666_v31 = vld [vmem:[%s15128_s1 + $0xf40] ss:$16 sps:$4 sm:$0xff]  }
 0x143   : > { %3725 = vmatpush1.bf16.msra.mxu0 %v10593_v38  ;;  %3766 = vmatpush1.bf16.msra.mxu1 %v10596_v39  ;;  %v10675_v38 = vld [vmem:[%s15128_s1 + $0xd80] ss:$16 sps:$4 sm:$0xff]  }
 0x144   : > { %3776 = vmatprep.subr.bf16.mxu0 %v10605_v40  ;;  %3817 = vmatprep.subr.bf16.mxu1 %v10608_v41  ;;  %v10678_v39 = vld [vmem:[%s15128_s1 + $0xf80] ss:$16 sps:$4 sm:$0xff]   ;;  %v10683_v40 = vld [vmem:[%s15128_s1 + $0xda4] ss:$16 sps:$4 sm:$0xff]  }
 0x145   : > { %v10686_v41 = vld [vmem:[%s15128_s1 + $0xfa4] ss:$16 sps:$4 sm:$0xff]  }
 0x146   : > { %3727 = vmatmul.mubr.bf16.vlgmr.msra.gmra.mrb[4].mxu0 %v12745_v48  ;;  %3768 = vmatmul.mubr.bf16.vlgmr.msra.gmra.mrb[4].mxu1 %v12747_v49 }
 0x147   : > { %3777 = vmatpush1.bf16.msra.mxu0 %v10603_v43  ;;  %3818 = vmatpush1.bf16.msra.mxu1 %v10606_v44  ;;  %v8773_v43 = vcombine.low %v12693_v18, %v12693_v18  ;;  %v10681_v44 = vld [vmem:[%s15128_s1 + $0xda0] ss:$16 sps:$4 sm:$0xff]   ;;  %v2381_v18 = vshll.u32 %v8771_v42, 16 }
 0x148   : > { %3778 = vmatprep.subr.bf16.mxu0 %v10611_v50  ;;  %3819 = vmatprep.subr.bf16.mxu1 %v10614_v51  ;;  %v10687_v50 = vld [vmem:[%s15128_s1 + $0xdc0] ss:$16 sps:$4 sm:$0xff]  }
 0x149   : > { %3808 = vmatprep.mubr.bf16.mxu0 %v12755_v52  ;;  %3849 = vmatprep.mubr.bf16.mxu1 %v12757_v53  ;;  %v2395_v47 = vshll.u32 %v8773_v43, 16  ;;  %v10690_v51 = vld [vmem:[%s15128_s1 + $0xfc0] ss:$16 sps:$4 sm:$0xff]  }
 0x14b   : > { %3779 = vmatpush1.bf16.msra.mxu0 %v10609_v54  ;;  %3820 = vmatpush1.bf16.msra.mxu1 %v10612_v55  ;;  %v10695_v54 = vld [vmem:[%s15128_s1 + $0xde4] ss:$16 sps:$4 sm:$0xff]  }
 0x14c   : > { %3780 = vmatprep.subr.bf16.mxu0 %v10617_v56  ;;  %3821 = vmatprep.subr.bf16.mxu1 %v10620_v57  ;;  %v10698_v55 = vld [vmem:[%s15128_s1 + $0xfe4] ss:$16 sps:$4 sm:$0xff]   ;;  %v2379_v56 = vshrl.u32 %v8771_v42, 16  ;;  %v2383_v57 = vrot.slane %v2381_v18, 1  ;;  %v10765_v42 = vld [vmem:[%s15128_s1 + $0x94c] ss:$16 sps:$4 sm:$0xff]  }
 0x14d   : > { %v10769_v18 = vld [vmem:[%s15128_s1 + $0x968] ss:$16 sps:$4 sm:$0xff]  }
 0x14f   : > { %3781 = vmatpush1.bf16.msra.mxu0 %v10615_v58  ;;  %3822 = vmatpush1.bf16.msra.mxu1 %v10618_v59  ;;  %v2393_v58 = vshrl.u32 %v8773_v43, 16  ;;  %v2397_v59 = vrot.slane %v2395_v47, 1  ;;  %v10768_v43 = vld [vmem:[%s15128_s1 + $0xb4c] ss:$16 sps:$4 sm:$0xff]   ;;  %v10772_v47 = vld [vmem:[%s15128_s1 + $0xb68] ss:$16 sps:$4 sm:$0xff]  }
 0x150   : > { %3782 = vmatprep.subr.bf16.mxu0 %v10623_v60  ;;  %3823 = vmatprep.subr.bf16.mxu1 %v10626_v61  ;;  %v10693_v60 = vld [vmem:[%s15128_s1 + $0xde0] ss:$16 sps:$4 sm:$0xff]  }
 0x151   : > { %v10696_v61 = vld [vmem:[%s15128_s1 + $0xfe0] ss:$16 sps:$4 sm:$0xff]  }
 0x153   : > { %3783 = vmatpush1.bf16.msra.mxu0 %v10621_v62  ;;  %3824 = vmatpush1.bf16.msra.mxu1 %v10624_v63  ;;  %v10705_v62 = vld [vmem:[%s15128_s1 + $0x80c] ss:$16 sps:$4 sm:$0xff]  }
 0x154   : > { %3784 = vmatprep.subr.bf16.mxu0 %v10629_v0  ;;  %3825 = vmatprep.subr.bf16.mxu1 %v10632_v3  ;;  %v10708_v63 = vld [vmem:[%s15128_s1 + $0xa0c] ss:$16 sps:$4 sm:$0xff]   ;;  %v10703_v0 = vld [vmem:[%s15128_s1 + $0x808] ss:$16 sps:$4 sm:$0xff]  }
 0x155   : > { %v10706_v3 = vld [vmem:[%s15128_s1 + $0xa08] ss:$16 sps:$4 sm:$0xff]  }
 0x157   : > { %3785 = vmatpush1.bf16.msra.mxu0 %v10627_v4  ;;  %3826 = vmatpush1.bf16.msra.mxu1 %v10630_v5  ;;  %v12953_v4 = vor.u32 %v2383_v57, %v2379_v56  ;;  %v12955_v5 = vor.u32 %v2397_v59, %v2393_v58  ;;  %v10783_v56 = vld [vmem:[%s15128_s1 + $0x9ac] ss:$16 sps:$4 sm:$0xff]   ;;  %v10781_v58 = vld [vmem:[%s15128_s1 + $0x9a8] ss:$16 sps:$4 sm:$0xff]  }
 0x158   : > { %3786 = vmatprep.subr.bf16.mxu0 %v10635_v6  ;;  %3827 = vmatprep.subr.bf16.mxu1 %v10638_v7  ;;  %v10711_v6 = vld [vmem:[%s15128_s1 + $0x82c] ss:$16 sps:$4 sm:$0xff]   ;;  %v10784_v59 = vld [vmem:[%s15128_s1 + $0xba8] ss:$16 sps:$4 sm:$0xff]  }
 0x159   : > { %v10714_v7 = vld [vmem:[%s15128_s1 + $0xa2c] ss:$16 sps:$4 sm:$0xff]  }
 0x15a   : > { %v10786_v57 = vld [vmem:[%s15128_s1 + $0xbac] ss:$16 sps:$4 sm:$0xff]  }
 0x15b   : > { %3787 = vmatpush1.bf16.msra.mxu0 %v10633_v8  ;;  %3828 = vmatpush1.bf16.msra.mxu1 %v10636_v9  ;;  %v10709_v8 = vld [vmem:[%s15128_s1 + $0x828] ss:$16 sps:$4 sm:$0xff]  }
 0x15c   : > { %3788 = vmatprep.subr.bf16.mxu0 %v10641_v10  ;;  %3829 = vmatprep.subr.bf16.mxu1 %v10644_v12  ;;  %v10712_v9 = vld [vmem:[%s15128_s1 + $0xa28] ss:$16 sps:$4 sm:$0xff]   ;;  %v10717_v10 = vld [vmem:[%s15128_s1 + $0x84c] ss:$16 sps:$4 sm:$0xff]  }
 0x15d   : > { %v10720_v12 = vld [vmem:[%s15128_s1 + $0xa4c] ss:$16 sps:$4 sm:$0xff]  }
 0x15f   : > { %3789 = vmatpush1.bf16.msra.mxu0 %v10639_v13  ;;  %3830 = vmatpush1.bf16.msra.mxu1 %v10642_v15  ;;  %v10715_v13 = vld [vmem:[%s15128_s1 + $0x848] ss:$16 sps:$4 sm:$0xff]  }
 0x160   : > { %3790 = vmatprep.subr.bf16.mxu0 %v10647_v16  ;;  %3831 = vmatprep.subr.bf16.mxu1 %v10650_v11  ;;  %v10718_v15 = vld [vmem:[%s15128_s1 + $0xa48] ss:$16 sps:$4 sm:$0xff]   ;;  %v10723_v16 = vld [vmem:[%s15128_s1 + $0x86c] ss:$16 sps:$4 sm:$0xff]  }
 0x161   : > { %v10724_v11 = vld [vmem:[%s15128_s1 + $0xa68] ss:$16 sps:$4 sm:$0xff]  }
 0x163   : > { %3791 = vmatpush1.bf16.msra.mxu0 %v10645_v19  ;;  %3832 = vmatpush1.bf16.msra.mxu1 %v10648_v20  ;;  %v10729_v19 = vld [vmem:[%s15128_s1 + $0x88c] ss:$16 sps:$4 sm:$0xff]  }
 0x164   : > { %3792 = vmatprep.subr.bf16.mxu0 %v10653_v21  ;;  %3833 = vmatprep.subr.bf16.mxu1 %v10656_v22  ;;  %v10732_v20 = vld [vmem:[%s15128_s1 + $0xa8c] ss:$16 sps:$4 sm:$0xff]   ;;  %v10727_v21 = vld [vmem:[%s15128_s1 + $0x888] ss:$16 sps:$4 sm:$0xff]  }
 0x165   : > { %v10730_v22 = vld [vmem:[%s15128_s1 + $0xa88] ss:$16 sps:$4 sm:$0xff]  }
 0x167   : > { %3793 = vmatpush1.bf16.msra.mxu0 %v10651_v23  ;;  %3834 = vmatpush1.bf16.msra.mxu1 %v10654_v1  ;;  %v10735_v23 = vld [vmem:[%s15128_s1 + $0x8ac] ss:$16 sps:$4 sm:$0xff]  }
 0x168   : > { %3794 = vmatprep.subr.bf16.mxu0 %v10659_v2  ;;  %3835 = vmatprep.subr.bf16.mxu1 %v10662_v24  ;;  %v10738_v1 = vld [vmem:[%s15128_s1 + $0xaac] ss:$16 sps:$4 sm:$0xff]   ;;  %v10733_v2 = vld [vmem:[%s15128_s1 + $0x8a8] ss:$16 sps:$4 sm:$0xff]  }
 0x169   : > { %v10736_v24 = vld [vmem:[%s15128_s1 + $0xaa8] ss:$16 sps:$4 sm:$0xff]  }
 0x16b   : > { %3795 = vmatpush1.bf16.msra.mxu0 %v10657_v25  ;;  %3836 = vmatpush1.bf16.msra.mxu1 %v10660_v26  ;;  %v10741_v25 = vld [vmem:[%s15128_s1 + $0x8cc] ss:$16 sps:$4 sm:$0xff]  }
 0x16c   : > { %3796 = vmatprep.subr.bf16.mxu0 %v10665_v27  ;;  %3837 = vmatprep.subr.bf16.mxu1 %v10668_v14  ;;  %v10744_v26 = vld [vmem:[%s15128_s1 + $0xacc] ss:$16 sps:$4 sm:$0xff]   ;;  %v10739_v27 = vld [vmem:[%s15128_s1 + $0x8c8] ss:$16 sps:$4 sm:$0xff]  }
 0x16d   : > { %v10742_v14 = vld [vmem:[%s15128_s1 + $0xac8] ss:$16 sps:$4 sm:$0xff]  }
 0x16f   : > { %3797 = vmatpush1.bf16.msra.mxu0 %v10663_v30  ;;  %3838 = vmatpush1.bf16.msra.mxu1 %v10666_v31  ;;  %v10747_v30 = vld [vmem:[%s15128_s1 + $0x8ec] ss:$16 sps:$4 sm:$0xff]  }
 0x170   : > { %3798 = vmatprep.subr.bf16.mxu0 %v10671_v32  ;;  %3839 = vmatprep.subr.bf16.mxu1 %v10674_v33  ;;  %v10750_v31 = vld [vmem:[%s15128_s1 + $0xaec] ss:$16 sps:$4 sm:$0xff]   ;;  %v10745_v32 = vld [vmem:[%s15128_s1 + $0x8e8] ss:$16 sps:$4 sm:$0xff]  }
 0x171   : > { %v10748_v33 = vld [vmem:[%s15128_s1 + $0xae8] ss:$16 sps:$4 sm:$0xff]  }
 0x173   : > { %3799 = vmatpush1.bf16.msra.mxu0 %v10669_v34  ;;  %3840 = vmatpush1.bf16.msra.mxu1 %v10672_v35  ;;  %v10753_v34 = vld [vmem:[%s15128_s1 + $0x90c] ss:$16 sps:$4 sm:$0xff]  }
 0x174   : > { %3800 = vmatprep.subr.bf16.mxu0 %v10677_v36  ;;  %3841 = vmatprep.subr.bf16.mxu1 %v10680_v37  ;;  %v10756_v35 = vld [vmem:[%s15128_s1 + $0xb0c] ss:$16 sps:$4 sm:$0xff]   ;;  %v10751_v36 = vld [vmem:[%s15128_s1 + $0x908] ss:$16 sps:$4 sm:$0xff]  }
 0x175   : > { %v10754_v37 = vld [vmem:[%s15128_s1 + $0xb08] ss:$16 sps:$4 sm:$0xff]  }
 0x177   : > { %3801 = vmatpush1.bf16.msra.mxu0 %v10675_v38  ;;  %3842 = vmatpush1.bf16.msra.mxu1 %v10678_v39  ;;  %v10759_v38 = vld [vmem:[%s15128_s1 + $0x92c] ss:$16 sps:$4 sm:$0xff]  }
 0x178   : > { %3802 = vmatprep.subr.bf16.mxu0 %v10683_v40  ;;  %3843 = vmatprep.subr.bf16.mxu1 %v10686_v41  ;;  %v10762_v39 = vld [vmem:[%s15128_s1 + $0xb2c] ss:$16 sps:$4 sm:$0xff]   ;;  %v10757_v40 = vld [vmem:[%s15128_s1 + $0x928] ss:$16 sps:$4 sm:$0xff]  }
 0x179   : > { %v10760_v41 = vld [vmem:[%s15128_s1 + $0xb28] ss:$16 sps:$4 sm:$0xff]  }
 0x17b   : > { %3803 = vmatpush1.bf16.msra.mxu0 %v10681_v44  ;;  %3844 = vmatpush1.bf16.msra.mxu1 %v10684_v45  ;;  %v10763_v44 = vld [vmem:[%s15128_s1 + $0x948] ss:$16 sps:$4 sm:$0xff]  }
 0x17c   : > { %3804 = vmatprep.subr.bf16.mxu0 %v10689_v46  ;;  %3845 = vmatprep.subr.bf16.mxu1 %v10692_v17  ;;  %v10766_v45 = vld [vmem:[%s15128_s1 + $0xb48] ss:$16 sps:$4 sm:$0xff]   ;;  %v10771_v46 = vld [vmem:[%s15128_s1 + $0x96c] ss:$16 sps:$4 sm:$0xff]  }
 0x17d   : > { %v10774_v17 = vld [vmem:[%s15128_s1 + $0xb6c] ss:$16 sps:$4 sm:$0xff]  }
 0x17f   : > { %3805 = vmatpush1.bf16.msra.mxu0 %v10687_v50  ;;  %3846 = vmatpush1.bf16.msra.mxu1 %v10690_v51  ;;  %v10777_v50 = vld [vmem:[%s15128_s1 + $0x98c] ss:$16 sps:$4 sm:$0xff]  }
 0x180   : > { %3806 = vmatprep.subr.bf16.mxu0 %v10695_v54  ;;  %3847 = vmatprep.subr.bf16.mxu1 %v10698_v55  ;;  %v10780_v51 = vld [vmem:[%s15128_s1 + $0xb8c] ss:$16 sps:$4 sm:$0xff]   ;;  %v10775_v54 = vld [vmem:[%s15128_s1 + $0x988] ss:$16 sps:$4 sm:$0xff]  }
 0x181   : > { %v10778_v55 = vld [vmem:[%s15128_s1 + $0xb88] ss:$16 sps:$4 sm:$0xff]  }
 0x183   : > { %3807 = vmatpush1.bf16.msra.mxu0 %v10693_v60  ;;  %3848 = vmatpush1.bf16.msra.mxu1 %v10696_v61  ;;  %v10789_v60 = vld [vmem:[%s15128_s1 + $0x9cc] ss:$16 sps:$4 sm:$0xff]  }
 0x184   : > { %3858 = vmatprep.subr.bf16.mxu0 %v10705_v62  ;;  %3899 = vmatprep.subr.bf16.mxu1 %v10708_v63  ;;  %v10792_v61 = vld [vmem:[%s15128_s1 + $0xbcc] ss:$16 sps:$4 sm:$0xff]   ;;  %v10787_v62 = vld [vmem:[%s15128_s1 + $0x9c8] ss:$16 sps:$4 sm:$0xff]  }
 0x185   : > { %v10790_v63 = vld [vmem:[%s15128_s1 + $0xbc8] ss:$16 sps:$4 sm:$0xff]  }
 0x186   : > { %3809 = vmatmul.mubr.bf16.vlgmr.msra.gmra.mrb[8].mxu0 %v12953_v4  ;;  %3850 = vmatmul.mubr.bf16.vlgmr.msra.gmra.mrb[8].mxu1 %v12955_v5 }
 0x187   : > { %3859 = vmatpush1.bf16.msra.mxu0 %v10703_v0  ;;  %3900 = vmatpush1.bf16.msra.mxu1 %v10706_v3  ;;  %v10795_v0 = vld [vmem:[%s15128_s1 + $0x9ec] ss:$16 sps:$4 sm:$0xff]  }
 0x188   : > { %3860 = vmatprep.subr.bf16.mxu0 %v10711_v6  ;;  %3901 = vmatprep.subr.bf16.mxu1 %v10714_v7  ;;  %v10798_v3 = vld [vmem:[%s15128_s1 + $0xbec] ss:$16 sps:$4 sm:$0xff]   ;;  %v10793_v6 = vld [vmem:[%s15128_s1 + $0x9e8] ss:$16 sps:$4 sm:$0xff]  }
 0x189   : > { %3890 = vmatprep.mubr.bf16.mxu0 %v12539_v28  ;;  %3931 = vmatprep.mubr.bf16.mxu1 %v12541_v29  ;;  %v10726_v28 = vld [vmem:[%s15128_s1 + $0xa6c] ss:$16 sps:$4 sm:$0xff]   ;;  %v10721_v29 = vld [vmem:[%s15128_s1 + $0x868] ss:$16 sps:$4 sm:$0xff]  }
 0x18a   : > { %v10796_v7 = vld [vmem:[%s15128_s1 + $0xbe8] ss:$16 sps:$4 sm:$0xff]  }
 0x18b   : > { %3861 = vmatpush1.bf16.msra.mxu0 %v10709_v8  ;;  %3902 = vmatpush1.bf16.msra.mxu1 %v10712_v9  ;;  %v10801_v8 = vld [vmem:[%s15128_s1 + $0xc0c] ss:$16 sps:$4 sm:$0xff]  }
 0x18c   : > { %3862 = vmatprep.subr.bf16.mxu0 %v10717_v10  ;;  %3903 = vmatprep.subr.bf16.mxu1 %v10720_v12  ;;  %v10804_v9 = vld [vmem:[%s15128_s1 + $0xe0c] ss:$16 sps:$4 sm:$0xff]   ;;  %v10799_v10 = vld [vmem:[%s15128_s1 + $0xc08] ss:$16 sps:$4 sm:$0xff]  }
 0x18d   : > { %v10802_v12 = vld [vmem:[%s15128_s1 + $0xe08] ss:$16 sps:$4 sm:$0xff]  }
 0x18f   : > { %3863 = vmatpush1.bf16.msra.mxu0 %v10715_v13  ;;  %3904 = vmatpush1.bf16.msra.mxu1 %v10718_v15  ;;  %v10807_v13 = vld [vmem:[%s15128_s1 + $0xc2c] ss:$16 sps:$4 sm:$0xff]  }
 0x190   : > { %3864 = vmatprep.subr.bf16.mxu0 %v10723_v16  ;;  %3905 = vmatprep.subr.bf16.mxu1 %v10726_v28  ;;  %v10810_v15 = vld [vmem:[%s15128_s1 + $0xe2c] ss:$16 sps:$4 sm:$0xff]   ;;  %v10805_v16 = vld [vmem:[%s15128_s1 + $0xc28] ss:$16 sps:$4 sm:$0xff]  }
 0x191   : > { %v10808_v28 = vld [vmem:[%s15128_s1 + $0xe28] ss:$16 sps:$4 sm:$0xff]  }
 0x193   : > { %3865 = vmatpush1.bf16.msra.mxu0 %v10721_v29  ;;  %3906 = vmatpush1.bf16.msra.mxu1 %v10724_v11  ;;  %v10813_v29 = vld [vmem:[%s15128_s1 + $0xc4c] ss:$16 sps:$4 sm:$0xff]   ;;  %v10814_v11 = vld [vmem:[%s15128_s1 + $0xe48] ss:$16 sps:$4 sm:$0xff]  }
 0x194   : > { %3866 = vmatprep.subr.bf16.mxu0 %v10729_v19  ;;  %3907 = vmatprep.subr.bf16.mxu1 %v10732_v20  ;;  %v10819_v19 = vld [vmem:[%s15128_s1 + $0xc6c] ss:$16 sps:$4 sm:$0xff]   ;;  %v10820_v20 = vld [vmem:[%s15128_s1 + $0xe68] ss:$16 sps:$4 sm:$0xff]  }
 0x197   : > { %3867 = vmatpush1.bf16.msra.mxu0 %v10727_v21  ;;  %3908 = vmatpush1.bf16.msra.mxu1 %v10730_v22  ;;  %v10825_v21 = vld [vmem:[%s15128_s1 + $0xc8c] ss:$16 sps:$4 sm:$0xff]  }
 0x198   : > { %3868 = vmatprep.subr.bf16.mxu0 %v10735_v23  ;;  %3909 = vmatprep.subr.bf16.mxu1 %v10738_v1  ;;  %v10828_v22 = vld [vmem:[%s15128_s1 + $0xe8c] ss:$16 sps:$4 sm:$0xff]   ;;  %v10823_v23 = vld [vmem:[%s15128_s1 + $0xc88] ss:$16 sps:$4 sm:$0xff]  }
 0x199   : > { %v10826_v1 = vld [vmem:[%s15128_s1 + $0xe88] ss:$16 sps:$4 sm:$0xff]  }
 0x19b   : > { %3869 = vmatpush1.bf16.msra.mxu0 %v10733_v2  ;;  %3910 = vmatpush1.bf16.msra.mxu1 %v10736_v24  ;;  %v10831_v2 = vld [vmem:[%s15128_s1 + $0xcac] ss:$16 sps:$4 sm:$0xff]  }
 0x19c   : > { %3870 = vmatprep.subr.bf16.mxu0 %v10741_v25  ;;  %3911 = vmatprep.subr.bf16.mxu1 %v10744_v26  ;;  %v10834_v24 = vld [vmem:[%s15128_s1 + $0xeac] ss:$16 sps:$4 sm:$0xff]   ;;  %v10829_v25 = vld [vmem:[%s15128_s1 + $0xca8] ss:$16 sps:$4 sm:$0xff]  }
 0x19d   : > { %v10832_v26 = vld [vmem:[%s15128_s1 + $0xea8] ss:$16 sps:$4 sm:$0xff]  }
 0x19f   : > { %3871 = vmatpush1.bf16.msra.mxu0 %v10739_v27  ;;  %3912 = vmatpush1.bf16.msra.mxu1 %v10742_v14  ;;  %v10837_v27 = vld [vmem:[%s15128_s1 + $0xccc] ss:$16 sps:$4 sm:$0xff]  }
 0x1a0   : > { %3872 = vmatprep.subr.bf16.mxu0 %v10747_v30  ;;  %3913 = vmatprep.subr.bf16.mxu1 %v10750_v31  ;;  %v10840_v14 = vld [vmem:[%s15128_s1 + $0xecc] ss:$16 sps:$4 sm:$0xff]  }
 0x1a3   : > { %3873 = vmatpush1.bf16.msra.mxu0 %v10745_v32  ;;  %3914 = vmatpush1.bf16.msra.mxu1 %v10748_v33  ;;  %v10835_v32 = vld [vmem:[%s15128_s1 + $0xcc8] ss:$16 sps:$4 sm:$0xff]  }
 0x1a4   : > { %3874 = vmatprep.subr.bf16.mxu0 %v10753_v34  ;;  %3915 = vmatprep.subr.bf16.mxu1 %v10756_v35  ;;  %v10838_v33 = vld [vmem:[%s15128_s1 + $0xec8] ss:$16 sps:$4 sm:$0xff]  }
 0x1a7   : > { %3875 = vmatpush1.bf16.msra.mxu0 %v10751_v36  ;;  %3916 = vmatpush1.bf16.msra.mxu1 %v10754_v37 }
 0x1a8   : > { %3876 = vmatprep.subr.bf16.mxu0 %v10759_v38  ;;  %3917 = vmatprep.subr.bf16.mxu1 %v10762_v39 }
 0x1ab   : > { %3877 = vmatpush1.bf16.msra.mxu0 %v10757_v40  ;;  %3918 = vmatpush1.bf16.msra.mxu1 %v10760_v41  ;;  %v10843_v40 = vld [vmem:[%s15128_s1 + $0xcec] ss:$16 sps:$4 sm:$0xff]  }
 0x1ac   : > { %3878 = vmatprep.subr.bf16.mxu0 %v10765_v42  ;;  %3919 = vmatprep.subr.bf16.mxu1 %v10768_v43  ;;  %v10846_v41 = vld [vmem:[%s15128_s1 + $0xeec] ss:$16 sps:$4 sm:$0xff]   ;;  %v10841_v42 = vld [vmem:[%s15128_s1 + $0xce8] ss:$16 sps:$4 sm:$0xff]  }
 0x1ad   : > { %v10844_v43 = vld [vmem:[%s15128_s1 + $0xee8] ss:$16 sps:$4 sm:$0xff]  }
 0x1af   : > { %3879 = vmatpush1.bf16.msra.mxu0 %v10763_v44  ;;  %3920 = vmatpush1.bf16.msra.mxu1 %v10766_v45  ;;  %v10849_v44 = vld [vmem:[%s15128_s1 + $0xd0c] ss:$16 sps:$4 sm:$0xff]  }
 0x1b0   : > { %3880 = vmatprep.subr.bf16.mxu0 %v10771_v46  ;;  %3921 = vmatprep.subr.bf16.mxu1 %v10774_v17  ;;  %v10852_v45 = vld [vmem:[%s15128_s1 + $0xf0c] ss:$16 sps:$4 sm:$0xff]   ;;  %v10847_v46 = vld [vmem:[%s15128_s1 + $0xd08] ss:$16 sps:$4 sm:$0xff]  }
 0x1b1   : > { %v10850_v17 = vld [vmem:[%s15128_s1 + $0xf08] ss:$16 sps:$4 sm:$0xff]  }
 0x1b3   : > { %3881 = vmatpush1.bf16.msra.mxu0 %v10769_v18  ;;  %3922 = vmatpush1.bf16.msra.mxu1 %v10772_v47  ;;  %v10855_v18 = vld [vmem:[%s15128_s1 + $0xd2c] ss:$16 sps:$4 sm:$0xff]  }
 0x1b4   : > { %3882 = vmatprep.subr.bf16.mxu0 %v10777_v50  ;;  %3923 = vmatprep.subr.bf16.mxu1 %v10780_v51  ;;  %v10858_v47 = vld [vmem:[%s15128_s1 + $0xf2c] ss:$16 sps:$4 sm:$0xff]   ;;  %v10853_v50 = vld [vmem:[%s15128_s1 + $0xd28] ss:$16 sps:$4 sm:$0xff]  }
 0x1b5   : > { %v10856_v51 = vld [vmem:[%s15128_s1 + $0xf28] ss:$16 sps:$4 sm:$0xff]  }
 0x1b7   : > { %3883 = vmatpush1.bf16.msra.mxu0 %v10775_v54  ;;  %3924 = vmatpush1.bf16.msra.mxu1 %v10778_v55  ;;  %v10861_v54 = vld [vmem:[%s15128_s1 + $0xd4c] ss:$16 sps:$4 sm:$0xff]  }
 0x1b8   : > { %3884 = vmatprep.subr.bf16.mxu0 %v10783_v56  ;;  %3925 = vmatprep.subr.bf16.mxu1 %v10786_v57  ;;  %v10864_v55 = vld [vmem:[%s15128_s1 + $0xf4c] ss:$16 sps:$4 sm:$0xff]   ;;  %v10859_v56 = vld [vmem:[%s15128_s1 + $0xd48] ss:$16 sps:$4 sm:$0xff]  }
 0x1b9   : > { %v10862_v57 = vld [vmem:[%s15128_s1 + $0xf48] ss:$16 sps:$4 sm:$0xff]  }
 0x1bb   : > { %3885 = vmatpush1.bf16.msra.mxu0 %v10781_v58  ;;  %3926 = vmatpush1.bf16.msra.mxu1 %v10784_v59  ;;  %v10867_v58 = vld [vmem:[%s15128_s1 + $0xd6c] ss:$16 sps:$4 sm:$0xff]  }
 0x1bc   : > { %3886 = vmatprep.subr.bf16.mxu0 %v10789_v60  ;;  %3927 = vmatprep.subr.bf16.mxu1 %v10792_v61  ;;  %v10870_v59 = vld [vmem:[%s15128_s1 + $0xf6c] ss:$16 sps:$4 sm:$0xff]   ;;  %v10865_v60 = vld [vmem:[%s15128_s1 + $0xd68] ss:$16 sps:$4 sm:$0xff]  }
 0x1bd   : > { %v10868_v61 = vld [vmem:[%s15128_s1 + $0xf68] ss:$16 sps:$4 sm:$0xff]  }
 0x1bf   : > { %3887 = vmatpush1.bf16.msra.mxu0 %v10787_v62  ;;  %3928 = vmatpush1.bf16.msra.mxu1 %v10790_v63  ;;  %v10873_v62 = vld [vmem:[%s15128_s1 + $0xd8c] ss:$16 sps:$4 sm:$0xff]  }
 0x1c0   : > { %3888 = vmatprep.subr.bf16.mxu0 %v10795_v0  ;;  %3929 = vmatprep.subr.bf16.mxu1 %v10798_v3  ;;  %v10876_v63 = vld [vmem:[%s15128_s1 + $0xf8c] ss:$16 sps:$4 sm:$0xff]   ;;  %v10871_v0 = vld [vmem:[%s15128_s1 + $0xd88] ss:$16 sps:$4 sm:$0xff]  }
 0x1c1   : > { %v10874_v3 = vld [vmem:[%s15128_s1 + $0xf88] ss:$16 sps:$4 sm:$0xff]  }
 0x1c3   : > { %3889 = vmatpush1.bf16.msra.mxu0 %v10793_v6  ;;  %3930 = vmatpush1.bf16.msra.mxu1 %v10796_v7  ;;  %v10879_v6 = vld [vmem:[%s15128_s1 + $0xdac] ss:$16 sps:$4 sm:$0xff]  }
 0x1c4   : > { %3940 = vmatprep.subr.bf16.mxu0 %v10801_v8  ;;  %3981 = vmatprep.subr.bf16.mxu1 %v10804_v9  ;;  %v10882_v7 = vld [vmem:[%s15128_s1 + $0xfac] ss:$16 sps:$4 sm:$0xff]   ;;  %v13308_v8 = vld [vmem:[%s11851_s30] sm:$0xee]  ;;  %v13311_v9 = vld [vmem:[%s11851_s30 + $0x20] sm:$0x11] }
 0x1c6   : > { %3891 = vmatmul.mubr.bf16.vlgmr.msra.gmra.mrb[12].mxu0 %v12745_v48  ;;  %3932 = vmatmul.mubr.bf16.vlgmr.msra.gmra.mrb[12].mxu1 %v12747_v49  ;;  %v10816_v48 = vld [vmem:[%s15128_s1 + $0xe4c] ss:$16 sps:$4 sm:$0xff]   ;;  %v10811_v49 = vld [vmem:[%s15128_s1 + $0xc48] ss:$16 sps:$4 sm:$0xff]  }
 0x1c7   : > { %3941 = vmatpush1.bf16.msra.mxu0 %v10799_v10  ;;  %3982 = vmatpush1.bf16.msra.mxu1 %v10802_v12  ;;  %v13314_v10 = vld [vmem:[%s11851_s30 + $0x8] sm:$0xee]  ;;  %v13317_v12 = vld [vmem:[%s11851_s30 + $0x28] sm:$0x11] }
 0x1c8   : > { %3942 = vmatprep.subr.bf16.mxu0 %v10807_v13  ;;  %3983 = vmatprep.subr.bf16.mxu1 %v10810_v15  ;;  %v10877_v13 = vld [vmem:[%s15128_s1 + $0xda8] ss:$16 sps:$4 sm:$0xff]  }
 0x1c9   : > { %3972 = vmatprep.mubr.bf16.mxu0 %v12755_v52  ;;  %4013 = vmatprep.mubr.bf16.mxu1 %v12757_v53  ;;  %v10822_v52 = vld [vmem:[%s15128_s1 + $0xe6c] ss:$16 sps:$4 sm:$0xff]   ;;  %v10817_v53 = vld [vmem:[%s15128_s1 + $0xc68] ss:$16 sps:$4 sm:$0xff]  }
 0x1ca   : > { %v10880_v15 = vld [vmem:[%s15128_s1 + $0xfa8] ss:$16 sps:$4 sm:$0xff]  }
 0x1cb   : > { %3943 = vmatpush1.bf16.msra.mxu0 %v10805_v16  ;;  %3984 = vmatpush1.bf16.msra.mxu1 %v10808_v28  ;;  %v10885_v16 = vld [vmem:[%s15128_s1 + $0xdcc] ss:$16 sps:$4 sm:$0xff]  }
 0x1cc   : > { %3944 = vmatprep.subr.bf16.mxu0 %v10813_v29  ;;  %3985 = vmatprep.subr.bf16.mxu1 %v10816_v48  ;;  %v10888_v28 = vld [vmem:[%s15128_s1 + $0xfcc] ss:$16 sps:$4 sm:$0xff]   ;;  %v9288_v29 = vcombine.high %v13308_v8, %v13311_v9  ;;  %v9290_v48 = vcombine.high %v13314_v10, %v13317_v12 }
 0x1cf   : > { %3945 = vmatpush1.bf16.msra.mxu0 %v10811_v49  ;;  %3986 = vmatpush1.bf16.msra.mxu1 %v10814_v11  ;;  %v10883_v49 = vld [vmem:[%s15128_s1 + $0xdc8] ss:$16 sps:$4 sm:$0xff]  }
 0x1d0   : > { %3946 = vmatprep.subr.bf16.mxu0 %v10819_v19  ;;  %3987 = vmatprep.subr.bf16.mxu1 %v10822_v52  ;;  %v10886_v11 = vld [vmem:[%s15128_s1 + $0xfc8] ss:$16 sps:$4 sm:$0xff]   ;;  %v10891_v19 = vld [vmem:[%s15128_s1 + $0xdec] ss:$16 sps:$4 sm:$0xff]  }
 0x1d1   : > { %v10894_v52 = vld [vmem:[%s15128_s1 + $0xfec] ss:$16 sps:$4 sm:$0xff]  }
 0x1d3   : > { %3947 = vmatpush1.bf16.msra.mxu0 %v10817_v53  ;;  %3988 = vmatpush1.bf16.msra.mxu1 %v10820_v20  ;;  %v4340_v53 = vshrl.u32 %v9288_v29, 16  ;;  %v4343_v20 = vshll.u32 %v9288_v29, 16  ;;  %v10945_v29 = vld [vmem:[%s15128_s1 + $0x1104] ss:$16 sps:$4 sm:$0xff]  }
 0x1d4   : > { %3948 = vmatprep.subr.bf16.mxu0 %v10825_v21  ;;  %3989 = vmatprep.subr.bf16.mxu1 %v10828_v22  ;;  %v4356_v21 = vshrl.u32 %v9290_v48, 16  ;;  %v4359_v22 = vshll.u32 %v9290_v48, 16  ;;  %v10948_v48 = vld [vmem:[%s15128_s1 + $0x1304] ss:$16 sps:$4 sm:$0xff]  }
 0x1d7   : > { %3949 = vmatpush1.bf16.msra.mxu0 %v10823_v23  ;;  %3990 = vmatpush1.bf16.msra.mxu1 %v10826_v1  ;;  %v10889_v23 = vld [vmem:[%s15128_s1 + $0xde8] ss:$16 sps:$4 sm:$0xff]  }
 0x1d8   : > { %3950 = vmatprep.subr.bf16.mxu0 %v10831_v2  ;;  %3991 = vmatprep.subr.bf16.mxu1 %v10834_v24  ;;  %v10892_v1 = vld [vmem:[%s15128_s1 + $0xfe8] ss:$16 sps:$4 sm:$0xff]   ;;  %v10897_v2 = vld [vmem:[%s15128_s1 + $0x1004] ss:$16 sps:$4 sm:$0xff]  }
 0x1d9   : > { %v1894_v30 = vpop.f32.mrb[0].mxu0  ;;  %v2058_v31 = vpop.f32.mrb[0].mxu1  ;;  %v10900_v24 = vld [vmem:[%s15128_s1 + $0x1204] ss:$16 sps:$4 sm:$0xff]  }
 0x1da   : > { %2065 = vst [vmem:[#allocation2] sm:$0x3f] %v1894_v30  ;;  %2067 = vst [vmem:[#allocation2 + $0x10] sm:$0x3f] %v2058_v31  ;;  %v1896_v34 = vpop.f32.mrb[1].mxu0  ;;  %v2060_v35 = vpop.f32.mrb[1].mxu1 }
 0x1db   : > { %2066 = vst [vmem:[#allocation2 + $0x8] sm:$0x3f] %v1896_v34  ;;  %2068 = vst [vmem:[#allocation2 + $0x18] sm:$0x3f] %v2060_v35  ;;  %v1898_v36 = vpop.f32.mrb[2].mxu0  ;;  %v2062_v37 = vpop.f32.mrb[2].mxu1  ;;  %3951 = vmatpush1.bf16.msra.mxu0 %v10829_v25  ;;  %3992 = vmatpush1.bf16.msra.mxu1 %v10832_v26 }
 0x1dc   : > { %v1899_v38 = vpop.f32.mrb[3].mxu0  ;;  %v2063_v39 = vpop.f32.mrb[3].mxu1  ;;  %3952 = vmatprep.subr.bf16.mxu0 %v10837_v27  ;;  %3993 = vmatprep.subr.bf16.mxu1 %v10840_v14  ;;  %v4342_v25 = vrot.slane %v4340_v53, 1  ;;  %v4345_v26 = vrot.slane %v4343_v20, 2  ;;  %v4358_v27 = vrot.slane %v4356_v21, 1  ;;  %v4361_v14 = vrot.slane %v4359_v22, 2 }
 0x1dd   : > { %v10895_v30 = vld [vmem:[%s15128_s1 + $0x1000] ss:$16 sps:$4 sm:$0xff]   ;;  %v10909_v38 = vld [vmem:[%s15128_s1 + $0x1044] ss:$16 sps:$4 sm:$0xff]  }
 0x1de   : > { %v10898_v31 = vld [vmem:[%s15128_s1 + $0x1200] ss:$16 sps:$4 sm:$0xff]   ;;  %v13371_v34 = vor.u32 %v4345_v26, %v4342_v25  ;;  %v13373_v35 = vor.u32 %v4361_v14, %v4358_v27  ;;  %v10957_v21 = vld [vmem:[%s15128_s1 + $0x1144] ss:$16 sps:$4 sm:$0xff]  }
 0x1df   : > { %3953 = vmatpush1.bf16.msra.mxu0 %v10835_v32  ;;  %3994 = vmatpush1.bf16.msra.mxu1 %v10838_v33  ;;  %v10903_v32 = vld [vmem:[%s15128_s1 + $0x1024] ss:$16 sps:$4 sm:$0xff]   ;;  %v10901_v36 = vld [vmem:[%s15128_s1 + $0x1020] ss:$16 sps:$4 sm:$0xff]  }
 0x1e0   : > { %3954 = vmatprep.subr.bf16.mxu0 %v10843_v40  ;;  %3995 = vmatprep.subr.bf16.mxu1 %v10846_v41  ;;  %v10906_v33 = vld [vmem:[%s15128_s1 + $0x1224] ss:$16 sps:$4 sm:$0xff]   ;;  %v10904_v37 = vld [vmem:[%s15128_s1 + $0x1220] ss:$16 sps:$4 sm:$0xff]  }
 0x1e1   : > { %v10910_v39 = vld [vmem:[%s15128_s1 + $0x1240] ss:$16 sps:$4 sm:$0xff]   ;;  %v10915_v40 = vld [vmem:[%s15128_s1 + $0x1064] ss:$16 sps:$4 sm:$0xff]  }
 0x1e2   : > { %v10918_v41 = vld [vmem:[%s15128_s1 + $0x1264] ss:$16 sps:$4 sm:$0xff]   ;;  %v10949_v53 = vld [vmem:[%s15128_s1 + $0x1120] ss:$16 sps:$4 sm:$0xff]  }
 0x1e3   : > { %3955 = vmatpush1.bf16.msra.mxu0 %v10841_v42  ;;  %3996 = vmatpush1.bf16.msra.mxu1 %v10844_v43  ;;  %v10913_v42 = vld [vmem:[%s15128_s1 + $0x1060] ss:$16 sps:$4 sm:$0xff]   ;;  %v10960_v22 = vld [vmem:[%s15128_s1 + $0x1344] ss:$16 sps:$4 sm:$0xff]  }
 0x1e4   : > { %3956 = vmatprep.subr.bf16.mxu0 %v10849_v44  ;;  %3997 = vmatprep.subr.bf16.mxu1 %v10852_v45  ;;  %v10916_v43 = vld [vmem:[%s15128_s1 + $0x1260] ss:$16 sps:$4 sm:$0xff]   ;;  %v10921_v44 = vld [vmem:[%s15128_s1 + $0x1084] ss:$16 sps:$4 sm:$0xff]  }
 0x1e5   : > { %v10924_v45 = vld [vmem:[%s15128_s1 + $0x1284] ss:$16 sps:$4 sm:$0xff]   ;;  %v10952_v20 = vld [vmem:[%s15128_s1 + $0x1320] ss:$16 sps:$4 sm:$0xff]  }
 0x1e6   : > { %v10961_v25 = vld [vmem:[%s15128_s1 + $0x1160] ss:$16 sps:$4 sm:$0xff]   ;;  %v10969_v27 = vld [vmem:[%s15128_s1 + $0x1184] ss:$16 sps:$4 sm:$0xff]  }
 0x1e7   : > { %3957 = vmatpush1.bf16.msra.mxu0 %v10847_v46  ;;  %3998 = vmatpush1.bf16.msra.mxu1 %v10850_v17  ;;  %v10919_v46 = vld [vmem:[%s15128_s1 + $0x1080] ss:$16 sps:$4 sm:$0xff]   ;;  %v10972_v14 = vld [vmem:[%s15128_s1 + $0x1384] ss:$16 sps:$4 sm:$0xff]  }
 0x1e8   : > { %3958 = vmatprep.subr.bf16.mxu0 %v10855_v18  ;;  %3999 = vmatprep.subr.bf16.mxu1 %v10858_v47  ;;  %v10922_v17 = vld [vmem:[%s15128_s1 + $0x1280] ss:$16 sps:$4 sm:$0xff]   ;;  %v10927_v18 = vld [vmem:[%s15128_s1 + $0x10a4] ss:$16 sps:$4 sm:$0xff]  }
 0x1e9   : > { %v10930_v47 = vld [vmem:[%s15128_s1 + $0x12a4] ss:$16 sps:$4 sm:$0xff]   ;;  %v10964_v26 = vld [vmem:[%s15128_s1 + $0x1360] ss:$16 sps:$4 sm:$0xff]  }
 0x1eb   : > { %3959 = vmatpush1.bf16.msra.mxu0 %v10853_v50  ;;  %4000 = vmatpush1.bf16.msra.mxu1 %v10856_v51  ;;  %v10925_v50 = vld [vmem:[%s15128_s1 + $0x10a0] ss:$16 sps:$4 sm:$0xff]  }
 0x1ec   : > { %3960 = vmatprep.subr.bf16.mxu0 %v10861_v54  ;;  %4001 = vmatprep.subr.bf16.mxu1 %v10864_v55  ;;  %v10928_v51 = vld [vmem:[%s15128_s1 + $0x12a0] ss:$16 sps:$4 sm:$0xff]   ;;  %v10933_v54 = vld [vmem:[%s15128_s1 + $0x10c4] ss:$16 sps:$4 sm:$0xff]  }
 0x1ed   : > { %v10936_v55 = vld [vmem:[%s15128_s1 + $0x12c4] ss:$16 sps:$4 sm:$0xff]  }
 0x1ef   : > { %3961 = vmatpush1.bf16.msra.mxu0 %v10859_v56  ;;  %4002 = vmatpush1.bf16.msra.mxu1 %v10862_v57 }
 0x1f0   : > { %3962 = vmatprep.subr.bf16.mxu0 %v10867_v58  ;;  %4003 = vmatprep.subr.bf16.mxu1 %v10870_v59  ;;  %v10931_v58 = vld [vmem:[%s15128_s1 + $0x10c0] ss:$16 sps:$4 sm:$0xff]  }
 0x1f1   : > { %v10934_v59 = vld [vmem:[%s15128_s1 + $0x12c0] ss:$16 sps:$4 sm:$0xff]  }
 0x1f3   : > { %3963 = vmatpush1.bf16.msra.mxu0 %v10865_v60  ;;  %4004 = vmatpush1.bf16.msra.mxu1 %v10868_v61 }
 0x1f4   : > { %3964 = vmatprep.subr.bf16.mxu0 %v10873_v62  ;;  %4005 = vmatprep.subr.bf16.mxu1 %v10876_v63 }
 0x1f7   : > { %3965 = vmatpush1.bf16.msra.mxu0 %v10871_v0  ;;  %4006 = vmatpush1.bf16.msra.mxu1 %v10874_v3 }
 0x1f8   : > { %3966 = vmatprep.subr.bf16.mxu0 %v10879_v6  ;;  %4007 = vmatprep.subr.bf16.mxu1 %v10882_v7 }
 0x1fb   : > { %3967 = vmatpush1.bf16.msra.mxu0 %v10877_v13  ;;  %4008 = vmatpush1.bf16.msra.mxu1 %v10880_v15  ;;  %v10939_v13 = vld [vmem:[%s15128_s1 + $0x10e4] ss:$16 sps:$4 sm:$0xff]  }
 0x1fc   : > { %3968 = vmatprep.subr.bf16.mxu0 %v10885_v16  ;;  %4009 = vmatprep.subr.bf16.mxu1 %v10888_v28  ;;  %v10942_v15 = vld [vmem:[%s15128_s1 + $0x12e4] ss:$16 sps:$4 sm:$0xff]   ;;  %v10937_v16 = vld [vmem:[%s15128_s1 + $0x10e0] ss:$16 sps:$4 sm:$0xff]  }
 0x1fd   : > { %v10940_v28 = vld [vmem:[%s15128_s1 + $0x12e0] ss:$16 sps:$4 sm:$0xff]  }
 0x1ff   : > { %3969 = vmatpush1.bf16.msra.mxu0 %v10883_v49  ;;  %4010 = vmatpush1.bf16.msra.mxu1 %v10886_v11  ;;  %v10943_v49 = vld [vmem:[%s15128_s1 + $0x1100] ss:$16 sps:$4 sm:$0xff]  }
 0x200   : > { %3970 = vmatprep.subr.bf16.mxu0 %v10891_v19  ;;  %4011 = vmatprep.subr.bf16.mxu1 %v10894_v52  ;;  %v10946_v11 = vld [vmem:[%s15128_s1 + $0x1300] ss:$16 sps:$4 sm:$0xff]   ;;  %v10951_v19 = vld [vmem:[%s15128_s1 + $0x1124] ss:$16 sps:$4 sm:$0xff]  }
 0x201   : > { %v10954_v52 = vld [vmem:[%s15128_s1 + $0x1324] ss:$16 sps:$4 sm:$0xff]  }
 0x203   : > { %3971 = vmatpush1.bf16.msra.mxu0 %v10889_v23  ;;  %4012 = vmatpush1.bf16.msra.mxu1 %v10892_v1  ;;  %v10955_v23 = vld [vmem:[%s15128_s1 + $0x1140] ss:$16 sps:$4 sm:$0xff]  }
 0x204   : > { %5683 = vmatprep.subr.bf16.mxu0 %v10897_v2  ;;  %5724 = vmatprep.subr.bf16.mxu1 %v10900_v24  ;;  %v10958_v1 = vld [vmem:[%s15128_s1 + $0x1340] ss:$16 sps:$4 sm:$0xff]   ;;  %v10963_v2 = vld [vmem:[%s15128_s1 + $0x1164] ss:$16 sps:$4 sm:$0xff]  }
 0x205   : > { %v10966_v24 = vld [vmem:[%s15128_s1 + $0x1364] ss:$16 sps:$4 sm:$0xff]  }
 0x206   : > { %3973 = vmatmul.mubr.bf16.vlgmr.msra.gmra.mrb[16].mxu0 %v12953_v4  ;;  %4014 = vmatmul.mubr.bf16.vlgmr.msra.gmra.mrb[16].mxu1 %v12955_v5  ;;  %v10912_v4 = vld [vmem:[%s15128_s1 + $0x1244] ss:$16 sps:$4 sm:$0xff]   ;;  %v10907_v5 = vld [vmem:[%s15128_s1 + $0x1040] ss:$16 sps:$4 sm:$0xff]  }
 0x207   : > { %5684 = vmatpush1.bf16.msra.mxu0 %v10895_v30  ;;  %5725 = vmatpush1.bf16.msra.mxu1 %v10898_v31  ;;  %v10967_v30 = vld [vmem:[%s15128_s1 + $0x1180] ss:$16 sps:$4 sm:$0xff]  }
 0x208   : > { %5685 = vmatprep.subr.bf16.mxu0 %v10903_v32  ;;  %5726 = vmatprep.subr.bf16.mxu1 %v10906_v33  ;;  %v10970_v31 = vld [vmem:[%s15128_s1 + $0x1380] ss:$16 sps:$4 sm:$0xff]   ;;  %v10975_v32 = vld [vmem:[%s15128_s1 + $0x11a4] ss:$16 sps:$4 sm:$0xff]  }
 0x209   : > { %5715 = vmatprep.mubr.bf16.mxu0 %v13371_v34  ;;  %5756 = vmatprep.mubr.bf16.mxu1 %v13373_v35  ;;  %v10978_v33 = vld [vmem:[%s15128_s1 + $0x13a4] ss:$16 sps:$4 sm:$0xff]  }
 0x20b   : > { %5686 = vmatpush1.bf16.msra.mxu0 %v10901_v36  ;;  %5727 = vmatpush1.bf16.msra.mxu1 %v10904_v37  ;;  %v13528_v36 = vld [vmem:[%s11851_s30 + $0x10] sm:$0xee]  ;;  %v13531_v37 = vld [vmem:[%s11851_s30 + $0x30] sm:$0x11] }
 0x20c   : > { %5687 = vmatprep.subr.bf16.mxu0 %v10909_v38  ;;  %5728 = vmatprep.subr.bf16.mxu1 %v10912_v4  ;;  %v9287_v38 = vcombine.low %v13308_v8, %v13311_v9  ;;  %v13536_v4 = vld [vmem:[%s11851_s30 + $0x18] sm:$0xee]  ;;  %v10981_v8 = vld [vmem:[%s15128_s1 + $0x11c4] ss:$16 sps:$4 sm:$0xff]  }
 0x20d   : > { %v10984_v9 = vld [vmem:[%s15128_s1 + $0x13c4] ss:$16 sps:$4 sm:$0xff]  }
 0x20f   : > { %5688 = vmatpush1.bf16.msra.mxu0 %v10907_v5  ;;  %5729 = vmatpush1.bf16.msra.mxu1 %v10910_v39  ;;  %v13539_v5 = vld [vmem:[%s11851_s30 + $0x38] sm:$0x11]  ;;  %v9289_v39 = vcombine.low %v13314_v10, %v13317_v12  ;;  %v4332_v10 = vshrl.u32 %v9287_v38, 16  ;;  %v9292_v12 = vcombine.high %v13528_v36, %v13531_v37 }
 0x210   : > { %5689 = vmatprep.subr.bf16.mxu0 %v10915_v40  ;;  %5730 = vmatprep.subr.bf16.mxu1 %v10918_v41  ;;  %v10973_v40 = vld [vmem:[%s15128_s1 + $0x11a0] ss:$16 sps:$4 sm:$0xff]  }
 0x211   : > { %v10976_v41 = vld [vmem:[%s15128_s1 + $0x13a0] ss:$16 sps:$4 sm:$0xff]  }
 0x213   : > { %5690 = vmatpush1.bf16.msra.mxu0 %v10913_v42  ;;  %5731 = vmatpush1.bf16.msra.mxu1 %v10916_v43  ;;  %v10979_v42 = vld [vmem:[%s15128_s1 + $0x11c0] ss:$16 sps:$4 sm:$0xff]   ;;  %v9294_v43 = vcombine.high %v13536_v4, %v13539_v5 }
 0x214   : > { %5691 = vmatprep.subr.bf16.mxu0 %v10921_v44  ;;  %5732 = vmatprep.subr.bf16.mxu1 %v10924_v45  ;;  %v4335_v44 = vshll.u32 %v9287_v38, 16  ;;  %v4348_v45 = vshrl.u32 %v9289_v39, 16  ;;  %v11021_v38 = vld [vmem:[%s15128_s1 + $0x14a0] ss:$16 sps:$4 sm:$0xff]  }
 0x217   : > { %5692 = vmatpush1.bf16.msra.mxu0 %v10919_v46  ;;  %5733 = vmatpush1.bf16.msra.mxu1 %v10922_v17  ;;  %v4351_v46 = vshll.u32 %v9289_v39, 16  ;;  %v10982_v17 = vld [vmem:[%s15128_s1 + $0x13c0] ss:$16 sps:$4 sm:$0xff]  }
 0x218   : > { %5693 = vmatprep.subr.bf16.mxu0 %v10927_v18  ;;  %5734 = vmatprep.subr.bf16.mxu1 %v10930_v47  ;;  %v10987_v18 = vld [vmem:[%s15128_s1 + $0x11e4] ss:$16 sps:$4 sm:$0xff]   ;;  %v11024_v39 = vld [vmem:[%s15128_s1 + $0x16a0] ss:$16 sps:$4 sm:$0xff]  }
 0x219   : > { %v3728_v56 = vpop.f32.mrb[4].mxu0  ;;  %v3769_v57 = vpop.f32.mrb[4].mxu1  ;;  %v10990_v47 = vld [vmem:[%s15128_s1 + $0x13e4] ss:$16 sps:$4 sm:$0xff]  }
 0x21a   : > { %v13445_v60 = vadd.f32 %v3769_v57, %v3728_v56  ;;  %v3730_v61 = vpop.f32.mrb[5].mxu0  ;;  %v3771_v62 = vpop.f32.mrb[5].mxu1  ;;  %v4391_v56 = vshll.u32 %v9294_v43, 16  ;;  %v4337_v57 = vrot.slane %v4335_v44, 2 }
 0x21b   : > { %v13447_v63 = vadd.f32 %v3771_v62, %v3730_v61  ;;  %v3732_v0 = vpop.f32.mrb[6].mxu0  ;;  %v3773_v3 = vpop.f32.mrb[6].mxu1  ;;  %5694 = vmatpush1.bf16.msra.mxu0 %v10925_v50  ;;  %5735 = vmatpush1.bf16.msra.mxu1 %v10928_v51  ;;  %v4334_v50 = vrot.slane %v4332_v10, 1  ;;  %v4372_v51 = vshrl.u32 %v9292_v12, 16  ;;  %v10985_v61 = vld [vmem:[%s15128_s1 + $0x11e0] ss:$16 sps:$4 sm:$0xff]  }
 0x21c   : > { %v3733_v6 = vpop.f32.mrb[7].mxu0  ;;  %v3774_v7 = vpop.f32.mrb[7].mxu1  ;;  %5695 = vmatprep.subr.bf16.mxu0 %v10933_v54  ;;  %5736 = vmatprep.subr.bf16.mxu1 %v10936_v55  ;;  %v4375_v54 = vshll.u32 %v9292_v12, 16  ;;  %v4388_v55 = vshrl.u32 %v9294_v43, 16  ;;  %v10988_v62 = vld [vmem:[%s15128_s1 + $0x13e0] ss:$16 sps:$4 sm:$0xff]  }
 0x21d   : > { %v10993_v0 = vld [vmem:[%s15128_s1 + $0x1404] ss:$16 sps:$4 sm:$0xff]   ;;  %v4374_v6 = vrot.slane %v4372_v51, 1  ;;  %v10991_v7 = vld [vmem:[%s15128_s1 + $0x1400] ss:$16 sps:$4 sm:$0xff]  }
 0x21e   : > { %v10996_v3 = vld [vmem:[%s15128_s1 + $0x1604] ss:$16 sps:$4 sm:$0xff]  }
 0x21f   : > { %5696 = vmatpush1.bf16.msra.mxu0 %v10931_v58  ;;  %5737 = vmatpush1.bf16.msra.mxu1 %v10934_v59  ;;  %v4350_v58 = vrot.slane %v4348_v45, 1  ;;  %v4353_v59 = vrot.slane %v4351_v46, 2  ;;  %v11027_v46 = vld [vmem:[%s15128_s1 + $0x14c0] ss:$16 sps:$4 sm:$0xff]  }
 0x220   : > { %5697 = vmatprep.subr.bf16.mxu0 %v10939_v13  ;;  %5738 = vmatprep.subr.bf16.mxu1 %v10942_v15  ;;  %v10994_v13 = vld [vmem:[%s15128_s1 + $0x1600] ss:$16 sps:$4 sm:$0xff]   ;;  %v4377_v15 = vrot.slane %v4375_v54, 2 }
 0x221   : > { %v4022_v51 = vld [vmem:[#allocation2] sm:$0x3f] }
 0x223   : > { %5698 = vmatpush1.bf16.msra.mxu0 %v10937_v16  ;;  %5739 = vmatpush1.bf16.msra.mxu1 %v10940_v28  ;;  %v4390_v16 = vrot.slane %v4388_v55, 1  ;;  %v4393_v28 = vrot.slane %v4391_v56, 2  ;;  %v4023_v56 = vld [vmem:[#allocation2 + $0x8] sm:$0x3f] }
 0x224   : > { %5699 = vmatprep.subr.bf16.mxu0 %v10945_v29  ;;  %5740 = vmatprep.subr.bf16.mxu1 %v10948_v48  ;;  %v13589_v29 = vor.u32 %v4337_v57, %v4334_v50  ;;  %v13591_v48 = vor.u32 %v4353_v59, %v4350_v58  ;;  %v11033_v58 = vld [vmem:[%s15128_s1 + $0x14e0] ss:$16 sps:$4 sm:$0xff]  }
 0x225   : > { %v11036_v59 = vld [vmem:[%s15128_s1 + $0x16e0] ss:$16 sps:$4 sm:$0xff]  }
 0x227   : > { %5700 = vmatpush1.bf16.msra.mxu0 %v10943_v49  ;;  %5741 = vmatpush1.bf16.msra.mxu1 %v10946_v11  ;;  %v10999_v49 = vld [vmem:[%s15128_s1 + $0x1424] ss:$16 sps:$4 sm:$0xff]  }
 0x228   : > { %5701 = vmatprep.subr.bf16.mxu0 %v10951_v19  ;;  %5742 = vmatprep.subr.bf16.mxu1 %v10954_v52  ;;  %v11002_v11 = vld [vmem:[%s15128_s1 + $0x1624] ss:$16 sps:$4 sm:$0xff]   ;;  %v13599_v19 = vor.u32 %v4377_v15, %v4374_v6  ;;  %v13601_v52 = vor.u32 %v4393_v28, %v4390_v16  ;;  %v11048_v15 = vld [vmem:[%s15128_s1 + $0x1720] ss:$16 sps:$4 sm:$0xff]  }
 0x229   : > { %v11047_v6 = vld [vmem:[%s15128_s1 + $0x1524] ss:$16 sps:$4 sm:$0xff]  }
 0x22a   : > { %v11053_v16 = vld [vmem:[%s15128_s1 + $0x1544] ss:$16 sps:$4 sm:$0xff]  }
 0x22b   : > { %5702 = vmatpush1.bf16.msra.mxu0 %v10949_v53  ;;  %5743 = vmatpush1.bf16.msra.mxu1 %v10952_v20  ;;  %v10997_v53 = vld [vmem:[%s15128_s1 + $0x1420] ss:$16 sps:$4 sm:$0xff]   ;;  %v11056_v28 = vld [vmem:[%s15128_s1 + $0x1744] ss:$16 sps:$4 sm:$0xff]  }
 0x22c   : > { %5703 = vmatprep.subr.bf16.mxu0 %v10957_v21  ;;  %5744 = vmatprep.subr.bf16.mxu1 %v10960_v22  ;;  %v11000_v20 = vld [vmem:[%s15128_s1 + $0x1620] ss:$16 sps:$4 sm:$0xff]   ;;  %v11005_v21 = vld [vmem:[%s15128_s1 + $0x1444] ss:$16 sps:$4 sm:$0xff]  }
 0x22d   : > { %v11008_v22 = vld [vmem:[%s15128_s1 + $0x1644] ss:$16 sps:$4 sm:$0xff]  }
 0x22f   : > { %5704 = vmatpush1.bf16.msra.mxu0 %v10955_v23  ;;  %5745 = vmatpush1.bf16.msra.mxu1 %v10958_v1  ;;  %v11003_v23 = vld [vmem:[%s15128_s1 + $0x1440] ss:$16 sps:$4 sm:$0xff]  }
 0x230   : > { %5705 = vmatprep.subr.bf16.mxu0 %v10963_v2  ;;  %5746 = vmatprep.subr.bf16.mxu1 %v10966_v24  ;;  %v11006_v1 = vld [vmem:[%s15128_s1 + $0x1640] ss:$16 sps:$4 sm:$0xff]   ;;  %v11011_v2 = vld [vmem:[%s15128_s1 + $0x1464] ss:$16 sps:$4 sm:$0xff]  }
 0x231   : > { %v11014_v24 = vld [vmem:[%s15128_s1 + $0x1664] ss:$16 sps:$4 sm:$0xff]  }
 0x233   : > { %5706 = vmatpush1.bf16.msra.mxu0 %v10961_v25  ;;  %5747 = vmatpush1.bf16.msra.mxu1 %v10964_v26  ;;  %v11009_v25 = vld [vmem:[%s15128_s1 + $0x1460] ss:$16 sps:$4 sm:$0xff]  }
 0x234   : > { %5707 = vmatprep.subr.bf16.mxu0 %v10969_v27  ;;  %5748 = vmatprep.subr.bf16.mxu1 %v10972_v14  ;;  %v11012_v26 = vld [vmem:[%s15128_s1 + $0x1660] ss:$16 sps:$4 sm:$0xff]   ;;  %v11017_v27 = vld [vmem:[%s15128_s1 + $0x1484] ss:$16 sps:$4 sm:$0xff]  }
 0x235   : > { %v11020_v14 = vld [vmem:[%s15128_s1 + $0x1684] ss:$16 sps:$4 sm:$0xff]  }
 0x237   : > { %5708 = vmatpush1.bf16.msra.mxu0 %v10967_v30  ;;  %5749 = vmatpush1.bf16.msra.mxu1 %v10970_v31  ;;  %v11015_v30 = vld [vmem:[%s15128_s1 + $0x1480] ss:$16 sps:$4 sm:$0xff]  }
 0x238   : > { %5709 = vmatprep.subr.bf16.mxu0 %v10975_v32  ;;  %5750 = vmatprep.subr.bf16.mxu1 %v10978_v33  ;;  %v11018_v31 = vld [vmem:[%s15128_s1 + $0x1680] ss:$16 sps:$4 sm:$0xff]   ;;  %v11023_v32 = vld [vmem:[%s15128_s1 + $0x14a4] ss:$16 sps:$4 sm:$0xff]  }
 0x239   : > { %v11026_v33 = vld [vmem:[%s15128_s1 + $0x16a4] ss:$16 sps:$4 sm:$0xff]  }
 0x23b   : > { %5710 = vmatpush1.bf16.msra.mxu0 %v10973_v40  ;;  %5751 = vmatpush1.bf16.msra.mxu1 %v10976_v41  ;;  %v11029_v40 = vld [vmem:[%s15128_s1 + $0x14c4] ss:$16 sps:$4 sm:$0xff]  }
 0x23c   : > { %5711 = vmatprep.subr.bf16.mxu0 %v10981_v8  ;;  %5752 = vmatprep.subr.bf16.mxu1 %v10984_v9  ;;  %v11032_v41 = vld [vmem:[%s15128_s1 + $0x16c4] ss:$16 sps:$4 sm:$0xff]  }
 0x23f   : > { %5712 = vmatpush1.bf16.msra.mxu0 %v10979_v42  ;;  %5753 = vmatpush1.bf16.msra.mxu1 %v10982_v17  ;;  %v11030_v17 = vld [vmem:[%s15128_s1 + $0x16c0] ss:$16 sps:$4 sm:$0xff]  }
 0x240   : > { %5713 = vmatprep.subr.bf16.mxu0 %v10987_v18  ;;  %5754 = vmatprep.subr.bf16.mxu1 %v10990_v47 }
 0x243   : > { %5714 = vmatpush1.bf16.msra.mxu0 %v10985_v61  ;;  %5755 = vmatpush1.bf16.msra.mxu1 %v10988_v62  ;;  %v11041_v61 = vld [vmem:[%s15128_s1 + $0x1504] ss:$16 sps:$4 sm:$0xff]  }
 0x244   : > { %5765 = vmatprep.subr.bf16.mxu0 %v10993_v0  ;;  %5806 = vmatprep.subr.bf16.mxu1 %v10996_v3  ;;  %v11044_v62 = vld [vmem:[%s15128_s1 + $0x1704] ss:$16 sps:$4 sm:$0xff]   ;;  %v11039_v0 = vld [vmem:[%s15128_s1 + $0x1500] ss:$16 sps:$4 sm:$0xff]  }
 0x245   : > { %v11042_v3 = vld [vmem:[%s15128_s1 + $0x1700] ss:$16 sps:$4 sm:$0xff]  }
 0x246   : > { %5716 = vmatmul.mubr.bf16.vlgmr.msra.gmra.mrb[20].mxu0 %v13589_v29  ;;  %5757 = vmatmul.mubr.bf16.vlgmr.msra.gmra.mrb[20].mxu1 %v13591_v48 }
 0x247   : > { %5766 = vmatpush1.bf16.msra.mxu0 %v10991_v7  ;;  %5807 = vmatpush1.bf16.msra.mxu1 %v10994_v13  ;;  %v11050_v7 = vld [vmem:[%s15128_s1 + $0x1724] ss:$16 sps:$4 sm:$0xff]   ;;  %v11045_v13 = vld [vmem:[%s15128_s1 + $0x1520] ss:$16 sps:$4 sm:$0xff]  }
 0x248   : > { %5767 = vmatprep.subr.bf16.mxu0 %v10999_v49  ;;  %5808 = vmatprep.subr.bf16.mxu1 %v11002_v11  ;;  %v11051_v49 = vld [vmem:[%s15128_s1 + $0x1540] ss:$16 sps:$4 sm:$0xff]  }
 0x249   : > { %5797 = vmatprep.mubr.bf16.mxu0 %v13599_v19  ;;  %5838 = vmatprep.mubr.bf16.mxu1 %v13601_v52  ;;  %v11054_v11 = vld [vmem:[%s15128_s1 + $0x1740] ss:$16 sps:$4 sm:$0xff]  }
 0x24b   : > { %5768 = vmatpush1.bf16.msra.mxu0 %v10997_v53  ;;  %5809 = vmatpush1.bf16.msra.mxu1 %v11000_v20  ;;  %v11059_v53 = vld [vmem:[%s15128_s1 + $0x1564] ss:$16 sps:$4 sm:$0xff]  }
 0x24c   : > { %5769 = vmatprep.subr.bf16.mxu0 %v11005_v21  ;;  %5810 = vmatprep.subr.bf16.mxu1 %v11008_v22  ;;  %v11062_v20 = vld [vmem:[%s15128_s1 + $0x1764] ss:$16 sps:$4 sm:$0xff]   ;;  %v11057_v21 = vld [vmem:[%s15128_s1 + $0x1560] ss:$16 sps:$4 sm:$0xff]  }
 0x24d   : > { %v11060_v22 = vld [vmem:[%s15128_s1 + $0x1760] ss:$16 sps:$4 sm:$0xff]  }
 0x24f   : > { %5770 = vmatpush1.bf16.msra.mxu0 %v11003_v23  ;;  %5811 = vmatpush1.bf16.msra.mxu1 %v11006_v1  ;;  %v11065_v23 = vld [vmem:[%s15128_s1 + $0x1584] ss:$16 sps:$4 sm:$0xff]  }
 0x250   : > { %5771 = vmatprep.subr.bf16.mxu0 %v11011_v2  ;;  %5812 = vmatprep.subr.bf16.mxu1 %v11014_v24  ;;  %v11068_v1 = vld [vmem:[%s15128_s1 + $0x1784] ss:$16 sps:$4 sm:$0xff]   ;;  %v11063_v2 = vld [vmem:[%s15128_s1 + $0x1580] ss:$16 sps:$4 sm:$0xff]  }
 0x251   : > { %v11066_v24 = vld [vmem:[%s15128_s1 + $0x1780] ss:$16 sps:$4 sm:$0xff]  }
 0x253   : > { %5772 = vmatpush1.bf16.msra.mxu0 %v11009_v25  ;;  %5813 = vmatpush1.bf16.msra.mxu1 %v11012_v26  ;;  %v11071_v25 = vld [vmem:[%s15128_s1 + $0x15a4] ss:$16 sps:$4 sm:$0xff]  }
 0x254   : > { %5773 = vmatprep.subr.bf16.mxu0 %v11017_v27  ;;  %5814 = vmatprep.subr.bf16.mxu1 %v11020_v14  ;;  %v11074_v26 = vld [vmem:[%s15128_s1 + $0x17a4] ss:$16 sps:$4 sm:$0xff]   ;;  %v9291_v27 = vcombine.low %v13528_v36, %v13531_v37  ;;  %v9293_v14 = vcombine.low %v13536_v4, %v13539_v5 }
 0x255   : > { %v11080_v36 = vld [vmem:[%s15128_s1 + $0x17c4] ss:$16 sps:$4 sm:$0xff]  }
 0x256   : > { %v4364_v37 = vshrl.u32 %v9291_v27, 16  ;;  %v4367_v4 = vshll.u32 %v9291_v27, 16  ;;  %v4380_v5 = vshrl.u32 %v9293_v14, 16  ;;  %v11131_v27 = vld [vmem:[%s15128_s1 + $0x10ec] ss:$16 sps:$4 sm:$0xff]  }
 0x257   : > { %5774 = vmatpush1.bf16.msra.mxu0 %v11015_v30  ;;  %5815 = vmatpush1.bf16.msra.mxu1 %v11018_v31  ;;  %v11069_v30 = vld [vmem:[%s15128_s1 + $0x15a0] ss:$16 sps:$4 sm:$0xff]  }
 0x258   : > { %5775 = vmatprep.subr.bf16.mxu0 %v11023_v32  ;;  %5816 = vmatprep.subr.bf16.mxu1 %v11026_v33  ;;  %v11072_v31 = vld [vmem:[%s15128_s1 + $0x17a0] ss:$16 sps:$4 sm:$0xff]   ;;  %v11077_v32 = vld [vmem:[%s15128_s1 + $0x15c4] ss:$16 sps:$4 sm:$0xff]   ;;  %v4383_v33 = vshll.u32 %v9293_v14, 16 }
 0x259   : > { %v3810_v8 = vpop.f32.mrb[8].mxu0  ;;  %v3851_v9 = vpop.f32.mrb[8].mxu1  ;;  %v11134_v14 = vld [vmem:[%s15128_s1 + $0x12ec] ss:$16 sps:$4 sm:$0xff]  }
 0x25a   : > { %v3811_v10 = vadd.f32 %v3810_v8, %v13445_v60  ;;  %v3812_v12 = vpop.f32.mrb[9].mxu0  ;;  %v3853_v42 = vpop.f32.mrb[9].mxu1  ;;  %v11035_v60 = vld [vmem:[%s15128_s1 + $0x14e4] ss:$16 sps:$4 sm:$0xff]   ;;  %v4366_v8 = vrot.slane %v4364_v37, 1 }
 0x25b   : > { %v3813_v43 = vadd.f32 %v3812_v12, %v13447_v63  ;;  %v3814_v44 = vpop.f32.mrb[10].mxu0  ;;  %v3855_v45 = vpop.f32.mrb[10].mxu1  ;;  %5776 = vmatpush1.bf16.msra.mxu0 %v11021_v38  ;;  %5817 = vmatpush1.bf16.msra.mxu1 %v11024_v39  ;;  %v11038_v63 = vld [vmem:[%s15128_s1 + $0x16e4] ss:$16 sps:$4 sm:$0xff]   ;;  %v11075_v38 = vld [vmem:[%s15128_s1 + $0x15c0] ss:$16 sps:$4 sm:$0xff]  }
 0x25c   : > { %v3852_v18 = vadd.f32 %v3851_v9, %v3811_v10  ;;  %v3815_v47 = vpop.f32.mrb[11].mxu0  ;;  %v3856_v50 = vpop.f32.mrb[11].mxu1  ;;  %5777 = vmatprep.subr.bf16.mxu0 %v11029_v40  ;;  %5818 = vmatprep.subr.bf16.mxu1 %v11032_v41  ;;  %v11078_v39 = vld [vmem:[%s15128_s1 + $0x17c0] ss:$16 sps:$4 sm:$0xff]   ;;  %v11083_v40 = vld [vmem:[%s15128_s1 + $0x15e4] ss:$16 sps:$4 sm:$0xff]  }
 0x25d   : > { %v3854_v54 = vadd.f32 %v3853_v42, %v3813_v43  ;;  %v11086_v41 = vld [vmem:[%s15128_s1 + $0x17e4] ss:$16 sps:$4 sm:$0xff]   ;;  %v4369_v9 = vrot.slane %v4367_v4, 2  ;;  %v4382_v10 = vrot.slane %v4380_v5, 1  ;;  %v4385_v12 = vrot.slane %v4383_v33, 2 }
 0x25e   : > { %v4026_v55 = vadd.f32 %v4022_v51, %v3852_v18  ;;  %v11081_v42 = vld [vmem:[%s15128_s1 + $0x15e0] ss:$16 sps:$4 sm:$0xff]   ;;  %v11089_v44 = vld [vmem:[%s15128_s1 + $0x100c] ss:$16 sps:$4 sm:$0xff]   ;;  %v11087_v18 = vld [vmem:[%s15128_s1 + $0x1008] ss:$16 sps:$4 sm:$0xff]  }
 0x25f   : > { %v4027_v57 = vadd.f32 %v4023_v56, %v3854_v54  ;;  %5778 = vmatpush1.bf16.msra.mxu0 %v11027_v46  ;;  %5819 = vmatpush1.bf16.msra.mxu1 %v11030_v17  ;;  %v11084_v43 = vld [vmem:[%s15128_s1 + $0x17e0] ss:$16 sps:$4 sm:$0xff]   ;;  %v11092_v45 = vld [vmem:[%s15128_s1 + $0x120c] ss:$16 sps:$4 sm:$0xff]   ;;  %v13793_v46 = vor.u32 %v4369_v9, %v4366_v8  ;;  %v13795_v17 = vor.u32 %v4385_v12, %v4382_v10  ;;  %v11090_v47 = vld [vmem:[%s15128_s1 + $0x1208] ss:$16 sps:$4 sm:$0xff]  }
 0x260   : > { %4030 = vst [vmem:[#allocation2] sm:$0x3f] %v4026_v55  ;;  %5779 = vmatprep.subr.bf16.mxu0 %v11035_v60  ;;  %5820 = vmatprep.subr.bf16.mxu1 %v11038_v63  ;;  %v11095_v50 = vld [vmem:[%s15128_s1 + $0x102c] ss:$16 sps:$4 sm:$0xff]   ;;  %v11093_v63 = vld [vmem:[%s15128_s1 + $0x1028] ss:$16 sps:$4 sm:$0xff]  }
 0x261   : > { %4031 = vst [vmem:[#allocation2 + $0x8] sm:$0x3f] %v4027_v57  ;;  %v11098_v60 = vld [vmem:[%s15128_s1 + $0x122c] ss:$16 sps:$4 sm:$0xff]   ;;  %v11096_v51 = vld [vmem:[%s15128_s1 + $0x1228] ss:$16 sps:$4 sm:$0xff]  }
 0x262   : > { %v11101_v54 = vld [vmem:[%s15128_s1 + $0x104c] ss:$16 sps:$4 sm:$0xff]   ;;  %v11099_v56 = vld [vmem:[%s15128_s1 + $0x1048] ss:$16 sps:$4 sm:$0xff]  }
 0x263   : > { %5780 = vmatpush1.bf16.msra.mxu0 %v11033_v58  ;;  %5821 = vmatpush1.bf16.msra.mxu1 %v11036_v59  ;;  %v11104_v55 = vld [vmem:[%s15128_s1 + $0x124c] ss:$16 sps:$4 sm:$0xff]   ;;  %v11102_v57 = vld [vmem:[%s15128_s1 + $0x1248] ss:$16 sps:$4 sm:$0xff]  }
 0x264   : > { %5781 = vmatprep.subr.bf16.mxu0 %v11041_v61  ;;  %5822 = vmatprep.subr.bf16.mxu1 %v11044_v62  ;;  %v11107_v58 = vld [vmem:[%s15128_s1 + $0x106c] ss:$16 sps:$4 sm:$0xff]   ;;  %v11108_v59 = vld [vmem:[%s15128_s1 + $0x1268] ss:$16 sps:$4 sm:$0xff]  }
 0x265   : > { %v11113_v61 = vld [vmem:[%s15128_s1 + $0x108c] ss:$16 sps:$4 sm:$0xff]   ;;  %v11135_v37 = vld [vmem:[%s15128_s1 + $0x1108] ss:$16 sps:$4 sm:$0xff]  }
 0x266   : > { %v11116_v62 = vld [vmem:[%s15128_s1 + $0x128c] ss:$16 sps:$4 sm:$0xff]   ;;  %v11138_v4 = vld [vmem:[%s15128_s1 + $0x1308] ss:$16 sps:$4 sm:$0xff]  }
 0x267   : > { %5782 = vmatpush1.bf16.msra.mxu0 %v11039_v0  ;;  %5823 = vmatpush1.bf16.msra.mxu1 %v11042_v3  ;;  %v11111_v0 = vld [vmem:[%s15128_s1 + $0x1088] ss:$16 sps:$4 sm:$0xff]   ;;  %v11143_v5 = vld [vmem:[%s15128_s1 + $0x112c] ss:$16 sps:$4 sm:$0xff]  }
 0x268   : > { %5783 = vmatprep.subr.bf16.mxu0 %v11047_v6  ;;  %5824 = vmatprep.subr.bf16.mxu1 %v11050_v7  ;;  %v11114_v3 = vld [vmem:[%s15128_s1 + $0x1288] ss:$16 sps:$4 sm:$0xff]   ;;  %v11119_v6 = vld [vmem:[%s15128_s1 + $0x10ac] ss:$16 sps:$4 sm:$0xff]  }
 0x269   : > { %v11122_v7 = vld [vmem:[%s15128_s1 + $0x12ac] ss:$16 sps:$4 sm:$0xff]   ;;  %v11147_v8 = vld [vmem:[%s15128_s1 + $0x1148] ss:$16 sps:$4 sm:$0xff]  }
 0x26a   : > { %v11146_v33 = vld [vmem:[%s15128_s1 + $0x132c] ss:$16 sps:$4 sm:$0xff]   ;;  %v11150_v9 = vld [vmem:[%s15128_s1 + $0x1348] ss:$16 sps:$4 sm:$0xff]  }
 0x26b   : > { %5784 = vmatpush1.bf16.msra.mxu0 %v11045_v13  ;;  %5825 = vmatpush1.bf16.msra.mxu1 %v11048_v15  ;;  %v11117_v13 = vld [vmem:[%s15128_s1 + $0x10a8] ss:$16 sps:$4 sm:$0xff]   ;;  %v11155_v10 = vld [vmem:[%s15128_s1 + $0x116c] ss:$16 sps:$4 sm:$0xff]  }
 0x26c   : > { %5785 = vmatprep.subr.bf16.mxu0 %v11053_v16  ;;  %5826 = vmatprep.subr.bf16.mxu1 %v11056_v28  ;;  %v11120_v15 = vld [vmem:[%s15128_s1 + $0x12a8] ss:$16 sps:$4 sm:$0xff]   ;;  %v11125_v16 = vld [vmem:[%s15128_s1 + $0x10cc] ss:$16 sps:$4 sm:$0xff]  }
 0x26d   : > { %v11128_v28 = vld [vmem:[%s15128_s1 + $0x12cc] ss:$16 sps:$4 sm:$0xff]  }
 0x26e   : > { %v11158_v12 = vld [vmem:[%s15128_s1 + $0x136c] ss:$16 sps:$4 sm:$0xff]  }
 0x26f   : > { %5786 = vmatpush1.bf16.msra.mxu0 %v11051_v49  ;;  %5827 = vmatpush1.bf16.msra.mxu1 %v11054_v11 }
 0x270   : > { %5787 = vmatprep.subr.bf16.mxu0 %v11059_v53  ;;  %5828 = vmatprep.subr.bf16.mxu1 %v11062_v20 }
 0x273   : > { %5788 = vmatpush1.bf16.msra.mxu0 %v11057_v21  ;;  %5829 = vmatpush1.bf16.msra.mxu1 %v11060_v22 }
 0x274   : > { %5789 = vmatprep.subr.bf16.mxu0 %v11065_v23  ;;  %5830 = vmatprep.subr.bf16.mxu1 %v11068_v1 }
 0x277   : > { %5790 = vmatpush1.bf16.msra.mxu0 %v11063_v2  ;;  %5831 = vmatpush1.bf16.msra.mxu1 %v11066_v24  ;;  %v11123_v2 = vld [vmem:[%s15128_s1 + $0x10c8] ss:$16 sps:$4 sm:$0xff]  }
 0x278   : > { %5791 = vmatprep.subr.bf16.mxu0 %v11071_v25  ;;  %5832 = vmatprep.subr.bf16.mxu1 %v11074_v26  ;;  %v11126_v24 = vld [vmem:[%s15128_s1 + $0x12c8] ss:$16 sps:$4 sm:$0xff]  }
 0x27b   : > { %5792 = vmatpush1.bf16.msra.mxu0 %v11069_v30  ;;  %5833 = vmatpush1.bf16.msra.mxu1 %v11072_v31  ;;  %v11129_v30 = vld [vmem:[%s15128_s1 + $0x10e8] ss:$16 sps:$4 sm:$0xff]  }
 0x27c   : > { %5793 = vmatprep.subr.bf16.mxu0 %v11077_v32  ;;  %5834 = vmatprep.subr.bf16.mxu1 %v11080_v36  ;;  %v11132_v31 = vld [vmem:[%s15128_s1 + $0x12e8] ss:$16 sps:$4 sm:$0xff]   ;;  %v11137_v32 = vld [vmem:[%s15128_s1 + $0x110c] ss:$16 sps:$4 sm:$0xff]  }
 0x27d   : > { %v11140_v36 = vld [vmem:[%s15128_s1 + $0x130c] ss:$16 sps:$4 sm:$0xff]  }
 0x27f   : > { %5794 = vmatpush1.bf16.msra.mxu0 %v11075_v38  ;;  %5835 = vmatpush1.bf16.msra.mxu1 %v11078_v39  ;;  %v11141_v38 = vld [vmem:[%s15128_s1 + $0x1128] ss:$16 sps:$4 sm:$0xff]  }
 0x280   : > { %5795 = vmatprep.subr.bf16.mxu0 %v11083_v40  ;;  %5836 = vmatprep.subr.bf16.mxu1 %v11086_v41  ;;  %v11144_v39 = vld [vmem:[%s15128_s1 + $0x1328] ss:$16 sps:$4 sm:$0xff]   ;;  %v11149_v40 = vld [vmem:[%s15128_s1 + $0x114c] ss:$16 sps:$4 sm:$0xff]  }
 0x281   : > { %v11152_v41 = vld [vmem:[%s15128_s1 + $0x134c] ss:$16 sps:$4 sm:$0xff]  }
 0x283   : > { %5796 = vmatpush1.bf16.msra.mxu0 %v11081_v42  ;;  %5837 = vmatpush1.bf16.msra.mxu1 %v11084_v43  ;;  %v11153_v42 = vld [vmem:[%s15128_s1 + $0x1168] ss:$16 sps:$4 sm:$0xff]  }
 0x284   : > { %5847 = vmatprep.subr.bf16.mxu0 %v11089_v44  ;;  %5888 = vmatprep.subr.bf16.mxu1 %v11092_v45  ;;  %v11156_v43 = vld [vmem:[%s15128_s1 + $0x1368] ss:$16 sps:$4 sm:$0xff]   ;;  %v11161_v44 = vld [vmem:[%s15128_s1 + $0x118c] ss:$16 sps:$4 sm:$0xff]  }
 0x285   : > { %v11164_v45 = vld [vmem:[%s15128_s1 + $0x138c] ss:$16 sps:$4 sm:$0xff]  }
 0x286   : > { %5798 = vmatmul.mubr.bf16.vlgmr.msra.gmra.mrb[24].mxu0 %v13793_v46  ;;  %5839 = vmatmul.mubr.bf16.vlgmr.msra.gmra.mrb[24].mxu1 %v13795_v17 }
 0x287   : > { %5848 = vmatpush1.bf16.msra.mxu0 %v11087_v18  ;;  %5889 = vmatpush1.bf16.msra.mxu1 %v11090_v47  ;;  %v11159_v18 = vld [vmem:[%s15128_s1 + $0x1188] ss:$16 sps:$4 sm:$0xff]  }
 0x288   : > { %5849 = vmatprep.subr.bf16.mxu0 %v11095_v50  ;;  %5890 = vmatprep.subr.bf16.mxu1 %v11098_v60  ;;  %v11162_v47 = vld [vmem:[%s15128_s1 + $0x1388] ss:$16 sps:$4 sm:$0xff]   ;;  %v11167_v50 = vld [vmem:[%s15128_s1 + $0x11ac] ss:$16 sps:$4 sm:$0xff]  }
 0x289   : > { %5879 = vmatprep.mubr.bf16.mxu0 %v13371_v34  ;;  %5920 = vmatprep.mubr.bf16.mxu1 %v13373_v35  ;;  %v11110_v34 = vld [vmem:[%s15128_s1 + $0x126c] ss:$16 sps:$4 sm:$0xff]   ;;  %v11105_v35 = vld [vmem:[%s15128_s1 + $0x1068] ss:$16 sps:$4 sm:$0xff]  }
 0x28a   : > { %v11170_v60 = vld [vmem:[%s15128_s1 + $0x13ac] ss:$16 sps:$4 sm:$0xff]  }
 0x28b   : > { %5850 = vmatpush1.bf16.msra.mxu0 %v11093_v63  ;;  %5891 = vmatpush1.bf16.msra.mxu1 %v11096_v51  ;;  %v11165_v63 = vld [vmem:[%s15128_s1 + $0x11a8] ss:$16 sps:$4 sm:$0xff]  }
 0x28c   : > { %5851 = vmatprep.subr.bf16.mxu0 %v11101_v54  ;;  %5892 = vmatprep.subr.bf16.mxu1 %v11104_v55  ;;  %v11168_v51 = vld [vmem:[%s15128_s1 + $0x13a8] ss:$16 sps:$4 sm:$0xff]   ;;  %v11173_v54 = vld [vmem:[%s15128_s1 + $0x11cc] ss:$16 sps:$4 sm:$0xff]  }
 0x28d   : > { %v11176_v55 = vld [vmem:[%s15128_s1 + $0x13cc] ss:$16 sps:$4 sm:$0xff]  }
 0x28f   : > { %5852 = vmatpush1.bf16.msra.mxu0 %v11099_v56  ;;  %5893 = vmatpush1.bf16.msra.mxu1 %v11102_v57  ;;  %v11171_v56 = vld [vmem:[%s15128_s1 + $0x11c8] ss:$16 sps:$4 sm:$0xff]  }
 0x290   : > { %5853 = vmatprep.subr.bf16.mxu0 %v11107_v58  ;;  %5894 = vmatprep.subr.bf16.mxu1 %v11110_v34  ;;  %v11174_v57 = vld [vmem:[%s15128_s1 + $0x13c8] ss:$16 sps:$4 sm:$0xff]   ;;  %v11179_v58 = vld [vmem:[%s15128_s1 + $0x11ec] ss:$16 sps:$4 sm:$0xff]  }
 0x291   : > { %v11182_v34 = vld [vmem:[%s15128_s1 + $0x13ec] ss:$16 sps:$4 sm:$0xff]  }
 0x293   : > { %5854 = vmatpush1.bf16.msra.mxu0 %v11105_v35  ;;  %5895 = vmatpush1.bf16.msra.mxu1 %v11108_v59  ;;  %v11177_v35 = vld [vmem:[%s15128_s1 + $0x11e8] ss:$16 sps:$4 sm:$0xff]  }
 0x294   : > { %5855 = vmatprep.subr.bf16.mxu0 %v11113_v61  ;;  %5896 = vmatprep.subr.bf16.mxu1 %v11116_v62  ;;  %v11180_v59 = vld [vmem:[%s15128_s1 + $0x13e8] ss:$16 sps:$4 sm:$0xff]   ;;  %v11185_v61 = vld [vmem:[%s15128_s1 + $0x140c] ss:$16 sps:$4 sm:$0xff]  }
 0x295   : > { %v11188_v62 = vld [vmem:[%s15128_s1 + $0x160c] ss:$16 sps:$4 sm:$0xff]  }
 0x297   : > { %5856 = vmatpush1.bf16.msra.mxu0 %v11111_v0  ;;  %5897 = vmatpush1.bf16.msra.mxu1 %v11114_v3  ;;  %v11183_v0 = vld [vmem:[%s15128_s1 + $0x1408] ss:$16 sps:$4 sm:$0xff]  }
 0x298   : > { %5857 = vmatprep.subr.bf16.mxu0 %v11119_v6  ;;  %5898 = vmatprep.subr.bf16.mxu1 %v11122_v7  ;;  %v11186_v3 = vld [vmem:[%s15128_s1 + $0x1608] ss:$16 sps:$4 sm:$0xff]   ;;  %v11191_v6 = vld [vmem:[%s15128_s1 + $0x142c] ss:$16 sps:$4 sm:$0xff]  }
 0x299   : > { %v3892_v49 = vpop.f32.mrb[12].mxu0  ;;  %v3933_v11 = vpop.f32.mrb[12].mxu1  ;;  %v11194_v7 = vld [vmem:[%s15128_s1 + $0x162c] ss:$16 sps:$4 sm:$0xff]  }
 0x29a   : > { %v13873_v53 = vadd.f32 %v3933_v11, %v3892_v49  ;;  %v3894_v20 = vpop.f32.mrb[13].mxu0  ;;  %v3935_v21 = vpop.f32.mrb[13].mxu1  ;;  %v11203_v49 = vld [vmem:[%s15128_s1 + $0x146c] ss:$16 sps:$4 sm:$0xff]   ;;  %v11204_v11 = vld [vmem:[%s15128_s1 + $0x1668] ss:$16 sps:$4 sm:$0xff]  }
 0x29b   : > { %v13875_v22 = vadd.f32 %v3935_v21, %v3894_v20  ;;  %v3896_v23 = vpop.f32.mrb[14].mxu0  ;;  %v3937_v1 = vpop.f32.mrb[14].mxu1  ;;  %5858 = vmatpush1.bf16.msra.mxu0 %v11117_v13  ;;  %5899 = vmatpush1.bf16.msra.mxu1 %v11120_v15  ;;  %v11189_v13 = vld [vmem:[%s15128_s1 + $0x1428] ss:$16 sps:$4 sm:$0xff]   ;;  %v11209_v20 = vld [vmem:[%s15128_s1 + $0x148c] ss:$16 sps:$4 sm:$0xff]  }
 0x29c   : > { %v3897_v25 = vpop.f32.mrb[15].mxu0  ;;  %v3938_v26 = vpop.f32.mrb[15].mxu1  ;;  %5859 = vmatprep.subr.bf16.mxu0 %v11125_v16  ;;  %5900 = vmatprep.subr.bf16.mxu1 %v11128_v28  ;;  %v11192_v15 = vld [vmem:[%s15128_s1 + $0x1628] ss:$16 sps:$4 sm:$0xff]   ;;  %v11197_v16 = vld [vmem:[%s15128_s1 + $0x144c] ss:$16 sps:$4 sm:$0xff]  }
 0x29d   : > { %v11198_v28 = vld [vmem:[%s15128_s1 + $0x1648] ss:$16 sps:$4 sm:$0xff]   ;;  %v11212_v21 = vld [vmem:[%s15128_s1 + $0x168c] ss:$16 sps:$4 sm:$0xff]  }
 0x29e   : > { %v11207_v23 = vld [vmem:[%s15128_s1 + $0x1488] ss:$16 sps:$4 sm:$0xff]  }
 0x29f   : > { %5860 = vmatpush1.bf16.msra.mxu0 %v11123_v2  ;;  %5901 = vmatpush1.bf16.msra.mxu1 %v11126_v24  ;;  %v11210_v1 = vld [vmem:[%s15128_s1 + $0x1688] ss:$16 sps:$4 sm:$0xff]   ;;  %v11215_v2 = vld [vmem:[%s15128_s1 + $0x14ac] ss:$16 sps:$4 sm:$0xff]  }
 0x2a0   : > { %5861 = vmatprep.subr.bf16.mxu0 %v11131_v27  ;;  %5902 = vmatprep.subr.bf16.mxu1 %v11134_v14  ;;  %v11218_v24 = vld [vmem:[%s15128_s1 + $0x16ac] ss:$16 sps:$4 sm:$0xff]   ;;  %v11213_v25 = vld [vmem:[%s15128_s1 + $0x14a8] ss:$16 sps:$4 sm:$0xff]  }
 0x2a1   : > { %v11216_v26 = vld [vmem:[%s15128_s1 + $0x16a8] ss:$16 sps:$4 sm:$0xff]   ;;  %v11221_v27 = vld [vmem:[%s15128_s1 + $0x14cc] ss:$16 sps:$4 sm:$0xff]  }
 0x2a2   : > { %v11224_v14 = vld [vmem:[%s15128_s1 + $0x16cc] ss:$16 sps:$4 sm:$0xff]  }
 0x2a3   : > { %5862 = vmatpush1.bf16.msra.mxu0 %v11129_v30  ;;  %5903 = vmatpush1.bf16.msra.mxu1 %v11132_v31 }
 0x2a4   : > { %5863 = vmatprep.subr.bf16.mxu0 %v11137_v32  ;;  %5904 = vmatprep.subr.bf16.mxu1 %v11140_v36 }
 0x2a7   : > { %5864 = vmatpush1.bf16.msra.mxu0 %v11135_v37  ;;  %5905 = vmatpush1.bf16.msra.mxu1 %v11138_v4 }
 0x2a8   : > { %5865 = vmatprep.subr.bf16.mxu0 %v11143_v5  ;;  %5906 = vmatprep.subr.bf16.mxu1 %v11146_v33 }
 0x2ab   : > { %5866 = vmatpush1.bf16.msra.mxu0 %v11141_v38  ;;  %5907 = vmatpush1.bf16.msra.mxu1 %v11144_v39  ;;  %v11219_v38 = vld [vmem:[%s15128_s1 + $0x14c8] ss:$16 sps:$4 sm:$0xff]  }
 0x2ac   : > { %5867 = vmatprep.subr.bf16.mxu0 %v11149_v40  ;;  %5908 = vmatprep.subr.bf16.mxu1 %v11152_v41  ;;  %v11222_v39 = vld [vmem:[%s15128_s1 + $0x16c8] ss:$16 sps:$4 sm:$0xff]  }
 0x2af   : > { %5868 = vmatpush1.bf16.msra.mxu0 %v11147_v8  ;;  %5909 = vmatpush1.bf16.msra.mxu1 %v11150_v9  ;;  %v4024_v9 = vld [vmem:[#allocation2 + $0x10] sm:$0x3f] }
 0x2b0   : > { %5869 = vmatprep.subr.bf16.mxu0 %v11155_v10  ;;  %5910 = vmatprep.subr.bf16.mxu1 %v11158_v12 }
 0x2b3   : > { %5870 = vmatpush1.bf16.msra.mxu0 %v11153_v42  ;;  %5911 = vmatpush1.bf16.msra.mxu1 %v11156_v43  ;;  %v4025_v42 = vld [vmem:[#allocation2 + $0x18] sm:$0x3f] }
 0x2b4   : > { %5871 = vmatprep.subr.bf16.mxu0 %v11161_v44  ;;  %5912 = vmatprep.subr.bf16.mxu1 %v11164_v45  ;;  %v11225_v44 = vld [vmem:[%s15128_s1 + $0x14e8] ss:$16 sps:$4 sm:$0xff]  }
 0x2b5   : > { %v11228_v45 = vld [vmem:[%s15128_s1 + $0x16e8] ss:$16 sps:$4 sm:$0xff]  }
 0x2b7   : > { %5872 = vmatpush1.bf16.msra.mxu0 %v11159_v18  ;;  %5913 = vmatpush1.bf16.msra.mxu1 %v11162_v47  ;;  %v11233_v18 = vld [vmem:[%s15128_s1 + $0x150c] ss:$16 sps:$4 sm:$0xff]  }
 0x2b8   : > { %5873 = vmatprep.subr.bf16.mxu0 %v11167_v50  ;;  %5914 = vmatprep.subr.bf16.mxu1 %v11170_v60  ;;  %v11236_v47 = vld [vmem:[%s15128_s1 + $0x170c] ss:$16 sps:$4 sm:$0xff]   ;;  %v11231_v50 = vld [vmem:[%s15128_s1 + $0x1508] ss:$16 sps:$4 sm:$0xff]  }
 0x2b9   : > { %v11234_v60 = vld [vmem:[%s15128_s1 + $0x1708] ss:$16 sps:$4 sm:$0xff]  }
 0x2bb   : > { %5874 = vmatpush1.bf16.msra.mxu0 %v11165_v63  ;;  %5915 = vmatpush1.bf16.msra.mxu1 %v11168_v51  ;;  %v11239_v63 = vld [vmem:[%s15128_s1 + $0x152c] ss:$16 sps:$4 sm:$0xff]  }
 0x2bc   : > { %5875 = vmatprep.subr.bf16.mxu0 %v11173_v54  ;;  %5916 = vmatprep.subr.bf16.mxu1 %v11176_v55  ;;  %v11242_v51 = vld [vmem:[%s15128_s1 + $0x172c] ss:$16 sps:$4 sm:$0xff]   ;;  %v11237_v54 = vld [vmem:[%s15128_s1 + $0x1528] ss:$16 sps:$4 sm:$0xff]  }
 0x2bd   : > { %v11240_v55 = vld [vmem:[%s15128_s1 + $0x1728] ss:$16 sps:$4 sm:$0xff]  }
 0x2bf   : > { %5876 = vmatpush1.bf16.msra.mxu0 %v11171_v56  ;;  %5917 = vmatpush1.bf16.msra.mxu1 %v11174_v57  ;;  %v11245_v56 = vld [vmem:[%s15128_s1 + $0x154c] ss:$16 sps:$4 sm:$0xff]  }
 0x2c0   : > { %5877 = vmatprep.subr.bf16.mxu0 %v11179_v58  ;;  %5918 = vmatprep.subr.bf16.mxu1 %v11182_v34  ;;  %v11248_v57 = vld [vmem:[%s15128_s1 + $0x174c] ss:$16 sps:$4 sm:$0xff]   ;;  %v11243_v58 = vld [vmem:[%s15128_s1 + $0x1548] ss:$16 sps:$4 sm:$0xff]  }
 0x2c1   : > { %v11246_v34 = vld [vmem:[%s15128_s1 + $0x1748] ss:$16 sps:$4 sm:$0xff]  }
 0x2c3   : > { %5878 = vmatpush1.bf16.msra.mxu0 %v11177_v35  ;;  %5919 = vmatpush1.bf16.msra.mxu1 %v11180_v59  ;;  %v11251_v35 = vld [vmem:[%s15128_s1 + $0x156c] ss:$16 sps:$4 sm:$0xff]  }
 0x2c4   : > { %5929 = vmatprep.subr.bf16.mxu0 %v11185_v61  ;;  %5970 = vmatprep.subr.bf16.mxu1 %v11188_v62  ;;  %v11254_v59 = vld [vmem:[%s15128_s1 + $0x176c] ss:$16 sps:$4 sm:$0xff]   ;;  %v11249_v61 = vld [vmem:[%s15128_s1 + $0x1568] ss:$16 sps:$4 sm:$0xff]  }
 0x2c5   : > { %v11252_v62 = vld [vmem:[%s15128_s1 + $0x1768] ss:$16 sps:$4 sm:$0xff]  }
 0x2c6   : > { %5880 = vmatmul.mubr.bf16.vlgmr.msra.gmra.mrb[28].mxu0 %v13589_v29  ;;  %5921 = vmatmul.mubr.bf16.vlgmr.msra.gmra.mrb[28].mxu1 %v13591_v48  ;;  %v11200_v29 = vld [vmem:[%s15128_s1 + $0x164c] ss:$16 sps:$4 sm:$0xff]   ;;  %v11195_v48 = vld [vmem:[%s15128_s1 + $0x1448] ss:$16 sps:$4 sm:$0xff]  }
 0x2c7   : > { %5930 = vmatpush1.bf16.msra.mxu0 %v11183_v0  ;;  %5971 = vmatpush1.bf16.msra.mxu1 %v11186_v3  ;;  %v11257_v0 = vld [vmem:[%s15128_s1 + $0x158c] ss:$16 sps:$4 sm:$0xff]  }
 0x2c8   : > { %5931 = vmatprep.subr.bf16.mxu0 %v11191_v6  ;;  %5972 = vmatprep.subr.bf16.mxu1 %v11194_v7  ;;  %v11260_v3 = vld [vmem:[%s15128_s1 + $0x178c] ss:$16 sps:$4 sm:$0xff]   ;;  %v11255_v6 = vld [vmem:[%s15128_s1 + $0x1588] ss:$16 sps:$4 sm:$0xff]  }
 0x2c9   : > { %5961 = vmatprep.mubr.bf16.mxu0 %v13599_v19  ;;  %6002 = vmatprep.mubr.bf16.mxu1 %v13601_v52  ;;  %v11206_v19 = vld [vmem:[%s15128_s1 + $0x166c] ss:$16 sps:$4 sm:$0xff]   ;;  %v11201_v52 = vld [vmem:[%s15128_s1 + $0x1468] ss:$16 sps:$4 sm:$0xff]  }
 0x2ca   : > { %v11258_v7 = vld [vmem:[%s15128_s1 + $0x1788] ss:$16 sps:$4 sm:$0xff]  }
 0x2cb   : > { %5932 = vmatpush1.bf16.msra.mxu0 %v11189_v13  ;;  %5973 = vmatpush1.bf16.msra.mxu1 %v11192_v15  ;;  %v11263_v13 = vld [vmem:[%s15128_s1 + $0x15ac] ss:$16 sps:$4 sm:$0xff]  }
 0x2cc   : > { %5933 = vmatprep.subr.bf16.mxu0 %v11197_v16  ;;  %5974 = vmatprep.subr.bf16.mxu1 %v11200_v29  ;;  %v11266_v15 = vld [vmem:[%s15128_s1 + $0x17ac] ss:$16 sps:$4 sm:$0xff]   ;;  %v11261_v16 = vld [vmem:[%s15128_s1 + $0x15a8] ss:$16 sps:$4 sm:$0xff]  }
 0x2cd   : > { %v11264_v29 = vld [vmem:[%s15128_s1 + $0x17a8] ss:$16 sps:$4 sm:$0xff]  }
 0x2cf   : > { %5934 = vmatpush1.bf16.msra.mxu0 %v11195_v48  ;;  %5975 = vmatpush1.bf16.msra.mxu1 %v11198_v28  ;;  %v11269_v48 = vld [vmem:[%s15128_s1 + $0x15cc] ss:$16 sps:$4 sm:$0xff]  }
 0x2d0   : > { %5935 = vmatprep.subr.bf16.mxu0 %v11203_v49  ;;  %5976 = vmatprep.subr.bf16.mxu1 %v11206_v19  ;;  %v11272_v28 = vld [vmem:[%s15128_s1 + $0x17cc] ss:$16 sps:$4 sm:$0xff]   ;;  %v11267_v49 = vld [vmem:[%s15128_s1 + $0x15c8] ss:$16 sps:$4 sm:$0xff]  }
 0x2d1   : > { %v11270_v19 = vld [vmem:[%s15128_s1 + $0x17c8] ss:$16 sps:$4 sm:$0xff]  }
 0x2d3   : > { %5936 = vmatpush1.bf16.msra.mxu0 %v11201_v52  ;;  %5977 = vmatpush1.bf16.msra.mxu1 %v11204_v11  ;;  %v11275_v52 = vld [vmem:[%s15128_s1 + $0x15ec] ss:$16 sps:$4 sm:$0xff]  }
 0x2d4   : > { %5937 = vmatprep.subr.bf16.mxu0 %v11209_v20  ;;  %5978 = vmatprep.subr.bf16.mxu1 %v11212_v21  ;;  %v11278_v11 = vld [vmem:[%s15128_s1 + $0x17ec] ss:$16 sps:$4 sm:$0xff]   ;;  %v14184_v20 = vld [vmem:[%s11851_s30] sm:$0xcc]  ;;  %v14187_v21 = vld [vmem:[%s11851_s30 + $0x20] sm:$0x11] }
 0x2d7   : > { %5938 = vmatpush1.bf16.msra.mxu0 %v11207_v23  ;;  %5979 = vmatpush1.bf16.msra.mxu1 %v11210_v1  ;;  %v14190_v23 = vld [vmem:[%s11851_s30 + $0x8] sm:$0xcc]  ;;  %v14193_v1 = vld [vmem:[%s11851_s30 + $0x28] sm:$0x11] }
 0x2d8   : > { %5939 = vmatprep.subr.bf16.mxu0 %v11215_v2  ;;  %5980 = vmatprep.subr.bf16.mxu1 %v11218_v24  ;;  %v11273_v2 = vld [vmem:[%s15128_s1 + $0x15e8] ss:$16 sps:$4 sm:$0xff]  }
 0x2d9   : > { %v3974_v30 = vpop.f32.mrb[16].mxu0  ;;  %v4015_v31 = vpop.f32.mrb[16].mxu1  ;;  %v11276_v24 = vld [vmem:[%s15128_s1 + $0x17e8] ss:$16 sps:$4 sm:$0xff]  }
 0x2da   : > { %v3975_v32 = vadd.f32 %v3974_v30, %v13873_v53  ;;  %v3976_v36 = vpop.f32.mrb[17].mxu0  ;;  %v4017_v37 = vpop.f32.mrb[17].mxu1  ;;  %v11227_v53 = vld [vmem:[%s15128_s1 + $0x14ec] ss:$16 sps:$4 sm:$0xff]   ;;  %v11279_v30 = vld [vmem:[%s15128_s1 + $0x1800] ss:$16 sps:$4 sm:$0xff]  }
 0x2db   : > { %v3977_v4 = vadd.f32 %v3976_v36, %v13875_v22  ;;  %v3978_v5 = vpop.f32.mrb[18].mxu0  ;;  %v4019_v33 = vpop.f32.mrb[18].mxu1  ;;  %5940 = vmatpush1.bf16.msra.mxu0 %v11213_v25  ;;  %5981 = vmatpush1.bf16.msra.mxu1 %v11216_v26  ;;  %v11230_v22 = vld [vmem:[%s15128_s1 + $0x16ec] ss:$16 sps:$4 sm:$0xff]   ;;  %v11281_v25 = vld [vmem:[%s15128_s1 + $0x1804] ss:$16 sps:$4 sm:$0xff]  }
 0x2dc   : > { %v4016_v40 = vadd.f32 %v4015_v31, %v3975_v32  ;;  %v3979_v41 = vpop.f32.mrb[19].mxu0  ;;  %v4020_v8 = vpop.f32.mrb[19].mxu1  ;;  %5941 = vmatprep.subr.bf16.mxu0 %v11221_v27  ;;  %5982 = vmatprep.subr.bf16.mxu1 %v11224_v14  ;;  %v11284_v26 = vld [vmem:[%s15128_s1 + $0x1a04] ss:$16 sps:$4 sm:$0xff]   ;;  %v9808_v27 = vcombine.high %v14184_v20, %v14187_v21  ;;  %v9810_v14 = vcombine.high %v14190_v23, %v14193_v1  ;;  %v11282_v31 = vld [vmem:[%s15128_s1 + $0x1a00] ss:$16 sps:$4 sm:$0xff]  }
 0x2dd   : > { %v4018_v10 = vadd.f32 %v4017_v37, %v3977_v4  ;;  %v11287_v32 = vld [vmem:[%s15128_s1 + $0x1824] ss:$16 sps:$4 sm:$0xff]   ;;  %v11285_v5 = vld [vmem:[%s15128_s1 + $0x1820] ss:$16 sps:$4 sm:$0xff]  }
 0x2de   : > { %v4028_v12 = vadd.f32 %v4024_v9, %v4016_v40  ;;  %v11290_v36 = vld [vmem:[%s15128_s1 + $0x1a24] ss:$16 sps:$4 sm:$0xff]   ;;  %v14223_v37 = vrot.slane %v9808_v27, 2  ;;  %v14225_v4 = vrot.slane %v9810_v14, 2  ;;  %v11288_v33 = vld [vmem:[%s15128_s1 + $0x1a20] ss:$16 sps:$4 sm:$0xff]  }
 0x2df   : > { %v4029_v43 = vadd.f32 %v4025_v42, %v4018_v10  ;;  %5942 = vmatpush1.bf16.msra.mxu0 %v11219_v38  ;;  %5983 = vmatpush1.bf16.msra.mxu1 %v11222_v39  ;;  %v11293_v38 = vld [vmem:[%s15128_s1 + $0x1844] ss:$16 sps:$4 sm:$0xff]   ;;  %v11294_v39 = vld [vmem:[%s15128_s1 + $0x1a40] ss:$16 sps:$4 sm:$0xff]  }
 0x2e0   : > { %4032 = vst [vmem:[#allocation2 + $0x10] sm:$0x3f] %v4028_v12  ;;  %5943 = vmatprep.subr.bf16.mxu0 %v11227_v53  ;;  %5984 = vmatprep.subr.bf16.mxu1 %v11230_v22  ;;  %v11299_v40 = vld [vmem:[%s15128_s1 + $0x1864] ss:$16 sps:$4 sm:$0xff]   ;;  %v11297_v8 = vld [vmem:[%s15128_s1 + $0x1860] ss:$16 sps:$4 sm:$0xff]  }
 0x2e1   : > { %4033 = vst [vmem:[#allocation2 + $0x18] sm:$0x3f] %v4029_v43  ;;  %v11302_v41 = vld [vmem:[%s15128_s1 + $0x1a64] ss:$16 sps:$4 sm:$0xff]   ;;  %v11300_v53 = vld [vmem:[%s15128_s1 + $0x1a60] ss:$16 sps:$4 sm:$0xff]  }
 0x2e2   : > { %v11305_v22 = vld [vmem:[%s15128_s1 + $0x1884] ss:$16 sps:$4 sm:$0xff]   ;;  %v11303_v10 = vld [vmem:[%s15128_s1 + $0x1880] ss:$16 sps:$4 sm:$0xff]  }
 0x2e3   : > { %5944 = vmatpush1.bf16.msra.mxu0 %v11225_v44  ;;  %5985 = vmatpush1.bf16.msra.mxu1 %v11228_v45  ;;  %v11308_v9 = vld [vmem:[%s15128_s1 + $0x1a84] ss:$16 sps:$4 sm:$0xff]   ;;  %v11306_v12 = vld [vmem:[%s15128_s1 + $0x1a80] ss:$16 sps:$4 sm:$0xff]  }
 0x2e4   : > { %5945 = vmatprep.subr.bf16.mxu0 %v11233_v18  ;;  %5986 = vmatprep.subr.bf16.mxu1 %v11236_v47  ;;  %v11311_v42 = vld [vmem:[%s15128_s1 + $0x18a4] ss:$16 sps:$4 sm:$0xff]   ;;  %v11309_v44 = vld [vmem:[%s15128_s1 + $0x18a0] ss:$16 sps:$4 sm:$0xff]  }
 0x2e5   : > { %v11314_v43 = vld [vmem:[%s15128_s1 + $0x1aa4] ss:$16 sps:$4 sm:$0xff]   ;;  %v11312_v45 = vld [vmem:[%s15128_s1 + $0x1aa0] ss:$16 sps:$4 sm:$0xff]  }
 0x2e6   : > { %v11317_v18 = vld [vmem:[%s15128_s1 + $0x18c4] ss:$16 sps:$4 sm:$0xff]  }
 0x2e7   : > { %5946 = vmatpush1.bf16.msra.mxu0 %v11231_v50  ;;  %5987 = vmatpush1.bf16.msra.mxu1 %v11234_v60  ;;  %v11320_v47 = vld [vmem:[%s15128_s1 + $0x1ac4] ss:$16 sps:$4 sm:$0xff]  }
 0x2e8   : > { %5947 = vmatprep.subr.bf16.mxu0 %v11239_v63  ;;  %5988 = vmatprep.subr.bf16.mxu1 %v11242_v51  ;;  %v11353_v27 = vld [vmem:[%s15128_s1 + $0x1984] ss:$16 sps:$4 sm:$0xff]  }
 0x2e9   : > { %v11356_v14 = vld [vmem:[%s15128_s1 + $0x1b84] ss:$16 sps:$4 sm:$0xff]  }
 0x2eb   : > { %5948 = vmatpush1.bf16.msra.mxu0 %v11237_v54  ;;  %5989 = vmatpush1.bf16.msra.mxu1 %v11240_v55 }
 0x2ec   : > { %5949 = vmatprep.subr.bf16.mxu0 %v11245_v56  ;;  %5990 = vmatprep.subr.bf16.mxu1 %v11248_v57 }
 0x2ef   : > { %5950 = vmatpush1.bf16.msra.mxu0 %v11243_v58  ;;  %5991 = vmatpush1.bf16.msra.mxu1 %v11246_v34  ;;  %v11315_v58 = vld [vmem:[%s15128_s1 + $0x18c0] ss:$16 sps:$4 sm:$0xff]  }
 0x2f0   : > { %5951 = vmatprep.subr.bf16.mxu0 %v11251_v35  ;;  %5992 = vmatprep.subr.bf16.mxu1 %v11254_v59  ;;  %v11318_v34 = vld [vmem:[%s15128_s1 + $0x1ac0] ss:$16 sps:$4 sm:$0xff]  }
 0x2f3   : > { %5952 = vmatpush1.bf16.msra.mxu0 %v11249_v61  ;;  %5993 = vmatpush1.bf16.msra.mxu1 %v11252_v62  ;;  %v11323_v61 = vld [vmem:[%s15128_s1 + $0x18e4] ss:$16 sps:$4 sm:$0xff]  }
 0x2f4   : > { %5953 = vmatprep.subr.bf16.mxu0 %v11257_v0  ;;  %5994 = vmatprep.subr.bf16.mxu1 %v11260_v3  ;;  %v11326_v62 = vld [vmem:[%s15128_s1 + $0x1ae4] ss:$16 sps:$4 sm:$0xff]   ;;  %v11321_v0 = vld [vmem:[%s15128_s1 + $0x18e0] ss:$16 sps:$4 sm:$0xff]  }
 0x2f5   : > { %v11324_v3 = vld [vmem:[%s15128_s1 + $0x1ae0] ss:$16 sps:$4 sm:$0xff]  }
 0x2f7   : > { %5954 = vmatpush1.bf16.msra.mxu0 %v11255_v6  ;;  %5995 = vmatpush1.bf16.msra.mxu1 %v11258_v7  ;;  %v11329_v6 = vld [vmem:[%s15128_s1 + $0x1904] ss:$16 sps:$4 sm:$0xff]  }
 0x2f8   : > { %5955 = vmatprep.subr.bf16.mxu0 %v11263_v13  ;;  %5996 = vmatprep.subr.bf16.mxu1 %v11266_v15  ;;  %v11332_v7 = vld [vmem:[%s15128_s1 + $0x1b04] ss:$16 sps:$4 sm:$0xff]   ;;  %v11327_v13 = vld [vmem:[%s15128_s1 + $0x1900] ss:$16 sps:$4 sm:$0xff]  }
 0x2f9   : > { %v11330_v15 = vld [vmem:[%s15128_s1 + $0x1b00] ss:$16 sps:$4 sm:$0xff]  }
 0x2fb   : > { %5956 = vmatpush1.bf16.msra.mxu0 %v11261_v16  ;;  %5997 = vmatpush1.bf16.msra.mxu1 %v11264_v29  ;;  %v11335_v16 = vld [vmem:[%s15128_s1 + $0x1924] ss:$16 sps:$4 sm:$0xff]  }
 0x2fc   : > { %5957 = vmatprep.subr.bf16.mxu0 %v11269_v48  ;;  %5998 = vmatprep.subr.bf16.mxu1 %v11272_v28  ;;  %v11338_v29 = vld [vmem:[%s15128_s1 + $0x1b24] ss:$16 sps:$4 sm:$0xff]   ;;  %v11333_v48 = vld [vmem:[%s15128_s1 + $0x1920] ss:$16 sps:$4 sm:$0xff]  }
 0x2fd   : > { %v11336_v28 = vld [vmem:[%s15128_s1 + $0x1b20] ss:$16 sps:$4 sm:$0xff]  }
 0x2ff   : > { %5958 = vmatpush1.bf16.msra.mxu0 %v11267_v49  ;;  %5999 = vmatpush1.bf16.msra.mxu1 %v11270_v19  ;;  %v11341_v49 = vld [vmem:[%s15128_s1 + $0x1944] ss:$16 sps:$4 sm:$0xff]  }
 0x300   : > { %5959 = vmatprep.subr.bf16.mxu0 %v11275_v52  ;;  %6000 = vmatprep.subr.bf16.mxu1 %v11278_v11  ;;  %v11344_v19 = vld [vmem:[%s15128_s1 + $0x1b44] ss:$16 sps:$4 sm:$0xff]   ;;  %v11339_v52 = vld [vmem:[%s15128_s1 + $0x1940] ss:$16 sps:$4 sm:$0xff]  }
 0x301   : > { %v11342_v11 = vld [vmem:[%s15128_s1 + $0x1b40] ss:$16 sps:$4 sm:$0xff]  }
 0x303   : > { %5960 = vmatpush1.bf16.msra.mxu0 %v11273_v2  ;;  %6001 = vmatpush1.bf16.msra.mxu1 %v11276_v24  ;;  %v11347_v2 = vld [vmem:[%s15128_s1 + $0x1964] ss:$16 sps:$4 sm:$0xff]  }
 0x304   : > { %7616 = vmatprep.subr.bf16.mxu0 %v11281_v25  ;;  %7657 = vmatprep.subr.bf16.mxu1 %v11284_v26  ;;  %v11350_v24 = vld [vmem:[%s15128_s1 + $0x1b64] ss:$16 sps:$4 sm:$0xff]   ;;  %v11345_v25 = vld [vmem:[%s15128_s1 + $0x1960] ss:$16 sps:$4 sm:$0xff]  }
 0x305   : > { %v11348_v26 = vld [vmem:[%s15128_s1 + $0x1b60] ss:$16 sps:$4 sm:$0xff]  }
 0x306   : > { %5962 = vmatmul.mubr.bf16.vlgmr.msra.gmra.mrb[32].mxu0 %v13793_v46  ;;  %6003 = vmatmul.mubr.bf16.vlgmr.msra.gmra.mrb[32].mxu1 %v13795_v17  ;;  %v11296_v46 = vld [vmem:[%s15128_s1 + $0x1a44] ss:$16 sps:$4 sm:$0xff]   ;;  %v11291_v17 = vld [vmem:[%s15128_s1 + $0x1840] ss:$16 sps:$4 sm:$0xff]  }
 0x307   : > { %7617 = vmatpush1.bf16.msra.mxu0 %v11279_v30  ;;  %7658 = vmatpush1.bf16.msra.mxu1 %v11282_v31  ;;  %v11351_v30 = vld [vmem:[%s15128_s1 + $0x1980] ss:$16 sps:$4 sm:$0xff]  }
 0x308   : > { %7618 = vmatprep.subr.bf16.mxu0 %v11287_v32  ;;  %7659 = vmatprep.subr.bf16.mxu1 %v11290_v36  ;;  %v11354_v31 = vld [vmem:[%s15128_s1 + $0x1b80] ss:$16 sps:$4 sm:$0xff]   ;;  %v11359_v32 = vld [vmem:[%s15128_s1 + $0x19a4] ss:$16 sps:$4 sm:$0xff]  }
 0x309   : > { %7648 = vmatprep.mubr.bf16.mxu0 %v14223_v37  ;;  %7689 = vmatprep.mubr.bf16.mxu1 %v14225_v4  ;;  %v11362_v36 = vld [vmem:[%s15128_s1 + $0x1ba4] ss:$16 sps:$4 sm:$0xff]  }
 0x30b   : > { %7619 = vmatpush1.bf16.msra.mxu0 %v11285_v5  ;;  %7660 = vmatpush1.bf16.msra.mxu1 %v11288_v33  ;;  %v11357_v5 = vld [vmem:[%s15128_s1 + $0x19a0] ss:$16 sps:$4 sm:$0xff]  }
 0x30c   : > { %7620 = vmatprep.subr.bf16.mxu0 %v11293_v38  ;;  %7661 = vmatprep.subr.bf16.mxu1 %v11296_v46  ;;  %v11360_v33 = vld [vmem:[%s15128_s1 + $0x1ba0] ss:$16 sps:$4 sm:$0xff]   ;;  %v11365_v38 = vld [vmem:[%s15128_s1 + $0x19c4] ss:$16 sps:$4 sm:$0xff]  }
 0x30d   : > { %v11368_v46 = vld [vmem:[%s15128_s1 + $0x1bc4] ss:$16 sps:$4 sm:$0xff]  }
 0x30f   : > { %7621 = vmatpush1.bf16.msra.mxu0 %v11291_v17  ;;  %7662 = vmatpush1.bf16.msra.mxu1 %v11294_v39  ;;  %v11363_v17 = vld [vmem:[%s15128_s1 + $0x19c0] ss:$16 sps:$4 sm:$0xff]  }
 0x310   : > { %7622 = vmatprep.subr.bf16.mxu0 %v11299_v40  ;;  %7663 = vmatprep.subr.bf16.mxu1 %v11302_v41  ;;  %v11366_v39 = vld [vmem:[%s15128_s1 + $0x1bc0] ss:$16 sps:$4 sm:$0xff]   ;;  %v11371_v40 = vld [vmem:[%s15128_s1 + $0x19e4] ss:$16 sps:$4 sm:$0xff]  }
 0x311   : > { %v11374_v41 = vld [vmem:[%s15128_s1 + $0x1be4] ss:$16 sps:$4 sm:$0xff]  }
 0x313   : > { %7623 = vmatpush1.bf16.msra.mxu0 %v11297_v8  ;;  %7664 = vmatpush1.bf16.msra.mxu1 %v11300_v53  ;;  %v14404_v8 = vld [vmem:[%s11851_s30 + $0x10] sm:$0xcc]  ;;  %v9807_v53 = vcombine.low %v14184_v20, %v14187_v21 }
 0x314   : > { %7624 = vmatprep.subr.bf16.mxu0 %v11305_v22  ;;  %7665 = vmatprep.subr.bf16.mxu1 %v11308_v9  ;;  %v9809_v22 = vcombine.low %v14190_v23, %v14193_v1  ;;  %v14411_v9 = vld [vmem:[%s11851_s30 + $0x30] sm:$0x11] }
 0x315   : > { %v11377_v20 = vld [vmem:[%s15128_s1 + $0x1c04] ss:$16 sps:$4 sm:$0xff]   ;;  %v9812_v23 = vcombine.high %v14404_v8, %v14411_v9 }
 0x316   : > { %v11380_v21 = vld [vmem:[%s15128_s1 + $0x1e04] ss:$16 sps:$4 sm:$0xff]  }
 0x317   : > { %7625 = vmatpush1.bf16.msra.mxu0 %v11303_v10  ;;  %7666 = vmatpush1.bf16.msra.mxu1 %v11306_v12  ;;  %v14414_v10 = vld [vmem:[%s11851_s30 + $0x18] sm:$0xcc]  ;;  %v14417_v12 = vld [vmem:[%s11851_s30 + $0x38] sm:$0x11] }
 0x318   : > { %7626 = vmatprep.subr.bf16.mxu0 %v11311_v42  ;;  %7667 = vmatprep.subr.bf16.mxu1 %v11314_v43  ;;  %v11369_v42 = vld [vmem:[%s15128_s1 + $0x19e0] ss:$16 sps:$4 sm:$0xff]   ;;  %v9814_v1 = vcombine.high %v14414_v10, %v14417_v12 }
 0x319   : > { %v5717_v50 = vpop.f32.mrb[20].mxu0  ;;  %v5758_v60 = vpop.f32.mrb[20].mxu1  ;;  %v11372_v43 = vld [vmem:[%s15128_s1 + $0x1be0] ss:$16 sps:$4 sm:$0xff]  }
 0x31a   : > { %v14291_v63 = vadd.f32 %v5758_v60, %v5717_v50  ;;  %v5719_v51 = vpop.f32.mrb[21].mxu0  ;;  %v5760_v54 = vpop.f32.mrb[21].mxu1  ;;  %v11383_v50 = vld [vmem:[%s15128_s1 + $0x1c24] ss:$16 sps:$4 sm:$0xff]  }
 0x31b   : > { %v14293_v55 = vadd.f32 %v5760_v54, %v5719_v51  ;;  %v5721_v56 = vpop.f32.mrb[22].mxu0  ;;  %v5762_v57 = vpop.f32.mrb[22].mxu1  ;;  %7627 = vmatpush1.bf16.msra.mxu0 %v11309_v44  ;;  %7668 = vmatpush1.bf16.msra.mxu1 %v11312_v45  ;;  %v14435_v44 = vrot.slane %v9807_v53, 2  ;;  %v14437_v45 = vrot.slane %v9809_v22, 2  ;;  %v11386_v60 = vld [vmem:[%s15128_s1 + $0x1e24] ss:$16 sps:$4 sm:$0xff]  }
 0x31c   : > { %v5722_v35 = vpop.f32.mrb[23].mxu0  ;;  %v5763_v59 = vpop.f32.mrb[23].mxu1  ;;  %7628 = vmatprep.subr.bf16.mxu0 %v11317_v18  ;;  %7669 = vmatprep.subr.bf16.mxu1 %v11320_v47  ;;  %v11375_v18 = vld [vmem:[%s15128_s1 + $0x1c00] ss:$16 sps:$4 sm:$0xff]   ;;  %v14451_v51 = vrot.slane %v9812_v23, 2  ;;  %v14453_v54 = vrot.slane %v9814_v1, 2 }
 0x31d   : > { %v11378_v47 = vld [vmem:[%s15128_s1 + $0x1e00] ss:$16 sps:$4 sm:$0xff]   ;;  %v11425_v53 = vld [vmem:[%s15128_s1 + $0x1d04] ss:$16 sps:$4 sm:$0xff]  }
 0x31e   : > { %v11381_v56 = vld [vmem:[%s15128_s1 + $0x1c20] ss:$16 sps:$4 sm:$0xff]   ;;  %v11428_v22 = vld [vmem:[%s15128_s1 + $0x1f04] ss:$16 sps:$4 sm:$0xff]  }
 0x31f   : > { %7629 = vmatpush1.bf16.msra.mxu0 %v11315_v58  ;;  %7670 = vmatpush1.bf16.msra.mxu1 %v11318_v34  ;;  %v11384_v57 = vld [vmem:[%s15128_s1 + $0x1e20] ss:$16 sps:$4 sm:$0xff]   ;;  %v11389_v58 = vld [vmem:[%s15128_s1 + $0x1c44] ss:$16 sps:$4 sm:$0xff]  }
 0x320   : > { %7630 = vmatprep.subr.bf16.mxu0 %v11323_v61  ;;  %7671 = vmatprep.subr.bf16.mxu1 %v11326_v62  ;;  %v11392_v34 = vld [vmem:[%s15128_s1 + $0x1e44] ss:$16 sps:$4 sm:$0xff]   ;;  %v11387_v35 = vld [vmem:[%s15128_s1 + $0x1c40] ss:$16 sps:$4 sm:$0xff]  }
 0x321   : > { %v11390_v59 = vld [vmem:[%s15128_s1 + $0x1e40] ss:$16 sps:$4 sm:$0xff]   ;;  %v11395_v61 = vld [vmem:[%s15128_s1 + $0x1c64] ss:$16 sps:$4 sm:$0xff]  }
 0x322   : > { %v11398_v62 = vld [vmem:[%s15128_s1 + $0x1e64] ss:$16 sps:$4 sm:$0xff]   ;;  %v11429_v23 = vld [vmem:[%s15128_s1 + $0x1d20] ss:$16 sps:$4 sm:$0xff]  }
 0x323   : > { %7631 = vmatpush1.bf16.msra.mxu0 %v11321_v0  ;;  %7672 = vmatpush1.bf16.msra.mxu1 %v11324_v3  ;;  %v11393_v0 = vld [vmem:[%s15128_s1 + $0x1c60] ss:$16 sps:$4 sm:$0xff]  }
 0x324   : > { %7632 = vmatprep.subr.bf16.mxu0 %v11329_v6  ;;  %7673 = vmatprep.subr.bf16.mxu1 %v11332_v7  ;;  %v11396_v3 = vld [vmem:[%s15128_s1 + $0x1e60] ss:$16 sps:$4 sm:$0xff]   ;;  %v11401_v6 = vld [vmem:[%s15128_s1 + $0x1c84] ss:$16 sps:$4 sm:$0xff]  }
 0x325   : > { %v11404_v7 = vld [vmem:[%s15128_s1 + $0x1e84] ss:$16 sps:$4 sm:$0xff]   ;;  %v11432_v1 = vld [vmem:[%s15128_s1 + $0x1f20] ss:$16 sps:$4 sm:$0xff]  }
 0x327   : > { %7633 = vmatpush1.bf16.msra.mxu0 %v11327_v13  ;;  %7674 = vmatpush1.bf16.msra.mxu1 %v11330_v15  ;;  %v11399_v13 = vld [vmem:[%s15128_s1 + $0x1c80] ss:$16 sps:$4 sm:$0xff]  }
 0x328   : > { %7634 = vmatprep.subr.bf16.mxu0 %v11335_v16  ;;  %7675 = vmatprep.subr.bf16.mxu1 %v11338_v29  ;;  %v11402_v15 = vld [vmem:[%s15128_s1 + $0x1e80] ss:$16 sps:$4 sm:$0xff]   ;;  %v11407_v16 = vld [vmem:[%s15128_s1 + $0x1ca4] ss:$16 sps:$4 sm:$0xff]  }
 0x329   : > { %v11410_v29 = vld [vmem:[%s15128_s1 + $0x1ea4] ss:$16 sps:$4 sm:$0xff]  }
 0x32b   : > { %7635 = vmatpush1.bf16.msra.mxu0 %v11333_v48  ;;  %7676 = vmatpush1.bf16.msra.mxu1 %v11336_v28  ;;  %v11405_v48 = vld [vmem:[%s15128_s1 + $0x1ca0] ss:$16 sps:$4 sm:$0xff]  }
 0x32c   : > { %7636 = vmatprep.subr.bf16.mxu0 %v11341_v49  ;;  %7677 = vmatprep.subr.bf16.mxu1 %v11344_v19  ;;  %v11408_v28 = vld [vmem:[%s15128_s1 + $0x1ea0] ss:$16 sps:$4 sm:$0xff]   ;;  %v11413_v49 = vld [vmem:[%s15128_s1 + $0x1cc4] ss:$16 sps:$4 sm:$0xff]  }
 0x32d   : > { %v11416_v19 = vld [vmem:[%s15128_s1 + $0x1ec4] ss:$16 sps:$4 sm:$0xff]  }
 0x32f   : > { %7637 = vmatpush1.bf16.msra.mxu0 %v11339_v52  ;;  %7678 = vmatpush1.bf16.msra.mxu1 %v11342_v11 }
 0x330   : > { %7638 = vmatprep.subr.bf16.mxu0 %v11347_v2  ;;  %7679 = vmatprep.subr.bf16.mxu1 %v11350_v24 }
 0x333   : > { %7639 = vmatpush1.bf16.msra.mxu0 %v11345_v25  ;;  %7680 = vmatpush1.bf16.msra.mxu1 %v11348_v26 }
 0x334   : > { %7640 = vmatprep.subr.bf16.mxu0 %v11353_v27  ;;  %7681 = vmatprep.subr.bf16.mxu1 %v11356_v14 }
 0x337   : > { %7641 = vmatpush1.bf16.msra.mxu0 %v11351_v30  ;;  %7682 = vmatpush1.bf16.msra.mxu1 %v11354_v31  ;;  %v11411_v30 = vld [vmem:[%s15128_s1 + $0x1cc0] ss:$16 sps:$4 sm:$0xff]  }
 0x338   : > { %7642 = vmatprep.subr.bf16.mxu0 %v11359_v32  ;;  %7683 = vmatprep.subr.bf16.mxu1 %v11362_v36  ;;  %v11414_v31 = vld [vmem:[%s15128_s1 + $0x1ec0] ss:$16 sps:$4 sm:$0xff]  }
 0x33b   : > { %7643 = vmatpush1.bf16.msra.mxu0 %v11357_v5  ;;  %7684 = vmatpush1.bf16.msra.mxu1 %v11360_v33  ;;  %v6011_v33 = vld [vmem:[#allocation2] sm:$0x3f] }
 0x33c   : > { %7644 = vmatprep.subr.bf16.mxu0 %v11365_v38  ;;  %7685 = vmatprep.subr.bf16.mxu1 %v11368_v46 }
 0x33f   : > { %7645 = vmatpush1.bf16.msra.mxu0 %v11363_v17  ;;  %7686 = vmatpush1.bf16.msra.mxu1 %v11366_v39  ;;  %v6012_v17 = vld [vmem:[#allocation2 + $0x8] sm:$0x3f] }
 0x340   : > { %7646 = vmatprep.subr.bf16.mxu0 %v11371_v40  ;;  %7687 = vmatprep.subr.bf16.mxu1 %v11374_v41  ;;  %v11417_v40 = vld [vmem:[%s15128_s1 + $0x1ce0] ss:$16 sps:$4 sm:$0xff]  }
 0x341   : > { %v11420_v41 = vld [vmem:[%s15128_s1 + $0x1ee0] ss:$16 sps:$4 sm:$0xff]  }
 0x343   : > { %7647 = vmatpush1.bf16.msra.mxu0 %v11369_v42  ;;  %7688 = vmatpush1.bf16.msra.mxu1 %v11372_v43  ;;  %v11423_v42 = vld [vmem:[%s15128_s1 + $0x1d00] ss:$16 sps:$4 sm:$0xff]  }
 0x344   : > { %7698 = vmatprep.subr.bf16.mxu0 %v11377_v20  ;;  %7739 = vmatprep.subr.bf16.mxu1 %v11380_v21  ;;  %v11426_v43 = vld [vmem:[%s15128_s1 + $0x1f00] ss:$16 sps:$4 sm:$0xff]   ;;  %v11431_v20 = vld [vmem:[%s15128_s1 + $0x1d24] ss:$16 sps:$4 sm:$0xff]  }
 0x345   : > { %v11434_v21 = vld [vmem:[%s15128_s1 + $0x1f24] ss:$16 sps:$4 sm:$0xff]  }
 0x346   : > { %7649 = vmatmul.mubr.bf16.vlgmr.msra.gmra.mrb[36].mxu0 %v14435_v44  ;;  %7690 = vmatmul.mubr.bf16.vlgmr.msra.gmra.mrb[36].mxu1 %v14437_v45 }
 0x347   : > { %7699 = vmatpush1.bf16.msra.mxu0 %v11375_v18  ;;  %7740 = vmatpush1.bf16.msra.mxu1 %v11378_v47  ;;  %v11437_v18 = vld [vmem:[%s15128_s1 + $0x1d44] ss:$16 sps:$4 sm:$0xff]  }
 0x348   : > { %7700 = vmatprep.subr.bf16.mxu0 %v11383_v50  ;;  %7741 = vmatprep.subr.bf16.mxu1 %v11386_v60  ;;  %v11440_v47 = vld [vmem:[%s15128_s1 + $0x1f44] ss:$16 sps:$4 sm:$0xff]   ;;  %v11435_v50 = vld [vmem:[%s15128_s1 + $0x1d40] ss:$16 sps:$4 sm:$0xff]  }
 0x349   : > { %7730 = vmatprep.mubr.bf16.mxu0 %v14451_v51  ;;  %7771 = vmatprep.mubr.bf16.mxu1 %v14453_v54  ;;  %v11438_v60 = vld [vmem:[%s15128_s1 + $0x1f40] ss:$16 sps:$4 sm:$0xff]  }
 0x34b   : > { %7701 = vmatpush1.bf16.msra.mxu0 %v11381_v56  ;;  %7742 = vmatpush1.bf16.msra.mxu1 %v11384_v57  ;;  %v11443_v56 = vld [vmem:[%s15128_s1 + $0x1d64] ss:$16 sps:$4 sm:$0xff]  }
 0x34c   : > { %7702 = vmatprep.subr.bf16.mxu0 %v11389_v58  ;;  %7743 = vmatprep.subr.bf16.mxu1 %v11392_v34  ;;  %v11446_v57 = vld [vmem:[%s15128_s1 + $0x1f64] ss:$16 sps:$4 sm:$0xff]   ;;  %v11441_v58 = vld [vmem:[%s15128_s1 + $0x1d60] ss:$16 sps:$4 sm:$0xff]  }
 0x34d   : > { %v11444_v34 = vld [vmem:[%s15128_s1 + $0x1f60] ss:$16 sps:$4 sm:$0xff]  }
 0x34f   : > { %7703 = vmatpush1.bf16.msra.mxu0 %v11387_v35  ;;  %7744 = vmatpush1.bf16.msra.mxu1 %v11390_v59  ;;  %v11449_v35 = vld [vmem:[%s15128_s1 + $0x1d84] ss:$16 sps:$4 sm:$0xff]  }
 0x350   : > { %7704 = vmatprep.subr.bf16.mxu0 %v11395_v61  ;;  %7745 = vmatprep.subr.bf16.mxu1 %v11398_v62  ;;  %v11452_v59 = vld [vmem:[%s15128_s1 + $0x1f84] ss:$16 sps:$4 sm:$0xff]   ;;  %v11447_v61 = vld [vmem:[%s15128_s1 + $0x1d80] ss:$16 sps:$4 sm:$0xff]  }
 0x351   : > { %v11450_v62 = vld [vmem:[%s15128_s1 + $0x1f80] ss:$16 sps:$4 sm:$0xff]  }
 0x353   : > { %7705 = vmatpush1.bf16.msra.mxu0 %v11393_v0  ;;  %7746 = vmatpush1.bf16.msra.mxu1 %v11396_v3  ;;  %v11455_v0 = vld [vmem:[%s15128_s1 + $0x1da4] ss:$16 sps:$4 sm:$0xff]  }
 0x354   : > { %7706 = vmatprep.subr.bf16.mxu0 %v11401_v6  ;;  %7747 = vmatprep.subr.bf16.mxu1 %v11404_v7  ;;  %v11458_v3 = vld [vmem:[%s15128_s1 + $0x1fa4] ss:$16 sps:$4 sm:$0xff]   ;;  %v11453_v6 = vld [vmem:[%s15128_s1 + $0x1da0] ss:$16 sps:$4 sm:$0xff]  }
 0x355   : > { %v11456_v7 = vld [vmem:[%s15128_s1 + $0x1fa0] ss:$16 sps:$4 sm:$0xff]  }
 0x357   : > { %7707 = vmatpush1.bf16.msra.mxu0 %v11399_v13  ;;  %7748 = vmatpush1.bf16.msra.mxu1 %v11402_v15  ;;  %v11461_v13 = vld [vmem:[%s15128_s1 + $0x1dc4] ss:$16 sps:$4 sm:$0xff]  }
 0x358   : > { %7708 = vmatprep.subr.bf16.mxu0 %v11407_v16  ;;  %7749 = vmatprep.subr.bf16.mxu1 %v11410_v29  ;;  %v11464_v15 = vld [vmem:[%s15128_s1 + $0x1fc4] ss:$16 sps:$4 sm:$0xff]   ;;  %v11459_v16 = vld [vmem:[%s15128_s1 + $0x1dc0] ss:$16 sps:$4 sm:$0xff]  }
 0x359   : > { %v5799_v52 = vpop.f32.mrb[24].mxu0  ;;  %v5840_v11 = vpop.f32.mrb[24].mxu1  ;;  %v11462_v29 = vld [vmem:[%s15128_s1 + $0x1fc0] ss:$16 sps:$4 sm:$0xff]  }
 0x35a   : > { %v5800_v2 = vadd.f32 %v5799_v52, %v14291_v63  ;;  %v5801_v24 = vpop.f32.mrb[25].mxu0  ;;  %v5842_v25 = vpop.f32.mrb[25].mxu1  ;;  %v11419_v63 = vld [vmem:[%s15128_s1 + $0x1ce4] ss:$16 sps:$4 sm:$0xff]   ;;  %v11465_v52 = vld [vmem:[%s15128_s1 + $0x1de0] ss:$16 sps:$4 sm:$0xff]  }
 0x35b   : > { %v5802_v26 = vadd.f32 %v5801_v24, %v14293_v55  ;;  %v5803_v27 = vpop.f32.mrb[26].mxu0  ;;  %v5844_v14 = vpop.f32.mrb[26].mxu1  ;;  %7709 = vmatpush1.bf16.msra.mxu0 %v11405_v48  ;;  %7750 = vmatpush1.bf16.msra.mxu1 %v11408_v28  ;;  %v11422_v55 = vld [vmem:[%s15128_s1 + $0x1ee4] ss:$16 sps:$4 sm:$0xff]   ;;  %v11474_v24 = vld [vmem:[%s15128_s1 + $0x1a08] ss:$16 sps:$4 sm:$0xff]  }
 0x35c   : > { %v5841_v32 = vadd.f32 %v5840_v11, %v5800_v2  ;;  %v5804_v36 = vpop.f32.mrb[27].mxu0  ;;  %v5845_v5 = vpop.f32.mrb[27].mxu1  ;;  %7710 = vmatprep.subr.bf16.mxu0 %v11413_v49  ;;  %7751 = vmatprep.subr.bf16.mxu1 %v11416_v19  ;;  %v11467_v48 = vld [vmem:[%s15128_s1 + $0x1de4] ss:$16 sps:$4 sm:$0xff]   ;;  %v9811_v49 = vcombine.low %v14404_v8, %v14411_v9  ;;  %v9813_v19 = vcombine.low %v14414_v10, %v14417_v12  ;;  %v11468_v11 = vld [vmem:[%s15128_s1 + $0x1fe0] ss:$16 sps:$4 sm:$0xff]  }
 0x35d   : > { %v5843_v38 = vadd.f32 %v5842_v25, %v5802_v26  ;;  %v11470_v28 = vld [vmem:[%s15128_s1 + $0x1fe4] ss:$16 sps:$4 sm:$0xff]   ;;  %v11473_v2 = vld [vmem:[%s15128_s1 + $0x180c] ss:$16 sps:$4 sm:$0xff]   ;;  %v11471_v12 = vld [vmem:[%s15128_s1 + $0x1808] ss:$16 sps:$4 sm:$0xff]  }
 0x35e   : > { %v6015_v46 = vadd.f32 %v6011_v33, %v5841_v32  ;;  %v11476_v8 = vld [vmem:[%s15128_s1 + $0x1a0c] ss:$16 sps:$4 sm:$0xff]   ;;  %v14645_v9 = vrot.slane %v9811_v49, 2  ;;  %v14647_v10 = vrot.slane %v9813_v19, 2  ;;  %v11477_v27 = vld [vmem:[%s15128_s1 + $0x1828] ss:$16 sps:$4 sm:$0xff]  }
 0x35f   : > { %v6016_v39 = vadd.f32 %v6012_v17, %v5843_v38  ;;  %7711 = vmatpush1.bf16.msra.mxu0 %v11411_v30  ;;  %7752 = vmatpush1.bf16.msra.mxu1 %v11414_v31  ;;  %v11479_v25 = vld [vmem:[%s15128_s1 + $0x182c] ss:$16 sps:$4 sm:$0xff]   ;;  %v11480_v14 = vld [vmem:[%s15128_s1 + $0x1a28] ss:$16 sps:$4 sm:$0xff]  }
 0x360   : > { %6019 = vst [vmem:[#allocation2] sm:$0x3f] %v6015_v46  ;;  %7712 = vmatprep.subr.bf16.mxu0 %v11419_v63  ;;  %7753 = vmatprep.subr.bf16.mxu1 %v11422_v55  ;;  %v11482_v26 = vld [vmem:[%s15128_s1 + $0x1a2c] ss:$16 sps:$4 sm:$0xff]   ;;  %v11483_v32 = vld [vmem:[%s15128_s1 + $0x1848] ss:$16 sps:$4 sm:$0xff]  }
 0x361   : > { %6020 = vst [vmem:[#allocation2 + $0x8] sm:$0x3f] %v6016_v39  ;;  %v11485_v30 = vld [vmem:[%s15128_s1 + $0x184c] ss:$16 sps:$4 sm:$0xff]   ;;  %v11486_v36 = vld [vmem:[%s15128_s1 + $0x1a48] ss:$16 sps:$4 sm:$0xff]  }
 0x362   : > { %v11488_v31 = vld [vmem:[%s15128_s1 + $0x1a4c] ss:$16 sps:$4 sm:$0xff]   ;;  %v11492_v63 = vld [vmem:[%s15128_s1 + $0x1a68] ss:$16 sps:$4 sm:$0xff]  }
 0x363   : > { %7713 = vmatpush1.bf16.msra.mxu0 %v11417_v40  ;;  %7754 = vmatpush1.bf16.msra.mxu1 %v11420_v41  ;;  %v11491_v5 = vld [vmem:[%s15128_s1 + $0x186c] ss:$16 sps:$4 sm:$0xff]   ;;  %v11495_v38 = vld [vmem:[%s15128_s1 + $0x1888] ss:$16 sps:$4 sm:$0xff]  }
 0x364   : > { %7714 = vmatprep.subr.bf16.mxu0 %v11425_v53  ;;  %7755 = vmatprep.subr.bf16.mxu1 %v11428_v22  ;;  %v11497_v55 = vld [vmem:[%s15128_s1 + $0x188c] ss:$16 sps:$4 sm:$0xff]   ;;  %v11498_v46 = vld [vmem:[%s15128_s1 + $0x1a88] ss:$16 sps:$4 sm:$0xff]  }
 0x365   : > { %v11500_v33 = vld [vmem:[%s15128_s1 + $0x1a8c] ss:$16 sps:$4 sm:$0xff]   ;;  %v11501_v40 = vld [vmem:[%s15128_s1 + $0x18a8] ss:$16 sps:$4 sm:$0xff]  }
 0x366   : > { %v11503_v17 = vld [vmem:[%s15128_s1 + $0x18ac] ss:$16 sps:$4 sm:$0xff]   ;;  %v11504_v41 = vld [vmem:[%s15128_s1 + $0x1aa8] ss:$16 sps:$4 sm:$0xff]  }
 0x367   : > { %7715 = vmatpush1.bf16.msra.mxu0 %v11423_v42  ;;  %7756 = vmatpush1.bf16.msra.mxu1 %v11426_v43  ;;  %v11506_v39 = vld [vmem:[%s15128_s1 + $0x1aac] ss:$16 sps:$4 sm:$0xff]  }
 0x368   : > { %7716 = vmatprep.subr.bf16.mxu0 %v11431_v20  ;;  %7757 = vmatprep.subr.bf16.mxu1 %v11434_v21  ;;  %v11509_v53 = vld [vmem:[%s15128_s1 + $0x18cc] ss:$16 sps:$4 sm:$0xff]  }
 0x369   : > { %v11512_v22 = vld [vmem:[%s15128_s1 + $0x1acc] ss:$16 sps:$4 sm:$0xff]  }
 0x36a   : > { %v11539_v49 = vld [vmem:[%s15128_s1 + $0x196c] ss:$16 sps:$4 sm:$0xff]  }
 0x36b   : > { %7717 = vmatpush1.bf16.msra.mxu0 %v11429_v23  ;;  %7758 = vmatpush1.bf16.msra.mxu1 %v11432_v1  ;;  %v11542_v19 = vld [vmem:[%s15128_s1 + $0x1b6c] ss:$16 sps:$4 sm:$0xff]  }
 0x36c   : > { %7718 = vmatprep.subr.bf16.mxu0 %v11437_v18  ;;  %7759 = vmatprep.subr.bf16.mxu1 %v11440_v47 }
 0x36f   : > { %7719 = vmatpush1.bf16.msra.mxu0 %v11435_v50  ;;  %7760 = vmatpush1.bf16.msra.mxu1 %v11438_v60  ;;  %v11507_v50 = vld [vmem:[%s15128_s1 + $0x18c8] ss:$16 sps:$4 sm:$0xff]  }
 0x370   : > { %7720 = vmatprep.subr.bf16.mxu0 %v11443_v56  ;;  %7761 = vmatprep.subr.bf16.mxu1 %v11446_v57  ;;  %v11510_v60 = vld [vmem:[%s15128_s1 + $0x1ac8] ss:$16 sps:$4 sm:$0xff]  }
 0x373   : > { %7721 = vmatpush1.bf16.msra.mxu0 %v11441_v58  ;;  %7762 = vmatpush1.bf16.msra.mxu1 %v11444_v34  ;;  %v11515_v58 = vld [vmem:[%s15128_s1 + $0x18ec] ss:$16 sps:$4 sm:$0xff]  }
 0x374   : > { %7722 = vmatprep.subr.bf16.mxu0 %v11449_v35  ;;  %7763 = vmatprep.subr.bf16.mxu1 %v11452_v59  ;;  %v11518_v34 = vld [vmem:[%s15128_s1 + $0x1aec] ss:$16 sps:$4 sm:$0xff]   ;;  %v11513_v35 = vld [vmem:[%s15128_s1 + $0x18e8] ss:$16 sps:$4 sm:$0xff]  }
 0x375   : > { %v11516_v59 = vld [vmem:[%s15128_s1 + $0x1ae8] ss:$16 sps:$4 sm:$0xff]  }
 0x377   : > { %7723 = vmatpush1.bf16.msra.mxu0 %v11447_v61  ;;  %7764 = vmatpush1.bf16.msra.mxu1 %v11450_v62  ;;  %v11521_v61 = vld [vmem:[%s15128_s1 + $0x190c] ss:$16 sps:$4 sm:$0xff]  }
 0x378   : > { %7724 = vmatprep.subr.bf16.mxu0 %v11455_v0  ;;  %7765 = vmatprep.subr.bf16.mxu1 %v11458_v3  ;;  %v11524_v62 = vld [vmem:[%s15128_s1 + $0x1b0c] ss:$16 sps:$4 sm:$0xff]   ;;  %v11519_v0 = vld [vmem:[%s15128_s1 + $0x1908] ss:$16 sps:$4 sm:$0xff]  }
 0x379   : > { %v11522_v3 = vld [vmem:[%s15128_s1 + $0x1b08] ss:$16 sps:$4 sm:$0xff]  }
 0x37b   : > { %7725 = vmatpush1.bf16.msra.mxu0 %v11453_v6  ;;  %7766 = vmatpush1.bf16.msra.mxu1 %v11456_v7  ;;  %v11527_v6 = vld [vmem:[%s15128_s1 + $0x192c] ss:$16 sps:$4 sm:$0xff]  }
 0x37c   : > { %7726 = vmatprep.subr.bf16.mxu0 %v11461_v13  ;;  %7767 = vmatprep.subr.bf16.mxu1 %v11464_v15  ;;  %v11530_v7 = vld [vmem:[%s15128_s1 + $0x1b2c] ss:$16 sps:$4 sm:$0xff]   ;;  %v11525_v13 = vld [vmem:[%s15128_s1 + $0x1928] ss:$16 sps:$4 sm:$0xff]  }
 0x37d   : > { %v11528_v15 = vld [vmem:[%s15128_s1 + $0x1b28] ss:$16 sps:$4 sm:$0xff]  }
 0x37f   : > { %7727 = vmatpush1.bf16.msra.mxu0 %v11459_v16  ;;  %7768 = vmatpush1.bf16.msra.mxu1 %v11462_v29  ;;  %v11533_v16 = vld [vmem:[%s15128_s1 + $0x194c] ss:$16 sps:$4 sm:$0xff]  }
 0x380   : > { %7728 = vmatprep.subr.bf16.mxu0 %v11467_v48  ;;  %7769 = vmatprep.subr.bf16.mxu1 %v11470_v28  ;;  %v11536_v29 = vld [vmem:[%s15128_s1 + $0x1b4c] ss:$16 sps:$4 sm:$0xff]   ;;  %v11531_v48 = vld [vmem:[%s15128_s1 + $0x1948] ss:$16 sps:$4 sm:$0xff]  }
 0x381   : > { %v11534_v28 = vld [vmem:[%s15128_s1 + $0x1b48] ss:$16 sps:$4 sm:$0xff]  }
 0x383   : > { %7729 = vmatpush1.bf16.msra.mxu0 %v11465_v52  ;;  %7770 = vmatpush1.bf16.msra.mxu1 %v11468_v11  ;;  %v11537_v52 = vld [vmem:[%s15128_s1 + $0x1968] ss:$16 sps:$4 sm:$0xff]  }
 0x384   : > { %7780 = vmatprep.subr.bf16.mxu0 %v11473_v2  ;;  %7821 = vmatprep.subr.bf16.mxu1 %v11476_v8  ;;  %v11540_v11 = vld [vmem:[%s15128_s1 + $0x1b68] ss:$16 sps:$4 sm:$0xff]   ;;  %v11545_v2 = vld [vmem:[%s15128_s1 + $0x198c] ss:$16 sps:$4 sm:$0xff]  }
 0x385   : > { %v11548_v8 = vld [vmem:[%s15128_s1 + $0x1b8c] ss:$16 sps:$4 sm:$0xff]  }
 0x386   : > { %7731 = vmatmul.mubr.bf16.vlgmr.msra.gmra.mrb[40].mxu0 %v14645_v9  ;;  %7772 = vmatmul.mubr.bf16.vlgmr.msra.gmra.mrb[40].mxu1 %v14647_v10 }
 0x387   : > { %7781 = vmatpush1.bf16.msra.mxu0 %v11471_v12  ;;  %7822 = vmatpush1.bf16.msra.mxu1 %v11474_v24  ;;  %v11543_v12 = vld [vmem:[%s15128_s1 + $0x1988] ss:$16 sps:$4 sm:$0xff]  }
 0x388   : > { %7782 = vmatprep.subr.bf16.mxu0 %v11479_v25  ;;  %7823 = vmatprep.subr.bf16.mxu1 %v11482_v26  ;;  %v11546_v24 = vld [vmem:[%s15128_s1 + $0x1b88] ss:$16 sps:$4 sm:$0xff]   ;;  %v11551_v25 = vld [vmem:[%s15128_s1 + $0x19ac] ss:$16 sps:$4 sm:$0xff]  }
 0x389   : > { %7812 = vmatprep.mubr.bf16.mxu0 %v14223_v37  ;;  %7853 = vmatprep.mubr.bf16.mxu1 %v14225_v4  ;;  %v11494_v37 = vld [vmem:[%s15128_s1 + $0x1a6c] ss:$16 sps:$4 sm:$0xff]   ;;  %v11489_v4 = vld [vmem:[%s15128_s1 + $0x1868] ss:$16 sps:$4 sm:$0xff]  }
 0x38a   : > { %v11554_v26 = vld [vmem:[%s15128_s1 + $0x1bac] ss:$16 sps:$4 sm:$0xff]  }
 0x38b   : > { %7783 = vmatpush1.bf16.msra.mxu0 %v11477_v27  ;;  %7824 = vmatpush1.bf16.msra.mxu1 %v11480_v14  ;;  %v11549_v27 = vld [vmem:[%s15128_s1 + $0x19a8] ss:$16 sps:$4 sm:$0xff]  }
 0x38c   : > { %7784 = vmatprep.subr.bf16.mxu0 %v11485_v30  ;;  %7825 = vmatprep.subr.bf16.mxu1 %v11488_v31  ;;  %v11552_v14 = vld [vmem:[%s15128_s1 + $0x1ba8] ss:$16 sps:$4 sm:$0xff]   ;;  %v11557_v30 = vld [vmem:[%s15128_s1 + $0x19cc] ss:$16 sps:$4 sm:$0xff]  }
 0x38d   : > { %v11560_v31 = vld [vmem:[%s15128_s1 + $0x1bcc] ss:$16 sps:$4 sm:$0xff]  }
 0x38f   : > { %7785 = vmatpush1.bf16.msra.mxu0 %v11483_v32  ;;  %7826 = vmatpush1.bf16.msra.mxu1 %v11486_v36  ;;  %v11555_v32 = vld [vmem:[%s15128_s1 + $0x19c8] ss:$16 sps:$4 sm:$0xff]  }
 0x390   : > { %7786 = vmatprep.subr.bf16.mxu0 %v11491_v5  ;;  %7827 = vmatprep.subr.bf16.mxu1 %v11494_v37  ;;  %v11558_v36 = vld [vmem:[%s15128_s1 + $0x1bc8] ss:$16 sps:$4 sm:$0xff]   ;;  %v11563_v5 = vld [vmem:[%s15128_s1 + $0x19ec] ss:$16 sps:$4 sm:$0xff]  }
 0x391   : > { %v11566_v37 = vld [vmem:[%s15128_s1 + $0x1bec] ss:$16 sps:$4 sm:$0xff]  }
 0x393   : > { %7787 = vmatpush1.bf16.msra.mxu0 %v11489_v4  ;;  %7828 = vmatpush1.bf16.msra.mxu1 %v11492_v63  ;;  %v11561_v4 = vld [vmem:[%s15128_s1 + $0x19e8] ss:$16 sps:$4 sm:$0xff]  }
 0x394   : > { %7788 = vmatprep.subr.bf16.mxu0 %v11497_v55  ;;  %7829 = vmatprep.subr.bf16.mxu1 %v11500_v33  ;;  %v11564_v63 = vld [vmem:[%s15128_s1 + $0x1be8] ss:$16 sps:$4 sm:$0xff]   ;;  %v11569_v55 = vld [vmem:[%s15128_s1 + $0x1c0c] ss:$16 sps:$4 sm:$0xff]  }
 0x395   : > { %v11572_v33 = vld [vmem:[%s15128_s1 + $0x1e0c] ss:$16 sps:$4 sm:$0xff]  }
 0x397   : > { %7789 = vmatpush1.bf16.msra.mxu0 %v11495_v38  ;;  %7830 = vmatpush1.bf16.msra.mxu1 %v11498_v46  ;;  %v11567_v38 = vld [vmem:[%s15128_s1 + $0x1c08] ss:$16 sps:$4 sm:$0xff]  }
 0x398   : > { %7790 = vmatprep.subr.bf16.mxu0 %v11503_v17  ;;  %7831 = vmatprep.subr.bf16.mxu1 %v11506_v39  ;;  %v11570_v46 = vld [vmem:[%s15128_s1 + $0x1e08] ss:$16 sps:$4 sm:$0xff]   ;;  %v11575_v17 = vld [vmem:[%s15128_s1 + $0x1c2c] ss:$16 sps:$4 sm:$0xff]  }
 0x399   : > { %v5881_v42 = vpop.f32.mrb[28].mxu0  ;;  %v5922_v43 = vpop.f32.mrb[28].mxu1  ;;  %v11578_v39 = vld [vmem:[%s15128_s1 + $0x1e2c] ss:$16 sps:$4 sm:$0xff]  }
 0x39a   : > { %v14725_v20 = vadd.f32 %v5922_v43, %v5881_v42  ;;  %v5883_v21 = vpop.f32.mrb[29].mxu0  ;;  %v5924_v23 = vpop.f32.mrb[29].mxu1  ;;  %v11587_v42 = vld [vmem:[%s15128_s1 + $0x1c6c] ss:$16 sps:$4 sm:$0xff]   ;;  %v11588_v43 = vld [vmem:[%s15128_s1 + $0x1e68] ss:$16 sps:$4 sm:$0xff]  }
 0x39b   : > { %v14727_v1 = vadd.f32 %v5924_v23, %v5883_v21  ;;  %v5885_v18 = vpop.f32.mrb[30].mxu0  ;;  %v5926_v47 = vpop.f32.mrb[30].mxu1  ;;  %7791 = vmatpush1.bf16.msra.mxu0 %v11501_v40  ;;  %7832 = vmatpush1.bf16.msra.mxu1 %v11504_v41  ;;  %v11573_v40 = vld [vmem:[%s15128_s1 + $0x1c28] ss:$16 sps:$4 sm:$0xff]   ;;  %v11593_v21 = vld [vmem:[%s15128_s1 + $0x1c8c] ss:$16 sps:$4 sm:$0xff]  }
 0x39c   : > { %v5886_v56 = vpop.f32.mrb[31].mxu0  ;;  %v5927_v57 = vpop.f32.mrb[31].mxu1  ;;  %7792 = vmatprep.subr.bf16.mxu0 %v11509_v53  ;;  %7833 = vmatprep.subr.bf16.mxu1 %v11512_v22  ;;  %v11576_v41 = vld [vmem:[%s15128_s1 + $0x1e28] ss:$16 sps:$4 sm:$0xff]   ;;  %v11581_v53 = vld [vmem:[%s15128_s1 + $0x1c4c] ss:$16 sps:$4 sm:$0xff]  }
 0x39d   : > { %v11582_v22 = vld [vmem:[%s15128_s1 + $0x1e48] ss:$16 sps:$4 sm:$0xff]   ;;  %v11596_v23 = vld [vmem:[%s15128_s1 + $0x1e8c] ss:$16 sps:$4 sm:$0xff]  }
 0x39e   : > { %v11591_v18 = vld [vmem:[%s15128_s1 + $0x1c88] ss:$16 sps:$4 sm:$0xff]  }
 0x39f   : > { %7793 = vmatpush1.bf16.msra.mxu0 %v11507_v50  ;;  %7834 = vmatpush1.bf16.msra.mxu1 %v11510_v60  ;;  %v11594_v47 = vld [vmem:[%s15128_s1 + $0x1e88] ss:$16 sps:$4 sm:$0xff]   ;;  %v11599_v50 = vld [vmem:[%s15128_s1 + $0x1cac] ss:$16 sps:$4 sm:$0xff]  }
 0x3a0   : > { %7794 = vmatprep.subr.bf16.mxu0 %v11515_v58  ;;  %7835 = vmatprep.subr.bf16.mxu1 %v11518_v34  ;;  %v11602_v60 = vld [vmem:[%s15128_s1 + $0x1eac] ss:$16 sps:$4 sm:$0xff]   ;;  %v11597_v56 = vld [vmem:[%s15128_s1 + $0x1ca8] ss:$16 sps:$4 sm:$0xff]  }
 0x3a1   : > { %v11600_v57 = vld [vmem:[%s15128_s1 + $0x1ea8] ss:$16 sps:$4 sm:$0xff]   ;;  %v11605_v58 = vld [vmem:[%s15128_s1 + $0x1ccc] ss:$16 sps:$4 sm:$0xff]  }
 0x3a2   : > { %v11608_v34 = vld [vmem:[%s15128_s1 + $0x1ecc] ss:$16 sps:$4 sm:$0xff]  }
 0x3a3   : > { %7795 = vmatpush1.bf16.msra.mxu0 %v11513_v35  ;;  %7836 = vmatpush1.bf16.msra.mxu1 %v11516_v59 }
 0x3a4   : > { %7796 = vmatprep.subr.bf16.mxu0 %v11521_v61  ;;  %7837 = vmatprep.subr.bf16.mxu1 %v11524_v62 }
 0x3a7   : > { %7797 = vmatpush1.bf16.msra.mxu0 %v11519_v0  ;;  %7838 = vmatpush1.bf16.msra.mxu1 %v11522_v3 }
 0x3a8   : > { %7798 = vmatprep.subr.bf16.mxu0 %v11527_v6  ;;  %7839 = vmatprep.subr.bf16.mxu1 %v11530_v7 }
 0x3ab   : > { %7799 = vmatpush1.bf16.msra.mxu0 %v11525_v13  ;;  %7840 = vmatpush1.bf16.msra.mxu1 %v11528_v15  ;;  %v11603_v13 = vld [vmem:[%s15128_s1 + $0x1cc8] ss:$16 sps:$4 sm:$0xff]  }
 0x3ac   : > { %7800 = vmatprep.subr.bf16.mxu0 %v11533_v16  ;;  %7841 = vmatprep.subr.bf16.mxu1 %v11536_v29  ;;  %v11606_v15 = vld [vmem:[%s15128_s1 + $0x1ec8] ss:$16 sps:$4 sm:$0xff]  }
 0x3af   : > { %7801 = vmatpush1.bf16.msra.mxu0 %v11531_v48  ;;  %7842 = vmatpush1.bf16.msra.mxu1 %v11534_v28  ;;  %v6013_v28 = vld [vmem:[#allocation2 + $0x10] sm:$0x3f] }
 0x3b0   : > { %7802 = vmatprep.subr.bf16.mxu0 %v11539_v49  ;;  %7843 = vmatprep.subr.bf16.mxu1 %v11542_v19 }
 0x3b3   : > { %7803 = vmatpush1.bf16.msra.mxu0 %v11537_v52  ;;  %7844 = vmatpush1.bf16.msra.mxu1 %v11540_v11  ;;  %v6014_v52 = vld [vmem:[#allocation2 + $0x18] sm:$0x3f] }
 0x3b4   : > { %7804 = vmatprep.subr.bf16.mxu0 %v11545_v2  ;;  %7845 = vmatprep.subr.bf16.mxu1 %v11548_v8  ;;  %v11609_v2 = vld [vmem:[%s15128_s1 + $0x1ce8] ss:$16 sps:$4 sm:$0xff]  }
 0x3b5   : > { %v11612_v8 = vld [vmem:[%s15128_s1 + $0x1ee8] ss:$16 sps:$4 sm:$0xff]  }
 0x3b7   : > { %7805 = vmatpush1.bf16.msra.mxu0 %v11543_v12  ;;  %7846 = vmatpush1.bf16.msra.mxu1 %v11546_v24  ;;  %v11617_v12 = vld [vmem:[%s15128_s1 + $0x1d0c] ss:$16 sps:$4 sm:$0xff]  }
 0x3b8   : > { %7806 = vmatprep.subr.bf16.mxu0 %v11551_v25  ;;  %7847 = vmatprep.subr.bf16.mxu1 %v11554_v26  ;;  %v11620_v24 = vld [vmem:[%s15128_s1 + $0x1f0c] ss:$16 sps:$4 sm:$0xff]   ;;  %v11615_v25 = vld [vmem:[%s15128_s1 + $0x1d08] ss:$16 sps:$4 sm:$0xff]  }
 0x3b9   : > { %v11618_v26 = vld [vmem:[%s15128_s1 + $0x1f08] ss:$16 sps:$4 sm:$0xff]  }
 0x3bb   : > { %7807 = vmatpush1.bf16.msra.mxu0 %v11549_v27  ;;  %7848 = vmatpush1.bf16.msra.mxu1 %v11552_v14  ;;  %v11623_v27 = vld [vmem:[%s15128_s1 + $0x1d2c] ss:$16 sps:$4 sm:$0xff]  }
 0x3bc   : > { %7808 = vmatprep.subr.bf16.mxu0 %v11557_v30  ;;  %7849 = vmatprep.subr.bf16.mxu1 %v11560_v31  ;;  %v11626_v14 = vld [vmem:[%s15128_s1 + $0x1f2c] ss:$16 sps:$4 sm:$0xff]   ;;  %v11621_v30 = vld [vmem:[%s15128_s1 + $0x1d28] ss:$16 sps:$4 sm:$0xff]  }
 0x3bd   : > { %v11624_v31 = vld [vmem:[%s15128_s1 + $0x1f28] ss:$16 sps:$4 sm:$0xff]  }
 0x3bf   : > { %7809 = vmatpush1.bf16.msra.mxu0 %v11555_v32  ;;  %7850 = vmatpush1.bf16.msra.mxu1 %v11558_v36  ;;  %v11629_v32 = vld [vmem:[%s15128_s1 + $0x1d4c] ss:$16 sps:$4 sm:$0xff]  }
 0x3c0   : > { %7810 = vmatprep.subr.bf16.mxu0 %v11563_v5  ;;  %7851 = vmatprep.subr.bf16.mxu1 %v11566_v37  ;;  %v11632_v36 = vld [vmem:[%s15128_s1 + $0x1f4c] ss:$16 sps:$4 sm:$0xff]   ;;  %v11627_v5 = vld [vmem:[%s15128_s1 + $0x1d48] ss:$16 sps:$4 sm:$0xff]  }
 0x3c1   : > { %v11630_v37 = vld [vmem:[%s15128_s1 + $0x1f48] ss:$16 sps:$4 sm:$0xff]  }
 0x3c3   : > { %7811 = vmatpush1.bf16.msra.mxu0 %v11561_v4  ;;  %7852 = vmatpush1.bf16.msra.mxu1 %v11564_v63  ;;  %v11635_v4 = vld [vmem:[%s15128_s1 + $0x1d6c] ss:$16 sps:$4 sm:$0xff]  }
 0x3c4   : > { %7862 = vmatprep.subr.bf16.mxu0 %v11569_v55  ;;  %7903 = vmatprep.subr.bf16.mxu1 %v11572_v33  ;;  %v11638_v63 = vld [vmem:[%s15128_s1 + $0x1f6c] ss:$16 sps:$4 sm:$0xff]   ;;  %v11633_v55 = vld [vmem:[%s15128_s1 + $0x1d68] ss:$16 sps:$4 sm:$0xff]  }
 0x3c5   : > { %v11636_v33 = vld [vmem:[%s15128_s1 + $0x1f68] ss:$16 sps:$4 sm:$0xff]  }
 0x3c6   : > { %7813 = vmatmul.mubr.bf16.vlgmr.msra.gmra.mrb[44].mxu0 %v14435_v44  ;;  %7854 = vmatmul.mubr.bf16.vlgmr.msra.gmra.mrb[44].mxu1 %v14437_v45  ;;  %v11584_v44 = vld [vmem:[%s15128_s1 + $0x1e4c] ss:$16 sps:$4 sm:$0xff]   ;;  %v11579_v45 = vld [vmem:[%s15128_s1 + $0x1c48] ss:$16 sps:$4 sm:$0xff]  }
 0x3c7   : > { %7863 = vmatpush1.bf16.msra.mxu0 %v11567_v38  ;;  %7904 = vmatpush1.bf16.msra.mxu1 %v11570_v46  ;;  %v11641_v38 = vld [vmem:[%s15128_s1 + $0x1d8c] ss:$16 sps:$4 sm:$0xff]  }
 0x3c8   : > { %7864 = vmatprep.subr.bf16.mxu0 %v11575_v17  ;;  %7905 = vmatprep.subr.bf16.mxu1 %v11578_v39  ;;  %v11644_v46 = vld [vmem:[%s15128_s1 + $0x1f8c] ss:$16 sps:$4 sm:$0xff]   ;;  %v11639_v17 = vld [vmem:[%s15128_s1 + $0x1d88] ss:$16 sps:$4 sm:$0xff]  }
 0x3c9   : > { %7894 = vmatprep.mubr.bf16.mxu0 %v14451_v51  ;;  %7935 = vmatprep.mubr.bf16.mxu1 %v14453_v54  ;;  %v11590_v51 = vld [vmem:[%s15128_s1 + $0x1e6c] ss:$16 sps:$4 sm:$0xff]   ;;  %v11585_v54 = vld [vmem:[%s15128_s1 + $0x1c68] ss:$16 sps:$4 sm:$0xff]  }
 0x3ca   : > { %v11642_v39 = vld [vmem:[%s15128_s1 + $0x1f88] ss:$16 sps:$4 sm:$0xff]  }
 0x3cb   : > { %7865 = vmatpush1.bf16.msra.mxu0 %v11573_v40  ;;  %7906 = vmatpush1.bf16.msra.mxu1 %v11576_v41  ;;  %v11647_v40 = vld [vmem:[%s15128_s1 + $0x1dac] ss:$16 sps:$4 sm:$0xff]  }
 0x3cc   : > { %7866 = vmatprep.subr.bf16.mxu0 %v11581_v53  ;;  %7907 = vmatprep.subr.bf16.mxu1 %v11584_v44  ;;  %v11650_v41 = vld [vmem:[%s15128_s1 + $0x1fac] ss:$16 sps:$4 sm:$0xff]   ;;  %v11645_v53 = vld [vmem:[%s15128_s1 + $0x1da8] ss:$16 sps:$4 sm:$0xff]  }
 0x3cd   : > { %v11648_v44 = vld [vmem:[%s15128_s1 + $0x1fa8] ss:$16 sps:$4 sm:$0xff]  }
 0x3cf   : > { %7867 = vmatpush1.bf16.msra.mxu0 %v11579_v45  ;;  %7908 = vmatpush1.bf16.msra.mxu1 %v11582_v22  ;;  %v11653_v45 = vld [vmem:[%s15128_s1 + $0x1dcc] ss:$16 sps:$4 sm:$0xff]  }
 0x3d0   : > { %7868 = vmatprep.subr.bf16.mxu0 %v11587_v42  ;;  %7909 = vmatprep.subr.bf16.mxu1 %v11590_v51  ;;  %v11656_v22 = vld [vmem:[%s15128_s1 + $0x1fcc] ss:$16 sps:$4 sm:$0xff]   ;;  %v11651_v42 = vld [vmem:[%s15128_s1 + $0x1dc8] ss:$16 sps:$4 sm:$0xff]  }
 0x3d1   : > { %v11654_v51 = vld [vmem:[%s15128_s1 + $0x1fc8] ss:$16 sps:$4 sm:$0xff]  }
 0x3d3   : > { %7869 = vmatpush1.bf16.msra.mxu0 %v11585_v54  ;;  %7910 = vmatpush1.bf16.msra.mxu1 %v11588_v43  ;;  %v11659_v54 = vld [vmem:[%s15128_s1 + $0x1dec] ss:$16 sps:$4 sm:$0xff]  }
 0x3d4   : > { %7870 = vmatprep.subr.bf16.mxu0 %v11593_v21  ;;  %7911 = vmatprep.subr.bf16.mxu1 %v11596_v23  ;;  %v11662_v43 = vld [vmem:[%s15128_s1 + $0x1fec] ss:$16 sps:$4 sm:$0xff]   ;;  %v11657_v21 = vld [vmem:[%s15128_s1 + $0x1de8] ss:$16 sps:$4 sm:$0xff]  }
 0x3d5   : > { %v11660_v23 = vld [vmem:[%s15128_s1 + $0x1fe8] ss:$16 sps:$4 sm:$0xff]  }
 0x3d7   : > { %7871 = vmatpush1.bf16.msra.mxu0 %v11591_v18  ;;  %7912 = vmatpush1.bf16.msra.mxu1 %v11594_v47 }
 0x3d8   : > { %7872 = vmatprep.subr.bf16.mxu0 %v11599_v50  ;;  %7913 = vmatprep.subr.bf16.mxu1 %v11602_v60 }
 0x3d9   : > { %v5963_v35 = vpop.f32.mrb[32].mxu0  ;;  %v6004_v59 = vpop.f32.mrb[32].mxu1 }
 0x3da   : > { %v5964_v61 = vadd.f32 %v5963_v35, %v14725_v20  ;;  %v5965_v62 = vpop.f32.mrb[33].mxu0  ;;  %v6006_v0 = vpop.f32.mrb[33].mxu1  ;;  %v11611_v20 = vld [vmem:[%s15128_s1 + $0x1cec] ss:$16 sps:$4 sm:$0xff]  }
 0x3db   : > { %v5966_v3 = vadd.f32 %v5965_v62, %v14727_v1  ;;  %v5967_v6 = vpop.f32.mrb[34].mxu0  ;;  %v6008_v7 = vpop.f32.mrb[34].mxu1  ;;  %7873 = vmatpush1.bf16.msra.mxu0 %v11597_v56  ;;  %7914 = vmatpush1.bf16.msra.mxu1 %v11600_v57  ;;  %v11614_v1 = vld [vmem:[%s15128_s1 + $0x1eec] ss:$16 sps:$4 sm:$0xff]  }
 0x3dc   : > { %v6005_v16 = vadd.f32 %v6004_v59, %v5964_v61  ;;  %v5968_v29 = vpop.f32.mrb[35].mxu0  ;;  %v6009_v48 = vpop.f32.mrb[35].mxu1  ;;  %7874 = vmatprep.subr.bf16.mxu0 %v11605_v58  ;;  %7915 = vmatprep.subr.bf16.mxu1 %v11608_v34 }
 0x3dd   : > { %v6007_v49 = vadd.f32 %v6006_v0, %v5966_v3  ;;  %v7944_v29 = vld [vmem:[#allocation2] sm:$0x3f] }
 0x3de   : > { %v6017_v19 = vadd.f32 %v6013_v28, %v6005_v16 }
 0x3df   : > { %v6018_v11 = vadd.f32 %v6014_v52, %v6007_v49  ;;  %7875 = vmatpush1.bf16.msra.mxu0 %v11603_v13  ;;  %7916 = vmatpush1.bf16.msra.mxu1 %v11606_v15  ;;  %v7962_v49 = vlaneseq }
 0x3e0   : > { %6021 = vst [vmem:[#allocation2 + $0x10] sm:$0x3f] %v6017_v19  ;;  %7876 = vmatprep.subr.bf16.mxu0 %v11611_v20  ;;  %7917 = vmatprep.subr.bf16.mxu1 %v11614_v1  ;;  %v7945_v1 = vld [vmem:[#allocation2 + $0x8] sm:$0x3f] }
 0x3e1   : > { %6022 = vst [vmem:[#allocation2 + $0x18] sm:$0x3f] %v6018_v11  ;;  %v15044_v19 = vshrl.u32 %v7962_v49, 7  ;;  %vm8183_vm9 = vcmp.lt.s32.totalorder %v7962_v49, 512 }
 0x3e3   : > { %7877 = vmatpush1.bf16.msra.mxu0 %v11609_v2  ;;  %7918 = vmatpush1.bf16.msra.mxu1 %v11612_v8  ;;  %v15047_v52 = vmul.u32.u64.low 2863311531, %v15044_v19  ;;  %v15048_v11 = vmul.u32.u64.high 2863311531, %v15044_v19, %v15047_v52 }
 0x3e4   : > { %7878 = vmatprep.subr.bf16.mxu0 %v11617_v12  ;;  %7919 = vmatprep.subr.bf16.mxu1 %v11620_v24 }
 0x3e7   : > { %7879 = vmatpush1.bf16.msra.mxu0 %v11615_v25  ;;  %7920 = vmatpush1.bf16.msra.mxu1 %v11618_v26  ;;  %v7994_v26 = vshrl.u32 %v15048_v11, 1 }
 0x3e8   : > { %7880 = vmatprep.subr.bf16.mxu0 %v11623_v27  ;;  %7921 = vmatprep.subr.bf16.mxu1 %v11626_v14 }
 0x3eb   : > { %7881 = vmatpush1.bf16.msra.mxu0 %v11621_v30  ;;  %7922 = vmatpush1.bf16.msra.mxu1 %v11624_v31 }
 0x3ec   : > { %7882 = vmatprep.subr.bf16.mxu0 %v11629_v32  ;;  %7923 = vmatprep.subr.bf16.mxu1 %v11632_v36  ;;  %v7995_v36 = vmul.u32 3, %v7994_v26 }
 0x3ef   : > { %7883 = vmatpush1.bf16.msra.mxu0 %v11627_v5  ;;  %7924 = vmatpush1.bf16.msra.mxu1 %v11630_v37  ;;  %v7996_v5 = vsub.s32 %v15044_v19, %v7995_v36 }
 0x3f0   : > { %7884 = vmatprep.subr.bf16.mxu0 %v11635_v4  ;;  %7925 = vmatprep.subr.bf16.mxu1 %v11638_v63  ;;  %v7964_v4 = vsub.s32 0, %v15044_v19  ;;  %v15060_v63 = vld [vmem:[%s15129_s2] sm:$0xf] }
 0x3f1   : > { %vm7999_vm0 = vcmp.ne.s32.totalorder %v7996_v5, 0  ;;  %vm8000_vm1 = vcmp.lt.s32.totalorder %v7996_v5, 0  ;;  %v8002_v37 = vadd.s32 3, %v7996_v5 }
 0x3f2   : > { %vm8001_vm2 = vmand %vm8000_vm1, %vm7999_vm0 }
 0x3f3   : > { %7885 = vmatpush1.bf16.msra.mxu0 %v11633_v55  ;;  %7926 = vmatpush1.bf16.msra.mxu1 %v11636_v33  ;;  %v7968_v55 = vsub.s32 1, %v15044_v19  ;;  %v8003_v33 = vsel %vm8001_vm2, %v8002_v37, %v7996_v5 }
 0x3f4   : > { %7886 = vmatprep.subr.bf16.mxu0 %v11641_v38  ;;  %7927 = vmatprep.subr.bf16.mxu1 %v11644_v46  ;;  %v7965_v38 = vrot.slane %v15060_v63, %v7964_v4  ;;  %vm8004_vm3 = vcmp.ne.s32.totalorder %v8003_v33, 2  ;;  %v7946_v33 = vld [vmem:[#allocation2 + $0x10] sm:$0x3f] }
 0x3f7   : > { %7887 = vmatpush1.bf16.msra.mxu0 %v11639_v17  ;;  %7928 = vmatpush1.bf16.msra.mxu1 %v11642_v39  ;;  %v7969_v17 = vrot.slane %v15060_v63, %v7968_v55 }
 0x3f8   : > { %7888 = vmatprep.subr.bf16.mxu0 %v11647_v40  ;;  %7929 = vmatprep.subr.bf16.mxu1 %v11650_v41  ;;  %v11679_v41 = vmov 0.0  }
 0x3fb   : > { %7889 = vmatpush1.bf16.msra.mxu0 %v11645_v53  ;;  %7930 = vmatpush1.bf16.msra.mxu1 %v11648_v44  ;;  %v15067_v53 = vsel %vm8004_vm3, 1.0, %v11679_v41 }
 0x3fc   : > { %7890 = vmatprep.subr.bf16.mxu0 %v11653_v45  ;;  %7931 = vmatprep.subr.bf16.mxu1 %v11656_v22 }
 0x3ff   : > { %7891 = vmatpush1.bf16.msra.mxu0 %v11651_v42  ;;  %7932 = vmatpush1.bf16.msra.mxu1 %v11654_v51 }
 0x400   : > { %7892 = vmatprep.subr.bf16.mxu0 %v11659_v54  ;;  %7933 = vmatprep.subr.bf16.mxu1 %v11662_v43 }
 0x403   : > { %7893 = vmatpush1.bf16.msra.mxu0 %v11657_v21  ;;  %7934 = vmatpush1.bf16.msra.mxu1 %v11660_v23 }
 0x406   : > { %7895 = vmatmul.mubr.bf16.vlgmr.msra.gmra.mrb[48].mxu0 %v14645_v9  ;;  %7936 = vmatmul.mubr.bf16.vlgmr.msra.gmra.mrb[48].mxu1 %v14647_v10 }
 0x419   : > { %v7650_v18 = vpop.f32.mrb[36].mxu0  ;;  %v7691_v47 = vpop.f32.mrb[36].mxu1 }
 0x41a   : > { %v7692_v50 = vadd.f32 %v7691_v47, %v7650_v18  ;;  %v7652_v60 = vpop.f32.mrb[37].mxu0  ;;  %v7693_v56 = vpop.f32.mrb[37].mxu1 }
 0x41b   : > { %v7694_v57 = vadd.f32 %v7693_v56, %v7652_v60  ;;  %v7654_v58 = vpop.f32.mrb[38].mxu0  ;;  %v7695_v34 = vpop.f32.mrb[38].mxu1 }
 0x41c   : > { %v7655_v35 = vpop.f32.mrb[39].mxu0  ;;  %v7696_v59 = vpop.f32.mrb[39].mxu1 }
 0x459   : > { %v7732_v61 = vpop.f32.mrb[40].mxu0  ;;  %v7773_v62 = vpop.f32.mrb[40].mxu1 }
 0x45a   : > { %v7733_v0 = vadd.f32 %v7732_v61, %v7692_v50  ;;  %v7734_v3 = vpop.f32.mrb[41].mxu0  ;;  %v7775_v6 = vpop.f32.mrb[41].mxu1 }
 0x45b   : > { %v7735_v7 = vadd.f32 %v7734_v3, %v7694_v57  ;;  %v7736_v13 = vpop.f32.mrb[42].mxu0  ;;  %v7777_v9 = vpop.f32.mrb[42].mxu1 }
 0x45c   : > { %v7774_v15 = vadd.f32 %v7773_v62, %v7733_v0  ;;  %v7737_v10 = vpop.f32.mrb[43].mxu0  ;;  %v7778_v16 = vpop.f32.mrb[43].mxu1 }
 0x45d   : > { %v7776_v48 = vadd.f32 %v7775_v6, %v7735_v7 }
 0x45e   : > { %v7948_v20 = vadd.f32 %v7944_v29, %v7774_v15 }
 0x45f   : > { %v7949_v28 = vadd.f32 %v7945_v1, %v7776_v48 }
 0x460   : > { %7952 = vst [vmem:[#allocation2] sm:$0x3f] %v7948_v20 }
 0x461   : > { %7953 = vst [vmem:[#allocation2 + $0x8] sm:$0x3f] %v7949_v28 }
 0x467   : > { %v7956_v46 = vld [vmem:[#allocation2] sm:$0x3f] }
 0x468   : > { %v7957_v39 = vld [vmem:[#allocation2 + $0x8] sm:$0x3f]  ;;  %v15065_v40 = vadd.f32 %v7965_v38, %v7956_v46 }
 0x469   : > { %v15069_v44 = vadd.f32 %v7969_v17, %v7957_v39  ;;  %v7947_v39 = vld [vmem:[#allocation2 + $0x18] sm:$0x3f] }
 0x46a   : > { %v8007_v45 = vmul.f32 %v15067_v53, %v15065_v40 }
 0x46b   : > { %v8008_v22 = vmul.f32 %v15067_v53, %v15069_v44 }
 0x46c   : > { %v8012_v42 = vsel %vm8011_vm4, %v8007_v45, 0.0  ;;  %v8044_v51 = vmul.f32 %v8007_v45, %v15065_v40  ;;  %v7972_v45 = vsub.s32 2, %v15044_v19 }
 0x46d   : > { %v8019_v54 = vsel %vm8011_vm4, %v8008_v22, 0.0  ;;  %v8045_v43 = vmul.f32 %v8008_v22, %v15069_v44  ;;  %v8013_v21 = vrot.slane %v8012_v42, 4  ;;  %v7976_v22 = vsub.s32 3, %v15044_v19 }
 0x46e   : > { %v8048_v23 = vsel %vm8011_vm4, %v8044_v51, 0.0  ;;  %v8020_v18 = vrot.slane %v8019_v54, 4 }
 0x46f   : > { %v8055_v47 = vsel %vm8011_vm4, %v8045_v43, 0.0  ;;  %v8014_v50 = vadd.f32 %v8013_v21, %v8012_v42  ;;  %v8049_v60 = vrot.slane %v8048_v23, 4  ;;  %v7973_v42 = vrot.slane %v15060_v63, %v7972_v45 }
 0x470   : > { %v8021_v56 = vadd.f32 %v8020_v18, %v8019_v54  ;;  %v8056_v57 = vrot.slane %v8055_v47, 4  ;;  %v7977_v51 = vrot.slane %v15060_v63, %v7976_v22 }
 0x471   : > { %v8015_v58 = vrot.slane %v8014_v50, 2  ;;  %v8050_v34 = vadd.f32 %v8049_v60, %v8048_v23 }
 0x472   : > { %v8022_v35 = vrot.slane %v8021_v56, 2  ;;  %v8057_v59 = vadd.f32 %v8056_v57, %v8055_v47 }
 0x473   : > { %v8016_v61 = vadd.f32 %v8015_v58, %v8014_v50  ;;  %v8051_v62 = vrot.slane %v8050_v34, 2 }
 0x474   : > { %v8023_v0 = vadd.f32 %v8022_v35, %v8021_v56  ;;  %v8058_v3 = vrot.slane %v8057_v59, 2 }
 0x475   : > { %v8017_v6 = vrot.slane %v8016_v61, 1  ;;  %v8052_v7 = vadd.f32 %v8051_v62, %v8050_v34 }
 0x476   : > { %v8024_v13 = vrot.slane %v8023_v0, 1  ;;  %v8059_v9 = vadd.f32 %v8058_v3, %v8057_v59 }
 0x477   : > { %v8018_v15 = vadd.f32 %v8017_v6, %v8016_v61  ;;  %v8053_v10 = vrot.slane %v8052_v7, 1 }
 0x478   : > { %v8025_v16 = vadd.f32 %v8024_v13, %v8023_v0  ;;  %v8060_v29 = vrot.slane %v8059_v9, 1 }
 0x479   : > { %v15081_v48 = vmul.f32 0.25, %v8018_v15  ;;  %v8054_v20 = vadd.f32 %v8053_v10, %v8052_v7 }
 0x47a   : > { %v8041_v1 = vmul.f32 0.25, %v8025_v16  ;;  %v8061_v28 = vadd.f32 %v8060_v29, %v8059_v9 }
 0x47b   : > { %v8076_v52 = vmul.f32 0.25, %v8054_v20  ;;  %v8080_v11 = vmul.f32 %v15081_v48, %v15081_v48  ;;  %v8088_v7 = vsub.f32 %v15065_v40, %v15081_v48 }
 0x47c   : > { %v8089_v13 = vsub.f32 %v15069_v44, %v8041_v1 }
 0x47d   : > { %v8084_v55 = vsub.f32 %v8076_v52, %v8080_v11 }
 0x499   : > { %v7814_v2 = vpop.f32.mrb[44].mxu0  ;;  %v7855_v8 = vpop.f32.mrb[44].mxu1 }
 0x49a   : > { %v15050_v12 = vadd.f32 %v7855_v8, %v7814_v2  ;;  %v7816_v24 = vpop.f32.mrb[45].mxu0  ;;  %v7857_v25 = vpop.f32.mrb[45].mxu1 }
 0x49b   : > { %v15053_v27 = vadd.f32 %v7857_v25, %v7816_v24  ;;  %v7818_v14 = vpop.f32.mrb[46].mxu0  ;;  %v7859_v30 = vpop.f32.mrb[46].mxu1  ;;  %v8077_v24 = vmul.f32 0.25, %v8061_v28  ;;  %v8081_v25 = vmul.f32 %v8041_v1, %v8041_v1 }
 0x49c   : > { %v7819_v31 = vpop.f32.mrb[47].mxu0  ;;  %v7860_v32 = vpop.f32.mrb[47].mxu1 }
 0x49d   : > { %v8085_v46 = vsub.f32 %v8077_v24, %v8081_v25 }
 0x4d9   : > { %v7896_v2 = vpop.f32.mrb[48].mxu0  ;;  %v7937_v8 = vpop.f32.mrb[48].mxu1 }
 0x4da   : > { %v7897_v26 = vadd.f32 %v7896_v2, %v15050_v12  ;;  %v7898_v14 = vpop.f32.mrb[49].mxu0  ;;  %v7939_v30 = vpop.f32.mrb[49].mxu1  ;;  %v8092_v12 = vadd.f32 1e-05, %v8084_v55 }
 0x4db   : > { %v7899_v31 = vadd.f32 %v7898_v14, %v15053_v27  ;;  %v7900_v32 = vpop.f32.mrb[50].mxu0  ;;  %v7941_v36 = vpop.f32.mrb[50].mxu1  ;;  %v8093_v27 = vadd.f32 1e-05, %v8085_v46 }
 0x4dc   : > { %v7938_v5 = vadd.f32 %v7937_v8, %v7897_v26  ;;  %v7901_v37 = vpop.f32.mrb[51].mxu0  ;;  %v7942_v4 = vpop.f32.mrb[51].mxu1  ;;  %11663 = vrsqrt.f32 %v8092_v12 }
 0x4dd   : > { %v7940_v38 = vadd.f32 %v7939_v30, %v7899_v31  ;;  %11665 = vrsqrt.f32 %v8093_v27 }
 0x4de   : > { %v7950_v17 = vadd.f32 %v7946_v33, %v7938_v5 }
 0x4df   : > { %v7951_v41 = vadd.f32 %v7947_v39, %v7940_v38 }
 0x4e0   : > { %7954 = vst [vmem:[#allocation2 + $0x10] sm:$0x3f] %v7950_v17 }
 0x4e1   : > { %7955 = vst [vmem:[#allocation2 + $0x18] sm:$0x3f] %v7951_v41 }
 0x4e6   : > { %v11664_v35 = vpop.eup %11663 }
 0x4e7   : > { %v7958_v54 = vld [vmem:[#allocation2 + $0x10] sm:$0x3f]  ;;  %v11666_v0 = vpop.eup %11665  ;;  %v8100_v29 = vmul.f32 %v11664_v35, %v8088_v7 }
 0x4e8   : > { %v15091_v43 = vadd.f32 %v7973_v42, %v7958_v54  ;;  %v7959_v21 = vld [vmem:[#allocation2 + $0x18] sm:$0x3f]  ;;  %v8101_v20 = vmul.f32 %v11666_v0, %v8089_v13 }
 0x4e9   : > { %v15093_v23 = vadd.f32 %v7977_v51, %v7959_v21  ;;  %v8108_v14 = vmul.f32 0.2, %v8100_v29  ;;  %vm8104_vm5 = vcmp.ge.f32.partialorder %v8100_v29, 0.0 }
 0x4ea   : > { %v8009_v18 = vmul.f32 %v15067_v53, %v15091_v43  ;;  %v8109_v30 = vmul.f32 0.2, %v8101_v20  ;;  %vm8105_vm6 = vcmp.ge.f32.partialorder %v8101_v20, 0.0 }
 0x4eb   : > { %v8010_v47 = vmul.f32 %v15067_v53, %v15093_v23  ;;  %v8112_v37 = vsel %vm8104_vm5, %v8100_v29, %v8108_v14 }
 0x4ec   : > { %v8026_v50 = vsel %vm8011_vm4, %v8009_v18, 0.0  ;;  %v8046_v60 = vmul.f32 %v8009_v18, %v15091_v43  ;;  %v8113_v4 = vsel %vm8105_vm6, %v8101_v20, %v8109_v30  ;;  %v8116_v39 = vmul.f32 %v15067_v53, %v8112_v37 }
 0x4ed   : > { %v8027_v56 = vrot.slane %v8026_v50, 4  ;;  %v8033_v63 = vsel %vm8011_vm4, %v8010_v47, 0.0  ;;  %v8047_v57 = vmul.f32 %v8010_v47, %v15093_v23  ;;  %v8117_v41 = vmul.f32 %v15067_v53, %v8113_v4 }
 0x4ee   : > { %v8062_v58 = vsel %vm8011_vm4, %v8046_v60, 0.0  ;;  %v8034_v34 = vrot.slane %v8033_v63, 4  ;;  %v8120_v27 = vsel %vm8011_vm4, %v8116_v39, 0.0 }
 0x4ef   : > { %v8028_v59 = vadd.f32 %v8027_v56, %v8026_v50  ;;  %v8063_v61 = vrot.slane %v8062_v58, 4  ;;  %v8069_v62 = vsel %vm8011_vm4, %v8047_v57, 0.0  ;;  %v8127_v42 = vsel %vm8011_vm4, %v8117_v41, 0.0 }
 0x4f0   : > { %v8035_v3 = vadd.f32 %v8034_v34, %v8033_v63  ;;  %v8070_v6 = vrot.slane %v8069_v62, 4  ;;  %v8121_v51 = vrot.slane %v8120_v27, 4  ;;  %v8128_v54 = vrot.slane %v8127_v42, 4 }
 0x4f1   : > { %v8029_v9 = vrot.slane %v8028_v59, 2  ;;  %v8064_v15 = vadd.f32 %v8063_v61, %v8062_v58 }
 0x4f2   : > { %v8036_v10 = vrot.slane %v8035_v3, 2  ;;  %v8071_v16 = vadd.f32 %v8070_v6, %v8069_v62  ;;  %v8122_v21 = vadd.f32 %v8121_v51, %v8120_v27  ;;  %v8129_v18 = vadd.f32 %v8128_v54, %v8127_v42 }
 0x4f3   : > { %v8030_v28 = vadd.f32 %v8029_v9, %v8028_v59  ;;  %v8065_v52 = vrot.slane %v8064_v15, 2 }
 0x4f4   : > { %v8037_v11 = vadd.f32 %v8036_v10, %v8035_v3  ;;  %v8072_v2 = vrot.slane %v8071_v16, 2  ;;  %v8123_v57 = vrot.slane %v8122_v21, 2  ;;  %v8130_v58 = vrot.slane %v8129_v18, 2 }
 0x4f5   : > { %v8031_v8 = vrot.slane %v8030_v28, 1  ;;  %v8066_v24 = vadd.f32 %v8065_v52, %v8064_v15 }
 0x4f6   : > { %v8038_v25 = vrot.slane %v8037_v11, 1  ;;  %v8073_v26 = vadd.f32 %v8072_v2, %v8071_v16  ;;  %v8124_v62 = vadd.f32 %v8123_v57, %v8122_v21  ;;  %v8131_v0 = vadd.f32 %v8130_v58, %v8129_v18 }
 0x4f7   : > { %v8032_v31 = vadd.f32 %v8031_v8, %v8030_v28  ;;  %v8067_v40 = vrot.slane %v8066_v24, 1 }
 0x4f8   : > { %v8039_v44 = vadd.f32 %v8038_v25, %v8037_v11  ;;  %v8074_v48 = vrot.slane %v8073_v26, 1  ;;  %v8125_v9 = vrot.slane %v8124_v62, 1  ;;  %v8132_v15 = vrot.slane %v8131_v0, 1 }
 0x4f9   : > { %v8042_v1 = vmul.f32 0.25, %v8032_v31  ;;  %v8068_v32 = vadd.f32 %v8067_v40, %v8066_v24  ;;  %v11680_v11 = vmov 1966171168  }
 0x4fa   : > { %v8043_v36 = vmul.f32 0.25, %v8039_v44  ;;  %v8075_v5 = vadd.f32 %v8074_v48, %v8073_v26  ;;  %v8126_v28 = vadd.f32 %v8125_v9, %v8124_v62  ;;  %v8133_v52 = vadd.f32 %v8132_v15, %v8131_v0 }
 0x4fb   : > { %v8078_v55 = vmul.f32 0.25, %v8068_v32  ;;  %v8082_v33 = vmul.f32 %v8042_v1, %v8042_v1  ;;  %v8090_v47 = vsub.f32 %v15091_v43, %v8042_v1  ;;  %v8159_v2 = vunpack.c.l.s4 %v11680_v11 }
 0x4fc   : > { %v8079_v38 = vmul.f32 0.25, %v8075_v5  ;;  %v8083_v46 = vmul.f32 %v8043_v36, %v8043_v36  ;;  %v8091_v60 = vsub.f32 %v15093_v23, %v8043_v36  ;;  %v8148_v26 = vmul.f32 0.25, %v8126_v28 }
 0x4fd   : > { %v8086_v17 = vsub.f32 %v8078_v55, %v8082_v33  ;;  %v8149_v14 = vmul.f32 0.25, %v8133_v52  ;;  %v8160_v30 = vunpack.c.0.s8 %v8159_v2 }
 0x4fe   : > { %v8087_v45 = vsub.f32 %v8079_v38, %v8083_v46 }
 0x4ff   : > { %v8094_v12 = vadd.f32 1e-05, %v8086_v17  ;;  %v8156_v1 = vcombine.low %v8148_v26, %v8149_v14  ;;  %v8163_v32 = vsub.s32 %v8160_v30, %v15044_v19 }
 0x500   : > { %v8095_v22 = vadd.f32 1e-05, %v8087_v45 }
 0x501   : > { %11667 = vrsqrt.f32 %v8094_v12  ;;  %v8164_v37 = vrot.slane %v8156_v1, %v8163_v32 }
 0x502   : > { %11669 = vrsqrt.f32 %v8095_v22 }
 0x50b   : > { %v11668_v50 = vpop.eup %11667 }
 0x50c   : > { %v11670_v56 = vpop.eup %11669  ;;  %v8102_v63 = vmul.f32 %v11668_v50, %v8090_v47 }
 0x50d   : > { %v8103_v34 = vmul.f32 %v11670_v56, %v8091_v60 }
 0x50e   : > { %vm8106_vm7 = vcmp.ge.f32.partialorder %v8102_v63, 0.0  ;;  %v8110_v35 = vmul.f32 0.2, %v8102_v63 }
 0x50f   : > { %vm8107_vm8 = vcmp.ge.f32.partialorder %v8103_v34, 0.0  ;;  %v8111_v59 = vmul.f32 0.2, %v8103_v34 }
 0x510   : > { %v8114_v61 = vsel %vm8106_vm7, %v8102_v63, %v8110_v35 }
 0x511   : > { %v8118_v3 = vmul.f32 %v15067_v53, %v8114_v61  ;;  %v8115_v6 = vsel %vm8107_vm8, %v8103_v34, %v8111_v59 }
 0x512   : > { %v8119_v43 = vmul.f32 %v15067_v53, %v8115_v6 }
 0x513   : > { %v8134_v7 = vsel %vm8011_vm4, %v8118_v3, 0.0 }
 0x514   : > { %v8135_v23 = vrot.slane %v8134_v7, 4  ;;  %v8141_v13 = vsel %vm8011_vm4, %v8119_v43, 0.0 }
 0x515   : > { %v8142_v10 = vrot.slane %v8141_v13, 4 }
 0x516   : > { %v8136_v16 = vadd.f32 %v8135_v23, %v8134_v7 }
 0x517   : > { %v8143_v29 = vadd.f32 %v8142_v10, %v8141_v13 }
 0x518   : > { %v8137_v20 = vrot.slane %v8136_v16, 2 }
 0x519   : > { %v8144_v8 = vrot.slane %v8143_v29, 2 }
 0x51a   : > { %v8138_v24 = vadd.f32 %v8137_v20, %v8136_v16 }
 0x51b   : > { %v8145_v25 = vadd.f32 %v8144_v8, %v8143_v29 }
 0x51c   : > { %v8139_v53 = vrot.slane %v8138_v24, 1 }
 0x51d   : > { %v8146_v31 = vrot.slane %v8145_v25, 1 }
 0x51e   : > { %v8140_v40 = vadd.f32 %v8139_v53, %v8138_v24 }
 0x51f   : > { %v8147_v44 = vadd.f32 %v8146_v31, %v8145_v25 }
 0x520   : > { %v8150_v48 = vmul.f32 0.25, %v8140_v40 }
 0x521   : > { %v8151_v36 = vmul.f32 0.25, %v8147_v44 }
 0x523   : > { %v8157_v5 = vcombine.low %v8150_v48, %v8151_v36 }
 0x525   : > { %v8171_v4 = vrot.slane %v8157_v5, %v8163_v32 }
 0x527   : > { %v8172_v55 = vcombine.low %v8164_v37, %v8171_v4 }
 0x529   : > { %v8179_v33 = vrot.slane %v8172_v55, %v8163_v32 }
 0x52b   : > { %8185 = vst.msk [vmem:[%s168_s9] sm:$0xf] %vm8183_vm9, %v8179_v33 }
 0x52c PF: > { %s13_s12 = sadd.s32 1, %s11677_s12  }
 0x52d   : > { %p10_p4 = scmp.ge.s32.totalorder %s13_s12, 4  }
 0x52f   :  { %12 = sbr.rel (!%p10_p4) target bundleno = 1 (0x1), region = 65 }

</bundles_post_ra>
